<compile_context>
chip_gen: v5e
topology: v5e:2x2
jax: 0.10.0
libtpu: 0.0.40
codegen_flags: <defaults>
</compile_context>

<pallas_src>
import functools

import jax
import jax.numpy as jnp
from jax.experimental import pallas as pl
from jax.experimental.pallas import tpu as pltpu

Keep = 2
Reuse = 1


# ----------------------------------------------------------------------------
# Tiling helper
# ----------------------------------------------------------------------------
def _pick_tb(NT, per_image_bytes, target_grid=4, budget=4 * 1024 * 1024):
    """Images per grid step.  target_grid=4 gives 2 steps per TensorCore on
    v7x (megacore, 'parallel' axis) while costing only ~1 us of per-step
    overhead on single-TC v5e/v6e; tb is also capped by a VMEM budget and
    must divide NT."""
    tb = max(1, min(NT, budget // max(per_image_bytes, 1)))
    if NT >= target_grid:
        tb = min(tb, max(1, NT // target_grid))
    while NT % tb:
        tb -= 1
    return max(tb, 1)


# ----------------------------------------------------------------------------
# Fused bottleneck kernel bodies
# ----------------------------------------------------------------------------
def _conv12_body(xs_ref, w1_ref, w2_ref, b1_ref, b2_ref, pad_ref, col_ref,
                 *, H, W, Ho, Wo, stride, dilation, width):
    """conv1(1x1)+BN+ReLU -> halo-padded VMEM scratch -> im2col -> conv2(3x3)
    +BN+ReLU.  Returns the (tb*Ho*Wo, width) bf16 conv2 activation."""
    tb, _, _, cin = xs_ref.shape
    rows_in = tb * H * W
    rows_out = tb * Ho * Wo
    pad = dilation

    # conv1: one MXU dot, K = Cin, f32 accumulate, bias+ReLU epilogue.
    xs = xs_ref[...].reshape(rows_in, cin)
    o1 = jnp.dot(xs, w1_ref[...], preferred_element_type=jnp.float32)
    o1 = jnp.maximum(o1 + b1_ref[...], 0.0).astype(jnp.bfloat16)

    # Halo pad lives only in VMEM (no HBM jnp.pad round trip).  Zero every
    # step: scratch is per-core, so a program_id==0 guard would leave the
    # second v7x core's halo uninitialised under "parallel" semantics.
    pad_ref[...] = jnp.zeros_like(pad_ref)
    pad_ref[:, pad:pad + H, pad:pad + W, :] = o1.reshape(tb, H, W, width)

    # conv2 (3x3): build the im2col matrix in a VMEM scratch and do ONE
    # K = 9*width MXU dot (instead of 9 K=width dots + 8 VALU acc passes).
    for ky in range(3):
        for kx in range(3):
            oy, ox = ky * dilation, kx * dilation
            if stride == 1:
                patch = pad_ref[:, oy:oy + Ho, ox:ox + Wo, :]
            else:
                # TODO(synk): stride>1 tap gather is functional but untuned.
                patch = pad_ref[:, pl.ds(oy, Ho, stride), pl.ds(ox, Wo, stride), :]
            t = ky * 3 + kx
            col_ref[:, t * width:(t + 1) * width] = patch.reshape(rows_out, width)

    o2 = jnp.dot(col_ref[...], w2_ref[...], preferred_element_type=jnp.float32)
    return jnp.maximum(o2 + b2_ref[...], 0.0).astype(jnp.bfloat16)


def _bottleneck_ds_kernel(xs_ref, xid_ref, w1_ref, w2_ref, w3_ref, wd_ref,
                          b1_ref, b2_ref, b3_ref, o_ref, pad_ref, col_ref,
                          *, H, W, Ho, Wo, stride, dilation, width):
    o2 = _conv12_body(xs_ref, w1_ref, w2_ref, b1_ref, b2_ref, pad_ref, col_ref,
                      H=H, W=W, Ho=Ho, Wo=Wo, stride=stride,
                      dilation=dilation, width=width)
    rows_out = o2.shape[0]
    # conv3 (1x1)+BN fused with the downsample (1x1+BN); both f32 accumulate.
    acc = jnp.dot(o2, w3_ref[...], preferred_element_type=jnp.float32)
    idm = xid_ref[...].reshape(rows_out, xid_ref.shape[-1])
    acc = acc + jnp.dot(idm, wd_ref[...], preferred_element_type=jnp.float32)
    o_ref[...] = jnp.maximum(acc + b3_ref[...], 0.0).astype(o_ref.dtype)


def _bottleneck_res_kernel(xs_ref, xid_ref, w1_ref, w2_ref, w3_ref,
                           b1_ref, b2_ref, b3_ref, o_ref, pad_ref, col_ref,
                           *, H, W, Ho, Wo, stride, dilation, width):
    o2 = _conv12_body(xs_ref, w1_ref, w2_ref, b1_ref, b2_ref, pad_ref, col_ref,
                      H=H, W=W, Ho=Ho, Wo=Wo, stride=stride,
                      dilation=dilation, width=width)
    rows_out = o2.shape[0]
    # conv3 (1x1)+BN + bf16 residual (upcast in-kernel) + ReLU.
    acc = jnp.dot(o2, w3_ref[...], preferred_element_type=jnp.float32)
    acc = acc + xid_ref[...].reshape(rows_out, xid_ref.shape[-1]).astype(jnp.float32)
    o_ref[...] = jnp.maximum(acc + b3_ref[...], 0.0).astype(o_ref.dtype)


# ----------------------------------------------------------------------------
# Fused bottleneck wrapper (single pallas_call)
# ----------------------------------------------------------------------------
def bottleneck_convs(x_shift, x_ident, w1, w2col, w3, wd, b1, b2, b3,
                     *, stride=1, dilation=1, out_dtype=jnp.bfloat16):
    """x_shift/x_ident: (NT,H,W,Cin) bf16 NHWC.  w1:(Cin,width), w2col:
    (9*width,width), w3:(width,outp), wd:(Cin,outp)|None, all bf16 with BN
    scale folded in.  b*: f32 (1,N) folded BN biases (b3 includes downsample
    bias).  Returns ((NT*Ho*Wo, outp) bf16, (Ho, Wo))."""
    NT, H, W, Cin = x_shift.shape
    width = w1.shape[1]
    outp = w3.shape[1]
    pad = dilation
    Ho = (H + 2 * pad - dilation * 2 - 1) // stride + 1
    Wo = (W + 2 * pad - dilation * 2 - 1) // stride + 1

    if wd is not None and stride > 1:
        x_ident = x_ident[:, ::stride, ::stride, :]
    cid = x_ident.shape[-1]

    # Per-image VMEM estimate (bf16 blocks, lane-padded scratch) -> tb.
    per_image = (2 * (2 * H * W * Cin)
                 + 2 * (H + 2 * pad) * (W + 2 * pad) * max(width, 128)
                 + 2 * Ho * Wo * 9 * width
                 + 6 * Ho * Wo * outp)
    tb = _pick_tb(NT, per_image)
    rows_out = tb * Ho * Wo

    in_specs = [
        pl.BlockSpec((tb, H, W, Cin), lambda i: (i, 0, 0, 0)),
        pl.BlockSpec((tb, Ho, Wo, cid), lambda i: (i, 0, 0, 0)),
        pl.BlockSpec((Cin, width), lambda i: (0, 0)),
        pl.BlockSpec((9 * width, width), lambda i: (0, 0)),
        pl.BlockSpec((width, outp), lambda i: (0, 0)),
    ]
    args = [x_shift, x_ident, w1, w2col, w3]
    if wd is not None:
        in_specs.append(pl.BlockSpec((Cin, outp), lambda i: (0, 0)))
        args.append(wd)
        kernel = functools.partial(_bottleneck_ds_kernel, H=H, W=W, Ho=Ho,
                                   Wo=Wo, stride=stride, dilation=dilation,
                                   width=width)
    else:
        kernel = functools.partial(_bottleneck_res_kernel, H=H, W=W, Ho=Ho,
                                   Wo=Wo, stride=stride, dilation=dilation,
                                   width=width)
    in_specs += [pl.BlockSpec((1, width), lambda i: (0, 0)),
                 pl.BlockSpec((1, width), lambda i: (0, 0)),
                 pl.BlockSpec((1, outp), lambda i: (0, 0))]
    args += [b1, b2, b3]

    # VMEM limit from actual per-step footprint (x4 covers 32->128 lane
    # padding and double buffering), clamped far below physical VMEM on
    # every generation (64 MiB on v7x, 128 MiB on v5e/v6e).
    blk = (tb * H * W * Cin + tb * Ho * Wo * cid + Cin * width
           + 9 * width * width + width * outp
           + (Cin * outp if wd is not None else 0) + rows_out * outp) * 2 \
          + (2 * width + outp) * 4
    scratch = (tb * (H + 2 * pad) * (W + 2 * pad) * width
               + rows_out * 9 * width) * 2
    vmem_limit = int(min(max(4 * (blk + scratch), 4 << 20), 32 << 20))

    out = pl.pallas_call(
        kernel,
        out_shape=jax.ShapeDtypeStruct((NT * Ho * Wo, outp), out_dtype),
        grid_spec=pltpu.PrefetchScalarGridSpec(
            num_scalar_prefetch=0,
            grid=(NT // tb,),
            in_specs=in_specs,
            out_specs=pl.BlockSpec((rows_out, outp), lambda i: (i, 0)),
            scratch_shapes=[
                pltpu.VMEM((tb, H + 2 * pad, W + 2 * pad, width), jnp.bfloat16),
                pltpu.VMEM((rows_out, 9 * width), jnp.bfloat16),
            ],
        ),
        compiler_params=pltpu.CompilerParams(
            dimension_semantics=("parallel",),
            vmem_limit_bytes=vmem_limit),
    )(*args)
    return out, (Ho, Wo)


# ----------------------------------------------------------------------------
# BN folding + temporal shift (data movement, kept in JAX glue, NHWC, bf16)
# ----------------------------------------------------------------------------
def fold_bn(bn, eps=1e-5):
    scale = bn["gamma"] / jnp.sqrt(bn["var"] + eps)
    bias = bn["beta"] - bn["mean"] * scale
    return scale, bias


def temporal_shift_nhwc(x, n_segment, fold_div=3, online_shift=False,
                        shift_copy_pad=False):
    nt, h, w, c = x.shape
    nb = nt // n_segment
    x5 = x.reshape(nb, n_segment, h, w, c)
    fold = c // fold_div
    gA, gB, gC = x5[..., :fold], x5[..., fold:2 * fold], x5[..., 2 * fold:]
    padB = gB[:, :1] if shift_copy_pad else jnp.zeros_like(gB[:, :1])
    newB = jnp.concatenate([padB, gB[:, :-1]], axis=1)        # shift "right" in t
    if online_shift:
        newA = gA
    else:
        padA = gA[:, -1:] if shift_copy_pad else jnp.zeros_like(gA[:, -1:])
        newA = jnp.concatenate([gA[:, 1:], padA], axis=1)     # shift "left" in t
    out = jnp.concatenate([newA, newB, gC], axis=-1)
    return out.reshape(nt, h, w, c)


# ----------------------------------------------------------------------------
# FLOPs bookkeeping (plain JAX; mirrors the PyTorch counters)
# ----------------------------------------------------------------------------
def _conv_out_hw(h_in, w_in, conv):
    h_out = (h_in + 2 * conv["padding"] - conv["dilation"] * (conv["ksize"] - 1)
             - 1) // conv["stride"] + 1
    w_out = (w_in + 2 * conv["padding"] - conv["dilation"] * (conv["ksize"] - 1)
             - 1) // conv["stride"] + 1
    return h_out, w_out


def count_conv2d_flops(input_shape, conv):
    # TODO(synk): count_conv2d_flops is not in the reference source; standard
    # per-clip MAC count assumed (only used for flops_full / flops_downsample).
    n, c_in, h_in, w_in = input_shape
    h_out, w_out = _conv_out_hw(h_in, w_in, conv)
    bias = 1 if conv["bias"] else 0
    flops = n * conv["out_channels"] * h_out * w_out * (
        c_in // conv["groups"] * conv["ksize"] ** 2 + bias)
    return float(flops), (n, conv["out_channels"], h_out, w_out)


def count_dyn_conv2d_flops(input_data_shape, conv, channels_mask, upstream_conv):
    n, c_in, h_in, w_in = input_data_shape
    h_out, w_out = _conv_out_hw(h_in, w_in, conv)
    c_out = conv["out_channels"]
    bias = 1 if conv["bias"] else 0
    ofm_size = h_out * w_out
    frames_per_clip = channels_mask.shape[1]
    out_active_pixels = ofm_size * jnp.ones(
        (n // frames_per_clip, frames_per_clip), jnp.float32)
    pn_num_outputs = channels_mask.shape[-1]
    gate_history = pn_num_outputs > 2
    kk = conv["ksize"] ** 2

    if upstream_conv:
        off = jnp.zeros(channels_mask.shape[:3], jnp.float32)
        if gate_history:
            off = off.at[:, :-1, :].set(
                (1.0 - channels_mask[:, :-1, :, Keep]) *
                (1.0 - channels_mask[:, 1:, :, Reuse]))
        else:
            off = off.at[:, :-1, :].set(1.0 - channels_mask[:, :-1, :, -1])
        if pn_num_outputs == 3:
            off = off.at[:, -1, :].set(1.0 - channels_mask[:, -1, :, Keep])
        else:
            off = off.at[:, -1, :].set(1.0 - channels_mask[:, -1, :, -1])
        out_active_channels = c_out - jnp.sum(off, axis=2)
        flops_per_frame = out_active_channels * out_active_pixels * (
            c_in // conv["groups"] * kk + bias)
        flops_ub_mat = c_out * out_active_pixels * (
            c_in // conv["groups"] * kk + bias)
    else:
        if pn_num_outputs == 1:
            in_off = 1.0 - channels_mask[:, :, :, 0]
        else:
            in_off = channels_mask[:, :, :, 0]
        in_active = c_in - jnp.sum(in_off, axis=2)
        flops_per_frame = c_out * out_active_pixels * (
            jnp.floor_divide(in_active, conv["groups"]) * kk + bias)
        flops_ub_mat = flops_per_frame

    flops = flops_per_frame.reshape((-1,))
    flops_ub = jnp.sum(flops_ub_mat, axis=1)
    return flops, flops_ub, (n, c_out, h_out, w_out)


def get_flops(block, mask_c, input_data_shape, args):
    channels_masks = mask_c.reshape((-1, args["num_segments"]) + mask_c.shape[1:])
    f1, ub1, s1 = count_dyn_conv2d_flops(
        input_data_shape, block["meta"]["conv1"], channels_masks, True)
    f2, ub2, s2 = count_dyn_conv2d_flops(
        s1, block["meta"]["conv2"], channels_masks, False)
    policy_outputs = 3 if args["gate_history"] else 2
    cm3 = jnp.zeros((channels_masks.shape[0], channels_masks.shape[1],
                     block["meta"]["conv3"]["out_channels"], policy_outputs),
                    jnp.float32)
    cm3 = cm3.at[:, :, :, -1].set(1.0)
    f3, ub3, s3 = count_dyn_conv2d_flops(
        s2, block["meta"]["conv3"], cm3, False)
    flops = f1 + f2 + f3
    flops_ub = jnp.sum(ub1 + ub2 + ub3)[None]
    return jnp.concatenate(
        [flops, flops_ub, block["flops_downsample"],
         block["flops_channels_policy"], block["flops_full"]])


# ----------------------------------------------------------------------------
# Bottleneck construction + forward
# ----------------------------------------------------------------------------
def build_bottleneck(key, inplanes, planes, h, w, args, stride=1,
                     groups=1, base_width=64, dilation=1, expansion=4):
    width = int(planes * (base_width / 64.0)) * groups
    outp = planes * expansion
    has_downsample = (stride != 1) or (inplanes != outp)

    def conv_w(k, co, ci, ks):
        fan_in = ci * ks * ks
        return jax.random.normal(k, (co, ci, ks, ks), jnp.float32) * (2.0 / fan_in) ** 0.5

    def bn_p(k, c):
        k1, k2, k3, k4 = jax.random.split(k, 4)
        return dict(
            gamma=jax.random.uniform(k1, (c,), minval=0.5, maxval=1.5),
            beta=0.1 * jax.random.normal(k2, (c,)),
            mean=0.1 * jax.random.normal(k3, (c,)),
            var=jax.random.uniform(k4, (c,), minval=0.5, maxval=1.5),
        )

    ks = jax.random.split(key, 8)
    params = dict(
        w1=conv_w(ks[0], width, inplanes, 1), bn1=bn_p(ks[1], width),
        w2=conv_w(ks[2], width, width, 3),    bn2=bn_p(ks[3], width),
        w3=conv_w(ks[4], outp, width, 1),     bn3=bn_p(ks[5], outp),
        wd=conv_w(ks[6], outp, inplanes, 1),  bnd=bn_p(ks[7], outp),
    )

    meta = dict(
        conv1=dict(out_channels=width, ksize=1, stride=1, padding=0,
                   dilation=1, groups=1, bias=False),
        conv2=dict(out_channels=width, ksize=3, stride=stride,
                   padding=dilation, dilation=dilation, groups=groups, bias=False),
        conv3=dict(out_channels=outp, ksize=1, stride=1, padding=0,
                   dilation=1, groups=1, bias=False),
        ds0=dict(out_channels=outp, ksize=1, stride=stride, padding=0,
                 dilation=1, groups=1, bias=False),
    )

    input_data_shape = (args["num_segments"], inplanes, h, w)
    f1, s1 = count_conv2d_flops(input_data_shape, meta["conv1"])
    f2, s2 = count_conv2d_flops(s1, meta["conv2"])
    f3, _ = count_conv2d_flops(s2, meta["conv3"])
    fds = count_conv2d_flops(input_data_shape, meta["ds0"])[0] if has_downsample else 0.0
    flops_downsample = jnp.array([fds], jnp.float32)
    flops_policy = jnp.array([0.0], jnp.float32)   # adaptive policy disabled
    flops_full = jnp.array([f1 + f2 + f3], jnp.float32) + flops_downsample + flops_policy

    return dict(params=params, meta=meta, stride=stride, dilation=dilation,
                groups=groups, width=width, outp=outp,
                has_downsample=has_downsample,
                flops_downsample=flops_downsample,
                flops_channels_policy=flops_policy, flops_full=flops_full)


def bottleneck_forward(block, x_nchw, flops_in, args):
    p = block["params"]
    NT, Cin, H, W = x_nchw.shape
    width, outp = block["width"], block["outp"]
    stride, dilation, groups = block["stride"], block["dilation"], block["groups"]
    if groups != 1:
        # TODO(synk): grouped 3x3 conv not implemented (demo config uses groups=1).
        raise NotImplementedError("groups > 1 not supported")

    # Single NCHW->NHWC relayout fused with the single f32->bf16 cast.  The
    # temporal shift, the conv1 input and the downsample/residual identity
    # all derive from this one bf16 buffer.
    x_nhwc = jnp.transpose(x_nchw, (0, 2, 3, 1)).astype(jnp.bfloat16)
    identity = x_nhwc
    x_work = x_nhwc
    if args["shift"]:
        x_work = temporal_shift_nhwc(x_nhwc, args["num_segments"],
                                     fold_div=args["shift_div"],
                                     online_shift=args["online_shift"],
                                     shift_copy_pad=args["shift_copy_pad"])

    # BN scales folded into the weights; biases stay f32 for the epilogue.
    s1, b1 = fold_bn(p["bn1"])
    s2, b2 = fold_bn(p["bn2"])
    s3, b3 = fold_bn(p["bn3"])
    w1 = (p["w1"].reshape(width, Cin) * s1[:, None]).T.astype(jnp.bfloat16)
    w2col = jnp.transpose(p["w2"] * s2[:, None, None, None],
                          (2, 3, 1, 0)).reshape(9 * width, width).astype(jnp.bfloat16)
    w3 = (p["w3"].reshape(outp, width) * s3[:, None]).T.astype(jnp.bfloat16)
    if block["has_downsample"]:
        sd, bd = fold_bn(p["bnd"])
        wd = (p["wd"].reshape(outp, Cin) * sd[:, None]).T.astype(jnp.bfloat16)
        bias3 = (b3 + bd).reshape(1, outp).astype(jnp.float32)
    else:
        wd = None
        bias3 = b3.reshape(1, outp).astype(jnp.float32)

    # disable_channelwise_masking=True => hmap / policy / mask path skipped;
    # fuse_out_with_mask(out, None, ...) is an identity op.
    out2d, (Ho, Wo) = bottleneck_convs(
        x_work, identity, w1, w2col, w3, wd,
        b1.reshape(1, width).astype(jnp.float32),
        b2.reshape(1, width).astype(jnp.float32),
        bias3,
        stride=stride, dilation=dilation, out_dtype=jnp.bfloat16)

    # Final relayout stays bf16 (caller may cast to f32 if strictly required).
    out_nchw = jnp.transpose(out2d.reshape(NT, Ho, Wo, outp), (0, 3, 1, 2))

    # disable_channelwise_masking branch: all-Keep mask
    mask = jnp.zeros((NT, outp, 3), jnp.float32).at[:, :, Keep].set(1.0)
    flops_blk = get_flops(block, mask, (NT, Cin, H, W), args)
    flops = jnp.concatenate([flops_in, flops_blk[None]], axis=0)
    mask_out = mask.reshape((-1, args["num_segments"]) + mask.shape[1:])
    # (out, mask, mask2, flops, soft_mask)
    return out_nchw, mask_out, None, flops, None


# ----------------------------------------------------------------------------
if __name__ == "__main__":
    args = dict(
        num_segments=4,
        shift=True, shift_div=8, online_shift=False, shift_copy_pad=False,
        disable_channelwise_masking=True,
        gate_history=True, pn_num_outputs=3,
    )

    inplanes, planes, H, W = 64, 32, 16, 16
    n_batch = 2
    NT = n_batch * args["num_segments"]          # 8

    key = jax.random.PRNGKey(0)
    k_param, k_x = jax.random.split(key)
    block = build_bottleneck(k_param, inplanes, planes, H, W, args, stride=1)

    x = jax.random.normal(k_x, (NT, inplanes, H, W), jnp.float32)
    flops_in = jnp.zeros((0, NT + 4), jnp.float32)   # per-frame flops + 4 scalars

    out, mask, mask2, flops, soft_mask = bottleneck_forward(block, x, flops_in, args)
    jax.block_until_ready(out)
    jax.block_until_ready(flops)

    assert out.shape == (NT, planes * 4, H, W)
    assert mask.shape == (n_batch, args["num_segments"], planes * 4, 3)
    assert flops.shape == (1, NT + 4)
    print("KERNEL_OK")
</pallas_src>

<mosaic_0001>
module attributes {stable_mosaic.version = 11 : i64} {
  func.func @_bottleneck_ds_kernel(%arg0: i32, %arg1: memref<2x16x16x64xbf16, #tpu.memory_space<vmem>>, %arg2: memref<2x16x16x64xbf16, #tpu.memory_space<vmem>>, %arg3: memref<64x32xbf16, #tpu.memory_space<vmem>>, %arg4: memref<288x32xbf16, #tpu.memory_space<vmem>>, %arg5: memref<32x128xbf16, #tpu.memory_space<vmem>>, %arg6: memref<64x128xbf16, #tpu.memory_space<vmem>>, %arg7: memref<1x32xf32, #tpu.memory_space<vmem>>, %arg8: memref<1x32xf32, #tpu.memory_space<vmem>>, %arg9: memref<1x128xf32, #tpu.memory_space<vmem>>, %arg10: memref<512x128xbf16, #tpu.memory_space<vmem>>, %arg11: memref<2x18x18x32xbf16, #tpu.memory_space<vmem>>, %arg12: memref<512x288xbf16, #tpu.memory_space<vmem>>) attributes {dimension_semantics = [#tpu.dimension_semantics<parallel>], iteration_bounds = array<i64: 4>, scalar_prefetch = 0 : i64, scratch_operands = 2 : i64, tpu.core_type = #tpu.core_type<tc>, window_params = [{transform_indices = @transform_0, window_bounds = array<i64: 2, 16, 16, 64>}, {transform_indices = @transform_1, window_bounds = array<i64: 2, 16, 16, 64>}, {pipeline_mode = #tpu.pipeline_mode<synchronous>, transform_indices = @transform_2, window_bounds = array<i64: 64, 32>}, {pipeline_mode = #tpu.pipeline_mode<synchronous>, transform_indices = @transform_3, window_bounds = array<i64: 288, 32>}, {pipeline_mode = #tpu.pipeline_mode<synchronous>, transform_indices = @transform_4, window_bounds = array<i64: 32, 128>}, {pipeline_mode = #tpu.pipeline_mode<synchronous>, transform_indices = @transform_5, window_bounds = array<i64: 64, 128>}, {pipeline_mode = #tpu.pipeline_mode<synchronous>, transform_indices = @transform_6, window_bounds = array<i64: 1, 32>}, {pipeline_mode = #tpu.pipeline_mode<synchronous>, transform_indices = @transform_7, window_bounds = array<i64: 1, 32>}, {pipeline_mode = #tpu.pipeline_mode<synchronous>, transform_indices = @transform_8, window_bounds = array<i64: 1, 128>}, {transform_indices = @transform_9, window_bounds = array<i64: 512, 128>}]} {
    %c0 = arith.constant 0 : index
    %c0_0 = arith.constant 0 : index
    %c0_1 = arith.constant 0 : index
    %c0_2 = arith.constant 0 : index
    %0 = vector.load %arg1[%c0, %c0_0, %c0_1, %c0_2] : memref<2x16x16x64xbf16, #tpu.memory_space<vmem>>, vector<2x16x16x64xbf16>
    %1 = vector.shape_cast %0 : vector<2x16x16x64xbf16> to vector<512x64xbf16>
    %c0_3 = arith.constant 0 : index
    %c0_4 = arith.constant 0 : index
    %2 = vector.load %arg3[%c0_3, %c0_4] : memref<64x32xbf16, #tpu.memory_space<vmem>>, vector<64x32xbf16>
    %cst = arith.constant dense<0.000000e+00> : vector<512x32xf32>
    %3 = tpu.matmul %1, %2, %cst {dimension_numbers = #tpu.dot_dimension_numbers<[1], [0], [0], [1], [0, 0, 1, 1], [], []>} : vector<512x64xbf16>, vector<64x32xbf16>, vector<512x32xf32> -> vector<512x32xf32>
    %c0_5 = arith.constant 0 : index
    %c0_6 = arith.constant 0 : index
    %4 = vector.load %arg7[%c0_5, %c0_6] : memref<1x32xf32, #tpu.memory_space<vmem>>, vector<1x32xf32>
    %5 = vector.broadcast %4 : vector<1x32xf32> to vector<512x32xf32>
    %6 = arith.addf %3, %5 : vector<512x32xf32>
    %cst_7 = arith.constant 0.000000e+00 : f32
    %7 = vector.broadcast %cst_7 : f32 to vector<512x32xf32>
    %8 = arith.maximumf %6, %7 : vector<512x32xf32>
    %9 = arith.truncf %8 : vector<512x32xf32> to vector<512x32xbf16>
    %cst_8 = arith.constant 0.000000e+00 : bf16
    %10 = vector.broadcast %cst_8 : bf16 to vector<2x18x18x32xbf16>
    %c0_9 = arith.constant 0 : index
    %c0_10 = arith.constant 0 : index
    %c0_11 = arith.constant 0 : index
    %c0_12 = arith.constant 0 : index
    %11 = vector.load %arg11[%c0_9, %c0_10, %c0_11, %c0_12] : memref<2x18x18x32xbf16, #tpu.memory_space<vmem>>, vector<2x18x18x32xbf16>
    tpu.vector_store %arg11[%c0_9, %c0_10, %c0_11, %c0_12], %10 {strides = array<i32>} : memref<2x18x18x32xbf16, #tpu.memory_space<vmem>>, vector<2x18x18x32xbf16>,
    %12 = vector.shape_cast %9 : vector<512x32xbf16> to vector<2x16x16x32xbf16>
    %c0_13 = arith.constant 0 : index
    %c1 = arith.constant 1 : index
    %c1_14 = arith.constant 1 : index
    %c0_15 = arith.constant 0 : index
    %13 = vector.load %arg11[%c0_13, %c1, %c1_14, %c0_15] : memref<2x18x18x32xbf16, #tpu.memory_space<vmem>>, vector<2x16x16x32xbf16>
    tpu.vector_store %arg11[%c0_13, %c1, %c1_14, %c0_15], %12 {strides = array<i32>} : memref<2x18x18x32xbf16, #tpu.memory_space<vmem>>, vector<2x16x16x32xbf16>,
    %c0_16 = arith.constant 0 : index
    %c0_17 = arith.constant 0 : index
    %c0_18 = arith.constant 0 : index
    %c0_19 = arith.constant 0 : index
    %14 = vector.load %arg11[%c0_16, %c0_17, %c0_18, %c0_19] : memref<2x18x18x32xbf16, #tpu.memory_space<vmem>>, vector<2x16x16x32xbf16>
    %15 = vector.shape_cast %14 : vector<2x16x16x32xbf16> to vector<512x32xbf16>
    %c0_20 = arith.constant 0 : index
    %c0_21 = arith.constant 0 : index
    %16 = vector.load %arg12[%c0_20, %c0_21] : memref<512x288xbf16, #tpu.memory_space<vmem>>, vector<512x32xbf16>
    tpu.vector_store %arg12[%c0_20, %c0_21], %15 {strides = array<i32>} : memref<512x288xbf16, #tpu.memory_space<vmem>>, vector<512x32xbf16>,
    %c0_22 = arith.constant 0 : index
    %c0_23 = arith.constant 0 : index
    %c1_24 = arith.constant 1 : index
    %c0_25 = arith.constant 0 : index
    %17 = vector.load %arg11[%c0_22, %c0_23, %c1_24, %c0_25] : memref<2x18x18x32xbf16, #tpu.memory_space<vmem>>, vector<2x16x16x32xbf16>
    %18 = vector.shape_cast %17 : vector<2x16x16x32xbf16> to vector<512x32xbf16>
    %c0_26 = arith.constant 0 : index
    %c32 = arith.constant 32 : index
    %19 = vector.load %arg12[%c0_26, %c32] : memref<512x288xbf16, #tpu.memory_space<vmem>>, vector<512x32xbf16>
    tpu.vector_store %arg12[%c0_26, %c32], %18 {strides = array<i32>} : memref<512x288xbf16, #tpu.memory_space<vmem>>, vector<512x32xbf16>,
    %c0_27 = arith.constant 0 : index
    %c0_28 = arith.constant 0 : index
    %c2 = arith.constant 2 : index
    %c0_29 = arith.constant 0 : index
    %20 = vector.load %arg11[%c0_27, %c0_28, %c2, %c0_29] : memref<2x18x18x32xbf16, #tpu.memory_space<vmem>>, vector<2x16x16x32xbf16>
    %21 = vector.shape_cast %20 : vector<2x16x16x32xbf16> to vector<512x32xbf16>
    %c0_30 = arith.constant 0 : index
    %c64 = arith.constant 64 : index
    %22 = vector.load %arg12[%c0_30, %c64] : memref<512x288xbf16, #tpu.memory_space<vmem>>, vector<512x32xbf16>
    tpu.vector_store %arg12[%c0_30, %c64], %21 {strides = array<i32>} : memref<512x288xbf16, #tpu.memory_space<vmem>>, vector<512x32xbf16>,
    %c0_31 = arith.constant 0 : index
    %c1_32 = arith.constant 1 : index
    %c0_33 = arith.constant 0 : index
    %c0_34 = arith.constant 0 : index
    %23 = vector.load %arg11[%c0_31, %c1_32, %c0_33, %c0_34] : memref<2x18x18x32xbf16, #tpu.memory_space<vmem>>, vector<2x16x16x32xbf16>
    %24 = vector.shape_cast %23 : vector<2x16x16x32xbf16> to vector<512x32xbf16>
    %c0_35 = arith.constant 0 : index
    %c96 = arith.constant 96 : index
    %25 = vector.load %arg12[%c0_35, %c96] : memref<512x288xbf16, #tpu.memory_space<vmem>>, vector<512x32xbf16>
    tpu.vector_store %arg12[%c0_35, %c96], %24 {strides = array<i32>} : memref<512x288xbf16, #tpu.memory_space<vmem>>, vector<512x32xbf16>,
    %c0_36 = arith.constant 0 : index
    %c1_37 = arith.constant 1 : index
    %c1_38 = arith.constant 1 : index
    %c0_39 = arith.constant 0 : index
    %26 = vector.load %arg11[%c0_36, %c1_37, %c1_38, %c0_39] : memref<2x18x18x32xbf16, #tpu.memory_space<vmem>>, vector<2x16x16x32xbf16>
    %27 = vector.shape_cast %26 : vector<2x16x16x32xbf16> to vector<512x32xbf16>
    %c0_40 = arith.constant 0 : index
    %c128 = arith.constant 128 : index
    %28 = vector.load %arg12[%c0_40, %c128] : memref<512x288xbf16, #tpu.memory_space<vmem>>, vector<512x32xbf16>
    tpu.vector_store %arg12[%c0_40, %c128], %27 {strides = array<i32>} : memref<512x288xbf16, #tpu.memory_space<vmem>>, vector<512x32xbf16>,
    %c0_41 = arith.constant 0 : index
    %c1_42 = arith.constant 1 : index
    %c2_43 = arith.constant 2 : index
    %c0_44 = arith.constant 0 : index
    %29 = vector.load %arg11[%c0_41, %c1_42, %c2_43, %c0_44] : memref<2x18x18x32xbf16, #tpu.memory_space<vmem>>, vector<2x16x16x32xbf16>
    %30 = vector.shape_cast %29 : vector<2x16x16x32xbf16> to vector<512x32xbf16>
    %c0_45 = arith.constant 0 : index
    %c160 = arith.constant 160 : index
    %31 = vector.load %arg12[%c0_45, %c160] : memref<512x288xbf16, #tpu.memory_space<vmem>>, vector<512x32xbf16>
    tpu.vector_store %arg12[%c0_45, %c160], %30 {strides = array<i32>} : memref<512x288xbf16, #tpu.memory_space<vmem>>, vector<512x32xbf16>,
    %c0_46 = arith.constant 0 : index
    %c2_47 = arith.constant 2 : index
    %c0_48 = arith.constant 0 : index
    %c0_49 = arith.constant 0 : index
    %32 = vector.load %arg11[%c0_46, %c2_47, %c0_48, %c0_49] : memref<2x18x18x32xbf16, #tpu.memory_space<vmem>>, vector<2x16x16x32xbf16>
    %33 = vector.shape_cast %32 : vector<2x16x16x32xbf16> to vector<512x32xbf16>
    %c0_50 = arith.constant 0 : index
    %c192 = arith.constant 192 : index
    %34 = vector.load %arg12[%c0_50, %c192] : memref<512x288xbf16, #tpu.memory_space<vmem>>, vector<512x32xbf16>
    tpu.vector_store %arg12[%c0_50, %c192], %33 {strides = array<i32>} : memref<512x288xbf16, #tpu.memory_space<vmem>>, vector<512x32xbf16>,
    %c0_51 = arith.constant 0 : index
    %c2_52 = arith.constant 2 : index
    %c1_53 = arith.constant 1 : index
    %c0_54 = arith.constant 0 : index
    %35 = vector.load %arg11[%c0_51, %c2_52, %c1_53, %c0_54] : memref<2x18x18x32xbf16, #tpu.memory_space<vmem>>, vector<2x16x16x32xbf16>
    %36 = vector.shape_cast %35 : vector<2x16x16x32xbf16> to vector<512x32xbf16>
    %c0_55 = arith.constant 0 : index
    %c224 = arith.constant 224 : index
    %37 = vector.load %arg12[%c0_55, %c224] : memref<512x288xbf16, #tpu.memory_space<vmem>>, vector<512x32xbf16>
    tpu.vector_store %arg12[%c0_55, %c224], %36 {strides = array<i32>} : memref<512x288xbf16, #tpu.memory_space<vmem>>, vector<512x32xbf16>,
    %c0_56 = arith.constant 0 : index
    %c2_57 = arith.constant 2 : index
    %c2_58 = arith.constant 2 : index
    %c0_59 = arith.constant 0 : index
    %38 = vector.load %arg11[%c0_56, %c2_57, %c2_58, %c0_59] : memref<2x18x18x32xbf16, #tpu.memory_space<vmem>>, vector<2x16x16x32xbf16>
    %39 = vector.shape_cast %38 : vector<2x16x16x32xbf16> to vector<512x32xbf16>
    %c0_60 = arith.constant 0 : index
    %c256 = arith.constant 256 : index
    %40 = vector.load %arg12[%c0_60, %c256] : memref<512x288xbf16, #tpu.memory_space<vmem>>, vector<512x32xbf16>
    tpu.vector_store %arg12[%c0_60, %c256], %39 {strides = array<i32>} : memref<512x288xbf16, #tpu.memory_space<vmem>>, vector<512x32xbf16>,
    %c0_61 = arith.constant 0 : index
    %c0_62 = arith.constant 0 : index
    %41 = vector.load %arg12[%c0_61, %c0_62] : memref<512x288xbf16, #tpu.memory_space<vmem>>, vector<512x288xbf16>
    %c0_63 = arith.constant 0 : index
    %c0_64 = arith.constant 0 : index
    %42 = vector.load %arg4[%c0_63, %c0_64] : memref<288x32xbf16, #tpu.memory_space<vmem>>, vector<288x32xbf16>
    %cst_65 = arith.constant dense<0.000000e+00> : vector<512x32xf32>
    %43 = tpu.matmul %41, %42, %cst_65 {dimension_numbers = #tpu.dot_dimension_numbers<[1], [0], [0], [1], [0, 0, 1, 1], [], []>} : vector<512x288xbf16>, vector<288x32xbf16>, vector<512x32xf32> -> vector<512x32xf32>
    %c0_66 = arith.constant 0 : index
    %c0_67 = arith.constant 0 : index
    %44 = vector.load %arg8[%c0_66, %c0_67] : memref<1x32xf32, #tpu.memory_space<vmem>>, vector<1x32xf32>
    %45 = vector.broadcast %44 : vector<1x32xf32> to vector<512x32xf32>
    %46 = arith.addf %43, %45 : vector<512x32xf32>
    %cst_68 = arith.constant 0.000000e+00 : f32
    %47 = vector.broadcast %cst_68 : f32 to vector<512x32xf32>
    %48 = arith.maximumf %46, %47 : vector<512x32xf32>
    %49 = arith.truncf %48 : vector<512x32xf32> to vector<512x32xbf16>
    %c0_69 = arith.constant 0 : index
    %c0_70 = arith.constant 0 : index
    %50 = vector.load %arg5[%c0_69, %c0_70] : memref<32x128xbf16, #tpu.memory_space<vmem>>, vector<32x128xbf16>
    %cst_71 = arith.constant dense<0.000000e+00> : vector<512x128xf32>
    %51 = tpu.matmul %49, %50, %cst_71 {dimension_numbers = #tpu.dot_dimension_numbers<[1], [0], [0], [1], [0, 0, 1, 1], [], []>} : vector<512x32xbf16>, vector<32x128xbf16>, vector<512x128xf32> -> vector<512x128xf32>
    %c0_72 = arith.constant 0 : index
    %c0_73 = arith.constant 0 : index
    %c0_74 = arith.constant 0 : index
    %c0_75 = arith.constant 0 : index
    %52 = vector.load %arg2[%c0_72, %c0_73, %c0_74, %c0_75] : memref<2x16x16x64xbf16, #tpu.memory_space<vmem>>, vector<2x16x16x64xbf16>
    %53 = vector.shape_cast %52 : vector<2x16x16x64xbf16> to vector<512x64xbf16>
    %c0_76 = arith.constant 0 : index
    %c0_77 = arith.constant 0 : index
    %54 = vector.load %arg6[%c0_76, %c0_77] : memref<64x128xbf16, #tpu.memory_space<vmem>>, vector<64x128xbf16>
    %cst_78 = arith.constant dense<0.000000e+00> : vector<512x128xf32>
    %55 = tpu.matmul %53, %54, %cst_78 {dimension_numbers = #tpu.dot_dimension_numbers<[1], [0], [0], [1], [0, 0, 1, 1], [], []>} : vector<512x64xbf16>, vector<64x128xbf16>, vector<512x128xf32> -> vector<512x128xf32>
    %56 = arith.addf %51, %55 : vector<512x128xf32>
    %c0_79 = arith.constant 0 : index
    %c0_80 = arith.constant 0 : index
    %57 = vector.load %arg9[%c0_79, %c0_80] : memref<1x128xf32, #tpu.memory_space<vmem>>, vector<1x128xf32>
    %58 = vector.broadcast %57 : vector<1x128xf32> to vector<512x128xf32>
    %59 = arith.addf %56, %58 : vector<512x128xf32>
    %cst_81 = arith.constant 0.000000e+00 : f32
    %60 = vector.broadcast %cst_81 : f32 to vector<512x128xf32>
    %61 = arith.maximumf %59, %60 : vector<512x128xf32>
    %62 = arith.truncf %61 : vector<512x128xf32> to vector<512x128xbf16>
    %c0_82 = arith.constant 0 : index
    %c0_83 = arith.constant 0 : index
    %63 = vector.load %arg10[%c0_82, %c0_83] : memref<512x128xbf16, #tpu.memory_space<vmem>>, vector<512x128xbf16>
    tpu.vector_store %arg10[%c0_82, %c0_83], %62 {strides = array<i32>} : memref<512x128xbf16, #tpu.memory_space<vmem>>, vector<512x128xbf16>,
    return
  }
  func.func @transform_0(%arg0: i32) -> (i32, i32, i32, i32) {
    %c0_i32 = arith.constant 0 : i32
    %c0_i32_0 = arith.constant 0 : i32
    %c0_i32_1 = arith.constant 0 : i32
    %c0_i32_2 = arith.constant 0 : i32
    return %arg0, %c0_i32, %c0_i32_0, %c0_i32_1 : i32, i32, i32, i32
  }
  func.func @transform_1(%arg0: i32) -> (i32, i32, i32, i32) {
    %c0_i32 = arith.constant 0 : i32
    %c0_i32_0 = arith.constant 0 : i32
    %c0_i32_1 = arith.constant 0 : i32
    %c0_i32_2 = arith.constant 0 : i32
    return %arg0, %c0_i32, %c0_i32_0, %c0_i32_1 : i32, i32, i32, i32
  }
  func.func @transform_2(%arg0: i32) -> (i32, i32) {
    %c0_i32 = arith.constant 0 : i32
    %c0_i32_0 = arith.constant 0 : i32
    %c0_i32_1 = arith.constant 0 : i32
    return %c0_i32, %c0_i32_0 : i32, i32
  }
  func.func @transform_3(%arg0: i32) -> (i32, i32) {
    %c0_i32 = arith.constant 0 : i32
    %c0_i32_0 = arith.constant 0 : i32
    %c0_i32_1 = arith.constant 0 : i32
    return %c0_i32, %c0_i32_0 : i32, i32
  }
  func.func @transform_4(%arg0: i32) -> (i32, i32) {
    %c0_i32 = arith.constant 0 : i32
    %c0_i32_0 = arith.constant 0 : i32
    %c0_i32_1 = arith.constant 0 : i32
    return %c0_i32, %c0_i32_0 : i32, i32
  }
  func.func @transform_5(%arg0: i32) -> (i32, i32) {
    %c0_i32 = arith.constant 0 : i32
    %c0_i32_0 = arith.constant 0 : i32
    %c0_i32_1 = arith.constant 0 : i32
    return %c0_i32, %c0_i32_0 : i32, i32
  }
  func.func @transform_6(%arg0: i32) -> (i32, i32) {
    %c0_i32 = arith.constant 0 : i32
    %c0_i32_0 = arith.constant 0 : i32
    %c0_i32_1 = arith.constant 0 : i32
    return %c0_i32, %c0_i32_0 : i32, i32
  }
  func.func @transform_7(%arg0: i32) -> (i32, i32) {
    %c0_i32 = arith.constant 0 : i32
    %c0_i32_0 = arith.constant 0 : i32
    %c0_i32_1 = arith.constant 0 : i32
    return %c0_i32, %c0_i32_0 : i32, i32
  }
  func.func @transform_8(%arg0: i32) -> (i32, i32) {
    %c0_i32 = arith.constant 0 : i32
    %c0_i32_0 = arith.constant 0 : i32
    %c0_i32_1 = arith.constant 0 : i32
    return %c0_i32, %c0_i32_0 : i32, i32
  }
  func.func @transform_9(%arg0: i32) -> (i32, i32) {
    %c0_i32 = arith.constant 0 : i32
    %c0_i32_0 = arith.constant 0 : i32
    return %arg0, %c0_i32 : i32, i32
  }
}

</mosaic_0001>

<bundles_post_ra>
// kernel: tpu_custom_call.1
= control target key start
LH: loop header
LB: loop body
LE: loop exit
PB: predicated region body
PF: predicated region fallthrough
CT: control target
= control target key end

     0   :  { %s16670_s0 = inlined_call_operand.hbm [shape: bf16[8,16,16,64], index: 0, kind: input, shape index: {}]   ;;  %s16671_s1 = inlined_call_operand.hbm [shape: bf16[8,16,16,64], index: 1, kind: input, shape index: {}]   ;;  %s16672_s2 = inlined_call_operand.vmem [shape: bf16[64,32], index: 2, kind: input, shape index: {}]   ;;  %s16673_s3 = inlined_call_operand.vmem [shape: bf16[288,32], index: 3, kind: input, shape index: {}]   ;;  %s16674_s4 = inlined_call_operand.vmem [shape: bf16[32,128], index: 4, kind: input, shape index: {}]   ;;  %s16675_s5 = inlined_call_operand.vmem [shape: bf16[64,128], index: 5, kind: input, shape index: {}]   ;;  %s16676_s6 = inlined_call_operand.vmem [shape: f32[1,32], index: 6, kind: input, shape index: {}]   ;;  %s16677_s7 = inlined_call_operand.vmem [shape: f32[1,32], index: 7, kind: input, shape index: {}]   ;;  %s16678_s8 = inlined_call_operand.vmem [shape: f32[1,128], index: 8, kind: input, shape index: {}]   ;;  %s16679_s9 = inlined_call_operand.hbm [shape: bf16[2048,128], index: 9, kind: output, shape index: {}]  }
   0x1   :  { %16696 = sst [smem:[#allocation71_spill]] %s16670_s0 }
   0x2   :  { %14 = vsyncpa [#allocation5], 0 }
   0x3   :  { %16 = vsyncpa [#allocation5 + $0x1], 0 }
   0x4   :  { %17 = vsyncpa [#allocation8], 0 }
   0x5   :  { %19 = vsyncpa [#allocation8 + $0x1], 0 }
   0x6   :  { %20 = vsyncpa [#allocation6], 0 }
   0x7   :  { %22 = vsyncpa [#allocation6 + $0x1], 0  ;;  %s12340_s30 = smov 0   ;;  %s12342_s10 = smov 0  }
   0x8   :  { %s12344_s11 = smov 0   ;;  %s12346_s12 = smov 0  }
   0x9 LB: > { %16697 = sst [smem:[#allocation13_spill]] %s12269_s30  ;;  %s12361_s13 = sadd.s32 4294967295, %s12281_s12   ;;  %s12281_s12 = sphi %s12346_s12, %s16852_s12   ;;  %s12277_s11 = sphi %s12344_s11, %s16854_s11   ;;  %s12273_s10 = sphi %s12342_s10, %s16856_s10   ;;  %s12269_s30 = sphi %s12340_s30, %s16855_s30  }
   0xa   : > { %16698 = sst [smem:[#allocation14_spill]] %s12277_s11  ;;  %s10694_s14 = sadd.s32 4294967294, %s12281_s12  }
   0xb   : > { %s12365_s15 = sadd.s32 1, %s12281_s12   ;;  %s35_s16 = sadd.s32 1, %s12277_s11 }
   0xc   : > { %16699 = sst [smem:[#allocation15_spill]] %s12365_s15  ;;  %s32_s17 = ssub.s32 %s12281_s12, %s12365_s15 }
   0xd   : > { %p42_p0 = scmp.ne.s32.totalorder %s12277_s11, %s12273_s10  ;;  %p33_p1 = scmp.eq.s32.totalorder %s32_s17, 0 }
   0xe   : > { %p43_p2 = scmp.eq.s32.totalorder %s12281_s12, 0  ;;  %p48_p3 = scmp.ne.s32.totalorder %s12273_s10, %s12269_s30 }
   0xf   : > { %p49_p4 = scmp.eq.s32.totalorder %s12361_s13, 0  ;;  %p245_p7 = scmp.eq.s32.totalorder %s12361_s13, 3 }
  0x10   : > { %s12377_s18 = scalar_select %p33_p1, %s12277_s11, %s35_s16  }
  0x11   : > { %p12379_p5 = por %p43_p2, %p42_p0  ;;  %p12383_p6 = por %p49_p4, %p48_p3 }
  0x12   : > { %16700 = sst [smem:[#allocation16_spill]] %s12377_s18  ;;  %p251_p8 = scmp.eq.s32.totalorder %s10694_s14, 3 }
  0x13   : > { %p12097_p9 = scmp.lt.s32.totalorder %s12281_s12, 4  ;;  %p12389_p10 = por %p245_p7, %p42_p0 }
  0x14   : > { %p12393_p11 = por %p251_p8, %p48_p3  ;;  %s12398_s23 = sand.u32 1, %s12277_s11  }
  0x15   : > { %s16703_s21 = scalar_select %p12389_p10, 1, 0 }
  0x16   : > { %s16705_s22 = scalar_select %p12393_p11, 1, 0 }
  0x17   : > { %16704 = sst [smem:[#allocation17_spill]] %s16703_s21  ;;  %s16682_s24 = sshll.u32 %s12281_s12, 8 }
  0x18   : > { %16706 = sst [smem:[#allocation18_spill]] %s16705_s22  ;;  %s16681_s25 = sshll.u32 %s12398_s23, 8 }
  0x19   : > { %s16707_s0 = sld [smem:[#allocation71_spill]]  ;;  %s296_s14 = scalar_lea.vmem [#allocation4], %s16681_s25 }
  0x1a   : > { %s305_s16 = sshll.u32 %s296_s14, 4  ;;  %p12411_p12 = pnand %p12097_p9, %p12379_p5  ;;  %s306_s16 = int_to_ptr.vmem [resolvable:$true] %s305_s16 }
  0x1b   : > { %p10705_p13 = scmp.ge.s32.totalorder %s12281_s12, 1  ;;  %p336_p0 = scmp.lt.s32.totalorder %s12281_s12, 5 }
  0x1c   : > { %s293_s18 = scalar_lea.sflag [#allocation5], %s12398_s23  ;;  %p12155_p2 = pneg %p12411_p12 }
  0x1f   : > { %s302_s28 = scalar_lea.hbm %s16707_s0, %s16682_s24 }
  0x20   : > { %s303_s29 = sshll.u32 %s302_s28, 4  ;;  %s12158_s28 = scalar_lea.hbm %s16707_s0, 1024  ;;  %s304_s29 = int_to_ptr.hbm [resolvable:$true] %s303_s29 }
  0x21   : > { %s12151_s11 = sshra.s32 %s304_s29, 4  ;;  %s12152_s11 = int_to_ptr.hbm [resolvable:$true] %s12151_s11 }
  0x22   : > { %s12153_s26 = scalar_lea.hbm %s12152_s11, 256  ;;  %p12159_p5 = scmp.lt.s32.totalorder %s12152_s11, %s16707_s0 }
  0x23   : > { %p12154_p1 = scmp.ne.s32.totalorder %s12152_s11, %s12153_s26  ;;  %p12160_p7 = scmp.lt.s32.totalorder %s12158_s28, %s12153_s26 }
  0x25   : > { %p12156_p3 = pnand %p12155_p2, %p12154_p1  ;;  %p12161_p8 = por %p12160_p7, %p12159_p5 }
  0x27   : > { %p12157_p4 = pneg %p12156_p3 }
  0x29   : > { %p12162_p9 = pnand %p12161_p8, %p12157_p4 }
  0x2b   : > { %12165 = shalt.err (!%p12162_p9)
}
  0x2c   : > { %s12283_s24 = smov 64   ;;  %s12284_s15 = smov 4  }
  0x2d   : > { %12089 = dma.hbm_to_vmem [thread:$0]  (!%p12411_p12), %s304_s29, 4096, %s306_s16, %s293_s18, %s12283_s24, %s12283_s24, %s12284_s15  }
  0x2e   : > { %p12435_p1 = pnand %p10705_p13, %p336_p0  ;;  %s16710_s11 = sshll.u32 %s12281_s12, 8 }
  0x2f   : > { %s325_s27 = scalar_lea.hbm %s16671_s1, %s16710_s11  ;;  %s16711_s14 = sshll.u32 %s12398_s23, 8 }
  0x30   : > { %s326_s28 = sshll.u32 %s325_s27, 4  ;;  %s319_s0 = scalar_lea.vmem [#allocation7], %s16711_s14  ;;  %s327_s28 = int_to_ptr.hbm [resolvable:$true] %s326_s28 }
  0x31   : > { %s328_s22 = sshll.u32 %s319_s0, 4  ;;  %s316_s30 = scalar_lea.sflag [#allocation8], %s12398_s23  ;;  %s329_s22 = int_to_ptr.vmem [resolvable:$true] %s328_s22 }
  0x32   : > { %s12181_s21 = sshra.s32 %s327_s28, 4  ;;  %s12188_s26 = scalar_lea.hbm %s16671_s1, 1024  ;;  %s12182_s21 = int_to_ptr.hbm [resolvable:$true] %s12181_s21 }
  0x33   : > { %s12183_s18 = scalar_lea.hbm %s12182_s21, 256  ;;  %p12189_p4 = scmp.lt.s32.totalorder %s12182_s21, %s16671_s1 }
  0x34   : > { %p12184_p3 = scmp.ne.s32.totalorder %s12182_s21, %s12183_s18  ;;  %p12190_p5 = scmp.lt.s32.totalorder %s12188_s26, %s12183_s18 }
  0x36   : > { %p12186_p13 = pnand %p12184_p3, %p12155_p2  ;;  %p12191_p7 = por %p12190_p5, %p12189_p4 }
  0x38   : > { %p12187_p0 = pneg %p12186_p13 }
  0x3a   : > { %p12192_p8 = pnand %p12191_p7, %p12187_p0 }
  0x3c   : > { %12195 = shalt.err (!%p12192_p8)
}
  0x3d   : > { %12092 = dma.hbm_to_vmem [thread:$0]  (!%p12411_p12), %s327_s28, 4096, %s329_s22, %s316_s30, %s12283_s24, %s12283_s24, %s12284_s15  }
  0x3e   : > { %340 = sbr.rel (%p12435_p1) target bundleno = 1728 (0x6c0), region = 56 }
  0x43   : > { %s12461_s0 = sand.u32 1, %s12273_s10  }
  0x44   : > { %s12464_s23 = sshll.u32 %s12461_s0, 8  ;;  %s343_s21 = scalar_lea.sflag [#allocation5], %s12461_s0 }
  0x45   : > { %s12468_s27 = scalar_lea.vmem [#allocation4], %s12464_s23 }
  0x46   : > { %12256 = dma.done.wait (%p12383_p6), %s343_s21, 4096  }
  0x47   : > { %12258 = vsyncadd (%p12383_p6), %s343_s21, 4294963200  ;;  %s353_s30 = scalar_lea.sflag [#allocation8], %s12461_s0  ;;  %s12476_s15 = scalar_lea.vmem [#allocation7], %s12464_s23 }
  0x48   : > { %12260 = dma.done.wait (%p12383_p6), %s353_s30, 4096  }
  0x49   : > { %12262 = vsyncadd (%p12383_p6), %s353_s30, 4294963200  ;;  %v11729_v0 = vld [vmem:[%s16672_s2 + $0x18] sm:$0xff]  ;;  %v11728_v1 = vld [vmem:[%s16672_s2 + $0x10] sm:$0xff]  ;;  %vm661_vm0 = vcmask 523264   ;;  %vm1055_vm1 = vcmask 257024   ;;  %v12285_v11 = vmov 0  }
  0x4a   : > { %762 = vmatpush.bf16.msra.mxu0 %v11729_v0  ;;  %12074 = vmatpush.bf16.msra.mxu1 %v11729_v0  ;;  %v11727_v2 = vld [vmem:[%s16672_s2 + $0x8] sm:$0xff]  ;;  %v11726_v3 = vld [vmem:[%s16672_s2] sm:$0xff]  ;;  %v11694_v4 = vld [vmem:[%s12468_s27] sm:$0xff]  ;;  %1060 = vst.msk [vmem:[#allocation2 + $0xc] sm:$0xf] %vm1055_vm1, %v12285_v11  ;;  %vm1058_vm7 = vcmask 253952  }
  0x4b   : > { %v11695_v5 = vld [vmem:[%s12468_s27 + $0x8] sm:$0xff]  ;;  %v11696_v6 = vld [vmem:[%s12468_s27 + $0x10] sm:$0xff]  ;;  %v11697_v7 = vld [vmem:[%s12468_s27 + $0x18] sm:$0xff]  ;;  %1056 = vst.msk [vmem:[#allocation2] sm:$0xf] %vm1055_vm1, %v12285_v11  ;;  %vm3482_vm9 = vcmask 1042432  }
  0x4c   : > { %v11698_v8 = vld [vmem:[%s12468_s27 + $0x20] sm:$0xff]  ;;  %v11699_v9 = vld [vmem:[%s12468_s27 + $0x28] sm:$0xff]  ;;  %v11700_v10 = vld [vmem:[%s12468_s27 + $0x30] sm:$0xff]  ;;  %1057 = vst.msk [vmem:[#allocation2 + $0x4] sm:$0xf] %vm1055_vm1, %v12285_v11  ;;  %vm3483_vm10 = vcmask 1046532  }
  0x4d   : > { %1061 = vst.msk [vmem:[#allocation2 + $0x10] sm:$0xf] %vm1055_vm1, %v12285_v11  ;;  %v11701_v12 = vld [vmem:[%s12468_s27 + $0x38] sm:$0xff]  ;;  %v12561_v13 = vld [vmem:[%s16676_s6] ss:$0 sm:$0xff]  ;;  %v11702_v14 = vld [vmem:[%s12468_s27 + $0x40] sm:$0xff] }
  0x4e   : > { %763 = vmatpush.bf16.msra.mxu0 %v11728_v1  ;;  %12075 = vmatpush.bf16.msra.mxu1 %v11728_v1  ;;  %1063 = vst.msk [vmem:[#allocation2 + $0x18] sm:$0xf] %vm1055_vm1, %v12285_v11  ;;  %vm1810_vm2 = vsmask.f32 7938  ;;  %vm1165_vm4 = vsmask.f32 256  ;;  %vm12704_vm11 = vmor %vm3482_vm9, %vm3483_vm10 }
  0x4f   : > { %1064 = vst.msk [vmem:[#allocation2 + $0x1c] sm:$0xf] %vm1055_vm1, %v12285_v11  ;;  %vm12593_vm3 = vmand %vm1055_vm1, %vm1810_vm2  ;;  %vm1166_vm5 = vsmask.f32 4368  ;;  %v11703_v34 = vld [vmem:[%s12468_s27 + $0x48] sm:$0xff]  ;;  %v11704_v50 = vld [vmem:[%s12468_s27 + $0x50] sm:$0xff] }
  0x50   : > { %1066 = vst.msk [vmem:[#allocation2 + $0x24] sm:$0xf] %vm1055_vm1, %v12285_v11  ;;  %vm12664_vm6 = vmor %vm1165_vm4, %vm1166_vm5  ;;  %s12286_s26 = smov 32   ;;  %s12287_s11 = smov 64   ;;  %vm2262_vm12 = vsmask.f32 3328 }
  0x51   : > { %1067 = vst.msk [vmem:[#allocation2 + $0x28] sm:$0xf] %vm1055_vm1, %v12285_v11  ;;  %v1812_v23 = vld [vmem:[#allocation2 + $0xc] sm:$0xf]  ;;  %vm12690_vm8 = vmand %vm1058_vm7, %vm1165_vm4  ;;  %vm2263_vm13 = vsmask.f32 7440 }
  0x52   : > { %764 = vmatpush.bf16.msra.mxu0 %v11727_v2  ;;  %12076 = vmatpush.bf16.msra.mxu1 %v11727_v2  ;;  %1069 = vst.msk [vmem:[#allocation2 + $0x30] sm:$0xf] %vm1055_vm1, %v12285_v11  ;;  %vm12823_vm14 = vmor %vm2262_vm12, %vm2263_vm13  ;;  %s12288_s19 = smov 96   ;;  %vm3225_vm15 = vcmask 519424   ;;  %vm3901_vm2 = vcmask 781824   ;;  %vm4286_vm4 = vcmask 1044224  }
  0x53   : > { %1070 = vst.msk [vmem:[#allocation2 + $0x34] sm:$0xf] %vm1055_vm1, %v12285_v11  ;;  %vm8820_vm5 = vcmask 261120   ;;  %s16071_s30 = scalar_lea.vmem [#allocation9], %s12464_s23  ;;  %s11882_s25 = sshll.u32 %s12361_s13, 8 }
  0x54   : > { %1072 = vst.msk [vmem:[#allocation2 + $0x3c] sm:$0xf] %vm1055_vm1, %v12285_v11  ;;  %s10594_s18 = scalar_lea.hbm %s16679_s9, %s11882_s25  ;;  %s10595_s29 = sshll.u32 %s16071_s30, 4  ;;  %s10596_s29 = int_to_ptr.vmem [resolvable:$true] %s10595_s29 }
  0x55   : > { %1073 = vst.msk [vmem:[#allocation2 + $0x40] sm:$0xf] %vm1055_vm1, %v12285_v11  ;;  %s10597_s16 = sshll.u32 %s10594_s18, 4  ;;  %s10583_s13 = scalar_lea.sflag [#allocation6], %s12461_s0  ;;  %s10598_s16 = int_to_ptr.hbm [resolvable:$true] %s10597_s16 }
  0x56   : > { %765 = vmatpush.bf16.msra.mxu0 %v11726_v3  ;;  %12077 = vmatpush.bf16.msra.mxu1 %v11726_v3  ;;  %1075 = vst.msk [vmem:[#allocation2 + $0x48] sm:$0xf] %vm1055_vm1, %v12285_v11  ;;  %s12225_s21 = sshra.s32 %s10598_s16, 4  ;;  %s12226_s21 = int_to_ptr.hbm [resolvable:$true] %s12225_s21 }
  0x57   : > { %1076 = vst.msk [vmem:[#allocation2 + $0x4c] sm:$0xf] %vm1055_vm1, %v12285_v11  ;;  %s12227_s23 = scalar_lea.hbm %s12226_s21, 256  ;;  %p12232_p9 = scmp.lt.s32.totalorder %s12226_s21, %s16679_s9 }
  0x58   : > { %1078 = vst.msk [vmem:[#allocation2 + $0x54] sm:$0xf] %vm1055_vm1, %v12285_v11  ;;  %p12228_p6 = scmp.ne.s32.totalorder %s12226_s21, %s12227_s23 }
  0x59   : > { %10853 = vmatmul.msk.bf16.vlgmr.msra.gmra.mxu0 %vm661_vm0, %v11694_v4  ;;  %1079 = vst.msk [vmem:[#allocation2 + $0x58] sm:$0xf] %vm1055_vm1, %v12285_v11 }
  0x5a   : > { %1081 = vst.msk [vmem:[#allocation2 + $0x60] sm:$0xf] %vm1055_vm1, %v12285_v11  ;;  %p12229_p12 = pnand %p12228_p6, %p12389_p10 }
  0x5b   : > { %1082 = vst.msk [vmem:[#allocation2 + $0x64] sm:$0xf] %vm1055_vm1, %v12285_v11 }
  0x5c   : > { %1084 = vst.msk [vmem:[#allocation2 + $0x6c] sm:$0xf] %vm1055_vm1, %v12285_v11  ;;  %p12230_p2 = pneg %p12229_p12 }
  0x5d   : > { %1085 = vst.msk [vmem:[#allocation2 + $0x70] sm:$0xf] %vm1055_vm1, %v12285_v11 }
  0x5e   : > { %1087 = vst.msk [vmem:[#allocation2 + $0x78] sm:$0xf] %vm1055_vm1, %v12285_v11 }
  0x5f   : > { %1088 = vst.msk [vmem:[#allocation2 + $0x7c] sm:$0xf] %vm1055_vm1, %v12285_v11 }
  0x60   : > { %1090 = vst.msk [vmem:[#allocation2 + $0x84] sm:$0xf] %vm1055_vm1, %v12285_v11 }
  0x61   : > { %1091 = vst.msk [vmem:[#allocation2 + $0x88] sm:$0xf] %vm1055_vm1, %v12285_v11 }
  0x62   : > { %1093 = vst.msk [vmem:[#allocation2 + $0x90] sm:$0xf] %vm1055_vm1, %v12285_v11 }
  0x63   : > { %1094 = vst.msk [vmem:[#allocation2 + $0x94] sm:$0xf] %vm1055_vm1, %v12285_v11 }
  0x64   : > { %1096 = vst.msk [vmem:[#allocation2 + $0x9c] sm:$0xf] %vm1055_vm1, %v12285_v11 }
  0x65   : > { %1097 = vst.msk [vmem:[#allocation2 + $0xa0] sm:$0xf] %vm1055_vm1, %v12285_v11 }
  0x66   : > { %1099 = vst.msk [vmem:[#allocation2 + $0xa8] sm:$0xf] %vm1055_vm1, %v12285_v11 }
  0x67   : > { %1100 = vst.msk [vmem:[#allocation2 + $0xac] sm:$0xf] %vm1055_vm1, %v12285_v11 }
  0x68   : > { %1102 = vst.msk [vmem:[#allocation2 + $0xb4] sm:$0xf] %vm1055_vm1, %v12285_v11 }
  0x69   : > { %10854 = vmatmul.msk.bf16.gmra.mxu0 %vm661_vm0, %v11695_v5  ;;  %1103 = vst.msk [vmem:[#allocation2 + $0xb8] sm:$0xf] %vm1055_vm1, %v12285_v11 }
  0x6a   : > { %1105 = vst.msk [vmem:[#allocation2 + $0xc0] sm:$0xf] %vm1055_vm1, %v12285_v11 }
  0x6b   : > { %1106 = vst.msk [vmem:[#allocation2 + $0xc4] sm:$0xf] %vm1055_vm1, %v12285_v11 }
  0x6c   : > { %1108 = vst.msk [vmem:[#allocation2 + $0xcc] sm:$0xf] %vm1055_vm1, %v12285_v11 }
  0x6d   : > { %1109 = vst.msk [vmem:[#allocation2 + $0xd0] sm:$0xf] %vm1055_vm1, %v12285_v11 }
  0x6e   : > { %1111 = vst.msk [vmem:[#allocation2 + $0xd8] sm:$0xf] %vm1055_vm1, %v12285_v11 }
  0x6f   : > { %1112 = vst.msk [vmem:[#allocation2 + $0xdc] sm:$0xf] %vm1055_vm1, %v12285_v11 }
  0x70   : > { %1114 = vst.msk [vmem:[#allocation2 + $0xe4] sm:$0xf] %vm1055_vm1, %v12285_v11 }
  0x71   : > { %1115 = vst.msk [vmem:[#allocation2 + $0xe8] sm:$0xf] %vm1055_vm1, %v12285_v11 }
  0x72   : > { %1117 = vst.msk [vmem:[#allocation2 + $0xf0] sm:$0xf] %vm1055_vm1, %v12285_v11 }
  0x73   : > { %1118 = vst.msk [vmem:[#allocation2 + $0xf4] sm:$0xf] %vm1055_vm1, %v12285_v11 }
  0x74   : > { %1120 = vst.msk [vmem:[#allocation2 + $0xfc] sm:$0xf] %vm1055_vm1, %v12285_v11 }
  0x75   : > { %1121 = vst.msk [vmem:[#allocation2 + $0x100] sm:$0xf] %vm1055_vm1, %v12285_v11 }
  0x76   : > { %1123 = vst.msk [vmem:[#allocation2 + $0x108] sm:$0xf] %vm1055_vm1, %v12285_v11 }
  0x77   : > { %1124 = vst.msk [vmem:[#allocation2 + $0x10c] sm:$0xf] %vm1055_vm1, %v12285_v11 }
  0x78   : > { %1126 = vst.msk [vmem:[#allocation2 + $0x114] sm:$0xf] %vm1055_vm1, %v12285_v11 }
  0x79   : > { %10855 = vmatmul.msk.bf16.gmra.mxu0 %vm661_vm0, %v11696_v6  ;;  %1127 = vst.msk [vmem:[#allocation2 + $0x118] sm:$0xf] %vm1055_vm1, %v12285_v11  ;;  %v11705_v6 = vld [vmem:[%s12468_s27 + $0x58] sm:$0xff] }
  0x7a   : > { %1129 = vst.msk [vmem:[#allocation2 + $0x120] sm:$0xf] %vm1055_vm1, %v12285_v11 }
  0x7b   : > { %1130 = vst.msk [vmem:[#allocation2 + $0x124] sm:$0xf] %vm1055_vm1, %v12285_v11 }
  0x7c   : > { %1132 = vst.msk [vmem:[#allocation2 + $0x12c] sm:$0xf] %vm1055_vm1, %v12285_v11 }
  0x7d   : > { %1133 = vst.msk [vmem:[#allocation2 + $0x130] sm:$0xf] %vm1055_vm1, %v12285_v11 }
  0x7e   : > { %1135 = vst.msk [vmem:[#allocation2 + $0x138] sm:$0xf] %vm1055_vm1, %v12285_v11 }
  0x7f   : > { %1136 = vst.msk [vmem:[#allocation2 + $0x13c] sm:$0xf] %vm1055_vm1, %v12285_v11 }
  0x80   : > { %1138 = vst.msk [vmem:[#allocation2 + $0x144] sm:$0xf] %vm1055_vm1, %v12285_v11 }
  0x81   : > { %1139 = vst.msk [vmem:[#allocation2 + $0x148] sm:$0xf] %vm1055_vm1, %v12285_v11 }
  0x82   : > { %1141 = vst.msk [vmem:[#allocation2 + $0x150] sm:$0xf] %vm1055_vm1, %v12285_v11 }
  0x83   : > { %1142 = vst.msk [vmem:[#allocation2 + $0x154] sm:$0xf] %vm1055_vm1, %v12285_v11 }
  0x84   : > { %1144 = vst.msk [vmem:[#allocation2 + $0x15c] sm:$0xf] %vm1055_vm1, %v12285_v11 }
  0x85   : > { %1145 = vst.msk [vmem:[#allocation2 + $0x160] sm:$0xf] %vm1055_vm1, %v12285_v11 }
  0x86   : > { %1147 = vst.msk [vmem:[#allocation2 + $0x168] sm:$0xf] %vm1055_vm1, %v12285_v11 }
  0x87   : > { %1148 = vst.msk [vmem:[#allocation2 + $0x16c] sm:$0xf] %vm1055_vm1, %v12285_v11 }
  0x88   : > { %1150 = vst.msk [vmem:[#allocation2 + $0x174] sm:$0xf] %vm1055_vm1, %v12285_v11 }
  0x89   : > { %10856 = vmatmul.msk.bf16.gmra.mxu0 %vm661_vm0, %v11697_v7  ;;  %1151 = vst.msk [vmem:[#allocation2 + $0x178] sm:$0xf] %vm1055_vm1, %v12285_v11 }
  0x8a   : > { %1153 = vst.msk [vmem:[#allocation2 + $0x180] sm:$0xf] %vm1055_vm1, %v12285_v11 }
  0x8b   : > { %1154 = vst.msk [vmem:[#allocation2 + $0x184] sm:$0xf] %vm1055_vm1, %v12285_v11 }
  0x8c   : > { %1156 = vst.msk [vmem:[#allocation2 + $0x18c] sm:$0xf] %vm1055_vm1, %v12285_v11 }
  0x8d   : > { %1157 = vst.msk [vmem:[#allocation2 + $0x190] sm:$0xf] %vm1055_vm1, %v12285_v11 }
  0x8e   : > { %1159 = vst.msk [vmem:[#allocation2 + $0x198] sm:$0xf] %vm1055_vm1, %v12285_v11 }
  0x8f   : > { %1160 = vst.msk [vmem:[#allocation2 + $0x19c] sm:$0xf] %vm1055_vm1, %v12285_v11 }
  0x90   : > { %1162 = vst.msk [vmem:[#allocation2 + $0x1a4] sm:$0xf] %vm1055_vm1, %v12285_v11 }
  0x91   : > { %1163 = vst.msk [vmem:[#allocation2 + $0x1a8] sm:$0xf] %vm1055_vm1, %v12285_v11 }
  0x92   : > { %1062 = vst.msk [vmem:[#allocation2 + $0x14] sm:$0x1] %vm1058_vm7, %v12285_v11 }
  0x93   : > { %1059 = vst.msk [vmem:[#allocation2 + $0x8] sm:$0x1] %vm1058_vm7, %v12285_v11 }
  0x94   : > { %1065 = vst.msk [vmem:[#allocation2 + $0x20] sm:$0x1] %vm1058_vm7, %v12285_v11 }
  0x95   : > { %1068 = vst.msk [vmem:[#allocation2 + $0x2c] sm:$0x1] %vm1058_vm7, %v12285_v11 }
  0x96   : > { %1071 = vst.msk [vmem:[#allocation2 + $0x38] sm:$0x1] %vm1058_vm7, %v12285_v11 }
  0x97   : > { %1074 = vst.msk [vmem:[#allocation2 + $0x44] sm:$0x1] %vm1058_vm7, %v12285_v11 }
  0x98   : > { %1077 = vst.msk [vmem:[#allocation2 + $0x50] sm:$0x1] %vm1058_vm7, %v12285_v11 }
  0x99   : > { %10857 = vmatmul.msk.bf16.gmra.mxu0 %vm661_vm0, %v11698_v8  ;;  %v1818_v43 = vld [vmem:[#allocation2 + $0x14] sm:$0x1]  ;;  %1080 = vst.msk [vmem:[#allocation2 + $0x5c] sm:$0x1] %vm1058_vm7, %v12285_v11 }
  0x9a   : > { %1083 = vst.msk [vmem:[#allocation2 + $0x68] sm:$0x1] %vm1058_vm7, %v12285_v11 }
  0x9b   : > { %1086 = vst.msk [vmem:[#allocation2 + $0x74] sm:$0x1] %vm1058_vm7, %v12285_v11 }
  0x9c   : > { %1089 = vst.msk [vmem:[#allocation2 + $0x80] sm:$0x1] %vm1058_vm7, %v12285_v11 }
  0x9d   : > { %1092 = vst.msk [vmem:[#allocation2 + $0x8c] sm:$0x1] %vm1058_vm7, %v12285_v11 }
  0x9e   : > { %1095 = vst.msk [vmem:[#allocation2 + $0x98] sm:$0x1] %vm1058_vm7, %v12285_v11 }
  0x9f   : > { %1098 = vst.msk [vmem:[#allocation2 + $0xa4] sm:$0x1] %vm1058_vm7, %v12285_v11 }
  0xa0   : > { %1101 = vst.msk [vmem:[#allocation2 + $0xb0] sm:$0x1] %vm1058_vm7, %v12285_v11 }
  0xa1   : > { %1104 = vst.msk [vmem:[#allocation2 + $0xbc] sm:$0x1] %vm1058_vm7, %v12285_v11 }
  0xa2   : > { %1107 = vst.msk [vmem:[#allocation2 + $0xc8] sm:$0x1] %vm1058_vm7, %v12285_v11 }
  0xa3   : > { %1110 = vst.msk [vmem:[#allocation2 + $0xd4] sm:$0x1] %vm1058_vm7, %v12285_v11 }
  0xa4   : > { %1113 = vst.msk [vmem:[#allocation2 + $0xe0] sm:$0x1] %vm1058_vm7, %v12285_v11 }
  0xa5   : > { %1116 = vst.msk [vmem:[#allocation2 + $0xec] sm:$0x1] %vm1058_vm7, %v12285_v11 }
  0xa6   : > { %1119 = vst.msk [vmem:[#allocation2 + $0xf8] sm:$0x1] %vm1058_vm7, %v12285_v11 }
  0xa7   : > { %1122 = vst.msk [vmem:[#allocation2 + $0x104] sm:$0x1] %vm1058_vm7, %v12285_v11 }
  0xa8   : > { %1125 = vst.msk [vmem:[#allocation2 + $0x110] sm:$0x1] %vm1058_vm7, %v12285_v11 }
  0xa9   : > { %10858 = vmatmul.msk.bf16.gmra.mxu0 %vm661_vm0, %v11699_v9  ;;  %1128 = vst.msk [vmem:[#allocation2 + $0x11c] sm:$0x1] %vm1058_vm7, %v12285_v11 }
  0xaa   : > { %1131 = vst.msk [vmem:[#allocation2 + $0x128] sm:$0x1] %vm1058_vm7, %v12285_v11 }
  0xab   : > { %1134 = vst.msk [vmem:[#allocation2 + $0x134] sm:$0x1] %vm1058_vm7, %v12285_v11 }
  0xac   : > { %1137 = vst.msk [vmem:[#allocation2 + $0x140] sm:$0x1] %vm1058_vm7, %v12285_v11 }
  0xad   : > { %1140 = vst.msk [vmem:[#allocation2 + $0x14c] sm:$0x1] %vm1058_vm7, %v12285_v11 }
  0xae   : > { %1143 = vst.msk [vmem:[#allocation2 + $0x158] sm:$0x1] %vm1058_vm7, %v12285_v11 }
  0xaf   : > { %1146 = vst.msk [vmem:[#allocation2 + $0x164] sm:$0x1] %vm1058_vm7, %v12285_v11 }
  0xb0   : > { %1149 = vst.msk [vmem:[#allocation2 + $0x170] sm:$0x1] %vm1058_vm7, %v12285_v11 }
  0xb1   : > { %1152 = vst.msk [vmem:[#allocation2 + $0x17c] sm:$0x1] %vm1058_vm7, %v12285_v11 }
  0xb2   : > { %1155 = vst.msk [vmem:[#allocation2 + $0x188] sm:$0x1] %vm1058_vm7, %v12285_v11 }
  0xb3   : > { %1158 = vst.msk [vmem:[#allocation2 + $0x194] sm:$0x1] %vm1058_vm7, %v12285_v11 }
  0xb4   : > { %1161 = vst.msk [vmem:[#allocation2 + $0x1a0] sm:$0x1] %vm1058_vm7, %v12285_v11 }
  0xb5   : > { %1164 = vst.msk [vmem:[#allocation2 + $0x1ac] sm:$0x1] %vm1058_vm7, %v12285_v11  ;;  %v11706_v11 = vld [vmem:[%s12468_s27 + $0x60] sm:$0xff] }
  0xb9   : > { %10859 = vmatmul.msk.bf16.gmra.mxu0 %vm661_vm0, %v11700_v10 }
  0xc9   : > { %10860 = vmatmul.msk.bf16.gmra.mxu0 %vm661_vm0, %v11701_v12 }
  0xd6   : > { %v767_v15 = vpop.f32.mrf.mxu0 }
  0xd7   : > { %v768_v16 = vadd.f32 %v12561_v13, %v767_v15 }
  0xd9   : > { %v927_v17 = vmax.f32 %v768_v16, 0.0  ;;  %10861 = vmatmul.msk.bf16.gmra.mxu0 %vm661_vm0, %v11702_v14 }
  0xdb   : > { %v991_v18 = vpack.c.bf16 %v927_v17, %v927_v17 }
  0xdd   : > { %v1169_v19 = vshrl.u32 %v991_v18, 16  ;;  %v1172_v21 = vshll.u32 %v991_v18, 16 }
  0xde   : > { %v769_v26 = vpop.f32.mrf.mxu0 }
  0xdf   : > { %v1171_v20 = vrot.slane %v1169_v19, 7  ;;  %v770_v27 = vadd.f32 %v12561_v13, %v769_v26 }
  0xe1   : > { %v1174_v24 = vor.u32 %v1172_v21, %v1171_v20  ;;  %v928_v28 = vmax.f32 %v770_v27, 0.0  ;;  %v1175_v37 = vrot.slane %v1171_v20, 4 }
  0xe3   : > { %v1813_v25 = vsel %vm12593_vm3, %v1174_v24, %v1812_v23  ;;  %v992_v29 = vpack.c.bf16 %v928_v28, %v928_v28 }
  0xe4   : > { %1814 = vst [vmem:[#allocation2 + $0xc] sm:$0xf] %v1813_v25  ;;  %v1821_v25 = vld [vmem:[#allocation2 + $0x18] sm:$0xf] }
  0xe5   : > { %v1177_v30 = vshrl.u32 %v992_v29, 16  ;;  %v1180_v33 = vshll.u32 %v992_v29, 16 }
  0xe6   : > { %v772_v32 = vpop.f32.mrf.mxu0 }
  0xe7   : > { %v1179_v31 = vrot.slane %v1177_v30, 7  ;;  %v773_v51 = vadd.f32 %v12561_v13, %v772_v32 }
  0xe9   : > { %v1182_v35 = vor.u32 %v1180_v33, %v1179_v31  ;;  %10862 = vmatmul.msk.bf16.gmra.mxu0 %vm661_vm0, %v11703_v34  ;;  %v1184_v40 = vrot.slane %v1179_v31, 4  ;;  %v929_v55 = vmax.f32 %v773_v51, 0.0  ;;  %v1825_v34 = vld [vmem:[#allocation2 + $0x20] sm:$0x1] }
  0xeb   : > { %v1183_v38 = vsel %vm12664_vm6, %v1175_v37, %v1182_v35  ;;  %v5343_v42 = vld [vmem:[#allocation2 + $0xc] sm:$0xe]  ;;  %v1819_v44 = vsel %vm12690_vm8, %v1184_v40, %v1818_v43  ;;  %v993_v63 = vpack.c.bf16 %v929_v55, %v929_v55 }
  0xec   : > { %1815 = vst.msk [vmem:[#allocation2 + $0x10] sm:$0xf] %vm1055_vm1, %v1183_v38  ;;  %v10917_v48 = vrot.slane %v5343_v42, 9  ;;  %v1828_v38 = vld [vmem:[#allocation2 + $0x24] sm:$0xf] }
  0xed   : > { %1820 = vst [vmem:[#allocation2 + $0x14] sm:$0x1] %v1819_v44  ;;  %v1186_v4 = vshrl.u32 %v993_v63, 16  ;;  %v1189_v17 = vshll.u32 %v993_v63, 16 }
  0xee   : > { %v774_v39 = vpop.f32.mrf.mxu0 }
  0xef   : > { %v775_v53 = vadd.f32 %v12561_v13, %v774_v39  ;;  %v1188_v12 = vrot.slane %v1186_v4, 7  ;;  %v1839_v4 = vld [vmem:[#allocation2 + $0x38] sm:$0x1] }
  0xf1   : > { %v930_v57 = vmax.f32 %v775_v53, 0.0  ;;  %v1191_v21 = vor.u32 %v1189_v17, %v1188_v12  ;;  %v1192_v33 = vrot.slane %v1188_v12, 4 }
  0xf3   : > { %v5344_v47 = vld [vmem:[#allocation2 + $0x10] sm:$0xf]  ;;  %v994_v2 = vpack.c.bf16 %v930_v57, %v930_v57  ;;  %v1822_v37 = vsel %vm12593_vm3, %v1191_v21, %v1821_v25 }
  0xf4   : > { %v5537_v49 = vrot.slane %v5344_v47, 5  ;;  %v5345_v59 = vld [vmem:[#allocation2 + $0x14] sm:$0x1]  ;;  %1823 = vst [vmem:[#allocation2 + $0x18] sm:$0xf] %v1822_v37 }
  0xf5   : > { %v5540_v61 = vrot.slane %v5345_v59, 5  ;;  %v1194_v7 = vshrl.u32 %v994_v2, 16  ;;  %v1197_v19 = vshll.u32 %v994_v2, 16 }
  0xf6   : > { %v777_v45 = vpop.f32.mrf.mxu0  ;;  %v5538_v52 = vsel %vm12704_vm11, %v10917_v48, %v5537_v49  ;;  %v5539_v56 = vrot.slane %v5537_v49, 4  ;;  %v1832_v48 = vld [vmem:[#allocation2 + $0x2c] sm:$0x1] }
  0xf7   : > { %5759 = vrot.lane.b32.xlu0 %v5538_v52, %s12286_s26  ;;  %v778_v54 = vadd.f32 %v12561_v13, %v777_v45  ;;  %v1196_v16 = vrot.slane %v1194_v7, 7  ;;  %v1835_v52 = vld [vmem:[#allocation2 + $0x30] sm:$0xf] }
  0xf8   : > { %v5541_v1 = vsel %vm12704_vm11, %v5539_v56, %v5540_v61 }
  0xf9   : > { %10863 = vmatmul.msk.bf16.gmra.mxu0 %vm661_vm0, %v11704_v50  ;;  %v931_v62 = vmax.f32 %v778_v54, 0.0  ;;  %v1199_v26 = vor.u32 %v1197_v19, %v1196_v16  ;;  %v1201_v29 = vrot.slane %v1196_v16, 4 }
  0xfb   : > { %v995_v3 = vpack.c.bf16 %v931_v62, %v931_v62  ;;  %v1200_v43 = vsel %vm12664_vm6, %v1192_v33, %v1199_v26  ;;  %v1826_v45 = vsel %vm12690_vm8, %v1201_v29, %v1825_v34  ;;  %v4351_v62 = vld [vmem:[#allocation2 + $0xc] sm:$0xf]  ;;  %v6016_v63 = vld [vmem:[#allocation2 + $0x18] sm:$0xf] }
  0xfc   : > { %1824 = vst.msk [vmem:[#allocation2 + $0x1c] sm:$0xf] %vm1055_vm1, %v1200_v43  ;;  %6144 = vrot.lane.b32.xlu1 %v6016_v63, %s12287_s11 }
  0xfd   : > { %v1203_v10 = vshrl.u32 %v995_v3, 16  ;;  %v1206_v27 = vshll.u32 %v995_v3, 16  ;;  %1827 = vst [vmem:[#allocation2 + $0x20] sm:$0x1] %v1826_v45 }
  0xfe   : > { %v779_v58 = vpop.f32.mrf.mxu0 }
  0xff   : > { %v780_v60 = vadd.f32 %v12561_v13, %v779_v58  ;;  %5761 = vrot.lane.b32.xlu0 %v5541_v1, %s12286_s26  ;;  %v1205_v20 = vrot.slane %v1203_v10, 7  ;;  %v4451_v10 = vshll.u32 %v4351_v62, 16 }
 0x101   : > { %v932_v0 = vmax.f32 %v780_v60, 0.0  ;;  %v1208_v35 = vor.u32 %v1206_v27, %v1205_v20  ;;  %v1209_v47 = vrot.slane %v1205_v20, 4 }
 0x103   : > { %v996_v5 = vpack.c.bf16 %v932_v0, %v932_v0  ;;  %v1829_v51 = vsel %vm12593_vm3, %v1208_v35, %v1828_v38  ;;  %v5346_v0 = vld [vmem:[#allocation2 + $0x18] sm:$0xe]  ;;  %v5347_v7 = vld [vmem:[#allocation2 + $0x1c] sm:$0xf] }
 0x104   : > { %1830 = vst [vmem:[#allocation2 + $0x24] sm:$0xf] %v1829_v51  ;;  %v10918_v12 = vrot.slane %v5346_v0, 9  ;;  %v6401_v17 = vld [vmem:[#allocation2 + $0x1c] sm:$0xf] }
 0x105   : > { %v1211_v14 = vshrl.u32 %v996_v5, 16  ;;  %v1214_v30 = vshll.u32 %v996_v5, 16  ;;  %v4352_v5 = vld [vmem:[#allocation2 + $0x10] sm:$0xf]  ;;  %v6506_v26 = vshll.u32 %v6401_v17, 16 }
 0x106   : > { %v782_v8 = vpop.f32.mrf.mxu0  ;;  %v4457_v20 = vshll.u32 %v4352_v5, 16  ;;  %v4461_v21 = vshrl.u32 %v4352_v5, 16  ;;  %v6017_v27 = vld [vmem:[#allocation2 + $0x1c] sm:$0xf]  ;;  %v5348_v43 = vld [vmem:[#allocation2 + $0x20] sm:$0x1] }
 0x107   : > { %v783_v9 = vadd.f32 %v12561_v13, %v782_v8  ;;  %v1213_v23 = vrot.slane %v1211_v14, 7  ;;  %v5544_v14 = vrot.slane %v5347_v7, 5  ;;  %6146 = vrot.lane.b32.xlu1 %v6017_v27, %s12287_s11  ;;  %v6508_v38 = vrot.slane %v6506_v26, 5 }
 0x108   : > { %v12814_v35 = vrot.slane %v4457_v20, 5  ;;  %v5547_v63 = vrot.slane %v5348_v43, 5 }
 0x109   : > { %v933_v15 = vmax.f32 %v783_v9, 0.0  ;;  %10864 = vmatmul.msk.bf16.gmra.mxu0 %vm661_vm0, %v11705_v6  ;;  %v1216_v39 = vor.u32 %v1214_v30, %v1213_v23  ;;  %v1218_v44 = vrot.slane %v1213_v23, 4  ;;  %v4448_v9 = vshrl.u32 %v4351_v62, 16 }
 0x10a   : > { %v5545_v23 = vsel %vm12704_vm11, %v10918_v12, %v5544_v14 }
 0x10b   : > { %v997_v18 = vpack.c.bf16 %v933_v15, %v933_v15  ;;  %v1217_v53 = vsel %vm12664_vm6, %v1209_v47, %v1216_v39  ;;  %v1833_v55 = vsel %vm12690_vm8, %v1218_v44, %v1832_v48  ;;  %v6400_v15 = vld [vmem:[#allocation2 + $0x18] sm:$0xf]  ;;  %5763 = vrot.lane.b32.xlu0 %v5545_v23, %s12286_s26  ;;  %v4450_v30 = vrot.slane %v4448_v9, 4  ;;  %v6403_v47 = vld [vmem:[#allocation2 + $0x24] sm:$0xf] }
 0x10c   : > { %1831 = vst.msk [vmem:[#allocation2 + $0x28] sm:$0xf] %vm1055_vm1, %v1217_v53  ;;  %v6500_v25 = vshll.u32 %v6400_v15, 16  ;;  %v6521_v51 = vshrl.u32 %v6403_v47, 16  ;;  %v5349_v9 = vld [vmem:[#allocation2 + $0x24] sm:$0xe] }
 0x10d   : > { %v1220_v24 = vshrl.u32 %v997_v18, 16  ;;  %v1223_v40 = vshll.u32 %v997_v18, 16  ;;  %1834 = vst [vmem:[#allocation2 + $0x2c] sm:$0x1] %v1833_v55  ;;  %v6402_v55 = vld [vmem:[#allocation2 + $0x20] sm:$0x1] }
 0x10e   : > { %v784_v28 = vpop.f32.mrf.mxu0  ;;  %v6502_v33 = vrot.slane %v6500_v25, 5  ;;  %v10919_v25 = vrot.slane %v5349_v9, 9 }
 0x10f   : > { %v12771_v31 = vrot.slane %v1220_v24, 7  ;;  %v785_v32 = vadd.f32 %v12561_v13, %v784_v28  ;;  %v6497_v24 = vshrl.u32 %v6400_v15, 16  ;;  %v6510_v28 = vshrl.u32 %v6401_v17, 16 }
 0x111   : > { %v934_v42 = vmax.f32 %v785_v32, 0.0  ;;  %v1225_v49 = vor.u32 %v1223_v40, %v12771_v31  ;;  %v1226_v6 = vrot.slane %v12771_v31, 4  ;;  %v4453_v31 = vrot.slane %v4451_v10, 5  ;;  %v1842_v40 = vld [vmem:[#allocation2 + $0x3c] sm:$0xf] }
 0x112   : > { %v6499_v32 = vrot.slane %v6497_v24, 4  ;;  %v6512_v39 = vrot.slane %v6510_v28, 4 }
 0x113   : > { %v998_v50 = vpack.c.bf16 %v934_v42, %v934_v42  ;;  %v1836_v57 = vsel %vm12593_vm3, %v1225_v49, %v1835_v52  ;;  %v4463_v42 = vrot.slane %v4461_v21, 4  ;;  %v6019_v44 = vld [vmem:[#allocation2 + $0x28] sm:$0xf]  ;;  %v6524_v52 = vshll.u32 %v6403_v47, 16 }
 0x114   : > { %1837 = vst [vmem:[#allocation2 + $0x30] sm:$0xf] %v1836_v57  ;;  %v6503_v37 = vor.u32 %v6502_v33, %v6499_v32  ;;  %v11707_v57 = vld [vmem:[%s12468_s27 + $0x68] sm:$0xff]  ;;  %6150 = vrot.lane.b32.xlu0 %v6019_v44, %s12287_s11 }
 0x115   : > { %v1228_v54 = vshrl.u32 %v998_v50, 16  ;;  %v1231_v60 = vshll.u32 %v998_v50, 16  ;;  %v12819_v50 = vld [vmem:[#allocation2 + $0x28] sm:$0xf]  ;;  %v6526_v62 = vrot.slane %v6524_v52, 5 }
 0x116   : > { %v787_v56 = vpop.f32.mrf.mxu0  ;;  %v6504_v49 = vrot.slane %v6503_v37, 4  ;;  %v6530_v0 = vshll.u32 %v12819_v50, 16  ;;  %v1846_v37 = vld [vmem:[#allocation2 + $0x44] sm:$0x1] }
 0x117   : > { %v1230_v58 = vrot.slane %v1228_v54, 7  ;;  %v788_v59 = vadd.f32 %v12561_v13, %v787_v56 }
 0x118   : > { %v12844_v17 = vrot.slane %v6530_v0, 5 }
 0x119   : > { %v935_v61 = vmax.f32 %v788_v59, 0.0  ;;  %10865 = vmatmul.msk.bf16.gmra.mxu0 %vm661_vm0, %v11706_v11  ;;  %v1233_v1 = vor.u32 %v1231_v60, %v1230_v58  ;;  %v1235_v2 = vrot.slane %v1230_v58, 4  ;;  %v5546_v11 = vrot.slane %v5544_v14, 4 }
 0x11a   : > { %v4454_v58 = vor.u32 %v4453_v31, %v4450_v30  ;;  %v6509_v59 = vsel %vm12823_vm14, %v6504_v49, %v6508_v38  ;;  %v6513_v60 = vor.u32 %v6512_v39, %v6508_v38  ;;  %v6534_v30 = vshrl.u32 %v12819_v50, 16 }
 0x11b   : > { %v999_v3 = vpack.c.bf16 %v935_v61, %v935_v61  ;;  %v1234_v18 = vsel %vm12664_vm6, %v1226_v6, %v1233_v1  ;;  %v1840_v19 = vsel %vm12690_vm8, %v1235_v2, %v1839_v4  ;;  %v6523_v61 = vrot.slane %v6521_v51, 4  ;;  %7264 = vrot.lane.b32.xlu2 %v6509_v59, %s12288_s19  ;;  %v12835_v1 = vld [vmem:[#allocation2 + $0x28] sm:$0xf]  ;;  %v4353_v6 = vld [vmem:[#allocation2 + $0x14] sm:$0x1] }
 0x11c   : > { %1838 = vst.msk [vmem:[#allocation2 + $0x34] sm:$0xf] %vm1055_vm1, %v1234_v18  ;;  %v6516_v4 = vshll.u32 %v6402_v55, 16  ;;  %v5548_v7 = vsel %vm12704_vm11, %v5546_v11, %v5547_v63  ;;  %v6514_v12 = vrot.slane %v6513_v60, 4  ;;  %v5551_v14 = vrot.slane %v12835_v1, 5 }
 0x11d   : > { %v1237_v8 = vshrl.u32 %v999_v3, 16  ;;  %1841 = vst [vmem:[#allocation2 + $0x38] sm:$0x1] %v1840_v19  ;;  %v1240_v34 = vshll.u32 %v999_v3, 16  ;;  %v4464_v3 = vor.u32 %v4463_v42, %v12814_v35  ;;  %5765 = vrot.lane.b32.xlu1 %v5548_v7, %s12286_s26  ;;  %v6406_v19 = vld [vmem:[#allocation2 + $0x30] sm:$0xf] }
 0x11e   : > { %v789_v16 = vpop.f32.mrf.mxu0  ;;  %v4467_v21 = vshll.u32 %v4353_v6, 16  ;;  %v6518_v23 = vrot.slane %v6516_v4, 5  ;;  %v6545_v39 = vshrl.u32 %v6406_v19, 16  ;;  %v6548_v43 = vshll.u32 %v6406_v19, 16  ;;  %v6405_v51 = vld [vmem:[#allocation2 + $0x2c] sm:$0x1] }
 0x11f   : > { %v12811_v29 = vrot.slane %v1237_v8, 7  ;;  %v790_v48 = vadd.f32 %v12561_v13, %v789_v16  ;;  %v6527_v8 = vor.u32 %v6526_v62, %v6523_v61  ;;  %v4455_v16 = vrot.slane %v4454_v58, 4  ;;  %v6018_v7 = vld [vmem:[#allocation2 + $0x24] sm:$0xf] }
 0x120   : > { %v4465_v20 = vrot.slane %v4464_v3, 4  ;;  %v6519_v33 = vsel %vm12823_vm14, %v6514_v12, %v6518_v23  ;;  %v6536_v52 = vrot.slane %v6534_v30, 4  ;;  %v4469_v11 = vrot.slane %v4467_v21, 5 }
 0x121   : > { %v1242_v45 = vor.u32 %v1240_v34, %v12811_v29  ;;  %v936_v2 = vmax.f32 %v790_v48, 0.0  ;;  %v1243_v24 = vrot.slane %v12811_v29, 4  ;;  %v6528_v28 = vrot.slane %v6527_v8, 4 }
 0x122   : > { %v5552_v34 = vsel %vm12704_vm11, %v10919_v25, %v5551_v14  ;;  %v4460_v48 = vsel %vm12823_vm14, %v4455_v16, %v12814_v35  ;;  %v5351_v35 = vld [vmem:[#allocation2 + $0x2c] sm:$0x1]  ;;  %v6547_v58 = vrot.slane %v6545_v39, 4  ;;  %v6550_v59 = vrot.slane %v6548_v43, 5  ;;  %v4354_v43 = vld [vmem:[#allocation2 + $0x18] sm:$0xf] }
 0x123   : > { %v1843_v56 = vsel %vm12593_vm3, %v1242_v45, %v1842_v40  ;;  %v1000_v10 = vpack.c.bf16 %v936_v2, %v936_v2  ;;  %7266 = vrot.lane.b32.xlu2 %v6519_v33, %s12288_s19  ;;  %v6533_v29 = vsel %vm12823_vm14, %v6528_v28, %v12844_v17  ;;  %5767 = vrot.lane.b32.xlu0 %v5552_v34, %s12286_s26  ;;  %v6540_v61 = vshll.u32 %v6405_v51, 16  ;;  %v6021_v62 = vld [vmem:[#allocation2 + $0x34] sm:$0xf]  ;;  %v11708_v2 = vld [vmem:[%s12468_s27 + $0x70] sm:$0xff] }
 0x124   : > { %1844 = vst [vmem:[#allocation2 + $0x3c] sm:$0xf] %v1843_v56  ;;  %v6407_v56 = vld [vmem:[#allocation2 + $0x34] sm:$0xf]  ;;  %v4470_v60 = vsel %vm12823_vm14, %v4465_v20, %v4469_v11  ;;  %v6537_v3 = vor.u32 %v6536_v52, %v12844_v17  ;;  %v5553_v4 = vrot.slane %v5551_v14, 4  ;;  %v5554_v9 = vrot.slane %v5351_v35, 5 }
 0x125   : > { %v1245_v18 = vshrl.u32 %v1000_v10, 16  ;;  %v1248_v32 = vshll.u32 %v1000_v10, 16  ;;  %7268 = vrot.lane.b32.xlu1 %v6533_v29, %s12288_s19  ;;  %5279 = vst.msk [vmem:[#allocation3 + $0x4] sm:$0xf] %vm1055_vm1, %v4460_v48  ;;  %v6551_v10 = vor.u32 %v6550_v59, %v6547_v58  ;;  %v6558_v12 = vshrl.u32 %v6407_v56, 16 }
 0x126   : > { %v792_v53 = vpop.f32.mrf.mxu0  ;;  %5280 = vst.msk [vmem:[#allocation3 + $0x10] sm:$0xf] %vm1055_vm1, %v4470_v60  ;;  %v5352_v17 = vld [vmem:[#allocation2 + $0x30] sm:$0xe]  ;;  %v6538_v20 = vrot.slane %v6537_v3, 4  ;;  %v5555_v21 = vsel %vm12704_vm11, %v5553_v4, %v5554_v9 }
 0x127   : > { %v793_v5 = vadd.f32 %v12561_v13, %v792_v53  ;;  %v1247_v31 = vrot.slane %v1245_v18, 7  ;;  %v1849_v53 = vld [vmem:[#allocation2 + $0x48] sm:$0xf]  ;;  %v6542_v18 = vrot.slane %v6540_v61, 5  ;;  %v10920_v33 = vrot.slane %v5352_v17, 9 }
 0x128   : > { %v6560_v34 = vrot.slane %v6558_v12, 4  ;;  %v1856_v52 = vld [vmem:[#allocation2 + $0x54] sm:$0xf]  ;;  %v5354_v61 = vld [vmem:[#allocation2 + $0x38] sm:$0x1]  ;;  %v11709_v17 = vld [vmem:[%s12468_s27 + $0x78] sm:$0xff] }
 0x129   : > { %10866 = vmatmul.msk.bf16.gmra.mxu0 %vm661_vm0, %v11707_v57  ;;  %v937_v15 = vmax.f32 %v793_v5, 0.0  ;;  %v1250_v40 = vor.u32 %v1248_v32, %v1247_v31  ;;  %v1252_v42 = vrot.slane %v1247_v31, 4  ;;  %v6554_v5 = vshll.u32 %v6407_v56, 16 }
 0x12a   : > { %v6552_v32 = vrot.slane %v6551_v10, 4  ;;  %v4472_v56 = vshrl.u32 %v4354_v43, 16  ;;  %v5561_v12 = vrot.slane %v5354_v61, 5 }
 0x12b   : > { %v1001_v26 = vpack.c.bf16 %v937_v15, %v937_v15  ;;  %v1251_v49 = vsel %vm12664_vm6, %v1243_v24, %v1250_v40  ;;  %v1847_v50 = vsel %vm12690_vm8, %v1252_v42, %v1846_v37  ;;  %6148 = vrot.lane.b32.xlu2 %v6018_v7, %s12287_s11  ;;  %6154 = vrot.lane.b32.xlu0 %v6021_v62, %s12287_s11  ;;  %v5353_v15 = vld [vmem:[#allocation2 + $0x34] sm:$0xf]  ;;  %v6556_v23 = vrot.slane %v6554_v5, 5  ;;  %v1853_v24 = vld [vmem:[#allocation2 + $0x50] sm:$0x1] }
 0x12c   : > { %1845 = vst.msk [vmem:[#allocation2 + $0x40] sm:$0xf] %vm1055_vm1, %v1251_v49  ;;  %v5558_v28 = vrot.slane %v5353_v15, 5  ;;  %v6543_v49 = vsel %vm12823_vm14, %v6538_v20, %v6542_v18 }
 0x12d   : > { %v1254_v38 = vshrl.u32 %v1001_v26, 16  ;;  %v1257_v45 = vshll.u32 %v1001_v26, 16  ;;  %1848 = vst [vmem:[#allocation2 + $0x44] sm:$0x1] %v1847_v50  ;;  %v6409_v26 = vld [vmem:[#allocation2 + $0x3c] sm:$0xf]  ;;  %5769 = vrot.lane.b32.xlu1 %v5555_v21, %s12286_s26  ;;  %v6557_v50 = vsel %vm12823_vm14, %v6552_v32, %v6556_v23  ;;  %v6561_v35 = vor.u32 %v6560_v34, %v6556_v23 }
 0x12e   : > { %v794_v27 = vpop.f32.mrf.mxu0  ;;  %v6569_v29 = vshrl.u32 %v6409_v26, 16  ;;  %v6572_v40 = vshll.u32 %v6409_v26, 16  ;;  %v5559_v51 = vsel %vm12704_vm11, %v10920_v33, %v5558_v28  ;;  %v5560_v3 = vrot.slane %v5558_v28, 4 }
 0x12f   : > { %v12857_v44 = vrot.slane %v1254_v38, 7  ;;  %v795_v47 = vadd.f32 %v12561_v13, %v794_v27  ;;  %v6562_v9 = vrot.slane %v6561_v35, 4 }
 0x130   : > { %v6571_v59 = vrot.slane %v6569_v29, 4  ;;  %v6574_v60 = vrot.slane %v6572_v40, 5 }
 0x131   : > { %v1259_v55 = vor.u32 %v1257_v45, %v12857_v44  ;;  %v938_v57 = vmax.f32 %v795_v47, 0.0  ;;  %v1260_v27 = vrot.slane %v12857_v44, 4  ;;  %v6408_v44 = vld [vmem:[#allocation2 + $0x38] sm:$0x1] }
 0x132   : > { %v6564_v58 = vshll.u32 %v6408_v44, 16 }
 0x133   : > { %v1850_v63 = vsel %vm12593_vm3, %v1259_v55, %v1849_v53  ;;  %v1002_v0 = vpack.c.bf16 %v938_v57, %v938_v57  ;;  %7270 = vrot.lane.b32.xlu2 %v6543_v49, %s12288_s19  ;;  %5771 = vrot.lane.b32.xlu0 %v5559_v51, %s12286_s26  ;;  %v6410_v11 = vld [vmem:[#allocation2 + $0x40] sm:$0xf]  ;;  %v4475_v57 = vshll.u32 %v4354_v43, 16 }
 0x134   : > { %1851 = vst [vmem:[#allocation2 + $0x48] sm:$0xf] %v1850_v63  ;;  %v12906_v4 = vld [vmem:[#allocation2 + $0x40] sm:$0xf]  ;;  %v6566_v10 = vrot.slane %v6564_v58, 5 }
 0x135   : > { %v1262_v8 = vshrl.u32 %v1002_v0, 16  ;;  %v1265_v19 = vshll.u32 %v1002_v0, 16  ;;  %7272 = vrot.lane.b32.xlu1 %v6557_v50, %s12288_s19  ;;  %v6578_v0 = vshll.u32 %v6410_v11, 16  ;;  %v4477_v7 = vrot.slane %v4475_v57, 5  ;;  %v6023_v15 = vld [vmem:[#allocation2 + $0x40] sm:$0xf] }
 0x136   : > { %v797_v1 = vpop.f32.mrf.mxu0  ;;  %v5565_v26 = vrot.slane %v12906_v4, 5  ;;  %v6411_v32 = vld [vmem:[#allocation2 + $0x44] sm:$0x1]  ;;  %v4356_v50 = vld [vmem:[#allocation2 + $0x20] sm:$0x1] }
 0x137   : > { %v798_v6 = vadd.f32 %v12561_v13, %v797_v1  ;;  %v1264_v14 = vrot.slane %v1262_v8, 7  ;;  %v6582_v1 = vshrl.u32 %v6410_v11, 16  ;;  %v6020_v8 = vld [vmem:[#allocation2 + $0x30] sm:$0xf]  ;;  %v12918_v29 = vld [vmem:[#allocation2 + $0x44] sm:$0x1] }
 0x138   : > { %v12927_v49 = vrot.slane %v5565_v26, 4 }
 0x139   : > { %v939_v16 = vmax.f32 %v798_v6, 0.0  ;;  %10867 = vmatmul.msk.bf16.gmra.mxu0 %vm661_vm0, %v11708_v2  ;;  %v1267_v30 = vor.u32 %v1265_v19, %v1264_v14  ;;  %v1269_v31 = vrot.slane %v1264_v14, 4  ;;  %v4355_v2 = vld [vmem:[#allocation2 + $0x1c] sm:$0xf]  ;;  %v4474_v6 = vrot.slane %v4472_v56, 4 }
 0x13a   : > { %v5355_v14 = vld [vmem:[#allocation2 + $0x3c] sm:$0xe]  ;;  %v4481_v23 = vshll.u32 %v4355_v2, 16  ;;  %v6584_v28 = vrot.slane %v6582_v1, 4  ;;  %v4485_v40 = vshrl.u32 %v4355_v2, 16 }
 0x13b   : > { %v1003_v25 = vpack.c.bf16 %v939_v16, %v939_v16  ;;  %v1268_v38 = vsel %vm12664_vm6, %v1260_v27, %v1267_v30  ;;  %v1854_v39 = vsel %vm12690_vm8, %v1269_v31, %v1853_v24  ;;  %v6575_v16 = vor.u32 %v6574_v60, %v6571_v59  ;;  %v1860_v27 = vld [vmem:[#allocation2 + $0x5c] sm:$0x1]  ;;  %6152 = vrot.lane.b32.xlu2 %v6020_v8, %s12287_s11  ;;  %v4357_v59 = vld [vmem:[#allocation2 + $0x24] sm:$0xf] }
 0x13c   : > { %1852 = vst.msk [vmem:[#allocation2 + $0x4c] sm:$0xf] %vm1055_vm1, %v1268_v38  ;;  %6158 = vrot.lane.b32.xlu0 %v6023_v15, %s12287_s11  ;;  %v4478_v34 = vor.u32 %v4477_v7, %v4474_v6  ;;  %v4487_v58 = vrot.slane %v4485_v40, 4  ;;  %v11711_v8 = vld [vmem:[%s12468_s27 + $0x88] sm:$0xff]  ;;  %v11710_v40 = vld [vmem:[%s12468_s27 + $0x80] sm:$0xff] }
 0x13d   : > { %v1271_v37 = vshrl.u32 %v1003_v25, 16  ;;  %v1274_v47 = vshll.u32 %v1003_v25, 16  ;;  %1855 = vst [vmem:[#allocation2 + $0x50] sm:$0x1] %v1854_v39  ;;  %v12911_v25 = vrot.slane %v6578_v0, 5  ;;  %v6576_v38 = vrot.slane %v6575_v16, 4  ;;  %10870 = vmatmul.msk.bf16.vlgmr.msra.gmra.mxu1 %vm661_vm0, %v11711_v8 }
 0x13e   : > { %v799_v42 = vpop.f32.mrf.mxu0  ;;  %v10921_v39 = vrot.slane %v5355_v14, 9  ;;  %v4479_v11 = vrot.slane %v4478_v34, 4  ;;  %v6567_v0 = vsel %vm12823_vm14, %v6562_v9, %v6566_v10  ;;  %v4358_v9 = vld [vmem:[#allocation2 + $0x28] sm:$0xf]  ;;  %v4496_v10 = vshrl.u32 %v4357_v59, 16 }
 0x13f   : > { %v12891_v45 = vrot.slane %v1271_v37, 7  ;;  %v800_v48 = vadd.f32 %v12561_v13, %v799_v42  ;;  %v5562_v37 = vsel %vm12704_vm11, %v5560_v3, %v5561_v12  ;;  %v6585_v51 = vor.u32 %v6584_v28, %v12911_v25  ;;  %v1863_v3 = vld [vmem:[#allocation2 + $0x60] sm:$0xf]  ;;  %v12958_v28 = vld [vmem:[#allocation2 + $0x48] sm:$0xe] }
 0x140   : > { %5773 = vrot.lane.b32.xlu1 %v5562_v37, %s12286_s26  ;;  %v6581_v1 = vsel %vm12823_vm14, %v6576_v38, %v12911_v25  ;;  %v5566_v2 = vsel %vm12704_vm11, %v10921_v39, %v5565_v26  ;;  %v4505_v25 = vshll.u32 %v4358_v9, 16  ;;  %v4509_v26 = vshrl.u32 %v4358_v9, 16  ;;  %v6022_v34 = vld [vmem:[#allocation2 + $0x3c] sm:$0xf] }
 0x141   : > { %v1276_v53 = vor.u32 %v1274_v47, %v12891_v45  ;;  %v940_v55 = vmax.f32 %v800_v48, 0.0  ;;  %v1277_v24 = vrot.slane %v12891_v45, 4  ;;  %v6412_v45 = vld [vmem:[#allocation2 + $0x48] sm:$0xf]  ;;  %v4483_v47 = vrot.slane %v4481_v23, 5 }
 0x142   : > { %v6588_v48 = vshll.u32 %v6411_v32, 16  ;;  %v6593_v56 = vshrl.u32 %v6412_v45, 16  ;;  %v6596_v57 = vshll.u32 %v6412_v45, 16  ;;  %v12950_v12 = vrot.slane %v6585_v51, 4 }
 0x143   : > { %v1857_v62 = vsel %vm12593_vm3, %v1276_v53, %v1856_v52  ;;  %v1004_v63 = vpack.c.bf16 %v940_v55, %v940_v55  ;;  %v5568_v52 = vrot.slane %v12918_v29, 5  ;;  %v6413_v4 = vld [vmem:[#allocation2 + $0x4c] sm:$0xf]  ;;  %7274 = vrot.lane.b32.xlu2 %v6567_v0, %s12288_s19 }
 0x144   : > { %1858 = vst [vmem:[#allocation2 + $0x54] sm:$0xf] %v1857_v62  ;;  %v4484_v62 = vsel %vm12823_vm14, %v4479_v11, %v4483_v47  ;;  %5775 = vrot.lane.b32.xlu0 %v5566_v2, %s12286_s26  ;;  %v6595_v15 = vrot.slane %v6593_v56, 4  ;;  %v6598_v16 = vrot.slane %v6596_v57, 5  ;;  %v6606_v23 = vshrl.u32 %v6413_v4, 16 }
 0x145   : > { %v1279_v5 = vshrl.u32 %v1004_v63, 16  ;;  %v1282_v20 = vshll.u32 %v1004_v63, 16  ;;  %v4491_v63 = vshll.u32 %v4356_v50, 16  ;;  %5281 = vst.msk [vmem:[#allocation3 + $0x1c] sm:$0xf] %vm1055_vm1, %v4484_v62  ;;  %v4511_v56 = vrot.slane %v4509_v26, 4 }
 0x146   : > { %v802_v18 = vpop.f32.mrf.mxu0  ;;  %v6599_v37 = vor.u32 %v6598_v16, %v6595_v15  ;;  %v12963_v38 = vld [vmem:[#allocation2 + $0x50] sm:$0x1]  ;;  %v4359_v50 = vld [vmem:[#allocation2 + $0x2c] sm:$0x1]  ;;  %v6608_v11 = vrot.slane %v6606_v23, 4 }
 0x147   : > { %v1281_v19 = vrot.slane %v1279_v5, 7  ;;  %v803_v21 = vadd.f32 %v12561_v13, %v802_v18  ;;  %v4488_v5 = vor.u32 %v4487_v58, %v4483_v47  ;;  %v12952_v18 = vld [vmem:[#allocation2 + $0x4c] sm:$0xf]  ;;  %v12972_v47 = vld [vmem:[%s16676_s6] ss:$0 sm:$0xff]  ;;  %v4515_v0 = vshll.u32 %v4359_v50, 16 }
 0x148   : > { %7276 = vrot.lane.b32.xlu1 %v6581_v1, %s12288_s19  ;;  %v6600_v29 = vrot.slane %v6599_v37, 4 }
 0x149   : > { %v1284_v30 = vor.u32 %v1282_v20, %v1281_v19  ;;  %v1286_v31 = vrot.slane %v1281_v19, 4  ;;  %v941_v33 = vmax.f32 %v803_v21, 0.0  ;;  %10868 = vmatmul.msk.bf16.gmra.mxu0 %vm661_vm0, %v11709_v17  ;;  %v4489_v17 = vrot.slane %v4488_v5, 4  ;;  %v4360_v5 = vld [vmem:[#allocation2 + $0x30] sm:$0xf] }
 0x14a   : > { %v6602_v19 = vshll.u32 %v6413_v4, 16  ;;  %v4493_v21 = vrot.slane %v4491_v63, 5  ;;  %v10922_v63 = vrot.slane %v12958_v28, 9  ;;  %v4517_v15 = vrot.slane %v4515_v0, 5 }
 0x14b   : > { %v1285_v42 = vsel %vm12664_vm6, %v1277_v24, %v1284_v30  ;;  %v1861_v43 = vsel %vm12690_vm8, %v1286_v31, %v1860_v27  ;;  %v1005_v44 = vpack.c.bf16 %v941_v33, %v941_v33  ;;  %v4499_v24 = vshll.u32 %v4357_v59, 16  ;;  %v6025_v27 = vld [vmem:[#allocation2 + $0x4c] sm:$0xf]  ;;  %6156 = vrot.lane.b32.xlu2 %v6022_v34, %s12287_s11  ;;  %v6415_v59 = vld [vmem:[#allocation2 + $0x54] sm:$0xf] }
 0x14c   : > { %1859 = vst.msk [vmem:[#allocation2 + $0x58] sm:$0xf] %vm1055_vm1, %v1285_v42  ;;  %v5572_v30 = vrot.slane %v12952_v18, 5  ;;  %v4494_v32 = vsel %vm12823_vm14, %v4489_v17, %v4493_v21  ;;  %v4498_v33 = vrot.slane %v4496_v10, 4  ;;  %6162 = vrot.lane.b32.xlu0 %v6025_v27, %s12287_s11  ;;  %v4520_v16 = vshrl.u32 %v4360_v5, 16 }
 0x14d   : > { %1862 = vst [vmem:[#allocation2 + $0x5c] sm:$0x1] %v1861_v43  ;;  %v1288_v53 = vshrl.u32 %v1005_v44, 16  ;;  %v1291_v55 = vshll.u32 %v1005_v44, 16  ;;  %v4501_v42 = vrot.slane %v4499_v24, 5  ;;  %v12967_v43 = vrot.slane %v6602_v19, 5 }
 0x14e   : > { %v804_v35 = vpop.f32.mrf.mxu0  ;;  %5282 = vst.msk [vmem:[#allocation3 + $0x28] sm:$0xf] %vm1055_vm1, %v4494_v32  ;;  %v4523_v17 = vshll.u32 %v4360_v5, 16  ;;  %v4361_v24 = vld [vmem:[#allocation2 + $0x34] sm:$0xf]  ;;  %v5573_v26 = vsel %vm12704_vm11, %v10922_v63, %v5572_v30 }
 0x14f   : > { %v12931_v60 = vrot.slane %v1288_v53, 7  ;;  %v805_v61 = vadd.f32 %v12561_v13, %v804_v35  ;;  %v12946_v13 = vrot.slane %v6588_v48, 5  ;;  %v1867_v53 = vld [vmem:[#allocation2 + $0x68] sm:$0x1]  ;;  %v1870_v27 = vld [vmem:[#allocation2 + $0x6c] sm:$0xf] }
 0x150   : > { %v4533_v50 = vshrl.u32 %v4361_v24, 16 }
 0x151   : > { %v1293_v6 = vor.u32 %v1291_v55, %v12931_v60  ;;  %v942_v7 = vmax.f32 %v805_v61, 0.0  ;;  %v1294_v51 = vrot.slane %v12931_v60, 4  ;;  %v4507_v55 = vrot.slane %v4505_v25, 5 }
 0x152   : > { %v4502_v61 = vor.u32 %v4501_v42, %v4498_v33  ;;  %v6591_v62 = vsel %vm12823_vm14, %v12950_v12, %v12946_v13  ;;  %v5569_v60 = vsel %vm12704_vm11, %v12927_v49, %v5568_v52  ;;  %v6609_v49 = vor.u32 %v6608_v11, %v12967_v43 }
 0x153   : > { %v1864_v14 = vsel %vm12593_vm3, %v1293_v6, %v1863_v3  ;;  %v1006_v20 = vpack.c.bf16 %v942_v7, %v942_v7  ;;  %v6612_v3 = vshll.u32 %v12963_v38, 16  ;;  %5777 = vrot.lane.b32.xlu1 %v5569_v60, %s12286_s26  ;;  %v5574_v52 = vrot.slane %v5572_v30, 4  ;;  %7278 = vrot.lane.b32.xlu2 %v6591_v62, %s12288_s19  ;;  %v6416_v33 = vld [vmem:[#allocation2 + $0x58] sm:$0xf]  ;;  %v6024_v60 = vld [vmem:[#allocation2 + $0x48] sm:$0xf] }
 0x154   : > { %1865 = vst [vmem:[#allocation2 + $0x60] sm:$0xf] %v1864_v14  ;;  %v6617_v13 = vshrl.u32 %v6415_v59, 16  ;;  %v6620_v7 = vshll.u32 %v6415_v59, 16  ;;  %v4503_v8 = vrot.slane %v4502_v61, 4  ;;  %v4512_v9 = vor.u32 %v4511_v56, %v4507_v55  ;;  %5779 = vrot.lane.b32.xlu0 %v5573_v26, %s12286_s26  ;;  %v11841_v30 = vld [vmem:[%s16673_s3 + $0x78] sm:$0xff] }
 0x155   : > { %v1296_v31 = vshrl.u32 %v1006_v20, 16  ;;  %v1299_v45 = vshll.u32 %v1006_v20, 16  ;;  %v5360_v14 = vld [vmem:[#allocation2 + $0x50] sm:$0x1]  ;;  %v6605_v25 = vsel %vm12823_vm14, %v6600_v29, %v12967_v43  ;;  %v4525_v42 = vrot.slane %v4523_v17, 5  ;;  %9086 = vmatpush.bf16.msra.mxu2 %v11841_v30 }
 0x156   : > { %v807_v39 = vpop.f32.mrf.mxu0  ;;  %v4508_v21 = vsel %vm12823_vm14, %v4503_v8, %v4507_v55  ;;  %v4513_v23 = vrot.slane %v4512_v9, 4  ;;  %v13011_v28 = vrot.slane %v6617_v13, 4  ;;  %v13017_v34 = vrot.slane %v6620_v7, 5  ;;  %v11840_v56 = vld [vmem:[%s16673_s3 + $0x70] sm:$0xff]  ;;  %v6027_v63 = vld [vmem:[#allocation2 + $0x58] sm:$0xf] }
 0x157   : > { %v1298_v44 = vrot.slane %v1296_v31, 7  ;;  %v808_v48 = vadd.f32 %v12972_v47, %v807_v39  ;;  %5283 = vst.msk [vmem:[#allocation3 + $0x34] sm:$0xf] %vm1055_vm1, %v4508_v21  ;;  %v4522_v31 = vrot.slane %v4520_v16, 4  ;;  %v13024_v39 = vrot.slane %v6609_v49, 4 }
 0x158   : > { %v4518_v37 = vsel %vm12823_vm14, %v4513_v23, %v4517_v15  ;;  %v4529_v43 = vshll.u32 %v4361_v24, 16  ;;  %v6626_v11 = vshll.u32 %v6416_v33, 16  ;;  %v6630_v55 = vshrl.u32 %v6416_v33, 16  ;;  %v13039_v29 = vld [vmem:[#allocation2 + $0x58] sm:$0xf] }
 0x159   : > { %v1301_v57 = vor.u32 %v1299_v45, %v1298_v44  ;;  %v1303_v35 = vrot.slane %v1298_v44, 4  ;;  %v943_v58 = vmax.f32 %v808_v48, 0.0  ;;  %10869 = vmatmul.msk.bf16.gmra.mxu0 %vm661_vm0, %v11710_v40  ;;  %v5575_v40 = vrot.slane %v5360_v14, 5  ;;  %5284 = vst.msk [vmem:[#allocation3 + $0x40] sm:$0xf] %vm1055_vm1, %v4518_v37  ;;  %v11712_v48 = vld [vmem:[%s12468_s27 + $0x90] sm:$0xff]  ;;  %9087 = vmatpush.bf16.msra.mxu2 %v11840_v56 }
 0x15a   : > { %v6623_v59 = vor.u32 %v13017_v34, %v13011_v28  ;;  %10871 = vmatmul.msk.bf16.gmra.mxu1 %vm661_vm0, %v11712_v48  ;;  %v4535_v62 = vrot.slane %v4533_v50, 4  ;;  %v13043_v9 = vrot.slane %v6626_v11, 5  ;;  %v13047_v15 = vld [vmem:[#allocation2 + $0x40] sm:$0xf]  ;;  %v5361_v21 = vld [vmem:[#allocation2 + $0x54] sm:$0xe] }
 0x15b   : > { %v1302_v1 = vsel %vm12664_vm6, %v1294_v51, %v1301_v57  ;;  %v1868_v2 = vsel %vm12690_vm8, %v1303_v35, %v1867_v53  ;;  %v1007_v4 = vpack.c.bf16 %v943_v58, %v943_v58  ;;  %v4362_v51 = vld [vmem:[#allocation2 + $0x38] sm:$0x1]  ;;  %v4363_v53 = vld [vmem:[#allocation2 + $0x3c] sm:$0xf]  ;;  %7280 = vrot.lane.b32.xlu1 %v6605_v25, %s12288_s19  ;;  %v4526_v57 = vor.u32 %v4525_v42, %v4522_v31  ;;  %v6418_v31 = vld [vmem:[#allocation2 + $0x60] sm:$0xf] }
 0x15c   : > { %1866 = vst.msk [vmem:[#allocation2 + $0x64] sm:$0xf] %vm1055_vm1, %v1302_v1  ;;  %v4531_v35 = vrot.slane %v4529_v43, 5  ;;  %v5576_v58 = vsel %vm12704_vm11, %v5574_v52, %v5575_v40  ;;  %v4547_v5 = vshll.u32 %v4363_v53, 16  ;;  %6160 = vrot.lane.b32.xlu2 %v6024_v60, %s12287_s11  ;;  %6166 = vrot.lane.b32.xlu0 %v6027_v63, %s12287_s11  ;;  %v6614_v33 = vrot.slane %v6612_v3, 5 }
 0x15d   : > { %1869 = vst [vmem:[#allocation2 + $0x68] sm:$0x1] %v1868_v2  ;;  %v1305_v6 = vshrl.u32 %v1007_v4, 16  ;;  %v1308_v10 = vshll.u32 %v1007_v4, 16  ;;  %v4527_v1 = vrot.slane %v4526_v57, 4  ;;  %v4539_v2 = vshll.u32 %v4362_v51, 16 }
 0x15e   : > { %v809_v12 = vpop.f32.mrf.mxu0  ;;  %v4544_v4 = vshrl.u32 %v4363_v53, 16  ;;  %v4536_v7 = vor.u32 %v4535_v62, %v4531_v35  ;;  %v4549_v25 = vrot.slane %v4547_v5, 5  ;;  %v5579_v34 = vrot.slane %v13039_v29, 5  ;;  %v13065_v37 = vld [vmem:[#allocation2 + $0x5c] sm:$0x1] }
 0x15f   : > { %v12999_v19 = vrot.slane %v1305_v6, 7  ;;  %v810_v20 = vadd.f32 %v12972_v47, %v809_v12  ;;  %v1874_v6 = vld [vmem:[#allocation2 + $0x74] sm:$0x1]  ;;  %v4532_v12 = vsel %vm12823_vm14, %v4527_v1, %v4531_v35  ;;  %v4541_v24 = vrot.slane %v4539_v2, 5  ;;  %v1877_v57 = vld [vmem:[#allocation2 + $0x78] sm:$0xf] }
 0x160   : > { %5285 = vst.msk [vmem:[#allocation3 + $0x4c] sm:$0xf] %vm1055_vm1, %v4532_v12  ;;  %v4537_v23 = vrot.slane %v4536_v7, 4  ;;  %v10923_v30 = vrot.slane %v5361_v21, 9  ;;  %v6615_v38 = vsel %vm12823_vm14, %v13024_v39, %v6614_v33  ;;  %v6624_v3 = vrot.slane %v6623_v59, 4 }
 0x161   : > { %v1310_v32 = vor.u32 %v1308_v10, %v12999_v19  ;;  %v944_v18 = vmax.f32 %v810_v20, 0.0  ;;  %v1311_v8 = vrot.slane %v12999_v19, 4  ;;  %v6632_v10 = vrot.slane %v6630_v55, 4  ;;  %v11839_v20 = vld [vmem:[%s16673_s3 + $0x68] sm:$0xff]  ;;  %v4365_v5 = vld [vmem:[#allocation2 + $0x44] sm:$0x1] }
 0x162   : > { %v4546_v19 = vrot.slane %v4544_v4, 4  ;;  %9088 = vmatpush.bf16.msra.mxu2 %v11839_v20  ;;  %v4542_v42 = vsel %vm12823_vm14, %v4537_v23, %v4541_v24  ;;  %v6641_v48 = vshrl.u32 %v6418_v31, 16  ;;  %v5580_v56 = vsel %vm12704_vm11, %v10923_v30, %v5579_v34  ;;  %v11837_v4 = vld [vmem:[%s16673_s3 + $0x58] sm:$0xff] }
 0x163   : > { %v1871_v44 = vsel %vm12593_vm3, %v1310_v32, %v1870_v27  ;;  %v1008_v45 = vpack.c.bf16 %v944_v18, %v944_v18  ;;  %v4553_v32 = vshll.u32 %v13047_v15, 16  ;;  %5781 = vrot.lane.b32.xlu1 %v5576_v58, %s12286_s26  ;;  %5286 = vst.msk [vmem:[#allocation3 + $0x58] sm:$0xf] %vm1055_vm1, %v4542_v42  ;;  %v6636_v39 = vshll.u32 %v13065_v37, 16  ;;  %v11838_v58 = vld [vmem:[%s16673_s3 + $0x60] sm:$0xff] }
 0x164   : > { %1872 = vst [vmem:[#allocation2 + $0x6c] sm:$0xf] %v1871_v44  ;;  %v4550_v43 = vor.u32 %v4549_v25, %v4546_v19  ;;  %v6633_v44 = vor.u32 %v6632_v10, %v13043_v9  ;;  %v6644_v35 = vshll.u32 %v6418_v31, 16  ;;  %v4557_v59 = vshrl.u32 %v13047_v15, 16  ;;  %7282 = vrot.lane.b32.xlu2 %v6615_v38, %s12288_s19  ;;  %5783 = vrot.lane.b32.xlu0 %v5580_v56, %s12286_s26  ;;  %v6026_v25 = vld [vmem:[#allocation2 + $0x54] sm:$0xf] }
 0x165   : > { %v1313_v61 = vshrl.u32 %v1008_v45, 16  ;;  %v1316_v13 = vshll.u32 %v1008_v45, 16  ;;  %v5363_v45 = vld [vmem:[#allocation2 + $0x5c] sm:$0x1]  ;;  %v4555_v55 = vrot.slane %v4553_v32, 5  ;;  %v5581_v1 = vrot.slane %v5579_v34, 4 }
 0x166   : > { %v812_v0 = vpop.f32.mrf.mxu0  ;;  %v4551_v63 = vrot.slane %v4550_v43, 4  ;;  %v5582_v2 = vrot.slane %v5363_v45, 5  ;;  %9089 = vmatpush.bf16.msra.mxu2 %v11838_v58  ;;  %v6646_v10 = vrot.slane %v6644_v35, 5  ;;  %v4559_v15 = vrot.slane %v4557_v59, 4  ;;  %v1881_v34 = vld [vmem:[#allocation2 + $0x80] sm:$0x1] }
 0x167   : > { %v1315_v49 = vrot.slane %v1313_v61, 7  ;;  %v813_v52 = vadd.f32 %v12972_v47, %v812_v0  ;;  %v6629_v61 = vsel %vm12823_vm14, %v6624_v3, %v13043_v9  ;;  %v13091_v0 = vrot.slane %v6633_v44, 4  ;;  %v6029_v9 = vld [vmem:[#allocation2 + $0x64] sm:$0xf] }
 0x168   : > { %v4556_v7 = vsel %vm12823_vm14, %v4551_v63, %v4555_v55  ;;  %v4560_v21 = vor.u32 %v4559_v15, %v4555_v55  ;;  %v13117_v42 = vld [vmem:[#allocation2 + $0x64] sm:$0xf]  ;;  %v6638_v58 = vrot.slane %v6636_v39, 5 }
 0x169   : > { %v1318_v16 = vor.u32 %v1316_v13, %v1315_v49  ;;  %v1320_v17 = vrot.slane %v1315_v49, 4  ;;  %v945_v14 = vmax.f32 %v813_v52, 0.0  ;;  %v5760_v18 = vpop.permute.xlu0 %5759  ;;  %v13098_v49 = vld [vmem:[#allocation2 + $0x64] sm:$0xf]  ;;  %v6643_v13 = vrot.slane %v6641_v48, 4  ;;  %v11713_v52 = vld [vmem:[%s12468_s27 + $0x98] sm:$0xff] }
 0x16a   : > { %5951 = vst.msk [vmem:[#allocation3 + $0x4] sm:$0xf] %vm3225_vm15, %v5760_v18  ;;  %10872 = vmatmul.msk.bf16.gmra.mxu1 %vm661_vm0, %v11713_v52  ;;  %v6650_v20 = vshll.u32 %v13098_v49, 16  ;;  %9090 = vmatpush.bf16.msra.mxu2 %v11837_v4  ;;  %v11836_v18 = vld [vmem:[%s16673_s3 + $0x50] sm:$0xff]  ;;  %v4561_v30 = vrot.slane %v4560_v21, 4  ;;  %v11835_v48 = vld [vmem:[%s16673_s3 + $0x48] sm:$0xff] }
 0x16b   : > { %v1319_v26 = vsel %vm12664_vm6, %v1311_v8, %v1318_v16  ;;  %v1875_v27 = vsel %vm12690_vm8, %v1320_v17, %v1874_v6  ;;  %v1009_v28 = vpack.c.bf16 %v945_v14, %v945_v14  ;;  %v4366_v8 = vld [vmem:[#allocation2 + $0x48] sm:$0xf]  ;;  %7284 = vrot.lane.b32.xlu1 %v6629_v61, %s12288_s19  ;;  %v4563_v17 = vshll.u32 %v4365_v5, 16  ;;  %v4367_v14 = vld [vmem:[#allocation2 + $0x4c] sm:$0xf] }
 0x16c   : > { %1873 = vst.msk [vmem:[#allocation2 + $0x70] sm:$0xf] %vm1055_vm1, %v1319_v26  ;;  %v4568_v23 = vshrl.u32 %v4366_v8, 16  ;;  %v4571_v24 = vshll.u32 %v4366_v8, 16  ;;  %v5583_v26 = vsel %vm12704_vm11, %v5581_v1, %v5582_v2  ;;  %v6647_v33 = vor.u32 %v6646_v10, %v6643_v13  ;;  %6164 = vrot.lane.b32.xlu2 %v6026_v25, %s12287_s11  ;;  %6170 = vrot.lane.b32.xlu0 %v6029_v9, %s12287_s11  ;;  %v4368_v1 = vld [vmem:[#allocation2 + $0x50] sm:$0x1] }
 0x16d   : > { %1876 = vst [vmem:[#allocation2 + $0x74] sm:$0x1] %v1875_v27  ;;  %v1322_v40 = vshrl.u32 %v1009_v28, 16  ;;  %v1325_v53 = vshll.u32 %v1009_v28, 16  ;;  %v4565_v44 = vrot.slane %v4563_v17, 5  ;;  %v13119_v45 = vrot.slane %v6650_v20, 5 }
 0x16e   : > { %v814_v50 = vpop.f32.mrf.mxu0  ;;  %5287 = vst.msk [vmem:[#allocation3 + $0x64] sm:$0xf] %vm1055_vm1, %v4556_v7  ;;  %9091 = vmatpush.bf16.msra.mxu2 %v11836_v18  ;;  %v6654_v59 = vshrl.u32 %v13098_v49, 16  ;;  %v5586_v61 = vrot.slane %v13117_v42, 5  ;;  %v6639_v2 = vsel %vm12823_vm14, %v13091_v0, %v6638_v58  ;;  %v6421_v37 = vld [vmem:[#allocation2 + $0x6c] sm:$0xf] }
 0x16f   : > { %v13074_v51 = vrot.slane %v1322_v40, 7  ;;  %v815_v11 = vadd.f32 %v12972_v47, %v814_v50  ;;  %v4577_v40 = vshll.u32 %v4367_v14, 16  ;;  %v4570_v50 = vrot.slane %v4568_v23, 4  ;;  %v11834_v0 = vld [vmem:[%s16673_s3 + $0x40] sm:$0xff]  ;;  %v13151_v8 = vld [vmem:[#allocation2 + $0x68] sm:$0x1] }
 0x170   : > { %v4566_v35 = vsel %vm12823_vm14, %v4561_v30, %v4565_v44  ;;  %v6656_v9 = vrot.slane %v6654_v59, 4  ;;  %v1884_v10 = vld [vmem:[#allocation2 + $0x84] sm:$0xf]  ;;  %v4587_v15 = vshll.u32 %v4368_v1, 16  ;;  %v6665_v17 = vshrl.u32 %v6421_v37, 16 }
 0x171   : > { %v1327_v62 = vor.u32 %v1325_v53, %v13074_v51  ;;  %v946_v60 = vmax.f32 %v815_v11, 0.0  ;;  %v5762_v12 = vpop.permute.xlu0 %5761  ;;  %v1328_v32 = vrot.slane %v13074_v51, 4  ;;  %v4573_v51 = vrot.slane %v4571_v24, 5  ;;  %v5364_v11 = vld [vmem:[#allocation2 + $0x60] sm:$0xe] }
 0x172   : > { %5952 = vst.msk [vmem:[#allocation3 + $0x10] sm:$0xf] %vm3225_vm15, %v5762_v12  ;;  %v4581_v53 = vshrl.u32 %v4367_v14, 16  ;;  %v10924_v4 = vrot.slane %v5364_v11, 9  ;;  %9092 = vmatpush.bf16.msra.mxu2 %v11835_v48  ;;  %v6668_v21 = vshll.u32 %v6421_v37, 16  ;;  %v6660_v24 = vshll.u32 %v13151_v8, 16 }
 0x173   : > { %v1878_v29 = vsel %vm12593_vm3, %v1327_v62, %v1877_v57  ;;  %v1010_v6 = vpack.c.bf16 %v946_v60, %v946_v60  ;;  %5785 = vrot.lane.b32.xlu1 %v5583_v26, %s12286_s26  ;;  %v4579_v62 = vrot.slane %v4577_v40, 5  ;;  %v6648_v60 = vrot.slane %v6647_v33, 4  ;;  %5288 = vst.msk [vmem:[#allocation3 + $0x70] sm:$0xf] %vm1055_vm1, %v4566_v35  ;;  %v13161_v26 = vld [vmem:[#allocation2 + $0x70] sm:$0xf] }
 0x174   : > { %1879 = vst [vmem:[#allocation2 + $0x78] sm:$0xf] %v1878_v29  ;;  %v4574_v5 = vor.u32 %v4573_v51, %v4570_v50  ;;  %v4583_v29 = vrot.slane %v4581_v53, 4  ;;  %v5587_v7 = vsel %vm12704_vm11, %v10924_v4, %v5586_v61  ;;  %7286 = vrot.lane.b32.xlu2 %v6639_v2, %s12288_s19  ;;  %v5588_v33 = vrot.slane %v5586_v61, 4  ;;  %v6031_v44 = vld [vmem:[#allocation2 + $0x70] sm:$0xf] }
 0x175   : > { %v1330_v16 = vshrl.u32 %v1010_v6, 16  ;;  %v1333_v28 = vshll.u32 %v1010_v6, 16  ;;  %v6653_v49 = vsel %vm12823_vm14, %v6648_v60, %v13119_v45  ;;  %5787 = vrot.lane.b32.xlu0 %v5587_v7, %s12286_s26  ;;  %v13156_v23 = vpop.permute.xlu2 %7264  ;;  %v4589_v30 = vrot.slane %v4587_v15, 5  ;;  %v1888_v58 = vld [vmem:[#allocation2 + $0x8c] sm:$0x1] }
 0x176   : > { %v817_v19 = vpop.f32.mrf.mxu0  ;;  %v4584_v12 = vor.u32 %v4583_v29, %v4579_v62  ;;  %v4575_v20 = vrot.slane %v4574_v5, 4  ;;  %9093 = vmatpush.bf16.msra.mxu2 %v11834_v0  ;;  %v6657_v40 = vor.u32 %v6656_v9, %v13119_v45  ;;  %v6667_v42 = vrot.slane %v6665_v17, 4  ;;  %v5367_v29 = vld [vmem:[#allocation2 + $0x6c] sm:$0xe] }
 0x177   : > { %v1332_v27 = vrot.slane %v1330_v16, 7  ;;  %v818_v31 = vadd.f32 %v12972_v47, %v817_v19  ;;  %v5366_v19 = vld [vmem:[#allocation2 + $0x68] sm:$0x1]  ;;  %v6670_v48 = vrot.slane %v6668_v21, 5  ;;  %v6674_v35 = vshll.u32 %v13161_v26, 16 }
 0x178   : > { %v4585_v18 = vrot.slane %v4584_v12, 4  ;;  %v5589_v45 = vrot.slane %v5366_v19, 5  ;;  %v6658_v37 = vrot.slane %v6657_v40, 4  ;;  %v6678_v7 = vshrl.u32 %v13161_v26, 16  ;;  %v13198_v19 = vld [vmem:[#allocation2 + $0x74] sm:$0x1] }
 0x179   : > { %v1335_v43 = vor.u32 %v1333_v28, %v1332_v27  ;;  %v1337_v38 = vrot.slane %v1332_v27, 4  ;;  %v947_v3 = vmax.f32 %v818_v31, 0.0  ;;  %v11714_v28 = vld [vmem:[%s12468_s27 + $0xa0] sm:$0xff]  ;;  %v4580_v31 = vsel %vm12823_vm14, %v4575_v20, %v4579_v62 }
 0x17a   : > { %10873 = vmatmul.msk.bf16.gmra.mxu1 %vm661_vm0, %v11714_v28  ;;  %5289 = vst.msk [vmem:[#allocation3 + $0x7c] sm:$0xf] %vm1055_vm1, %v4580_v31  ;;  %v4590_v51 = vsel %vm12823_vm14, %v4585_v18, %v4589_v30  ;;  %v6671_v5 = vor.u32 %v6670_v48, %v6667_v42  ;;  %v6662_v12 = vrot.slane %v6660_v24, 5  ;;  %v13196_v15 = vrot.slane %v6674_v35, 5  ;;  %v1891_v18 = vld [vmem:[#allocation2 + $0x90] sm:$0xf] }
 0x17b   : > { %v1336_v55 = vsel %vm12664_vm6, %v1328_v32, %v1335_v43  ;;  %v1882_v56 = vsel %vm12690_vm8, %v1337_v38, %v1881_v34  ;;  %v1011_v57 = vpack.c.bf16 %v947_v3, %v947_v3  ;;  %v4369_v32 = vld [vmem:[#allocation2 + $0x54] sm:$0xf]  ;;  %7288 = vrot.lane.b32.xlu1 %v6653_v49, %s12288_s19  ;;  %v11843_v34 = vld [vmem:[%s16673_s3 + $0x88] sm:$0xff]  ;;  %v13173_v38 = vld [vmem:[#allocation2 + $0x58] sm:$0xf]  ;;  %v6684_v48 = vshll.u32 %v13198_v19, 16 }
 0x17c   : > { %1880 = vst.msk [vmem:[#allocation2 + $0x7c] sm:$0xf] %vm1055_vm1, %v1336_v55  ;;  %v6028_v3 = vld [vmem:[#allocation2 + $0x60] sm:$0xf]  ;;  %9261 = vmatpush.bf16.msrb.mxu2 %v11843_v34  ;;  %v4592_v53 = vshrl.u32 %v4369_v32, 16  ;;  %v4595_v11 = vshll.u32 %v4369_v32, 16  ;;  %12078 = vmatpush.bf16.msra.mxu3 %v11843_v34  ;;  %v6663_v26 = vsel %vm12823_vm14, %v6658_v37, %v6662_v12 }
 0x17d   : > { %1883 = vst [vmem:[#allocation2 + $0x80] sm:$0x1] %v1882_v56  ;;  %v1339_v63 = vshrl.u32 %v1011_v57, 16  ;;  %v1342_v6 = vshll.u32 %v1011_v57, 16  ;;  %v4601_v62 = vshll.u32 %v13173_v38, 16  ;;  %6168 = vrot.lane.b32.xlu2 %v6028_v3, %s12287_s11  ;;  %6174 = vrot.lane.b32.xlu0 %v6031_v44, %s12287_s11  ;;  %v13186_v49 = vpop.permute.xlu2 %7266  ;;  %v6672_v20 = vrot.slane %v6671_v5, 4 }
 0x17e   : > { %v819_v39 = vpop.f32.mrf.mxu0  ;;  %5290 = vst.msk [vmem:[#allocation3 + $0x88] sm:$0xf] %vm1055_vm1, %v4590_v51  ;;  %v4594_v59 = vrot.slane %v4592_v53, 4  ;;  %v4597_v61 = vrot.slane %v4595_v11, 5  ;;  %v6424_v31 = vld [vmem:[#allocation2 + $0x78] sm:$0xf]  ;;  %v5764_v11 = vpop.permute.xlu0 %5763 }
 0x17f   : > { %v13143_v13 = vrot.slane %v1339_v63, 7  ;;  %v820_v52 = vadd.f32 %v12972_v47, %v819_v39  ;;  %v5368_v63 = vld [vmem:[#allocation2 + $0x70] sm:$0xf]  ;;  %v5590_v39 = vsel %vm12704_vm11, %v5588_v33, %v5589_v45  ;;  %v4603_v9 = vrot.slane %v4601_v62, 5  ;;  %5953 = vst.msk [vmem:[#allocation3 + $0x1c] sm:$0xf] %vm3225_vm15, %v5764_v11 }
 0x180   : > { %v4598_v0 = vor.u32 %v4597_v61, %v4594_v59  ;;  %v5593_v8 = vrot.slane %v5368_v63, 5  ;;  %v6680_v34 = vrot.slane %v6678_v7, 4  ;;  %v6677_v42 = vsel %vm12823_vm14, %v6672_v20, %v13196_v15  ;;  %v1895_v12 = vld [vmem:[#allocation2 + $0x98] sm:$0x1] }
 0x181   : > { %v1344_v16 = vor.u32 %v1342_v6, %v13143_v13  ;;  %v948_v14 = vmax.f32 %v820_v52, 0.0  ;;  %v1345_v60 = vrot.slane %v13143_v13, 4  ;;  %v6692_v51 = vshll.u32 %v6424_v31, 16 }
 0x182   : > { %v5595_v45 = vrot.slane %v5593_v8, 4  ;;  %v6681_v59 = vor.u32 %v6680_v34, %v13196_v15 }
 0x183   : > { %v1885_v25 = vsel %vm12593_vm3, %v1344_v16, %v1884_v10  ;;  %v1012_v27 = vpack.c.bf16 %v948_v14, %v948_v14  ;;  %5789 = vrot.lane.b32.xlu1 %v5590_v39, %s12286_s26  ;;  %v4605_v10 = vshrl.u32 %v13173_v38, 16  ;;  %v10925_v16 = vrot.slane %v5367_v29, 9  ;;  %v6145_v14 = vpop.permute.xlu1 %6144  ;;  %v13218_v38 = vld [vmem:[#allocation2 + $0x7c] sm:$0xf] }
 0x184   : > { %1886 = vst [vmem:[#allocation2 + $0x84] sm:$0xf] %v1885_v25  ;;  %v4599_v25 = vrot.slane %v4598_v0, 4  ;;  %v6033_v62 = vld [vmem:[#allocation2 + $0x7c] sm:$0xf]  ;;  %v6702_v63 = vshrl.u32 %v13218_v38, 16 }
 0x185   : > { %v1347_v43 = vshrl.u32 %v1012_v27, 16  ;;  %v1350_v56 = vshll.u32 %v1012_v27, 16  ;;  %v4371_v27 = vld [vmem:[#allocation2 + $0x5c] sm:$0x1]  ;;  %6336 = vst.msk [vmem:[#allocation3 + $0x4] sm:$0xf] %vm3901_vm2, %v6145_v14  ;;  %v5594_v33 = vsel %vm12704_vm11, %v10925_v16, %v5593_v8  ;;  %7290 = vrot.lane.b32.xlu2 %v6663_v26, %s12288_s19  ;;  %v6149_v53 = vpop.permute.xlu2 %6148 }
 0x186   : > { %v822_v50 = vpop.f32.mrf.mxu0  ;;  %7456 = vst.msk [vmem:[#allocation3 + $0x4] sm:$0xf] %vm4286_vm4, %v13156_v23  ;;  %v4604_v30 = vsel %vm12823_vm14, %v4599_v25, %v4603_v9  ;;  %v4607_v40 = vrot.slane %v4605_v10, 4  ;;  %5791 = vrot.lane.b32.xlu0 %v5594_v33, %s12286_s26  ;;  %v4611_v44 = vshll.u32 %v4371_v27, 16  ;;  %v6694_v5 = vrot.slane %v6692_v51, 5 }
 0x187   : > { %v1349_v55 = vrot.slane %v1347_v43, 7  ;;  %v823_v57 = vadd.f32 %v12972_v47, %v822_v50  ;;  %v5369_v43 = vld [vmem:[#allocation2 + $0x74] sm:$0x1]  ;;  %v6689_v50 = vshrl.u32 %v6424_v31, 16  ;;  %5291 = vst.msk [vmem:[#allocation3 + $0x94] sm:$0xf] %vm1055_vm1, %v4604_v30 }
 0x188   : > { %v4608_v35 = vor.u32 %v4607_v40, %v4603_v9  ;;  %v5596_v61 = vrot.slane %v5369_v43, 5  ;;  %6338 = vst.msk [vmem:[#allocation3 + $0x1c] sm:$0xf] %vm3901_vm2, %v6149_v53  ;;  %v5370_v10 = vld [vmem:[#allocation2 + $0x78] sm:$0xe]  ;;  %v6682_v19 = vrot.slane %v6681_v59, 4 }
 0x189   : > { %v1352_v1 = vor.u32 %v1350_v56, %v1349_v55  ;;  %v1354_v2 = vrot.slane %v1349_v55, 4  ;;  %v949_v4 = vmax.f32 %v823_v57, 0.0  ;;  %v11715_v57 = vld [vmem:[%s12468_s27 + $0xa8] sm:$0xff]  ;;  %v6691_v39 = vrot.slane %v6689_v50, 4 }
 0x18a   : > { %10874 = vmatmul.msk.bf16.gmra.mxu1 %vm661_vm0, %v11715_v57  ;;  %v13241_v16 = vld [vmem:[#allocation2 + $0x7c] sm:$0xf]  ;;  %v10926_v43 = vrot.slane %v5370_v10, 9 }
 0x18b   : > { %v1353_v6 = vsel %vm12664_vm6, %v1345_v60, %v1352_v1  ;;  %v1889_v52 = vsel %vm12690_vm8, %v1354_v2, %v1888_v58  ;;  %v1013_v13 = vpack.c.bf16 %v949_v4, %v949_v4  ;;  %v4372_v58 = vld [vmem:[#allocation2 + $0x60] sm:$0xf]  ;;  %7292 = vrot.lane.b32.xlu1 %v6677_v42, %s12288_s19  ;;  %v6698_v60 = vshll.u32 %v13218_v38, 16  ;;  %v6147_v37 = vpop.permute.xlu1 %6146  ;;  %v6427_v53 = vld [vmem:[#allocation2 + $0x84] sm:$0xf] }
 0x18c   : > { %1887 = vst.msk [vmem:[#allocation2 + $0x88] sm:$0xf] %vm1055_vm1, %v1353_v6  ;;  %v4609_v2 = vrot.slane %v4608_v35, 4  ;;  %v4613_v4 = vrot.slane %v4611_v44, 5  ;;  %v4619_v9 = vshll.u32 %v4372_v58, 16  ;;  %v6695_v25 = vor.u32 %v6694_v5, %v6691_v39 }
 0x18d   : > { %1890 = vst [vmem:[#allocation2 + $0x8c] sm:$0x1] %v1889_v52  ;;  %v1356_v17 = vshrl.u32 %v1013_v13, 16  ;;  %v1359_v24 = vshll.u32 %v1013_v13, 16  ;;  %v4616_v52 = vshrl.u32 %v4372_v58, 16  ;;  %v7271_v26 = vpop.permute.xlu2 %7270  ;;  %v6700_v30 = vrot.slane %v6698_v60, 5 }
 0x18e   : > { %v824_v21 = vpop.f32.mrf.mxu0  ;;  %6337 = vst.msk [vmem:[#allocation3 + $0x10] sm:$0xf] %vm3901_vm2, %v6147_v37  ;;  %v6030_v13 = vld [vmem:[#allocation2 + $0x6c] sm:$0xf]  ;;  %v4614_v8 = vsel %vm12823_vm14, %v4609_v2, %v4613_v4  ;;  %6178 = vrot.lane.b32.xlu0 %v6033_v62, %s12287_s11  ;;  %v4621_v34 = vrot.slane %v4619_v9, 5  ;;  %v5600_v40 = vrot.slane %v13241_v16, 5 }
 0x18f   : > { %v13203_v28 = vrot.slane %v1356_v17, 7  ;;  %v825_v32 = vadd.f32 %v12972_v47, %v824_v21  ;;  %7457 = vst.msk [vmem:[#allocation3 + $0x10] sm:$0xf] %vm4286_vm4, %v13186_v49  ;;  %6172 = vrot.lane.b32.xlu2 %v6030_v13, %s12287_s11  ;;  %v5597_v21 = vsel %vm12704_vm11, %v5595_v45, %v5596_v61  ;;  %v13246_v49 = vld [vmem:[#allocation2 + $0x64] sm:$0xf]  ;;  %v4618_v27 = vrot.slane %v4616_v52, 4 }
 0x190   : > { %5292 = vst.msk [vmem:[#allocation3 + $0xa0] sm:$0xf] %vm1055_vm1, %v4614_v8  ;;  %v6704_v42 = vrot.slane %v6702_v63, 4  ;;  %v4625_v38 = vshll.u32 %v13246_v49, 16  ;;  %v11730_v50 = vld [vmem:[#allocation3 + $0x4] sm:$0xf]  ;;  %v5601_v61 = vsel %vm12704_vm11, %v10926_v43, %v5600_v40 }
 0x191   : > { %v1361_v23 = vor.u32 %v1359_v24, %v13203_v28  ;;  %v950_v3 = vmax.f32 %v825_v32, 0.0  ;;  %v1362_v15 = vrot.slane %v13203_v28, 4  ;;  %v6151_v24 = vpop.permute.xlu0 %6150  ;;  %v6426_v32 = vld [vmem:[#allocation2 + $0x80] sm:$0x1]  ;;  %v6696_v51 = vrot.slane %v6695_v25, 4 }
 0x192   : > { %v4622_v35 = vor.u32 %v4621_v34, %v4618_v27  ;;  %v6705_v62 = vor.u32 %v6704_v42, %v6700_v30  ;;  %v1898_v60 = vld [vmem:[#allocation2 + $0x9c] sm:$0xf]  ;;  %v4627_v2 = vrot.slane %v4625_v38, 5  ;;  %v4629_v4 = vshrl.u32 %v13246_v49, 16  ;;  %v5372_v52 = vld [vmem:[#allocation2 + $0x80] sm:$0x1] }
 0x193   : > { %v1892_v55 = vsel %vm12593_vm3, %v1361_v23, %v1891_v18  ;;  %v1014_v56 = vpack.c.bf16 %v950_v3, %v950_v3  ;;  %v6686_v18 = vrot.slane %v6684_v48, 5  ;;  %5793 = vrot.lane.b32.xlu1 %v5597_v21, %s12286_s26  ;;  %v5766_v3 = vpop.permute.xlu1 %5765  ;;  %v6708_v48 = vshll.u32 %v6426_v32, 16  ;;  %v11716_v8 = vld [vmem:[%s12468_s27 + $0xb0] sm:$0xff]  ;;  %v13291_v42 = vld [vmem:[#allocation2 + $0x88] sm:$0xf] }
 0x194   : > { %1893 = vst [vmem:[#allocation2 + $0x90] sm:$0xf] %v1892_v55  ;;  %v6701_v59 = vsel %vm12823_vm14, %v6696_v51, %v6700_v30  ;;  %v6713_v39 = vshrl.u32 %v6427_v53, 16  ;;  %v6716_v5 = vshll.u32 %v6427_v53, 16  ;;  %v4623_v9 = vrot.slane %v4622_v35, 4 }
 0x195   : > { %v1364_v1 = vshrl.u32 %v1014_v56, 16  ;;  %v1367_v29 = vshll.u32 %v1014_v56, 16  ;;  %v6687_v44 = vsel %vm12823_vm14, %v6682_v19, %v6686_v18  ;;  %5954 = vst.msk [vmem:[#allocation3 + $0x28] sm:$0xf] %vm3225_vm15, %v5766_v3  ;;  %v13272_v37 = vrot.slane %v6708_v48, 5 }
 0x196   : > { %v827_v6 = vpop.f32.mrf.mxu0  ;;  %v10985_v45 = vld [vmem:[#allocation3 + $0xc] sm:$0xf0]  ;;  %6339 = vst.msk [vmem:[#allocation3 + $0x28] sm:$0xf] %vm3901_vm2, %v6151_v24  ;;  %5795 = vrot.lane.b32.xlu0 %v5601_v61, %s12286_s26  ;;  %v13279_v10 = vrot.slane %v6705_v62, 4  ;;  %v5603_v25 = vrot.slane %v5372_v52, 5 }
 0x197   : > { %v1366_v0 = vrot.slane %v1364_v1, 7  ;;  %v828_v7 = vadd.f32 %v12972_v47, %v827_v6  ;;  %v10988_v58 = vor.u32 %v11730_v50, %v10985_v45  ;;  %7294 = vrot.lane.b32.xlu2 %v6687_v44, %s12288_s19  ;;  %7459 = vst.msk [vmem:[#allocation3 + $0x28] sm:$0xf] %vm4286_vm4, %v7271_v26  ;;  %v6032_v19 = vld [vmem:[#allocation2 + $0x78] sm:$0xf]  ;;  %v6715_v49 = vrot.slane %v6713_v39, 4 }
 0x198   : > { %v6718_v27 = vrot.slane %v6716_v5, 5  ;;  %v5373_v34 = vld [vmem:[#allocation2 + $0x84] sm:$0xe]  ;;  %v1902_v18 = vld [vmem:[#allocation2 + $0xa4] sm:$0x1] }
 0x199   : > { %v1369_v17 = vor.u32 %v1367_v29, %v1366_v0  ;;  %v1371_v14 = vrot.slane %v1366_v0, 4  ;;  %v951_v20 = vmax.f32 %v828_v7, 0.0  ;;  %9094 = vmatmul.bf16.vlgmr.msra.gmra.mxu2 %v10988_v58  ;;  %v6153_v29 = vpop.permute.xlu2 %6152  ;;  %v5768_v6 = vpop.permute.xlu0 %5767  ;;  %v6428_v0 = vld [vmem:[#allocation2 + $0x88] sm:$0xf] }
 0x19a   : > { %5955 = vst.msk [vmem:[#allocation3 + $0x34] sm:$0xf] %vm3225_vm15, %v5768_v6  ;;  %10875 = vmatmul.msk.bf16.gmra.mxu1 %vm661_vm0, %v11716_v8  ;;  %v6722_v26 = vshll.u32 %v6428_v0, 16  ;;  %v6726_v24 = vshrl.u32 %v6428_v0, 16  ;;  %v6719_v44 = vor.u32 %v6718_v27, %v6715_v49  ;;  %v5375_v27 = vld [vmem:[#allocation2 + $0x8c] sm:$0x1] }
 0x19b   : > { %v1370_v28 = vsel %vm12664_vm6, %v1362_v15, %v1369_v17  ;;  %v1896_v31 = vsel %vm12690_vm8, %v1371_v14, %v1895_v12  ;;  %v1015_v33 = vpack.c.bf16 %v951_v20, %v951_v20  ;;  %7296 = vrot.lane.b32.xlu1 %v6701_v59, %s12288_s19  ;;  %v5602_v12 = vrot.slane %v5600_v40, 4  ;;  %v6035_v15 = vld [vmem:[#allocation2 + $0x88] sm:$0xf]  ;;  %6340 = vst.msk [vmem:[#allocation3 + $0x34] sm:$0xf] %vm3901_vm2, %v6153_v29  ;;  %v7269_v21 = vpop.permute.xlu1 %7268 }
 0x19c   : > { %1894 = vst.msk [vmem:[#allocation2 + $0x94] sm:$0xf] %vm1055_vm1, %v1370_v28  ;;  %v4628_v17 = vsel %vm12823_vm14, %v4623_v9, %v4627_v2  ;;  %v4374_v14 = vld [vmem:[#allocation2 + $0x68] sm:$0x1]  ;;  %v4631_v20 = vrot.slane %v4629_v4, 4  ;;  %v13295_v50 = vrot.slane %v6722_v26, 5 }
 0x19d   : > { %1897 = vst [vmem:[#allocation2 + $0x98] sm:$0x1] %v1896_v31  ;;  %v1373_v23 = vshrl.u32 %v1015_v33, 16  ;;  %v1376_v56 = vshll.u32 %v1015_v33, 16  ;;  %v4635_v38 = vshll.u32 %v4374_v14, 16  ;;  %v5604_v3 = vsel %vm12704_vm11, %v5602_v12, %v5603_v25 }
 0x19e   : > { %v829_v11 = vpop.f32.mrf.mxu0  ;;  %7458 = vst.msk [vmem:[#allocation3 + $0x1c] sm:$0xf] %vm4286_vm4, %v7269_v21  ;;  %v4632_v33 = vor.u32 %v4631_v20, %v4627_v2  ;;  %6182 = vrot.lane.b32.xlu0 %v6035_v15, %s12287_s11  ;;  %v6728_v35 = vrot.slane %v6726_v24, 4  ;;  %v6430_v59 = vld [vmem:[#allocation2 + $0x90] sm:$0xf]  ;;  %v6720_v39 = vrot.slane %v6719_v44, 4 }
 0x19f   : > { %v13259_v55 = vrot.slane %v1373_v23, 7  ;;  %v830_v57 = vadd.f32 %v12972_v47, %v829_v11  ;;  %5293 = vst.msk [vmem:[#allocation3 + $0xac] sm:$0xf] %vm1055_vm1, %v4628_v17  ;;  %6176 = vrot.lane.b32.xlu2 %v6032_v19, %s12287_s11  ;;  %v10927_v11 = vrot.slane %v5373_v34, 9  ;;  %v4637_v62 = vrot.slane %v4635_v38, 5  ;;  %v11717_v34 = vld [vmem:[%s12468_s27 + $0xb8] sm:$0xff] }
 0x1a0   : > { %v10997_v4 = vld [vmem:[#allocation3 + $0x24] sm:$0xf0]  ;;  %v6737_v6 = vshrl.u32 %v6430_v59, 16  ;;  %v6740_v52 = vshll.u32 %v6430_v59, 16  ;;  %v13319_v9 = vld [vmem:[%s16676_s6] ss:$0 sm:$0xff]  ;;  %v6725_v12 = vsel %vm12823_vm14, %v6720_v39, %v13295_v50  ;;  %v6729_v14 = vor.u32 %v6728_v35, %v13295_v50 }
 0x1a1   : > { %v1378_v63 = vor.u32 %v1376_v56, %v13259_v55  ;;  %v952_v1 = vmax.f32 %v830_v57, 0.0  ;;  %v1379_v40 = vrot.slane %v13259_v55, 4  ;;  %v7275_v48 = vpop.permute.xlu2 %7274  ;;  %v6155_v53 = vpop.permute.xlu0 %6154  ;;  %v4633_v56 = vrot.slane %v4632_v33, 4  ;;  %v1905_v15 = vld [vmem:[#allocation2 + $0xa8] sm:$0xf] }
 0x1a2   : > { %v5607_v57 = vrot.slane %v13291_v42, 5  ;;  %v6739_v26 = vrot.slane %v6737_v6, 4  ;;  %v6742_v24 = vrot.slane %v6740_v52, 5 }
 0x1a3   : > { %v1899_v13 = vsel %vm12593_vm3, %v1378_v63, %v1898_v60  ;;  %v1016_v7 = vpack.c.bf16 %v952_v1, %v952_v1  ;;  %5797 = vrot.lane.b32.xlu1 %v5604_v3, %s12286_s26  ;;  %v4375_v60 = vld [vmem:[#allocation2 + $0x6c] sm:$0xf]  ;;  %v6711_v63 = vsel %vm12823_vm14, %v13279_v10, %v13272_v37  ;;  %v5770_v1 = vpop.permute.xlu1 %5769  ;;  %v4638_v0 = vsel %vm12823_vm14, %v4633_v56, %v4637_v62  ;;  %v6431_v19 = vld [vmem:[#allocation2 + $0x94] sm:$0xf]  ;;  %v1909_v62 = vld [vmem:[#allocation2 + $0xb0] sm:$0x1] }
 0x1a4   : > { %1900 = vst [vmem:[#allocation2 + $0x9c] sm:$0xf] %v1899_v13  ;;  %v4643_v17 = vshll.u32 %v4375_v60, 16  ;;  %v13339_v3 = vrot.slane %v6729_v14, 4  ;;  %v13341_v44 = vld [vmem:[#allocation2 + $0x94] sm:$0xf] }
 0x1a5   : > { %v1381_v16 = vshrl.u32 %v1016_v7, 16  ;;  %v1384_v31 = vshll.u32 %v1016_v7, 16  ;;  %v11733_v2 = vld [vmem:[#allocation3 + $0x1c] sm:$0xf]  ;;  %5956 = vst.msk [vmem:[#allocation3 + $0x40] sm:$0xf] %vm3225_vm15, %v5770_v1  ;;  %v5608_v7 = vsel %vm12704_vm11, %v10927_v11, %v5607_v57 }
 0x1a6   : > { %v832_v32 = vpop.f32.mrf.mxu0  ;;  %v11000_v29 = vor.u32 %v11733_v2, %v10997_v4  ;;  %6341 = vst.msk [vmem:[#allocation3 + $0x40] sm:$0xf] %vm3901_vm2, %v6155_v53  ;;  %5799 = vrot.lane.b32.xlu0 %v5608_v7, %s12286_s26  ;;  %v6432_v4 = vld [vmem:[#allocation2 + $0x98] sm:$0x1]  ;;  %v4377_v7 = vld [vmem:[#allocation2 + $0x74] sm:$0x1] }
 0x1a7   : > { %v1383_v28 = vrot.slane %v1381_v16, 7  ;;  %v833_v30 = vadd.f32 %v12972_v47, %v832_v32  ;;  %v6429_v47 = vld [vmem:[#allocation2 + $0x8c] sm:$0x1]  ;;  %7298 = vrot.lane.b32.xlu2 %v6711_v63, %s12288_s19  ;;  %7461 = vst.msk [vmem:[#allocation3 + $0x40] sm:$0xf] %vm4286_vm4, %v7275_v48  ;;  %v4640_v16 = vshrl.u32 %v4375_v60, 16 }
 0x1a8   : > { %v6732_v61 = vshll.u32 %v6429_v47, 16  ;;  %5294 = vst.msk [vmem:[#allocation3 + $0xb8] sm:$0xf] %vm1055_vm1, %v4638_v0  ;;  %v5610_v47 = vrot.slane %v5375_v27, 5  ;;  %v6750_v48 = vshrl.u32 %v6431_v19, 16  ;;  %v6756_v14 = vshll.u32 %v6432_v4, 16 }
 0x1a9   : > { %v1386_v43 = vor.u32 %v1384_v31, %v1383_v28  ;;  %v1388_v23 = vrot.slane %v1383_v28, 4  ;;  %v953_v51 = vmax.f32 %v833_v30, 0.0  ;;  %9099 = vmatmul.bf16.gmra.mxu2 %v11000_v29  ;;  %v6157_v25 = vpop.permute.xlu2 %6156  ;;  %v5772_v49 = vpop.permute.xlu0 %5771  ;;  %v6037_v31 = vld [vmem:[#allocation2 + $0x94] sm:$0xf]  ;;  %v5609_v30 = vrot.slane %v5607_v57, 4 }
 0x1aa   : > { %5957 = vst.msk [vmem:[#allocation3 + $0x4c] sm:$0xf] %vm3225_vm15, %v5772_v49  ;;  %v13333_v28 = vrot.slane %v6732_v61, 5  ;;  %v4642_v42 = vrot.slane %v4640_v16, 4  ;;  %10876 = vmatmul.msk.bf16.gmra.mxu1 %vm661_vm0, %v11717_v34  ;;  %v5614_v61 = vrot.slane %v13341_v44, 5 }
 0x1ab   : > { %v1387_v45 = vsel %vm12664_vm6, %v1379_v40, %v1386_v43  ;;  %v1903_v55 = vsel %vm12690_vm8, %v1388_v23, %v1902_v18  ;;  %v1017_v58 = vpack.c.bf16 %v953_v51, %v953_v51  ;;  %7300 = vrot.lane.b32.xlu1 %v6725_v12, %s12288_s19  ;;  %v4376_v18 = vld [vmem:[#allocation2 + $0x70] sm:$0xf]  ;;  %6342 = vst.msk [vmem:[#allocation3 + $0x4c] sm:$0xf] %vm3901_vm2, %v6157_v25  ;;  %v6746_v40 = vshll.u32 %v6431_v19, 16  ;;  %v7273_v38 = vpop.permute.xlu1 %7272 }
 0x1ac   : > { %1901 = vst.msk [vmem:[#allocation2 + $0xa0] sm:$0xf] %vm1055_vm1, %v1387_v45  ;;  %v4645_v43 = vrot.slane %v4643_v17, 5  ;;  %v6034_v23 = vld [vmem:[#allocation2 + $0x84] sm:$0xf]  ;;  %v6743_v51 = vor.u32 %v6742_v24, %v6739_v26  ;;  %v4649_v11 = vshll.u32 %v4376_v18, 16  ;;  %v6735_v19 = vsel %vm12823_vm14, %v13339_v3, %v13333_v28 }
 0x1ad   : > { %1904 = vst [vmem:[#allocation2 + $0xa4] sm:$0x1] %v1903_v55  ;;  %v1390_v5 = vshrl.u32 %v1017_v58, 16  ;;  %v1393_v8 = vshll.u32 %v1017_v58, 16  ;;  %v5376_v45 = vld [vmem:[#allocation2 + $0x90] sm:$0xe]  ;;  %v5611_v58 = vsel %vm12704_vm11, %v5609_v30, %v5610_v47 }
 0x1ae   : > { %v834_v13 = vpop.f32.mrf.mxu0  ;;  %7460 = vst.msk [vmem:[#allocation3 + $0x34] sm:$0xf] %vm4286_vm4, %v7273_v38  ;;  %v4653_v35 = vshrl.u32 %v4376_v18, 16  ;;  %6186 = vrot.lane.b32.xlu0 %v6037_v31, %s12287_s11  ;;  %v13350_v59 = vrot.slane %v6746_v40, 5  ;;  %v4646_v60 = vor.u32 %v4645_v43, %v4642_v42  ;;  %v6744_v6 = vrot.slane %v6743_v51, 4 }
 0x1af   : > { %v13314_v37 = vrot.slane %v1390_v5, 7  ;;  %v835_v10 = vadd.f32 %v13319_v9, %v834_v13  ;;  %6180 = vrot.lane.b32.xlu2 %v6034_v23, %s12287_s11  ;;  %v10928_v52 = vrot.slane %v5376_v45, 9  ;;  %v13354_v13 = vrot.slane %v6750_v48, 4  ;;  %v6433_v12 = vld [vmem:[#allocation2 + $0x9c] sm:$0xf] }
 0x1b0   : > { %v4651_v0 = vrot.slane %v4649_v11, 5  ;;  %v13361_v16 = vld [vmem:[#allocation2 + $0x78] sm:$0xf]  ;;  %v11009_v17 = vld [vmem:[#allocation3 + $0x3c] sm:$0xf0]  ;;  %v4659_v26 = vshll.u32 %v4377_v7, 16  ;;  %v6749_v43 = vsel %vm12823_vm14, %v6744_v6, %v13350_v59 }
 0x1b1   : > { %v1395_v20 = vor.u32 %v1393_v8, %v13314_v37  ;;  %v954_v21 = vmax.f32 %v835_v10, 0.0  ;;  %v1396_v63 = vrot.slane %v13314_v37, 4  ;;  %v7279_v5 = vpop.permute.xlu2 %7278  ;;  %v6159_v29 = vpop.permute.xlu0 %6158  ;;  %v5615_v49 = vsel %vm12704_vm11, %v10928_v52, %v5614_v61  ;;  %v5378_v28 = vld [vmem:[#allocation2 + $0x98] sm:$0x1]  ;;  %v1912_v23 = vld [vmem:[#allocation2 + $0xb4] sm:$0xf] }
 0x1b2   : > { %v6761_v31 = vshrl.u32 %v6433_v12, 16  ;;  %v4664_v38 = vshrl.u32 %v13361_v16, 16  ;;  %v6753_v3 = vor.u32 %v13354_v13, %v13350_v59  ;;  %v5616_v11 = vrot.slane %v5614_v61, 4  ;;  %v6036_v4 = vld [vmem:[#allocation2 + $0x90] sm:$0xf] }
 0x1b3   : > { %v1906_v32 = vsel %vm12593_vm3, %v1395_v20, %v1905_v15  ;;  %v1018_v33 = vpack.c.bf16 %v954_v21, %v954_v21  ;;  %5801 = vrot.lane.b32.xlu1 %v5611_v58, %s12286_s26  ;;  %v4655_v15 = vrot.slane %v4653_v35, 4  ;;  %v4647_v20 = vrot.slane %v4646_v60, 4  ;;  %v5774_v21 = vpop.permute.xlu1 %5773  ;;  %v4379_v60 = vld [vmem:[#allocation2 + $0x7c] sm:$0xf] }
 0x1b4   : > { %1907 = vst [vmem:[#allocation2 + $0xa8] sm:$0xf] %v1906_v32  ;;  %v6764_v32 = vshll.u32 %v6433_v12, 16  ;;  %v6763_v45 = vrot.slane %v6761_v31, 4  ;;  %v4666_v61 = vrot.slane %v4664_v38, 4 }
 0x1b5   : > { %v1398_v50 = vshrl.u32 %v1018_v33, 16  ;;  %v1401_v56 = vshll.u32 %v1018_v33, 16  ;;  %v11736_v25 = vld [vmem:[#allocation3 + $0x34] sm:$0xf]  ;;  %5958 = vst.msk [vmem:[#allocation3 + $0x58] sm:$0xf] %vm3225_vm15, %v5774_v21  ;;  %v4652_v34 = vsel %vm12823_vm14, %v4647_v20, %v4651_v0  ;;  %v4656_v42 = vor.u32 %v4655_v15, %v4651_v0 }
 0x1b6   : > { %v837_v53 = vpop.f32.mrf.mxu0  ;;  %v11012_v24 = vor.u32 %v11736_v25, %v11009_v17  ;;  %6343 = vst.msk [vmem:[#allocation3 + $0x58] sm:$0xf] %vm3901_vm2, %v6159_v29  ;;  %5803 = vrot.lane.b32.xlu0 %v5615_v49, %s12286_s26  ;;  %v6766_v58 = vrot.slane %v6764_v32, 5  ;;  %v5379_v13 = vld [vmem:[#allocation2 + $0x9c] sm:$0xe]  ;;  %v4677_v21 = vshrl.u32 %v4379_v60, 16 }
 0x1b7   : > { %v1400_v55 = vrot.slane %v1398_v50, 7  ;;  %v838_v57 = vadd.f32 %v13319_v9, %v837_v53  ;;  %7302 = vrot.lane.b32.xlu2 %v6735_v19, %s12288_s19  ;;  %7463 = vst.msk [vmem:[#allocation3 + $0x58] sm:$0xf] %vm4286_vm4, %v7279_v5  ;;  %v6434_v50 = vld [vmem:[#allocation2 + $0xa0] sm:$0xf]  ;;  %v13388_v53 = vrot.slane %v6756_v14, 5 }
 0x1b8   : > { %5295 = vst.msk [vmem:[#allocation3 + $0xc4] sm:$0xf] %vm1055_vm1, %v4652_v34  ;;  %v13397_v5 = vrot.slane %v6753_v3, 4  ;;  %v6774_v29 = vshrl.u32 %v6434_v50, 16  ;;  %v1916_v20 = vld [vmem:[#allocation2 + $0xbc] sm:$0x1] }
 0x1b9   : > { %v1403_v1 = vor.u32 %v1401_v56, %v1400_v55  ;;  %v1405_v2 = vrot.slane %v1400_v55, 4  ;;  %v955_v39 = vmax.f32 %v838_v57, 0.0  ;;  %9104 = vmatmul.bf16.gmra.mxu2 %v11012_v24  ;;  %v6161_v51 = vpop.permute.xlu2 %6160  ;;  %v5776_v48 = vpop.permute.xlu0 %5775  ;;  %v11718_v55 = vld [vmem:[%s12468_s27 + $0xc0] sm:$0xff]  ;;  %v4661_v56 = vrot.slane %v4659_v26, 5  ;;  %v6039_v57 = vld [vmem:[#allocation2 + $0xa0] sm:$0xf] }
 0x1ba   : > { %5959 = vst.msk [vmem:[#allocation3 + $0x64] sm:$0xf] %vm3225_vm15, %v5776_v48  ;;  %10877 = vmatmul.msk.bf16.gmra.mxu1 %vm661_vm0, %v11718_v55  ;;  %v10929_v32 = vrot.slane %v5379_v13, 9  ;;  %v6435_v34 = vld [vmem:[#allocation2 + $0xa4] sm:$0x1] }
 0x1bb   : > { %v1404_v8 = vsel %vm12664_vm6, %v1396_v63, %v1403_v1  ;;  %v1910_v37 = vsel %vm12690_vm8, %v1405_v2, %v1909_v62  ;;  %v1019_v10 = vpack.c.bf16 %v955_v39, %v955_v39  ;;  %7304 = vrot.lane.b32.xlu1 %v6749_v43, %s12288_s19  ;;  %v4657_v62 = vrot.slane %v4656_v42, 4  ;;  %6344 = vst.msk [vmem:[#allocation3 + $0x64] sm:$0xf] %vm3901_vm2, %v6161_v51  ;;  %v7277_v39 = vpop.permute.xlu1 %7276 }
 0x1bc   : > { %1908 = vst.msk [vmem:[#allocation2 + $0xac] sm:$0xf] %vm1055_vm1, %v1404_v8  ;;  %v5617_v63 = vrot.slane %v5378_v28, 5  ;;  %v6770_v1 = vshll.u32 %v6434_v50, 16  ;;  %v4667_v2 = vshll.u32 %v13361_v16, 16  ;;  %v4673_v8 = vshll.u32 %v4379_v60, 16 }
 0x1bd   : > { %1911 = vst [vmem:[#allocation2 + $0xb0] sm:$0x1] %v1910_v37  ;;  %v1407_v27 = vshrl.u32 %v1019_v10, 16  ;;  %v1410_v30 = vshll.u32 %v1019_v10, 16  ;;  %v4662_v52 = vsel %vm12823_vm14, %v4657_v62, %v4661_v56  ;;  %v6767_v37 = vor.u32 %v6766_v58, %v6763_v45  ;;  %v13403_v10 = vld [vmem:[#allocation2 + $0xa0] sm:$0xf] }
 0x1be   : > { %v839_v33 = vpop.f32.mrf.mxu0  ;;  %7462 = vst.msk [vmem:[#allocation3 + $0x4c] sm:$0xf] %vm4286_vm4, %v7277_v39  ;;  %v4669_v7 = vrot.slane %v4667_v2, 5  ;;  %v5618_v17 = vsel %vm12704_vm11, %v5616_v11, %v5617_v63  ;;  %6190 = vrot.lane.b32.xlu0 %v6039_v57, %s12287_s11  ;;  %v13411_v14 = vrot.slane %v6770_v1, 5  ;;  %v6776_v28 = vrot.slane %v6774_v29, 4  ;;  %v852_v39 = vpop.f32.mrf.mxu1 }
 0x1bf   : > { %v13374_v18 = vrot.slane %v1407_v27, 7  ;;  %v840_v40 = vadd.f32 %v13319_v9, %v839_v33  ;;  %5296 = vst.msk [vmem:[#allocation3 + $0xd0] sm:$0xf] %vm1055_vm1, %v4662_v52  ;;  %6184 = vrot.lane.b32.xlu2 %v6036_v4, %s12287_s11  ;;  %v5621_v33 = vrot.slane %v13403_v10, 5  ;;  %v11021_v38 = vld [vmem:[#allocation3 + $0x54] sm:$0xf0]  ;;  %v6759_v50 = vsel %vm12823_vm14, %v13397_v5, %v13388_v53 }
 0x1c0   : > { %v4670_v19 = vor.u32 %v4669_v7, %v4666_v61  ;;  %v6780_v48 = vshll.u32 %v6435_v34, 16  ;;  %v4380_v58 = vld [vmem:[#allocation2 + $0x80] sm:$0x1]  ;;  %v6777_v61 = vor.u32 %v6776_v28, %v13411_v14  ;;  %v5381_v2 = vld [vmem:[#allocation2 + $0xa4] sm:$0x1] }
 0x1c1   : > { %v1412_v44 = vor.u32 %v1410_v30, %v13374_v18  ;;  %v956_v47 = vmax.f32 %v840_v40, 0.0  ;;  %v1413_v25 = vrot.slane %v13374_v18, 4  ;;  %v7283_v24 = vpop.permute.xlu2 %7282  ;;  %v6163_v31 = vpop.permute.xlu0 %6162  ;;  %v4675_v30 = vrot.slane %v4673_v8, 5  ;;  %v1919_v4 = vld [vmem:[#allocation2 + $0xc0] sm:$0xf] }
 0x1c2   : > { %v6768_v40 = vrot.slane %v6767_v37, 4  ;;  %v4671_v3 = vrot.slane %v4670_v19, 4  ;;  %v5622_v53 = vsel %vm12704_vm11, %v10929_v32, %v5621_v33  ;;  %v13443_v29 = vrot.slane %v6780_v48, 5 }
 0x1c3   : > { %v1913_v35 = vsel %vm12593_vm3, %v1412_v44, %v1912_v23  ;;  %v1020_v59 = vpack.c.bf16 %v956_v47, %v956_v47  ;;  %5805 = vrot.lane.b32.xlu1 %v5618_v17, %s12286_s26  ;;  %v6436_v23 = vld [vmem:[#allocation2 + $0xa8] sm:$0xf]  ;;  %v4679_v44 = vrot.slane %v4677_v21, 4  ;;  %v13433_v60 = vld [vmem:[#allocation2 + $0xac] sm:$0xf]  ;;  %v13455_v19 = vrot.slane %v6777_v61, 4 }
 0x1c4   : > { %1914 = vst [vmem:[#allocation2 + $0xb4] sm:$0xf] %v1913_v35  ;;  %v6785_v55 = vshrl.u32 %v6436_v23, 16  ;;  %v6788_v56 = vshll.u32 %v6436_v23, 16  ;;  %v4676_v35 = vsel %vm12823_vm14, %v4671_v3, %v4675_v30  ;;  %v6773_v1 = vsel %vm12823_vm14, %v6768_v40, %v13411_v14  ;;  %v6041_v21 = vld [vmem:[#allocation2 + $0xac] sm:$0xf] }
 0x1c5   : > { %v1415_v6 = vshrl.u32 %v1020_v59, 16  ;;  %v1418_v15 = vshll.u32 %v1020_v59, 16  ;;  %v5778_v47 = vpop.permute.xlu1 %5777  ;;  %v11739_v51 = vld [vmem:[#allocation3 + $0x4c] sm:$0xf]  ;;  %v4680_v5 = vor.u32 %v4679_v44, %v4675_v30  ;;  %5297 = vst.msk [vmem:[#allocation3 + $0xdc] sm:$0xf] %vm1055_vm1, %v4676_v35 }
 0x1c6   : > { %v842_v0 = vpop.f32.mrf.mxu0  ;;  %5960 = vst.msk [vmem:[#allocation3 + $0x70] sm:$0xf] %vm3225_vm15, %v5778_v47  ;;  %v11024_v45 = vor.u32 %v11739_v51, %v11021_v38  ;;  %5807 = vrot.lane.b32.xlu0 %v5622_v53, %s12286_s26  ;;  %v6787_v8 = vrot.slane %v6785_v55, 4  ;;  %v6790_v37 = vrot.slane %v6788_v56, 5  ;;  %v6794_v10 = vshll.u32 %v13433_v60, 16  ;;  %v854_v48 = vpop.f32.mrf.mxu1 }
 0x1c7   : > { %v1417_v12 = vrot.slane %v1415_v6, 7  ;;  %v843_v16 = vadd.f32 %v13319_v9, %v842_v0  ;;  %6345 = vst.msk [vmem:[#allocation3 + $0x70] sm:$0xf] %vm3901_vm2, %v6163_v31  ;;  %7306 = vrot.lane.b32.xlu2 %v6759_v50, %s12288_s19  ;;  %v5623_v6 = vrot.slane %v5621_v33, 4  ;;  %v6798_v34 = vshrl.u32 %v13433_v60, 16 }
 0x1c8   : > { %7465 = vst.msk [vmem:[#allocation3 + $0x70] sm:$0xf] %vm4286_vm4, %v7283_v24  ;;  %v6791_v32 = vor.u32 %v6790_v37, %v6787_v8  ;;  %v13461_v33 = vrot.slane %v6794_v10, 5  ;;  %v5382_v40 = vld [vmem:[#allocation2 + $0xa8] sm:$0xe] }
 0x1c9   : > { %v1420_v49 = vor.u32 %v1418_v15, %v1417_v12  ;;  %v1422_v27 = vrot.slane %v1417_v12, 4  ;;  %v957_v26 = vmax.f32 %v843_v16, 0.0  ;;  %9109 = vmatmul.bf16.gmra.mxu2 %v11024_v45  ;;  %v6165_v0 = vpop.permute.xlu2 %6164  ;;  %v5780_v7 = vpop.permute.xlu0 %5779  ;;  %v11719_v12 = vld [vmem:[%s12468_s27 + $0xc8] sm:$0xff]  ;;  %v4683_v15 = vshll.u32 %v4380_v58, 16  ;;  %v6438_v47 = vld [vmem:[#allocation2 + $0xb0] sm:$0x1] }
 0x1ca   : > { %5961 = vst.msk [vmem:[#allocation3 + $0x7c] sm:$0xf] %vm3225_vm15, %v5780_v7  ;;  %v5624_v16 = vrot.slane %v5381_v2, 5  ;;  %10878 = vmatmul.msk.bf16.gmra.mxu1 %vm661_vm0, %v11719_v12  ;;  %v6792_v53 = vrot.slane %v6791_v32, 4  ;;  %v6800_v60 = vrot.slane %v6798_v34, 4  ;;  %v6804_v61 = vshll.u32 %v6438_v47, 16 }
 0x1cb   : > { %v1421_v42 = vsel %vm12664_vm6, %v1413_v25, %v1420_v49  ;;  %v1917_v18 = vsel %vm12690_vm8, %v1422_v27, %v1916_v20  ;;  %v1021_v43 = vpack.c.bf16 %v957_v26, %v957_v26  ;;  %7308 = vrot.lane.b32.xlu1 %v6773_v1, %s12288_s19  ;;  %v853_v20 = vadd.f32 %v13319_v9, %v852_v39  ;;  %v6038_v49 = vld [vmem:[#allocation2 + $0x9c] sm:$0xf]  ;;  %v13457_v26 = vld [vmem:[#allocation2 + $0xac] sm:$0xf]  ;;  %v6439_v51 = vld [vmem:[#allocation2 + $0xb4] sm:$0xf] }
 0x1cc   : > { %1915 = vst.msk [vmem:[#allocation2 + $0xb8] sm:$0xf] %vm1055_vm1, %v1421_v42  ;;  %v4681_v25 = vrot.slane %v4680_v5, 4  ;;  %v4685_v30 = vrot.slane %v4683_v15, 5  ;;  %v5625_v3 = vsel %vm12704_vm11, %v5623_v6, %v5624_v16  ;;  %v5628_v50 = vrot.slane %v13457_v26, 5 }
 0x1cd   : > { %1918 = vst [vmem:[#allocation2 + $0xbc] sm:$0x1] %v1917_v18  ;;  %v1424_v11 = vshrl.u32 %v1021_v43, 16  ;;  %v1427_v62 = vshll.u32 %v1021_v43, 16  ;;  %v7281_v27 = vpop.permute.xlu1 %7280  ;;  %v961_v31 = vmax.f32 %v853_v20, 0.0  ;;  %v6809_v5 = vshrl.u32 %v6439_v51, 16 }
 0x1ce   : > { %v844_v57 = vpop.f32.mrf.mxu0  ;;  %6346 = vst.msk [vmem:[#allocation3 + $0x7c] sm:$0xf] %vm3901_vm2, %v6165_v0  ;;  %v1923_v43 = vld [vmem:[#allocation2 + $0xc8] sm:$0x1]  ;;  %6194 = vrot.lane.b32.xlu0 %v6041_v21, %s12287_s11  ;;  %v6812_v6 = vshll.u32 %v6439_v51, 16  ;;  %v6801_v15 = vor.u32 %v6800_v60, %v13461_v33  ;;  %v6797_v20 = vsel %vm12823_vm14, %v6792_v53, %v13461_v33  ;;  %v11720_v51 = vld [vmem:[%s12468_s27 + $0xd0] sm:$0xff] }
 0x1cf   : > { %v13431_v59 = vrot.slane %v1424_v11, 7  ;;  %v845_v63 = vadd.f32 %v13319_v9, %v844_v57  ;;  %7464 = vst.msk [vmem:[#allocation3 + $0x64] sm:$0xf] %vm4286_vm4, %v7281_v27  ;;  %v1025_v23 = vpack.c.bf16 %v961_v31, %v961_v31  ;;  %6188 = vrot.lane.b32.xlu2 %v6038_v49, %s12287_s11  ;;  %v4686_v11 = vsel %vm12823_vm14, %v4681_v25, %v4685_v30  ;;  %v11033_v8 = vld [vmem:[#allocation3 + $0x6c] sm:$0xf0] }
 0x1d0   : > { %5298 = vst.msk [vmem:[#allocation3 + $0xe8] sm:$0xf] %vm1055_vm1, %v4686_v11  ;;  %v5384_v21 = vld [vmem:[#allocation2 + $0xb0] sm:$0x1]  ;;  %v6814_v31 = vrot.slane %v6812_v6, 5 }
 0x1d1   : > { %v1429_v52 = vor.u32 %v1427_v62, %v13431_v59  ;;  %v958_v13 = vmax.f32 %v845_v63, 0.0  ;;  %v1430_v44 = vrot.slane %v13431_v59, 4  ;;  %v1458_v56 = vshrl.u32 %v1025_v23, 16  ;;  %v7287_v35 = vpop.permute.xlu2 %7286  ;;  %v6167_v58 = vpop.permute.xlu0 %6166  ;;  %v1926_v33 = vld [vmem:[#allocation2 + $0xe4] sm:$0xf] }
 0x1d2   : > { %v1461_v57 = vshll.u32 %v1025_v23, 16  ;;  %v10930_v62 = vrot.slane %v5382_v40, 9  ;;  %v13510_v23 = vrot.slane %v6801_v15, 4  ;;  %v13515_v47 = vld [vmem:[#allocation2 + $0xb4] sm:$0xe] }
 0x1d3   : > { %v1920_v17 = vsel %vm12593_vm3, %v1429_v52, %v1919_v4  ;;  %v1022_v14 = vpack.c.bf16 %v958_v13, %v958_v13  ;;  %5809 = vrot.lane.b32.xlu1 %v5625_v3, %s12286_s26  ;;  %v13479_v2 = vrot.slane %v1458_v56, 7  ;;  %v1933_v4 = vld [vmem:[#allocation2 + $0xf0] sm:$0xf]  ;;  %v855_v52 = vadd.f32 %v13319_v9, %v854_v48  ;;  %v6043_v48 = vld [vmem:[#allocation2 + $0xb8] sm:$0xf] }
 0x1d4   : > { %1921 = vst [vmem:[#allocation2 + $0xc0] sm:$0xf] %v1920_v17  ;;  %v6783_v13 = vsel %vm12823_vm14, %v13455_v19, %v13443_v29  ;;  %v5629_v37 = vsel %vm12704_vm11, %v10930_v62, %v5628_v50  ;;  %v13498_v19 = vrot.slane %v6804_v61, 5  ;;  %v5631_v3 = vrot.slane %v5384_v21, 5  ;;  %v1937_v61 = vld [vmem:[#allocation2 + $0xf8] sm:$0x1] }
 0x1d5   : > { %v1432_v24 = vshrl.u32 %v1022_v14, 16  ;;  %v1435_v18 = vshll.u32 %v1022_v14, 16  ;;  %v5782_v0 = vpop.permute.xlu1 %5781  ;;  %v1463_v10 = vor.u32 %v1461_v57, %v13479_v2  ;;  %v6440_v14 = vld [vmem:[#allocation2 + $0xb8] sm:$0xf]  ;;  %v962_v49 = vmax.f32 %v855_v52, 0.0 }
 0x1d6   : > { %v847_v28 = vpop.f32.mrf.mxu0  ;;  %v11742_v7 = vld [vmem:[#allocation3 + $0x64] sm:$0xf]  ;;  %5962 = vst.msk [vmem:[#allocation3 + $0x88] sm:$0xf] %vm3225_vm15, %v5782_v0  ;;  %5811 = vrot.lane.b32.xlu0 %v5629_v37, %s12286_s26  ;;  %v6818_v34 = vshll.u32 %v6440_v14, 16  ;;  %v1464_v26 = vrot.slane %v13479_v2, 4 }
 0x1d7   : > { %v1434_v42 = vrot.slane %v1432_v24, 7  ;;  %v848_v38 = vadd.f32 %v13319_v9, %v847_v28  ;;  %v11036_v12 = vor.u32 %v11742_v7, %v11033_v8  ;;  %6347 = vst.msk [vmem:[#allocation3 + $0x88] sm:$0xf] %vm3901_vm2, %v6167_v58  ;;  %v1934_v25 = vsel %vm12593_vm3, %v1463_v10, %v1933_v4  ;;  %7310 = vrot.lane.b32.xlu2 %v6783_v13, %s12288_s19  ;;  %v857_v40 = vpop.f32.mrf.mxu1  ;;  %v6441_v58 = vld [vmem:[#allocation2 + $0xbc] sm:$0x1] }
 0x1d8   : > { %7467 = vst.msk [vmem:[#allocation3 + $0x88] sm:$0xf] %vm4286_vm4, %v7287_v35  ;;  %v6811_v24 = vrot.slane %v6809_v5, 4  ;;  %v6822_v28 = vshrl.u32 %v6440_v14, 16  ;;  %v1026_v30 = vpack.c.bf16 %v962_v49, %v962_v49  ;;  %v858_v56 = vadd.f32 %v13319_v9, %v857_v40  ;;  %v6040_v5 = vld [vmem:[#allocation2 + $0xa8] sm:$0xf] }
 0x1d9   : > { %v1437_v45 = vor.u32 %v1435_v18, %v1434_v42  ;;  %v1439_v55 = vrot.slane %v1434_v42, 4  ;;  %v959_v59 = vmax.f32 %v848_v38, 0.0  ;;  %9114 = vmatmul.bf16.gmra.mxu2 %v11036_v12  ;;  %1935 = vst [vmem:[#allocation2 + $0xf0] sm:$0xf] %v1934_v25  ;;  %v13508_v42 = vld [vmem:[#allocation2 + $0x84] sm:$0xf]  ;;  %v6169_v18 = vpop.permute.xlu2 %6168 }
 0x1da   : > { %v5630_v38 = vrot.slane %v5628_v50, 4  ;;  %v1466_v11 = vshrl.u32 %v1026_v30, 16  ;;  %v6815_v57 = vor.u32 %v6814_v31, %v6811_v24  ;;  %v13527_v62 = vrot.slane %v6818_v34, 5  ;;  %10879 = vmatmul.msk.bf16.gmra.mxu1 %vm661_vm0, %v11720_v51  ;;  %v1930_v24 = vld [vmem:[#allocation2 + $0xec] sm:$0x1] }
 0x1db   : > { %v1438_v63 = vsel %vm12664_vm6, %v1430_v44, %v1437_v45  ;;  %v1924_v1 = vsel %vm12690_vm8, %v1439_v55, %v1923_v43  ;;  %v1023_v39 = vpack.c.bf16 %v959_v59, %v959_v59  ;;  %v5784_v43 = vpop.permute.xlu0 %5783  ;;  %7312 = vrot.lane.b32.xlu1 %v6797_v20, %s12288_s19  ;;  %v1469_v45 = vshll.u32 %v1026_v30, 16  ;;  %v13520_v55 = vld [vmem:[#allocation2 + $0xb8] sm:$0xf]  ;;  %v6442_v12 = vld [vmem:[#allocation2 + $0xc0] sm:$0xf] }
 0x1dc   : > { %1922 = vst.msk [vmem:[#allocation2 + $0xc4] sm:$0xf] %vm1055_vm1, %v1438_v63  ;;  %v1468_v60 = vrot.slane %v1466_v11, 7  ;;  %v6824_v59 = vrot.slane %v6822_v28, 4  ;;  %v963_v63 = vmax.f32 %v858_v56, 0.0  ;;  %v4688_v4 = vshrl.u32 %v13508_v42, 16 }
 0x1dd   : > { %1925 = vst [vmem:[#allocation2 + $0xc8] sm:$0x1] %v1924_v1  ;;  %v1441_v16 = vshrl.u32 %v1023_v39, 16  ;;  %v1444_v17 = vshll.u32 %v1023_v39, 16  ;;  %v7285_v53 = vpop.permute.xlu1 %7284  ;;  %v5632_v1 = vsel %vm12704_vm11, %v5630_v38, %v5631_v3  ;;  %v4691_v39 = vshll.u32 %v13508_v42, 16  ;;  %v11842_v30 = vld [vmem:[%s16673_s3 + $0x80] sm:$0xff] }
 0x1de   : > { %v849_v29 = vpop.f32.mrf.mxu0  ;;  %5963 = vst.msk [vmem:[#allocation3 + $0x94] sm:$0xf] %vm3225_vm15, %v5784_v43  ;;  %v1471_v6 = vor.u32 %v1469_v45, %v1468_v60  ;;  %v1473_v52 = vrot.slane %v1468_v60, 4  ;;  %v10931_v13 = vrot.slane %v13515_v47, 9  ;;  %v6828_v0 = vshll.u32 %v6441_v58, 16  ;;  %6198 = vrot.lane.b32.xlu0 %v6043_v48, %s12287_s11  ;;  %12079 = vmatpush.bf16.msra.mxu3 %v11842_v30 }
 0x1df   : > { %v13505_v27 = vrot.slane %v1441_v16, 7  ;;  %v850_v32 = vadd.f32 %v13319_v9, %v849_v29  ;;  %6348 = vst.msk [vmem:[#allocation3 + $0x94] sm:$0xf] %vm3901_vm2, %v6169_v18  ;;  %6192 = vrot.lane.b32.xlu2 %v6040_v5, %s12287_s11  ;;  %v13538_v7 = vrot.slane %v6815_v57, 4  ;;  %v5635_v8 = vrot.slane %v13520_v55, 5  ;;  %v859_v29 = vpop.f32.mrf.mxu1  ;;  %9262 = vmatpush.bf16.msrb.mxu2 %v11842_v30 }
 0x1e0   : > { %7466 = vst.msk [vmem:[#allocation3 + $0x7c] sm:$0xf] %vm4286_vm4, %v7285_v53  ;;  %v1027_v10 = vpack.c.bf16 %v963_v63, %v963_v63  ;;  %v1472_v16 = vsel %vm12664_vm6, %v1464_v26, %v1471_v6  ;;  %v6825_v14 = vor.u32 %v6824_v59, %v13527_v62  ;;  %v6836_v34 = vshll.u32 %v6442_v12, 16  ;;  %v13555_v43 = vld [vmem:[#allocation2 + $0xbc] sm:$0x1] }
 0x1e1   : > { %v1446_v44 = vor.u32 %v1444_v17, %v13505_v27  ;;  %v960_v35 = vmax.f32 %v850_v32, 0.0  ;;  %v1447_v15 = vrot.slane %v13505_v27, 4  ;;  %v1938_v17 = vsel %vm12690_vm8, %v1473_v52, %v1937_v61  ;;  %v7291_v20 = vpop.permute.xlu2 %7290  ;;  %1936 = vst.msk [vmem:[#allocation2 + $0xf4] sm:$0xf] %vm1055_vm1, %v1472_v16  ;;  %v11045_v48 = vld [vmem:[#allocation3 + $0x84] sm:$0xf0] }
 0x1e2   : > { %v1475_v31 = vshrl.u32 %v1027_v10, 16  ;;  %v1478_v32 = vshll.u32 %v1027_v10, 16  ;;  %1939 = vst [vmem:[#allocation2 + $0xf8] sm:$0x1] %v1938_v17  ;;  %v13549_v27 = vrot.slane %v6828_v0, 5  ;;  %v860_v28 = vadd.f32 %v13319_v9, %v859_v29 }
 0x1e3   : > { %v1927_v50 = vsel %vm12593_vm3, %v1446_v44, %v1926_v33  ;;  %v1024_v2 = vpack.c.bf16 %v960_v35, %v960_v35  ;;  %v6171_v21 = vpop.permute.xlu0 %6170  ;;  %5813 = vrot.lane.b32.xlu1 %v5632_v1, %s12286_s26  ;;  %v6833_v33 = vshrl.u32 %v6442_v12, 16  ;;  %v13557_v38 = vrot.slane %v5635_v8, 4  ;;  %v1940_v45 = vld [vmem:[#allocation2 + $0xfc] sm:$0xf]  ;;  %v7566_v57 = vld [vmem:[#allocation2 + $0xd0] sm:$0xf] }
 0x1e4   : > { %1928 = vst [vmem:[#allocation2 + $0xe4] sm:$0xf] %v1927_v50  ;;  %v13559_v3 = vrot.slane %v1475_v31, 7  ;;  %v6807_v44 = vsel %vm12823_vm14, %v13510_v23, %v13498_v19  ;;  %v13565_v11 = vrot.slane %v6825_v14, 4  ;;  %v964_v55 = vmax.f32 %v860_v28, 0.0  ;;  %v11721_v12 = vld [vmem:[%s12468_s27 + $0xd8] sm:$0xff] }
 0x1e5   : > { %v1449_v37 = vshrl.u32 %v1024_v2, 16  ;;  %v1452_v49 = vshll.u32 %v1024_v2, 16  ;;  %v5786_v47 = vpop.permute.xlu1 %5785  ;;  %v5636_v26 = vsel %vm12704_vm11, %v10931_v13, %v5635_v8  ;;  %v7565_v23 = vld [vmem:[#allocation2 + $0xcc] sm:$0xe]  ;;  %v13576_v58 = vld [vmem:[#allocation2 + $0xc4] sm:$0xf]  ;;  %v6821_v63 = vsel %vm12823_vm14, %v13538_v7, %v13527_v62 }
 0x1e6   : > { %5964 = vst.msk [vmem:[#allocation3 + $0xa0] sm:$0xf] %vm3225_vm15, %v5786_v47  ;;  %v1480_v19 = vor.u32 %v1478_v32, %v13559_v3  ;;  %v6835_v53 = vrot.slane %v6833_v33, 4  ;;  %v6838_v60 = vrot.slane %v6836_v34, 5  ;;  %v1028_v59 = vpack.c.bf16 %v964_v55, %v964_v55  ;;  %5815 = vrot.lane.b32.xlu0 %v5636_v26, %s12286_s26  ;;  %v7567_v1 = vld [vmem:[#allocation2 + $0xd4] sm:$0x1] }
 0x1e7   : > { %v1451_v25 = vrot.slane %v1449_v37, 7  ;;  %v11745_v51 = vld [vmem:[#allocation3 + $0x7c] sm:$0xf]  ;;  %6349 = vst.msk [vmem:[#allocation3 + $0xa0] sm:$0xf] %vm3901_vm2, %v6171_v21  ;;  %7314 = vrot.lane.b32.xlu2 %v6807_v44, %s12288_s19  ;;  %v10964_v61 = vrot.slane %v7565_v23, 9  ;;  %v862_v13 = vpop.f32.mrf.mxu1 }
 0x1e8   : > { %v11048_v56 = vor.u32 %v11745_v51, %v11045_v48  ;;  %7469 = vst.msk [vmem:[#allocation3 + $0xa0] sm:$0xf] %vm4286_vm4, %v7291_v20  ;;  %v7819_v2 = vrot.slane %v7566_v57, 5  ;;  %v5638_v5 = vrot.slane %v13555_v43, 5  ;;  %v1483_v6 = vshrl.u32 %v1028_v59, 16 }
 0x1e9   : > { %v1454_v40 = vor.u32 %v1452_v49, %v1451_v25  ;;  %v1456_v18 = vrot.slane %v1451_v25, 4  ;;  %v1486_v52 = vshll.u32 %v1028_v59, 16  ;;  %v13589_v0 = vrot.slane %v4688_v4, 4  ;;  %v6173_v8 = vpop.permute.xlu2 %6172  ;;  %v13594_v10 = vld [vmem:[#allocation2 + $0xc0] sm:$0xe] }
 0x1ea   : > { %9119 = vmatmul.bf16.gmra.mxu2 %v11048_v56  ;;  %v1941_v7 = vsel %vm12593_vm3, %v1480_v19, %v1940_v45  ;;  %v6842_v37 = vshll.u32 %v13576_v58, 16  ;;  %v6045_v16 = vld [vmem:[#allocation2 + $0xc4] sm:$0xf]  ;;  %v1485_v4 = vrot.slane %v1483_v6, 7  ;;  %v7821_v17 = vrot.slane %v7819_v2, 4  ;;  %10880 = vmatmul.msk.bf16.gmra.mxu1 %vm661_vm0, %v11721_v12 }
 0x1eb   : > { %v1455_v50 = vsel %vm12664_vm6, %v1447_v15, %v1454_v40  ;;  %v1931_v35 = vsel %vm12690_vm8, %v1456_v18, %v1930_v24  ;;  %v5788_v62 = vpop.permute.xlu0 %5787  ;;  %7316 = vrot.lane.b32.xlu1 %v6821_v63, %s12288_s19  ;;  %v1481_v15 = vrot.slane %v13559_v3, 4  ;;  %v7822_v14 = vrot.slane %v7567_v1, 5  ;;  %v1944_v20 = vld [vmem:[#allocation2 + $0x104] sm:$0x1]  ;;  %1942 = vst [vmem:[#allocation2 + $0xfc] sm:$0xf] %v1941_v7 }
 0x1ec   : > { %1929 = vst.msk [vmem:[#allocation2 + $0xe8] sm:$0xf] %vm1055_vm1, %v1455_v50  ;;  %v6839_v29 = vor.u32 %v6838_v60, %v6835_v53  ;;  %v13601_v21 = vld [vmem:[#allocation2 + $0xc4] sm:$0xf]  ;;  %v7820_v25 = vsel %vm12704_vm11, %v10964_v61, %v7819_v2  ;;  %v863_v49 = vadd.f32 %v13319_v9, %v862_v13  ;;  %v1488_v31 = vor.u32 %v1486_v52, %v1485_v4  ;;  %v6444_v33 = vld [vmem:[#allocation2 + $0xc8] sm:$0x1] }
 0x1ed   : > { %1932 = vst [vmem:[#allocation2 + $0xec] sm:$0x1] %v1931_v35  ;;  %v7289_v24 = vpop.permute.xlu1 %7288  ;;  %v1490_v32 = vrot.slane %v1485_v4, 4  ;;  %v13609_v34 = vrot.slane %v4691_v39, 5  ;;  %v13612_v28 = vrot.slane %v6842_v37, 5  ;;  %v6846_v30 = vshrl.u32 %v13576_v58, 16 }
 0x1ee   : > { %5965 = vst.msk [vmem:[#allocation3 + $0xac] sm:$0xf] %vm3225_vm15, %v5788_v62  ;;  %v10932_v40 = vrot.slane %v13594_v10, 9  ;;  %v965_v18 = vmax.f32 %v863_v49, 0.0  ;;  %v6042_v43 = vld [vmem:[#allocation2 + $0xb4] sm:$0xf]  ;;  %v1489_v3 = vsel %vm12664_vm6, %v1481_v15, %v1488_v31  ;;  %v7823_v39 = vsel %vm12704_vm11, %v7821_v17, %v7822_v14  ;;  %6202 = vrot.lane.b32.xlu0 %v6045_v16, %s12287_s11 }
 0x1ef   : > { %6350 = vst.msk [vmem:[#allocation3 + $0xac] sm:$0xf] %vm3901_vm2, %v6173_v8  ;;  %v1945_v44 = vsel %vm12690_vm8, %v1490_v32, %v1944_v20  ;;  %v5642_v42 = vrot.slane %v13601_v21, 5  ;;  %6196 = vrot.lane.b32.xlu2 %v6042_v43, %s12287_s11  ;;  %v13626_v47 = vrot.slane %v6839_v29, 4  ;;  %v6852_v51 = vshll.u32 %v6444_v33, 16  ;;  %v864_v19 = vpop.f32.mrf.mxu1 }
 0x1f0   : > { %7468 = vst.msk [vmem:[#allocation3 + $0x94] sm:$0xf] %vm4286_vm4, %v7289_v24  ;;  %v1029_v48 = vpack.c.bf16 %v965_v18, %v965_v18  ;;  %v6445_v45 = vld [vmem:[#allocation2 + $0xcc] sm:$0xf]  ;;  %v5639_v55 = vsel %vm12704_vm11, %v13557_v38, %v5638_v5  ;;  %v13632_v56 = vld [vmem:[#allocation2 + $0xc8] sm:$0x1]  ;;  %v865_v53 = vadd.f32 %v13319_v9, %v864_v19  ;;  %v6831_v9 = vsel %vm12823_vm14, %v13565_v11, %v13549_v27 }
 0x1f1   : > { %8030 = vst.msk [vmem:[#allocation3 + $0x170] sm:$0xf] %vm1055_vm1, %v7820_v25  ;;  %v6857_v26 = vshrl.u32 %v6445_v45, 16  ;;  %v6860_v50 = vshll.u32 %v6445_v45, 16  ;;  %v7295_v23 = vpop.permute.xlu2 %7294  ;;  %v6848_v60 = vrot.slane %v6846_v30, 4  ;;  %v13637_v59 = vrot.slane %v5642_v42, 4 }
 0x1f2   : > { %1943 = vst.msk [vmem:[#allocation2 + $0x100] sm:$0xf] %vm1055_vm1, %v1489_v3  ;;  %v1492_v35 = vshrl.u32 %v1029_v48, 16  ;;  %v1495_v58 = vshll.u32 %v1029_v48, 16  ;;  %v1947_v38 = vld [vmem:[#allocation2 + $0x108] sm:$0xf]  ;;  %v4694_v37 = vor.u32 %v13609_v34, %v13589_v0  ;;  %v5643_v27 = vsel %vm12704_vm11, %v10932_v40, %v5642_v42 }
 0x1f3   : > { %1946 = vst [vmem:[#allocation2 + $0x104] sm:$0x1] %v1945_v44  ;;  %v6175_v57 = vpop.permute.xlu0 %6174  ;;  %5817 = vrot.lane.b32.xlu1 %v5639_v55, %s12286_s26  ;;  %v13639_v63 = vld [vmem:[#allocation2 + $0xd0] sm:$0xf]  ;;  %v13641_v61 = vrot.slane %v6852_v51, 5  ;;  %v5645_v2 = vrot.slane %v13632_v56, 5  ;;  %v6849_v11 = vor.u32 %v6848_v60, %v13612_v28  ;;  %v6845_v20 = vsel %vm12823_vm14, %v13626_v47, %v13612_v28 }
 0x1f4   : > { %8031 = vst.msk [vmem:[#allocation3 + $0x17c] sm:$0xf] %vm1055_vm1, %v7823_v39  ;;  %v11057_v1 = vld [vmem:[#allocation3 + $0x9c] sm:$0xf0]  ;;  %v13644_v5 = vrot.slane %v1492_v35, 7  ;;  %v966_v6 = vmax.f32 %v865_v53, 0.0 }
 0x1f5   : > { %v5790_v52 = vpop.permute.xlu1 %5789  ;;  %v6859_v8 = vrot.slane %v6857_v26, 4  ;;  %v6862_v62 = vrot.slane %v6860_v50, 5  ;;  %v7568_v7 = vld [vmem:[#allocation2 + $0xf0] sm:$0xe]  ;;  %v6866_v16 = vshll.u32 %v13639_v63, 16  ;;  %v6870_v0 = vshrl.u32 %v13639_v63, 16 }
 0x1f6   : > { %5966 = vst.msk [vmem:[#allocation3 + $0xb8] sm:$0xf] %vm3225_vm15, %v5790_v52  ;;  %v1497_v15 = vor.u32 %v1495_v58, %v13644_v5  ;;  %v1030_v4 = vpack.c.bf16 %v966_v6, %v966_v6  ;;  %v13655_v17 = vld [vmem:[#allocation2 + $0x88] sm:$0xf]  ;;  %v7569_v14 = vld [vmem:[#allocation2 + $0xf4] sm:$0xf]  ;;  %5819 = vrot.lane.b32.xlu0 %v5643_v27, %s12286_s26 }
 0x1f7   : > { %v11748_v13 = vld [vmem:[#allocation3 + $0x94] sm:$0xf]  ;;  %6351 = vst.msk [vmem:[#allocation3 + $0xb8] sm:$0xf] %vm3901_vm2, %v6175_v57  ;;  %v10965_v29 = vrot.slane %v7568_v7, 9  ;;  %7318 = vrot.lane.b32.xlu2 %v6831_v9, %s12288_s19  ;;  %v1498_v32 = vrot.slane %v13644_v5, 4  ;;  %v6863_v33 = vor.u32 %v6862_v62, %v6859_v8  ;;  %v867_v40 = vpop.f32.mrf.mxu1 }
 0x1f8   : > { %v11060_v10 = vor.u32 %v11748_v13, %v11057_v1  ;;  %v11171_v12 = vld [vmem:[#allocation3 + $0x170] sm:$0xf]  ;;  %7471 = vst.msk [vmem:[#allocation3 + $0xb8] sm:$0xf] %vm4286_vm4, %v7295_v23  ;;  %v1948_v21 = vsel %vm12593_vm3, %v1497_v15, %v1947_v38  ;;  %v1500_v25 = vshrl.u32 %v1030_v4, 16  ;;  %v1503_v49 = vshll.u32 %v1030_v4, 16 }
 0x1f9   : > { %v7570_v24 = vld [vmem:[#allocation2 + $0xf8] sm:$0x1]  ;;  %1949 = vst [vmem:[#allocation2 + $0x108] sm:$0xf] %v1948_v21  ;;  %v1951_v34 = vld [vmem:[#allocation2 + $0x110] sm:$0x1]  ;;  %v6177_v18 = vpop.permute.xlu2 %6176 }
 0x1fa   : > { %9124 = vmatmul.bf16.gmra.mxu2 %v11060_v10  ;;  %v7826_v30 = vrot.slane %v7569_v14, 5  ;;  %v1502_v3 = vrot.slane %v1500_v25, 7  ;;  %v13672_v44 = vld [vmem:[#allocation2 + $0xe4] sm:$0xe]  ;;  %v13674_v42 = vld [vmem:[#allocation2 + $0xe8] sm:$0xf] }
 0x1fb   : > { %v11777_v31 = vld [vmem:[#allocation3 + $0x178] sm:$0xf0]  ;;  %v5792_v28 = vpop.permute.xlu0 %5791  ;;  %v7829_v39 = vrot.slane %v7570_v24, 5  ;;  %v13679_v47 = vld [vmem:[%s16676_s6] ss:$0 sm:$0xff]  ;;  %7320 = vrot.lane.b32.xlu1 %v6845_v20, %s12288_s19  ;;  %v13684_v48 = vrot.slane %v6849_v11, 4 }
 0x1fc   : > { %v11172_v43 = vor.u32 %v11777_v31, %v11171_v12  ;;  %v868_v51 = vadd.f32 %v13679_v47, %v867_v40  ;;  %5967 = vst.msk [vmem:[#allocation3 + $0xc4] sm:$0xf] %vm3225_vm15, %v5792_v28  ;;  %v6047_v45 = vld [vmem:[#allocation2 + $0xd0] sm:$0xf]  ;;  %v7827_v55 = vsel %vm12704_vm11, %v10965_v29, %v7826_v30  ;;  %v7828_v26 = vrot.slane %v7826_v30, 4 }
 0x1fd   : > { %v11722_v50 = vld [vmem:[%s12468_s27 + $0xe0] sm:$0xff]  ;;  %v4697_v19 = vshll.u32 %v13655_v17, 16  ;;  %6352 = vst.msk [vmem:[#allocation3 + $0xc4] sm:$0xf] %vm3901_vm2, %v6177_v18  ;;  %v13692_v23 = vrot.slane %v6866_v16, 5  ;;  %v1505_v57 = vor.u32 %v1503_v49, %v1502_v3  ;;  %v1507_v35 = vrot.slane %v1502_v3, 4  ;;  %v7293_v60 = vpop.permute.xlu1 %7292 }
 0x1fe   : > { %11452 = vmatmul.msk.bf16.vlgmr.msra.gmra.mxu3 %vm8820_vm5, %v11172_v43  ;;  %v4695_v58 = vrot.slane %v4694_v37, 4  ;;  %v6044_v53 = vld [vmem:[#allocation2 + $0xc0] sm:$0xf]  ;;  %v13694_v38 = vrot.slane %v6863_v33, 4  ;;  %v10933_v63 = vrot.slane %v13672_v44, 9  ;;  %v5649_v1 = vrot.slane %v13674_v42, 5  ;;  %10881 = vmatmul.msk.bf16.gmra.mxu1 %vm661_vm0, %v11722_v50 }
 0x1ff   : > { %8032 = vst.msk [vmem:[#allocation3 + $0x188] sm:$0xf] %vm1055_vm1, %v7827_v55  ;;  %v967_v5 = vmax.f32 %v868_v51, 0.0  ;;  %v1506_v6 = vsel %vm12664_vm6, %v1498_v32, %v1505_v57  ;;  %v1952_v9 = vsel %vm12690_vm8, %v1507_v35, %v1951_v34  ;;  %v7830_v52 = vsel %vm12704_vm11, %v7828_v26, %v7829_v39  ;;  %v13707_v13 = vld [vmem:[#allocation2 + $0xd4] sm:$0x1]  ;;  %6200 = vrot.lane.b32.xlu2 %v6044_v53, %s12287_s11 }
 0x200   : > { %7470 = vst.msk [vmem:[#allocation3 + $0xac] sm:$0xf] %vm4286_vm4, %v7293_v60  ;;  %v13709_v8 = vrot.slane %v6870_v0, 4  ;;  %v13712_v62 = vld [vmem:[#allocation2 + $0xec] sm:$0x1]  ;;  %v13714_v37 = vrot.slane %v4697_v19, 5  ;;  %v5646_v12 = vsel %vm12704_vm11, %v13637_v59, %v5645_v2  ;;  %6206 = vrot.lane.b32.xlu0 %v6047_v45, %s12287_s11  ;;  %v6855_v44 = vsel %vm12823_vm14, %v13684_v48, %v13641_v61 }
 0x201   : > { %1950 = vst.msk [vmem:[#allocation2 + $0x10c] sm:$0xf] %vm1055_vm1, %v1506_v6  ;;  %v1031_v7 = vpack.c.bf16 %v967_v5, %v967_v5  ;;  %v4701_v10 = vshrl.u32 %v13655_v17, 16  ;;  %v6448_v15 = vld [vmem:[#allocation2 + $0xf0] sm:$0xf]  ;;  %v869_v17 = vpop.f32.mrf.mxu1  ;;  %v7299_v14 = vpop.permute.xlu2 %7298  ;;  %v6876_v56 = vshll.u32 %v13707_v13, 16  ;;  %v5650_v55 = vsel %vm12704_vm11, %v10933_v63, %v5649_v1 }
 0x202   : > { %1953 = vst [vmem:[#allocation2 + $0x110] sm:$0x1] %v1952_v9  ;;  %v6449_v16 = vld [vmem:[#allocation2 + $0xf4] sm:$0xf]  ;;  %v6881_v11 = vshrl.u32 %v6448_v15, 16  ;;  %v6884_v0 = vshll.u32 %v6448_v15, 16  ;;  %v870_v59 = vadd.f32 %v13679_v47, %v869_v17  ;;  %v4700_v2 = vsel %vm12823_vm14, %v4695_v58, %v13714_v37 }
 0x203   : > { %8033 = vst.msk [vmem:[#allocation3 + $0x194] sm:$0xf] %vm1055_vm1, %v7830_v52  ;;  %v1509_v4 = vshrl.u32 %v1031_v7, 16  ;;  %v1512_v27 = vshll.u32 %v1031_v7, 16  ;;  %v6179_v29 = vpop.permute.xlu0 %6178  ;;  %v13726_v20 = vrot.slane %v5649_v1, 4  ;;  %5821 = vrot.lane.b32.xlu1 %v5646_v12, %s12286_s26  ;;  %v6890_v24 = vshll.u32 %v6449_v16, 16 }
 0x204   : > { %v11069_v21 = vld [vmem:[#allocation3 + $0xb4] sm:$0xf0]  ;;  %v1954_v49 = vld [vmem:[#allocation2 + $0x114] sm:$0xf]  ;;  %v5652_v32 = vrot.slane %v13712_v62, 5  ;;  %v13736_v33 = vrot.slane %v6881_v11, 4  ;;  %v6869_v61 = vsel %vm12823_vm14, %v13694_v38, %v13692_v23  ;;  %v6873_v35 = vor.u32 %v13709_v8, %v13692_v23 }
 0x205   : > { %v13733_v25 = vrot.slane %v1509_v4, 7  ;;  %v6894_v34 = vshrl.u32 %v6449_v16, 16  ;;  %v968_v30 = vmax.f32 %v870_v59, 0.0  ;;  %v5794_v40 = vpop.permute.xlu1 %5793  ;;  %v13739_v43 = vrot.slane %v6884_v0, 5  ;;  %5299 = vst.msk [vmem:[#allocation3 + $0xf4] sm:$0xf] %vm1055_vm1, %v4700_v2 }
 0x206   : > { %v11183_v31 = vld [vmem:[#allocation3 + $0x188] sm:$0xf]  ;;  %v4703_v3 = vrot.slane %v4701_v10, 4  ;;  %5968 = vst.msk [vmem:[#allocation3 + $0xd0] sm:$0xf] %vm3225_vm15, %v5794_v40  ;;  %v13752_v50 = vrot.slane %v6890_v24, 5 }
 0x207   : > { %v11751_v18 = vld [vmem:[#allocation3 + $0xac] sm:$0xf]  ;;  %v1514_v28 = vor.u32 %v1512_v27, %v13733_v25  ;;  %v1032_v39 = vpack.c.bf16 %v968_v30, %v968_v30  ;;  %v7572_v45 = vld [vmem:[#allocation2 + $0x100] sm:$0xf]  ;;  %6353 = vst.msk [vmem:[#allocation3 + $0xd0] sm:$0xf] %vm3901_vm2, %v6179_v29  ;;  %7322 = vrot.lane.b32.xlu2 %v6855_v44, %s12288_s19  ;;  %v6887_v16 = vor.u32 %v13739_v43, %v13736_v33 }
 0x208   : > { %v11072_v42 = vor.u32 %v11751_v18, %v11069_v21  ;;  %v7571_v51 = vld [vmem:[#allocation2 + $0xfc] sm:$0xe]  ;;  %v7573_v19 = vld [vmem:[#allocation2 + $0x104] sm:$0x1]  ;;  %7473 = vst.msk [vmem:[#allocation3 + $0xd0] sm:$0xf] %vm4286_vm4, %v7299_v14  ;;  %5823 = vrot.lane.b32.xlu0 %v5650_v55, %s12286_s26  ;;  %v4704_v52 = vor.u32 %v4703_v3, %v13714_v37 }
 0x209   : > { %v1955_v26 = vsel %vm12593_vm3, %v1514_v28, %v1954_v49  ;;  %v10966_v57 = vrot.slane %v7571_v51, 9  ;;  %v1517_v58 = vshrl.u32 %v1032_v39, 16  ;;  %v1520_v53 = vshll.u32 %v1032_v39, 16  ;;  %v4383_v60 = vld [vmem:[#allocation2 + $0x8c] sm:$0x1]  ;;  %v872_v9 = vpop.f32.mrf.mxu1  ;;  %v6181_v38 = vpop.permute.xlu2 %6180 }
 0x20a   : > { %v11780_v48 = vld [vmem:[#allocation3 + $0x190] sm:$0xf0]  ;;  %9129 = vmatmul.bf16.gmra.mxu2 %v11072_v42  ;;  %1956 = vst [vmem:[#allocation2 + $0x114] sm:$0xf] %v1955_v26  ;;  %v13763_v1 = vld [vmem:[#allocation2 + $0xf0] sm:$0xe]  ;;  %v873_v11 = vadd.f32 %v13679_v47, %v872_v9  ;;  %v5653_v42 = vsel %vm12704_vm11, %v13726_v20, %v5652_v32 }
 0x20b   : > { %v11184_v63 = vor.u32 %v11780_v48, %v11183_v31  ;;  %v7833_v5 = vrot.slane %v7572_v45, 5  ;;  %v6896_v6 = vrot.slane %v6894_v34, 4  ;;  %v5796_v13 = vpop.permute.xlu0 %5795  ;;  %v13766_v7 = vrot.slane %v6876_v56, 5  ;;  %v1958_v8 = vld [vmem:[#allocation2 + $0x11c] sm:$0x1]  ;;  %7324 = vrot.lane.b32.xlu1 %v6869_v61, %s12288_s19 }
 0x20c   : > { %v1515_v10 = vrot.slane %v13733_v25, 4  ;;  %v1519_v23 = vrot.slane %v1517_v58, 7  ;;  %v7836_v12 = vrot.slane %v7573_v19, 5  ;;  %v6046_v15 = vld [vmem:[#allocation2 + $0xcc] sm:$0xf]  ;;  %v13780_v0 = vrot.slane %v6873_v35, 4 }
 0x20d   : > { %5969 = vst.msk [vmem:[#allocation3 + $0xdc] sm:$0xf] %vm3225_vm15, %v5796_v13  ;;  %v13773_v4 = vld [vmem:[#allocation2 + $0xf4] sm:$0xf]  ;;  %v7834_v37 = vsel %vm12704_vm11, %v10966_v57, %v7833_v5  ;;  %v7835_v27 = vrot.slane %v7833_v5, 4  ;;  %v10934_v29 = vrot.slane %v13763_v1, 9  ;;  %v7297_v59 = vpop.permute.xlu1 %7296  ;;  %v6897_v21 = vor.u32 %v6896_v6, %v13752_v50 }
 0x20e   : > { %6354 = vst.msk [vmem:[#allocation3 + $0xdc] sm:$0xf] %vm3901_vm2, %v6181_v38  ;;  %11453 = vmatmul.msk.bf16.gmra.mxu3 %vm8820_vm5, %v11184_v63  ;;  %v1522_v17 = vor.u32 %v1520_v53, %v1519_v23  ;;  %v1524_v14 = vrot.slane %v1519_v23, 4  ;;  %v11723_v56 = vld [vmem:[%s12468_s27 + $0xe8] sm:$0xff]  ;;  %v6049_v2 = vld [vmem:[#allocation2 + $0xf4] sm:$0xf]  ;;  %v6879_v1 = vsel %vm12823_vm14, %v13780_v0, %v13766_v7 }
 0x20f   : > { %8034 = vst.msk [vmem:[#allocation3 + $0x1a0] sm:$0xf] %vm1055_vm1, %v7834_v37  ;;  %v969_v25 = vmax.f32 %v873_v11, 0.0  ;;  %v4705_v49 = vrot.slane %v4704_v52, 4  ;;  %v4707_v24 = vshll.u32 %v4383_v60, 16  ;;  %v5656_v34 = vrot.slane %v13773_v4, 5  ;;  %10882 = vmatmul.msk.bf16.gmra.mxu1 %vm661_vm0, %v11723_v56  ;;  %6204 = vrot.lane.b32.xlu2 %v6046_v15, %s12287_s11 }
 0x210   : > { %7472 = vst.msk [vmem:[#allocation3 + $0xc4] sm:$0xf] %vm4286_vm4, %v7297_v59  ;;  %v1523_v31 = vsel %vm12664_vm6, %v1515_v10, %v1522_v17  ;;  %v1959_v33 = vsel %vm12690_vm8, %v1524_v14, %v1958_v8  ;;  %v7837_v30 = vsel %vm12704_vm11, %v7835_v27, %v7836_v12  ;;  %v13794_v40 = vld [vmem:[#allocation2 + $0xf8] sm:$0x1]  ;;  %v13797_v18 = vrot.slane %v6887_v16, 4  ;;  %6210 = vrot.lane.b32.xlu0 %v6049_v2, %s12287_s11 }
 0x211   : > { %1957 = vst.msk [vmem:[#allocation2 + $0x118] sm:$0xf] %vm1055_vm1, %v1523_v31  ;;  %v13800_v28 = vld [vmem:[#allocation2 + $0xf8] sm:$0x1]  ;;  %v1033_v43 = vpack.c.bf16 %v969_v25, %v969_v25  ;;  %v4709_v3 = vrot.slane %v4707_v24, 5  ;;  %v874_v57 = vpop.f32.mrf.mxu1  ;;  %v7303_v62 = vpop.permute.xlu2 %7302  ;;  %v13814_v48 = vrot.slane %v6897_v21, 4  ;;  %v5657_v10 = vsel %vm12704_vm11, %v10934_v29, %v5656_v34 }
 0x212   : > { %v4384_v44 = vld [vmem:[#allocation2 + $0x90] sm:$0xf]  ;;  %1960 = vst [vmem:[#allocation2 + $0x11c] sm:$0x1] %v1959_v33  ;;  %v6451_v39 = vld [vmem:[#allocation2 + $0xfc] sm:$0xf]  ;;  %v875_v35 = vadd.f32 %v13679_v47, %v874_v57 }
 0x213   : > { %v13809_v51 = vld [vmem:[#allocation2 + $0x100] sm:$0xf]  ;;  %8035 = vst.msk [vmem:[#allocation3 + $0x1ac] sm:$0xf] %vm1055_vm1, %v7837_v30  ;;  %v1526_v45 = vshrl.u32 %v1033_v43, 16  ;;  %v1529_v55 = vshll.u32 %v1033_v43, 16  ;;  %v4710_v26 = vsel %vm12823_vm14, %v4705_v49, %v4709_v3  ;;  %v6183_v61 = vpop.permute.xlu0 %6182  ;;  %5825 = vrot.lane.b32.xlu1 %v5653_v42, %s12286_s26 }
 0x214   : > { %v6905_v19 = vshrl.u32 %v6451_v39, 16  ;;  %5300 = vst.msk [vmem:[#allocation3 + $0x100] sm:$0xf] %vm1055_vm1, %v4710_v26  ;;  %v6908_v20 = vshll.u32 %v6451_v39, 16  ;;  %v6914_v32 = vshll.u32 %v13809_v51, 16  ;;  %v6900_v58 = vshll.u32 %v13794_v40, 16 }
 0x215   : > { %v13821_v53 = vrot.slane %v5656_v34, 4  ;;  %v13823_v60 = vrot.slane %v1526_v45, 7  ;;  %v4712_v63 = vshrl.u32 %v4384_v44, 16  ;;  %v11081_v5 = vld [vmem:[#allocation3 + $0xcc] sm:$0xf0]  ;;  %v5659_v6 = vrot.slane %v13800_v28, 5  ;;  %v5798_v38 = vpop.permute.xlu1 %5797 }
 0x216   : > { %v1961_v9 = vld [vmem:[#allocation2 + $0x120] sm:$0xf]  ;;  %v970_v52 = vmax.f32 %v875_v35, 0.0  ;;  %v11195_v23 = vld [vmem:[#allocation3 + $0x1a0] sm:$0xf]  ;;  %v13833_v12 = vrot.slane %v6905_v19, 4  ;;  %v6893_v34 = vsel %vm12823_vm14, %v13797_v18, %v13752_v50 }
 0x217   : > { %v11754_v13 = vld [vmem:[#allocation3 + $0xc4] sm:$0xf]  ;;  %v1531_v8 = vor.u32 %v1529_v55, %v13823_v60  ;;  %v6918_v15 = vshrl.u32 %v13809_v51, 16  ;;  %5970 = vst.msk [vmem:[#allocation3 + $0xe8] sm:$0xf] %vm3225_vm15, %v5798_v38  ;;  %v13837_v16 = vrot.slane %v6908_v20, 5  ;;  %7326 = vrot.lane.b32.xlu2 %v6879_v1, %s12288_s19  ;;  %v5660_v40 = vsel %vm12704_vm11, %v13821_v53, %v5659_v6 }
 0x218   : > { %v11084_v7 = vor.u32 %v11754_v13, %v11081_v5  ;;  %v13839_v4 = vrot.slane %v6914_v32, 5  ;;  %v1034_v37 = vpack.c.bf16 %v970_v52, %v970_v52  ;;  %v13841_v27 = vld [vmem:[#allocation2 + $0x94] sm:$0xf]  ;;  %6355 = vst.msk [vmem:[#allocation3 + $0xe8] sm:$0xf] %vm3901_vm2, %v6183_v61  ;;  %v4714_v0 = vrot.slane %v4712_v63, 4  ;;  %5827 = vrot.lane.b32.xlu0 %v5657_v10, %s12286_s26 }
 0x219   : > { %v1962_v11 = vsel %vm12593_vm3, %v1531_v8, %v1961_v9  ;;  %v4715_v17 = vshll.u32 %v4384_v44, 16  ;;  %v4721_v14 = vshll.u32 %v13841_v27, 16  ;;  %7475 = vst.msk [vmem:[#allocation3 + $0xe8] sm:$0xf] %vm4286_vm4, %v7303_v62  ;;  %v1532_v56 = vrot.slane %v13823_v60, 4  ;;  %v877_v31 = vpop.f32.mrf.mxu1  ;;  %v6185_v33 = vpop.permute.xlu2 %6184  ;;  %v11724_v1 = vld [vmem:[%s12468_s27 + $0xf0] sm:$0xff] }
 0x21a   : > { %v11783_v29 = vld [vmem:[#allocation3 + $0x1a8] sm:$0xf0]  ;;  %v1534_v59 = vshrl.u32 %v1034_v37, 16  ;;  %9134 = vmatmul.bf16.gmra.mxu2 %v11084_v7  ;;  %1963 = vst [vmem:[#allocation2 + $0x120] sm:$0xf] %v1962_v11  ;;  %v1537_v21 = vshll.u32 %v1034_v37, 16  ;;  %v878_v62 = vadd.f32 %v13679_v47, %v877_v31  ;;  %v6911_v32 = vor.u32 %v13837_v16, %v13833_v12 }
 0x21b   : > { %v11196_v2 = vor.u32 %v11783_v29, %v11195_v23  ;;  %v1965_v25 = vld [vmem:[#allocation2 + $0x128] sm:$0x1]  ;;  %v4717_v49 = vrot.slane %v4715_v17, 5  ;;  %v4725_v24 = vshrl.u32 %v13841_v27, 16  ;;  %v5800_v30 = vpop.permute.xlu0 %5799  ;;  %v13856_v3 = vrot.slane %v4721_v14, 5  ;;  %7328 = vrot.lane.b32.xlu1 %v6893_v34, %s12288_s19 }
 0x21c   : > { %v1536_v43 = vrot.slane %v1534_v59, 7  ;;  %v7574_v44 = vld [vmem:[#allocation2 + $0x108] sm:$0xe]  ;;  %v7575_v42 = vld [vmem:[#allocation2 + $0x10c] sm:$0xf]  ;;  %v13860_v26 = vpop.f32.mrf.mxu2  ;;  %v6920_v63 = vrot.slane %v6918_v15, 4 }
 0x21d   : > { %5971 = vst.msk [vmem:[#allocation3 + $0xf4] sm:$0xf] %vm3225_vm15, %v5800_v30  ;;  %v4718_v39 = vor.u32 %v4717_v49, %v4714_v0  ;;  %v7576_v51 = vld [vmem:[#allocation2 + $0x110] sm:$0x1]  ;;  %v10967_v45 = vrot.slane %v7574_v44, 9  ;;  %v7840_v55 = vrot.slane %v7575_v42, 5  ;;  %v7301_v20 = vpop.permute.xlu1 %7300 }
 0x21e   : > { %6356 = vst.msk [vmem:[#allocation3 + $0xf4] sm:$0xf] %vm3901_vm2, %v6185_v33  ;;  %11454 = vmatmul.msk.bf16.gmra.mxu3 %vm8820_vm5, %v11196_v2  ;;  %v1539_v50 = vor.u32 %v1537_v21, %v1536_v43  ;;  %v1541_v18 = vrot.slane %v1536_v43, 4  ;;  %v5397_v19 = vld [vmem:[#allocation2 + $0xfc] sm:$0xe]  ;;  %v7843_v57 = vrot.slane %v7576_v51, 5  ;;  %v6921_v28 = vor.u32 %v6920_v63, %v13839_v4 }
 0x21f   : > { %v6048_v61 = vld [vmem:[#allocation2 + $0xf0] sm:$0xf]  ;;  %v4719_v35 = vrot.slane %v4718_v39, 4  ;;  %v7842_v60 = vrot.slane %v7840_v55, 4  ;;  %7474 = vst.msk [vmem:[#allocation3 + $0xdc] sm:$0xf] %vm4286_vm4, %v7301_v20  ;;  %v7841_v8 = vsel %vm12704_vm11, %v10967_v45, %v7840_v55  ;;  %10883 = vmatmul.msk.bf16.gmra.mxu1 %vm661_vm0, %v11724_v1 }
 0x220   : > { %v6051_v5 = vld [vmem:[#allocation2 + $0x100] sm:$0xf]  ;;  %v1540_v9 = vsel %vm12664_vm6, %v1532_v56, %v1539_v50  ;;  %v1966_v52 = vsel %vm12690_vm8, %v1541_v18, %v1965_v25  ;;  %v6902_v13 = vrot.slane %v6900_v58, 5  ;;  %v10935_v10 = vrot.slane %v5397_v19, 9  ;;  %v13881_v12 = vld [vmem:[#allocation2 + $0x104] sm:$0x1]  ;;  %6208 = vrot.lane.b32.xlu2 %v6048_v61, %s12287_s11 }
 0x221   : > { %v5398_v38 = vld [vmem:[#allocation2 + $0x100] sm:$0xf]  ;;  %1964 = vst.msk [vmem:[#allocation2 + $0x124] sm:$0xf] %vm1055_vm1, %v1540_v9  ;;  %v4724_v23 = vsel %vm12823_vm14, %v4719_v35, %v13856_v3  ;;  %6214 = vrot.lane.b32.xlu0 %v6051_v5, %s12287_s11  ;;  %v7844_v58 = vsel %vm12704_vm11, %v7842_v60, %v7843_v57  ;;  %v971_v15 = vmax.f32 %v878_v62, 0.0  ;;  %v4727_v16 = vrot.slane %v4725_v24, 4  ;;  %v879_v0 = vpop.f32.mrf.mxu1  ;;  %v7307_v17 = vpop.permute.xlu2 %7306 }
 0x222   : > { %1967 = vst [vmem:[#allocation2 + $0x128] sm:$0x1] %v1966_v52  ;;  %v4386_v7 = vld [vmem:[#allocation2 + $0x98] sm:$0x1]  ;;  %v13893_v37 = vrot.slane %v6911_v32, 4  ;;  %v5663_v27 = vrot.slane %v5398_v38, 5  ;;  %v880_v59 = vadd.f32 %v13679_v47, %v879_v0  ;;  %v6903_v43 = vsel %vm12823_vm14, %v13814_v48, %v6902_v13 }
 0x223   : > { %5301 = vst.msk [vmem:[#allocation3 + $0x10c] sm:$0xf] %vm1055_vm1, %v4724_v23  ;;  %v4731_v11 = vshll.u32 %v4386_v7, 16  ;;  %v6187_v53 = vpop.permute.xlu0 %6186  ;;  %v6924_v6 = vshll.u32 %v13881_v12, 16  ;;  %v1035_v14 = vpack.c.bf16 %v971_v15, %v971_v15  ;;  %v4728_v29 = vor.u32 %v4727_v16, %v13856_v3  ;;  %v6454_v56 = vld [vmem:[#allocation2 + $0x108] sm:$0xf]  ;;  %5829 = vrot.lane.b32.xlu1 %v5660_v40, %s12286_s26 }
 0x224   : > { %8036 = vst.msk [vmem:[#allocation3 + $0x1b8] sm:$0xf] %vm1055_vm1, %v7841_v8  ;;  %v13903_v2 = vld [vmem:[#allocation2 + $0x104] sm:$0x1]  ;;  %v6929_v25 = vshrl.u32 %v6454_v56, 16  ;;  %v13905_v49 = vpop.f32.mrf.mxu2  ;;  %v6932_v30 = vshll.u32 %v6454_v56, 16  ;;  %v5664_v39 = vsel %vm12704_vm11, %v10935_v10, %v5663_v27  ;;  %v6917_v38 = vsel %vm12823_vm14, %v13893_v37, %v13839_v4 }
 0x225   : > { %8037 = vst.msk [vmem:[#allocation3 + $0x1c4] sm:$0xf] %vm1055_vm1, %v7844_v58  ;;  %v4733_v21 = vrot.slane %v4731_v11, 5  ;;  %v1543_v24 = vshrl.u32 %v1035_v14, 16  ;;  %v1546_v31 = vshll.u32 %v1035_v14, 16  ;;  %v4729_v33 = vrot.slane %v4728_v29, 4  ;;  %v5802_v3 = vpop.permute.xlu1 %5801 }
 0x226   : > { %v13907_v34 = vld [vmem:[#allocation2 + $0x10c] sm:$0xf]  ;;  %v11093_v42 = vld [vmem:[#allocation3 + $0xe4] sm:$0xf0]  ;;  %v13914_v51 = vrot.slane %v6921_v28, 4  ;;  %v972_v45 = vmax.f32 %v880_v59, 0.0 }
 0x227   : > { %v11757_v44 = vld [vmem:[#allocation3 + $0xdc] sm:$0xf]  ;;  %5972 = vst.msk [vmem:[#allocation3 + $0x100] sm:$0xf] %vm3225_vm15, %v5802_v3  ;;  %v13917_v50 = vrot.slane %v5663_v27, 4  ;;  %v1545_v18 = vrot.slane %v1543_v24, 7  ;;  %v4734_v57 = vsel %vm12823_vm14, %v4729_v33, %v4733_v21 }
 0x228   : > { %v11096_v55 = vor.u32 %v11757_v44, %v11093_v42  ;;  %v1968_v19 = vld [vmem:[#allocation2 + $0x12c] sm:$0xf]  ;;  %6357 = vst.msk [vmem:[#allocation3 + $0x100] sm:$0xf] %vm3901_vm2, %v6187_v53  ;;  %v5666_v48 = vrot.slane %v13903_v2, 5  ;;  %v13923_v62 = vrot.slane %v6929_v25, 4  ;;  %v1036_v20 = vpack.c.bf16 %v972_v45, %v972_v45  ;;  %7330 = vrot.lane.b32.xlu2 %v6903_v43, %s12288_s19 }
 0x229   : > { %v6938_v61 = vshll.u32 %v13907_v34, 16  ;;  %7477 = vst.msk [vmem:[#allocation3 + $0x100] sm:$0xf] %vm4286_vm4, %v7307_v17  ;;  %5831 = vrot.lane.b32.xlu0 %v5664_v39, %s12286_s26  ;;  %v1548_v32 = vor.u32 %v1546_v31, %v1545_v18  ;;  %v13929_v35 = vrot.slane %v6932_v30, 5  ;;  %v6942_v60 = vshrl.u32 %v13907_v34, 16  ;;  %v6189_v52 = vpop.permute.xlu2 %6188  ;;  %v882_v37 = vpop.f32.mrf.mxu1  ;;  %v11725_v11 = vld [vmem:[%s12468_s27 + $0xf8] sm:$0xff] }
 0x22a   : > { %v4387_v63 = vld [vmem:[#allocation2 + $0x9c] sm:$0xf]  ;;  %9139 = vmatmul.bf16.gmra.mxu2 %v11096_v55  ;;  %5302 = vst.msk [vmem:[#allocation3 + $0x118] sm:$0xf] %vm1055_vm1, %v4734_v57  ;;  %v1551_v5 = vshrl.u32 %v1036_v20, 16  ;;  %v1554_v9 = vshll.u32 %v1036_v20, 16  ;;  %v883_v43 = vadd.f32 %v13679_v47, %v882_v37  ;;  %v5667_v20 = vsel %vm12704_vm11, %v13917_v50, %v5666_v48 }
 0x22b   : > { %v11207_v1 = vld [vmem:[#allocation3 + $0x1b8] sm:$0xf]  ;;  %v5804_v13 = vpop.permute.xlu0 %5803  ;;  %v1549_v23 = vrot.slane %v1545_v18, 4  ;;  %v1969_v8 = vsel %vm12593_vm3, %v1548_v32, %v1968_v19  ;;  %v1972_v40 = vld [vmem:[#allocation2 + $0x134] sm:$0x1]  ;;  %v4736_v15 = vshrl.u32 %v4387_v63, 16  ;;  %7332 = vrot.lane.b32.xlu1 %v6917_v38, %s12288_s19  ;;  %v6935_v31 = vor.u32 %v13929_v35, %v13923_v62 }
 0x22c   : > { %v11786_v10 = vld [vmem:[#allocation3 + $0x1c0] sm:$0xf0]  ;;  %v4388_v58 = vld [vmem:[#allocation2 + $0xa0] sm:$0xf]  ;;  %5973 = vst.msk [vmem:[#allocation3 + $0x10c] sm:$0xf] %vm3225_vm15, %v5804_v13  ;;  %v13944_v0 = vpop.f32.mrf.mxu2 }
 0x22d   : > { %v11208_v7 = vor.u32 %v11786_v10, %v11207_v1  ;;  %v1553_v16 = vrot.slane %v1551_v5, 7  ;;  %v13941_v27 = vld [vmem:[#allocation2 + $0x108] sm:$0xe]  ;;  %v4739_v28 = vshll.u32 %v4387_v63, 16  ;;  %v4745_v4 = vshll.u32 %v4388_v58, 16  ;;  %v7305_v56 = vpop.permute.xlu1 %7304 }
 0x22e   : > { %6358 = vst.msk [vmem:[#allocation3 + $0x10c] sm:$0xf] %vm3901_vm2, %v6189_v52  ;;  %v13947_v17 = vld [vmem:[#allocation2 + $0x10c] sm:$0xf]  ;;  %v4738_v53 = vrot.slane %v4736_v15, 4  ;;  %v4749_v14 = vshrl.u32 %v4388_v58, 16 }
 0x22f   : > { %v7577_v29 = vld [vmem:[#allocation2 + $0x114] sm:$0xe]  ;;  %11455 = vmatmul.msk.bf16.gmra.mxu3 %vm8820_vm5, %v11208_v7  ;;  %1970 = vst [vmem:[#allocation2 + $0x12c] sm:$0xf] %v1969_v8  ;;  %v1556_v59 = vor.u32 %v1554_v9, %v1553_v16  ;;  %v1558_v21 = vrot.slane %v1553_v16, 4  ;;  %v4741_v25 = vrot.slane %v4739_v28, 5  ;;  %10884 = vmatmul.msk.bf16.gmra.mxu1 %vm661_vm0, %v11725_v11 }
 0x230   : > { %v13950_v24 = vrot.slane %v4745_v4, 5  ;;  %7476 = vst.msk [vmem:[#allocation3 + $0xf4] sm:$0xf] %vm4286_vm4, %v7305_v56  ;;  %v7578_v33 = vld [vmem:[#allocation2 + $0x118] sm:$0xf]  ;;  %v10968_v55 = vrot.slane %v7577_v29, 9 }
 0x231   : > { %v7579_v30 = vld [vmem:[#allocation2 + $0x11c] sm:$0x1]  ;;  %v6053_v44 = vld [vmem:[#allocation2 + $0x10c] sm:$0xf]  ;;  %v1557_v42 = vsel %vm12664_vm6, %v1549_v23, %v1556_v59  ;;  %v1973_v39 = vsel %vm12690_vm8, %v1558_v21, %v1972_v40  ;;  %v4742_v45 = vor.u32 %v4741_v25, %v4738_v53  ;;  %v6926_v18 = vrot.slane %v6924_v6, 5  ;;  %v7311_v6 = vpop.permute.xlu2 %7310 }
 0x232   : > { %v6050_v3 = vld [vmem:[#allocation2 + $0xfc] sm:$0xf]  ;;  %6218 = vrot.lane.b32.xlu0 %v6053_v44, %s12287_s11  ;;  %1971 = vst.msk [vmem:[#allocation2 + $0x130] sm:$0xf] %vm1055_vm1, %v1557_v42  ;;  %v10936_v19 = vrot.slane %v13941_v27, 9  ;;  %v7847_v57 = vrot.slane %v7578_v33, 5 }
 0x233   : > { %6212 = vrot.lane.b32.xlu2 %v6050_v3, %s12287_s11  ;;  %v7850_v62 = vrot.slane %v7579_v30, 5  ;;  %1974 = vst [vmem:[#allocation2 + $0x134] sm:$0x1] %v1973_v39  ;;  %v5670_v32 = vrot.slane %v13947_v17, 5  ;;  %v4743_v35 = vrot.slane %v4742_v45, 4  ;;  %v6191_v63 = vpop.permute.xlu0 %6190  ;;  %v6940_v1 = vrot.slane %v6938_v61, 5  ;;  %5833 = vrot.lane.b32.xlu1 %v5667_v20, %s12286_s26  ;;  %v884_v61 = vpop.f32.mrf.mxu1 }
 0x234   : > { %v6456_v12 = vld [vmem:[#allocation2 + $0x110] sm:$0x1]  ;;  %v7848_v5 = vsel %vm12704_vm11, %v10968_v55, %v7847_v57  ;;  %v7849_v9 = vrot.slane %v7847_v57, 4  ;;  %v6944_v2 = vrot.slane %v6942_v60, 4  ;;  %v4389_v52 = vld [vmem:[#allocation2 + $0xa4] sm:$0x1]  ;;  %v13984_v10 = vpop.f32.mrf.mxu2  ;;  %v885_v40 = vadd.f32 %v13679_v47, %v884_v61 }
 0x235   : > { %v6936_v50 = vrot.slane %v6935_v31, 4  ;;  %v4748_v48 = vsel %vm12823_vm14, %v4743_v35, %v13950_v24  ;;  %8038 = vst.msk [vmem:[#allocation3 + $0x1d0] sm:$0xf] %vm1055_vm1, %v7848_v5  ;;  %v973_v38 = vmax.f32 %v883_v43, 0.0  ;;  %v4751_v13 = vrot.slane %v4749_v14, 4  ;;  %v5806_v15 = vpop.permute.xlu1 %5805 }
 0x236   : > { %v11105_v23 = vld [vmem:[#allocation3 + $0xfc] sm:$0xf0]  ;;  %5303 = vst.msk [vmem:[#allocation3 + $0x124] sm:$0xf] %vm1055_vm1, %v4748_v48  ;;  %v7851_v34 = vsel %vm12704_vm11, %v7849_v9, %v7850_v62  ;;  %v6948_v60 = vshll.u32 %v6456_v12, 16  ;;  %v4755_v8 = vshll.u32 %v4389_v52, 16  ;;  %v6927_v58 = vsel %vm12823_vm14, %v13914_v51, %v6926_v18 }
 0x237   : > { %v11760_v7 = vld [vmem:[#allocation3 + $0xf4] sm:$0xf]  ;;  %v5671_v16 = vsel %vm12704_vm11, %v10936_v19, %v5670_v32  ;;  %8039 = vst.msk [vmem:[#allocation3 + $0x1dc] sm:$0xf] %vm1055_vm1, %v7851_v34  ;;  %v13996_v27 = vld [vmem:[#allocation2 + $0x110] sm:$0x1]  ;;  %v1037_v28 = vpack.c.bf16 %v973_v38, %v973_v38  ;;  %v4752_v4 = vor.u32 %v4751_v13, %v13950_v24  ;;  %v6945_v11 = vor.u32 %v6944_v2, %v6940_v1 }
 0x238   : > { %5974 = vst.msk [vmem:[#allocation3 + $0x118] sm:$0xf] %vm3225_vm15, %v5806_v15  ;;  %v11108_v37 = vor.u32 %v11760_v7, %v11105_v23  ;;  %v4757_v17 = vrot.slane %v4755_v8, 5  ;;  %v6457_v53 = vld [vmem:[#allocation2 + $0x114] sm:$0xf]  ;;  %v974_v14 = vmax.f32 %v885_v40, 0.0  ;;  %v6941_v39 = vsel %vm12823_vm14, %v6936_v50, %v6940_v1 }
 0x239   : > { %6359 = vst.msk [vmem:[#allocation3 + $0x118] sm:$0xf] %vm3901_vm2, %v6191_v63  ;;  %v1560_v51 = vshrl.u32 %v1037_v28, 16  ;;  %v1563_v29 = vshll.u32 %v1037_v28, 16  ;;  %v4753_v56 = vrot.slane %v4752_v4, 4  ;;  %v6953_v59 = vshrl.u32 %v6457_v53, 16  ;;  %v6193_v42 = vpop.permute.xlu2 %6192 }
 0x23a   : > { %7479 = vst.msk [vmem:[#allocation3 + $0x118] sm:$0xf] %vm4286_vm4, %v7311_v6  ;;  %5835 = vrot.lane.b32.xlu0 %v5671_v16, %s12286_s26  ;;  %v5672_v21 = vrot.slane %v5670_v32, 4  ;;  %v6458_v25 = vld [vmem:[#allocation2 + $0x118] sm:$0xf]  ;;  %v6956_v24 = vshll.u32 %v6457_v53, 16  ;;  %v1038_v31 = vpack.c.bf16 %v974_v14, %v974_v14  ;;  %9144 = vmatmul.bf16.gmra.mxu2 %v11108_v37 }
 0x23b   : > { %7334 = vrot.lane.b32.xlu2 %v6927_v58, %s12288_s19  ;;  %v14004_v33 = vrot.slane %v6948_v60, 5  ;;  %v5673_v30 = vrot.slane %v13996_v27, 5  ;;  %v1562_v43 = vrot.slane %v1560_v51, 7  ;;  %v1975_v3 = vld [vmem:[#allocation2 + $0x138] sm:$0xf]  ;;  %v4758_v44 = vsel %vm12823_vm14, %v4753_v56, %v4757_v17  ;;  %v5808_v45 = vpop.permute.xlu0 %5807  ;;  %7336 = vrot.lane.b32.xlu1 %v6941_v39, %s12288_s19  ;;  %v887_v35 = vpop.f32.mrf.mxu1 }
 0x23c   : > { %v11219_v55 = vld [vmem:[#allocation3 + $0x1d0] sm:$0xf]  ;;  %5304 = vst.msk [vmem:[#allocation3 + $0x130] sm:$0xf] %vm1055_vm1, %v4758_v44  ;;  %v6962_v18 = vshll.u32 %v6458_v25, 16  ;;  %v6966_v19 = vshrl.u32 %v6458_v25, 16  ;;  %v14018_v12 = vpop.f32.mrf.mxu2  ;;  %v888_v5 = vadd.f32 %v13679_v47, %v887_v35 }
 0x23d   : > { %5975 = vst.msk [vmem:[#allocation3 + $0x124] sm:$0xf] %vm3225_vm15, %v5808_v45  ;;  %v14014_v57 = vrot.slane %v6945_v11, 4  ;;  %v1565_v62 = vor.u32 %v1563_v29, %v1562_v43  ;;  %v14016_v20 = vrot.slane %v6953_v59, 4  ;;  %v1568_v32 = vshrl.u32 %v1038_v31, 16  ;;  %v7309_v2 = vpop.permute.xlu1 %7308 }
 0x23e   : > { %6360 = vst.msk [vmem:[#allocation3 + $0x124] sm:$0xf] %vm3901_vm2, %v6193_v42  ;;  %v11789_v6 = vld [vmem:[#allocation3 + $0x1d8] sm:$0xf0]  ;;  %v6958_v63 = vrot.slane %v6956_v24, 5  ;;  %v1571_v1 = vshll.u32 %v1038_v31, 16  ;;  %v5674_v16 = vsel %vm12704_vm11, %v5672_v21, %v5673_v30 }
 0x23f   : > { %v6052_v9 = vld [vmem:[#allocation2 + $0x108] sm:$0xf]  ;;  %v11220_v52 = vor.u32 %v11789_v6, %v11219_v55  ;;  %v1566_v50 = vrot.slane %v1562_v43, 4  ;;  %v1976_v48 = vsel %vm12593_vm3, %v1565_v62, %v1975_v3  ;;  %v6055_v38 = vld [vmem:[#allocation2 + $0x118] sm:$0xf]  ;;  %v1570_v13 = vrot.slane %v1568_v32, 7 }
 0x240   : > { %v1979_v61 = vld [vmem:[#allocation2 + $0x140] sm:$0x1]  ;;  %v5403_v23 = vld [vmem:[#allocation2 + $0x114] sm:$0xe]  ;;  %7478 = vst.msk [vmem:[#allocation3 + $0x10c] sm:$0xf] %vm4286_vm4, %v7309_v2  ;;  %v6959_v27 = vor.u32 %v6958_v63, %v14016_v20  ;;  %v6951_v39 = vsel %vm12823_vm14, %v14014_v57, %v14004_v33 }
 0x241   : > { %v14025_v34 = vrot.slane %v6962_v18, 5  ;;  %v14027_v60 = vld [vmem:[#allocation2 + $0x118] sm:$0xf]  ;;  %v14029_v8 = vrot.slane %v6966_v19, 4  ;;  %11456 = vmatmul.msk.bf16.gmra.mxu3 %vm8820_vm5, %v11220_v52  ;;  %1977 = vst [vmem:[#allocation2 + $0x138] sm:$0xf] %v1976_v48  ;;  %v1573_v40 = vor.u32 %v1571_v1, %v1570_v13  ;;  %v7315_v56 = vpop.permute.xlu2 %7314 }
 0x242   : > { %v1575_v58 = vrot.slane %v1570_v13, 4  ;;  %v10937_v15 = vrot.slane %v5403_v23, 9  ;;  %v975_v7 = vmax.f32 %v888_v5, 0.0  ;;  %6222 = vrot.lane.b32.xlu0 %v6055_v38, %s12287_s11  ;;  %v4390_v28 = vld [vmem:[#allocation2 + $0xa8] sm:$0xf]  ;;  %v5677_v21 = vrot.slane %v14027_v60, 5 }
 0x243   : > { %6216 = vrot.lane.b32.xlu2 %v6052_v9, %s12287_s11  ;;  %v4391_v4 = vld [vmem:[#allocation2 + $0xac] sm:$0xf]  ;;  %v7580_v37 = vld [vmem:[#allocation2 + $0x120] sm:$0xe]  ;;  %v1574_v11 = vsel %vm12664_vm6, %v1566_v50, %v1573_v40  ;;  %v4760_v53 = vshrl.u32 %v4390_v28, 16  ;;  %v4763_v14 = vshll.u32 %v4390_v28, 16  ;;  %v6195_v59 = vpop.permute.xlu0 %6194  ;;  %5837 = vrot.lane.b32.xlu1 %v5674_v16, %s12286_s26  ;;  %v889_v42 = vpop.f32.mrf.mxu1  ;;  %v6969_v9 = vor.u32 %v14029_v8, %v14025_v34 }
 0x244   : > { %v1980_v17 = vsel %vm12690_vm8, %v1575_v58, %v1979_v61  ;;  %v7581_v51 = vld [vmem:[#allocation2 + $0x124] sm:$0xf]  ;;  %v7582_v29 = vld [vmem:[#allocation2 + $0x128] sm:$0x1]  ;;  %1978 = vst.msk [vmem:[#allocation2 + $0x13c] sm:$0xf] %vm1055_vm1, %v1574_v11  ;;  %v14048_v45 = vpop.f32.mrf.mxu2  ;;  %v1039_v62 = vpack.c.bf16 %v975_v7, %v975_v7  ;;  %v890_v1 = vadd.f32 %v13679_v47, %v889_v42  ;;  %v5678_v52 = vsel %vm12704_vm11, %v10937_v15, %v5677_v21 }
 0x245   : > { %v4769_v25 = vshll.u32 %v4391_v4, 16  ;;  %v10969_v24 = vrot.slane %v7580_v37, 9  ;;  %v7854_v31 = vrot.slane %v7581_v51, 5  ;;  %1981 = vst [vmem:[#allocation2 + $0x140] sm:$0x1] %v1980_v17  ;;  %v4762_v30 = vrot.slane %v4760_v53, 4  ;;  %v5810_v20 = vpop.permute.xlu1 %5809 }
 0x246   : > { %v4765_v43 = vrot.slane %v4763_v14, 5  ;;  %v4773_v3 = vshrl.u32 %v4391_v4, 16  ;;  %v7857_v44 = vrot.slane %v7582_v29, 5  ;;  %v11117_v55 = vld [vmem:[#allocation3 + $0x114] sm:$0xf0]  ;;  %v6960_v35 = vrot.slane %v6959_v27, 4 }
 0x247   : > { %v7855_v18 = vsel %vm12704_vm11, %v10969_v24, %v7854_v31  ;;  %v7856_v19 = vrot.slane %v7854_v31, 4  ;;  %v11763_v32 = vld [vmem:[#allocation3 + $0x10c] sm:$0xf]  ;;  %v4771_v63 = vrot.slane %v4769_v25, 5  ;;  %5976 = vst.msk [vmem:[#allocation3 + $0x130] sm:$0xf] %vm3225_vm15, %v5810_v20 }
 0x248   : > { %v4766_v6 = vor.u32 %v4765_v43, %v4762_v30  ;;  %8040 = vst.msk [vmem:[#allocation3 + $0x1e8] sm:$0xf] %vm1055_vm1, %v7855_v18  ;;  %v11120_v33 = vor.u32 %v11763_v32, %v11117_v55  ;;  %v6459_v5 = vld [vmem:[#allocation2 + $0x11c] sm:$0x1]  ;;  %v1577_v2 = vshrl.u32 %v1039_v62, 16  ;;  %v1580_v48 = vshll.u32 %v1039_v62, 16 }
 0x249   : > { %v7858_v57 = vsel %vm12704_vm11, %v7856_v19, %v7857_v44  ;;  %6361 = vst.msk [vmem:[#allocation3 + $0x130] sm:$0xf] %vm3901_vm2, %v6195_v59  ;;  %v14064_v47 = vld [vmem:[#allocation2 + $0x11c] sm:$0x1]  ;;  %v4775_v38 = vrot.slane %v4773_v3, 4  ;;  %v976_v23 = vmax.f32 %v890_v1, 0.0  ;;  %v6965_v8 = vsel %vm12823_vm14, %v6960_v35, %v14025_v34  ;;  %v6197_v16 = vpop.permute.xlu2 %6196 }
 0x24a   : > { %v4767_v50 = vrot.slane %v4766_v6, 4  ;;  %7481 = vst.msk [vmem:[#allocation3 + $0x130] sm:$0xf] %vm4286_vm4, %v7315_v56  ;;  %5839 = vrot.lane.b32.xlu0 %v5678_v52, %s12286_s26  ;;  %v14069_v13 = vrot.slane %v1577_v2, 7  ;;  %v4392_v61 = vld [vmem:[#allocation2 + $0xb0] sm:$0x1]  ;;  %9149 = vmatmul.bf16.gmra.mxu2 %v11120_v33 }
 0x24b   : > { %7338 = vrot.lane.b32.xlu2 %v6951_v39, %s12288_s19  ;;  %8041 = vst.msk [vmem:[#allocation3 + $0x1f4] sm:$0xf] %vm1055_vm1, %v7858_v57  ;;  %v1982_v58 = vld [vmem:[#allocation2 + $0x144] sm:$0xf]  ;;  %v4776_v15 = vor.u32 %v4775_v38, %v4771_v63  ;;  %v4779_v7 = vshll.u32 %v4392_v61, 16  ;;  %v5812_v27 = vpop.permute.xlu0 %5811  ;;  %v14078_v28 = vrot.slane %v6969_v9, 4  ;;  %v1040_v11 = vpack.c.bf16 %v976_v23, %v976_v23  ;;  %7340 = vrot.lane.b32.xlu1 %v6965_v8, %s12288_s19  ;;  %v892_v14 = vpop.f32.mrf.mxu1 }
 0x24c   : > { %v4772_v40 = vsel %vm12823_vm14, %v4767_v50, %v4771_v63  ;;  %v6972_v4 = vshll.u32 %v6459_v5, 16  ;;  %v1582_v37 = vor.u32 %v1580_v48, %v14069_v13  ;;  %v6460_v53 = vld [vmem:[#allocation2 + $0x120] sm:$0xf]  ;;  %v14083_v51 = vpop.f32.mrf.mxu2  ;;  %v5679_v29 = vrot.slane %v5677_v21, 4  ;;  %v14091_v25 = vld [vmem:[#allocation2 + $0x124] sm:$0xf] }
 0x24d   : > { %5305 = vst.msk [vmem:[#allocation3 + $0x13c] sm:$0xf] %vm1055_vm1, %v4772_v40  ;;  %v4777_v34 = vrot.slane %v4776_v15, 4  ;;  %v4781_v17 = vrot.slane %v4779_v7, 5  ;;  %v5680_v56 = vrot.slane %v14064_v47, 5  ;;  %v7313_v43 = vpop.permute.xlu1 %7312  ;;  %v6977_v3 = vshrl.u32 %v6460_v53, 16 }
 0x24e   : > { %5977 = vst.msk [vmem:[#allocation3 + $0x13c] sm:$0xf] %vm3225_vm15, %v5812_v27  ;;  %v1983_v59 = vsel %vm12593_vm3, %v1582_v37, %v1982_v58  ;;  %v14096_v24 = vld [vmem:[%s16676_s6] ss:$0 sm:$0xff]  ;;  %v6054_v30 = vld [vmem:[#allocation2 + $0x114] sm:$0xf] }
 0x24f   : > { %6362 = vst.msk [vmem:[#allocation3 + $0x13c] sm:$0xf] %vm3901_vm2, %v6197_v16  ;;  %v893_v31 = vadd.f32 %v14096_v24, %v892_v14  ;;  %v4782_v60 = vsel %vm12823_vm14, %v4777_v34, %v4781_v17  ;;  %v6057_v21 = vld [vmem:[#allocation2 + $0x124] sm:$0xf]  ;;  %v6980_v44 = vshll.u32 %v6460_v53, 16  ;;  %v6986_v42 = vshll.u32 %v14091_v25, 16 }
 0x250   : > { %1984 = vst [vmem:[#allocation2 + $0x144] sm:$0xf] %v1983_v59  ;;  %v11231_v39 = vld [vmem:[#allocation3 + $0x1e8] sm:$0xf]  ;;  %v1585_v55 = vshrl.u32 %v1040_v11, 16  ;;  %v1588_v18 = vshll.u32 %v1040_v11, 16  ;;  %v5681_v47 = vsel %vm12704_vm11, %v5679_v29, %v5680_v56 }
 0x251   : > { %7480 = vst.msk [vmem:[#allocation3 + $0x124] sm:$0xf] %vm4286_vm4, %v7313_v43  ;;  %v6974_v19 = vrot.slane %v6972_v4, 5  ;;  %v1583_v62 = vrot.slane %v14069_v13, 4  ;;  %v6979_v20 = vrot.slane %v6977_v3, 4  ;;  %v6982_v32 = vrot.slane %v6980_v44, 5  ;;  %v7319_v50 = vpop.permute.xlu2 %7318 }
 0x252   : > { %5306 = vst.msk [vmem:[#allocation3 + $0x148] sm:$0xf] %vm1055_vm1, %v4782_v60  ;;  %v11792_v35 = vld [vmem:[#allocation3 + $0x1f0] sm:$0xf0]  ;;  %6226 = vrot.lane.b32.xlu0 %v6057_v21, %s12287_s11  ;;  %v14107_v6 = vrot.slane %v6986_v42, 5  ;;  %v6990_v63 = vshrl.u32 %v14091_v25, 16 }
 0x253   : > { %6220 = vrot.lane.b32.xlu2 %v6054_v30, %s12287_s11  ;;  %v1587_v1 = vrot.slane %v1585_v55, 7  ;;  %v977_v33 = vmax.f32 %v893_v31, 0.0  ;;  %v11232_v57 = vor.u32 %v11792_v35, %v11231_v39  ;;  %v6983_v5 = vor.u32 %v6982_v32, %v6979_v20  ;;  %v5406_v9 = vld [vmem:[#allocation2 + $0x120] sm:$0xe]  ;;  %v14110_v2 = vld [vmem:[#allocation2 + $0x124] sm:$0xf]  ;;  %v6199_v48 = vpop.permute.xlu0 %6198  ;;  %5841 = vrot.lane.b32.xlu1 %v5681_v47, %s12286_s26  ;;  %v894_v4 = vpop.f32.mrf.mxu1 }
 0x254   : > { %v4393_v52 = vld [vmem:[#allocation2 + $0xb4] sm:$0xf]  ;;  %v1986_v61 = vld [vmem:[#allocation2 + $0x14c] sm:$0x1]  ;;  %v10938_v23 = vrot.slane %v5406_v9, 9  ;;  %v5684_v58 = vrot.slane %v14110_v2, 5  ;;  %v6975_v37 = vsel %vm12823_vm14, %v14078_v28, %v6974_v19  ;;  %v14120_v11 = vpop.f32.mrf.mxu2  ;;  %v895_v20 = vadd.f32 %v14096_v24, %v894_v4 }
 0x255   : > { %v1590_v38 = vor.u32 %v1588_v18, %v1587_v1  ;;  %v1592_v13 = vrot.slane %v1587_v1, 4  ;;  %v4394_v8 = vld [vmem:[#allocation2 + $0xb8] sm:$0xf]  ;;  %11457 = vmatmul.msk.bf16.gmra.mxu3 %vm8820_vm5, %v11232_v57  ;;  %v11129_v40 = vld [vmem:[#allocation3 + $0x12c] sm:$0xf0]  ;;  %v4784_v15 = vshrl.u32 %v4393_v52, 16  ;;  %v5814_v56 = vpop.permute.xlu1 %5813  ;;  %v1041_v43 = vpack.c.bf16 %v977_v33, %v977_v33 }
 0x256   : > { %v4787_v7 = vshll.u32 %v4393_v52, 16  ;;  %v4793_v16 = vshll.u32 %v4394_v8, 16  ;;  %v7583_v27 = vld [vmem:[#allocation2 + $0x12c] sm:$0xe]  ;;  %v6984_v34 = vrot.slane %v6983_v5, 4  ;;  %v4797_v53 = vshrl.u32 %v4394_v8, 16 }
 0x257   : > { %v1591_v17 = vsel %vm12664_vm6, %v1583_v62, %v1590_v38  ;;  %v7584_v14 = vld [vmem:[#allocation2 + $0x130] sm:$0xf]  ;;  %v7585_v29 = vld [vmem:[#allocation2 + $0x134] sm:$0x1]  ;;  %v1987_v25 = vsel %vm12690_vm8, %v1592_v13, %v1986_v61  ;;  %v4786_v31 = vrot.slane %v4784_v15, 4  ;;  %v10970_v21 = vrot.slane %v7583_v27, 9 }
 0x258   : > { %v11766_v59 = vld [vmem:[#allocation3 + $0x124] sm:$0xf]  ;;  %1985 = vst.msk [vmem:[#allocation2 + $0x148] sm:$0xf] %vm1055_vm1, %v1591_v17  ;;  %v4789_v30 = vrot.slane %v4787_v7, 5  ;;  %v4795_v60 = vrot.slane %v4793_v16, 5  ;;  %v5685_v44 = vsel %vm12704_vm11, %v10938_v23, %v5684_v58 }
 0x259   : > { %5978 = vst.msk [vmem:[#allocation3 + $0x148] sm:$0xf] %vm3225_vm15, %v5814_v56  ;;  %v11132_v28 = vor.u32 %v11766_v59, %v11129_v40  ;;  %v7861_v3 = vrot.slane %v7584_v14, 5  ;;  %v7864_v39 = vrot.slane %v7585_v29, 5  ;;  %v6462_v55 = vld [vmem:[#allocation2 + $0x128] sm:$0x1]  ;;  %v6201_v1 = vpop.permute.xlu2 %6200 }
 0x25a   : > { %6363 = vst.msk [vmem:[#allocation3 + $0x148] sm:$0xf] %vm3901_vm2, %v6199_v48  ;;  %v4790_v42 = vor.u32 %v4789_v30, %v4786_v31  ;;  %v6992_v18 = vrot.slane %v6990_v63, 4  ;;  %5843 = vrot.lane.b32.xlu0 %v5685_v44, %s12286_s26  ;;  %v6996_v35 = vshll.u32 %v6462_v55, 16  ;;  %v6989_v63 = vsel %vm12823_vm14, %v6984_v34, %v14107_v6  ;;  %v5408_v5 = vld [vmem:[#allocation2 + $0x128] sm:$0x1] }
 0x25b   : > { %7342 = vrot.lane.b32.xlu2 %v6975_v37, %s12288_s19  ;;  %7483 = vst.msk [vmem:[#allocation3 + $0x148] sm:$0xf] %vm4286_vm4, %v7319_v50  ;;  %v7862_v19 = vsel %vm12704_vm11, %v10970_v21, %v7861_v3  ;;  %v7863_v62 = vrot.slane %v7861_v3, 4  ;;  %9154 = vmatmul.bf16.gmra.mxu2 %v11132_v28  ;;  %v5816_v33 = vpop.permute.xlu0 %5815  ;;  %v1594_v9 = vshrl.u32 %v1041_v43, 16  ;;  %v1597_v2 = vshll.u32 %v1041_v43, 16  ;;  %v897_v38 = vpop.f32.mrf.mxu1 }
 0x25c   : > { %1988 = vst [vmem:[#allocation2 + $0x14c] sm:$0x1] %v1987_v25  ;;  %v4791_v32 = vrot.slane %v4790_v42, 4  ;;  %7344 = vrot.lane.b32.xlu1 %v6989_v63, %s12288_s19  ;;  %v6993_v50 = vor.u32 %v6992_v18, %v14107_v6  ;;  %v5686_v47 = vrot.slane %v5684_v58, 4  ;;  %v4799_v48 = vrot.slane %v4797_v53, 4  ;;  %v14148_v13 = vpop.f32.mrf.mxu2 }
 0x25d   : > { %v7865_v57 = vsel %vm12704_vm11, %v7863_v62, %v7864_v39  ;;  %8042 = vst.msk [vmem:[#allocation3 + $0x200] sm:$0xf] %vm1055_vm1, %v7862_v19  ;;  %v14151_v61 = vrot.slane %v1594_v9, 7  ;;  %v4395_v23 = vld [vmem:[#allocation2 + $0xbc] sm:$0x1]  ;;  %v978_v8 = vmax.f32 %v895_v20, 0.0  ;;  %v7317_v15 = vpop.permute.xlu1 %7316  ;;  %v14157_v17 = vadd.f32 %v14096_v24, %v897_v38 }
 0x25e   : > { %v4796_v52 = vsel %vm12823_vm14, %v4791_v32, %v4795_v60  ;;  %8043 = vst.msk [vmem:[#allocation3 + $0x20c] sm:$0xf] %vm1055_vm1, %v7865_v57  ;;  %v6056_v40 = vld [vmem:[#allocation2 + $0x120] sm:$0xf]  ;;  %v5687_v7 = vrot.slane %v5408_v5, 5  ;;  %v4800_v27 = vor.u32 %v4799_v48, %v4795_v60  ;;  %v4803_v4 = vshll.u32 %v4395_v23, 16 }
 0x25f   : > { %5307 = vst.msk [vmem:[#allocation3 + $0x154] sm:$0xf] %vm1055_vm1, %v4796_v52  ;;  %v1989_v16 = vld [vmem:[#allocation2 + $0x150] sm:$0xf]  ;;  %v6998_v6 = vrot.slane %v6996_v35, 5  ;;  %v1599_v58 = vor.u32 %v1597_v2, %v14151_v61  ;;  %v1042_v34 = vpack.c.bf16 %v978_v8, %v978_v8  ;;  %v6994_v53 = vrot.slane %v6993_v50, 4 }
 0x260   : > { %5979 = vst.msk [vmem:[#allocation3 + $0x154] sm:$0xf] %vm3225_vm15, %v5816_v33  ;;  %v6059_v37 = vld [vmem:[#allocation2 + $0x130] sm:$0xf]  ;;  %v1600_v14 = vrot.slane %v14151_v61, 4  ;;  %v4801_v29 = vrot.slane %v4800_v27, 4  ;;  %v5688_v39 = vsel %vm12704_vm11, %v5686_v47, %v5687_v7 }
 0x261   : > { %7482 = vst.msk [vmem:[#allocation3 + $0x13c] sm:$0xf] %vm4286_vm4, %v7317_v15  ;;  %v4805_v56 = vrot.slane %v4803_v4, 5  ;;  %v1990_v59 = vsel %vm12593_vm3, %v1599_v58, %v1989_v16  ;;  %v6463_v25 = vld [vmem:[#allocation2 + $0x12c] sm:$0xf]  ;;  %v1602_v30 = vshrl.u32 %v1042_v34, 16  ;;  %v7323_v44 = vpop.permute.xlu2 %7322 }
 0x262   : > { %6364 = vst.msk [vmem:[#allocation3 + $0x154] sm:$0xf] %vm3901_vm2, %v6201_v1  ;;  %6230 = vrot.lane.b32.xlu0 %v6059_v37, %s12287_s11  ;;  %v6464_v31 = vld [vmem:[#allocation2 + $0x130] sm:$0xf]  ;;  %v1605_v43 = vshll.u32 %v1042_v34, 16  ;;  %v7001_v21 = vshrl.u32 %v6463_v25, 16 }
 0x263   : > { %6224 = vrot.lane.b32.xlu2 %v6056_v40, %s12287_s11  ;;  %1991 = vst [vmem:[#allocation2 + $0x150] sm:$0xf] %v1990_v59  ;;  %v4806_v60 = vsel %vm12823_vm14, %v4801_v29, %v4805_v56  ;;  %v7004_v3 = vshll.u32 %v6463_v25, 16  ;;  %v6203_v55 = vpop.permute.xlu0 %6202  ;;  %v7010_v18 = vshll.u32 %v6464_v31, 16  ;;  %v979_v19 = vmax.f32 %v14157_v17, 0.0  ;;  %v14172_v33 = vpop.f32.mrf.mxu1 }
 0x264   : > { %v11243_v28 = vld [vmem:[#allocation3 + $0x200] sm:$0xf]  ;;  %5308 = vst.msk [vmem:[#allocation3 + $0x160] sm:$0xf] %vm1055_vm1, %v4806_v60  ;;  %5845 = vrot.lane.b32.xlu1 %v5688_v39, %s12286_s26  ;;  %v11141_v20 = vld [vmem:[#allocation3 + $0x144] sm:$0xf0]  ;;  %v14174_v57 = vpop.f32.mrf.mxu2  ;;  %v6999_v40 = vsel %vm12823_vm14, %v6994_v53, %v6998_v6 }
 0x265   : > { %v11795_v42 = vld [vmem:[#allocation3 + $0x208] sm:$0xf0]  ;;  %v7003_v32 = vrot.slane %v7001_v21, 4  ;;  %v7006_v35 = vrot.slane %v7004_v3, 5  ;;  %v1604_v1 = vrot.slane %v1602_v30, 7  ;;  %v14176_v5 = vrot.slane %v7010_v18, 5  ;;  %v5818_v50 = vpop.permute.xlu1 %5817 }
 0x266   : > { %v11244_v62 = vor.u32 %v11795_v42, %v11243_v28  ;;  %v1993_v63 = vld [vmem:[#allocation2 + $0x158] sm:$0x1]  ;;  %v7014_v9 = vshrl.u32 %v6464_v31, 16  ;;  %v5409_v2 = vld [vmem:[#allocation2 + $0x12c] sm:$0xe]  ;;  %v1043_v31 = vpack.c.bf16 %v979_v19, %v979_v19 }
 0x267   : > { %v5410_v52 = vld [vmem:[#allocation2 + $0x130] sm:$0xf]  ;;  %v7007_v48 = vor.u32 %v7006_v35, %v7003_v32  ;;  %v1607_v38 = vor.u32 %v1605_v43, %v1604_v1  ;;  %v1609_v61 = vrot.slane %v1604_v1, 4  ;;  %v10939_v23 = vrot.slane %v5409_v2, 9  ;;  %v4396_v8 = vld [vmem:[#allocation2 + $0xc0] sm:$0xf] }
 0x268   : > { %11458 = vmatmul.msk.bf16.gmra.mxu3 %vm8820_vm5, %v11244_v62  ;;  %v11769_v47 = vld [vmem:[#allocation3 + $0x13c] sm:$0xf]  ;;  %5980 = vst.msk [vmem:[#allocation3 + $0x160] sm:$0xf] %vm3225_vm15, %v5818_v50  ;;  %v5691_v7 = vrot.slane %v5410_v52, 5  ;;  %v4808_v27 = vshrl.u32 %v4396_v8, 16 }
 0x269   : > { %v11144_v15 = vor.u32 %v11769_v47, %v11141_v20  ;;  %v4397_v16 = vld [vmem:[#allocation2 + $0xc4] sm:$0xf]  ;;  %6365 = vst.msk [vmem:[#allocation3 + $0x160] sm:$0xf] %vm3901_vm2, %v6203_v55  ;;  %v7008_v4 = vrot.slane %v7007_v48, 4  ;;  %v1608_v58 = vsel %vm12664_vm6, %v1600_v14, %v1607_v38  ;;  %v1994_v37 = vsel %vm12690_vm8, %v1609_v61, %v1993_v63  ;;  %v6205_v30 = vpop.permute.xlu2 %6204 }
 0x26a   : > { %v4811_v34 = vshll.u32 %v4396_v8, 16  ;;  %v7586_v17 = vld [vmem:[#allocation2 + $0x138] sm:$0xe]  ;;  %7485 = vst.msk [vmem:[#allocation3 + $0x160] sm:$0xf] %vm4286_vm4, %v7323_v44  ;;  %v5692_v6 = vsel %vm12704_vm11, %v10939_v23, %v5691_v7  ;;  %v4810_v53 = vrot.slane %v4808_v27, 4 }
 0x26b   : > { %7346 = vrot.lane.b32.xlu2 %v6999_v40, %s12288_s19  ;;  %v4817_v29 = vshll.u32 %v4397_v16, 16  ;;  %v7016_v56 = vrot.slane %v7014_v9, 4  ;;  %9159 = vmatmul.bf16.gmra.mxu2 %v11144_v15  ;;  %1992 = vst.msk [vmem:[#allocation2 + $0x154] sm:$0xf] %vm1055_vm1, %v1608_v58  ;;  %v7587_v59 = vld [vmem:[#allocation2 + $0x13c] sm:$0xf]  ;;  %v7013_v43 = vsel %vm12823_vm14, %v7008_v4, %v14176_v5  ;;  %v5820_v60 = vpop.permute.xlu0 %5819  ;;  %v902_v1 = vpop.f32.mrf.mxu1  ;;  %v900_v58 = vadd.f32 %v14096_v24, %v14172_v33 }
 0x26c   : > { %5847 = vrot.lane.b32.xlu0 %v5692_v6, %s12286_s26  ;;  %v4813_v14 = vrot.slane %v4811_v34, 5  ;;  %v10971_v25 = vrot.slane %v7586_v17, 9  ;;  %1995 = vst [vmem:[#allocation2 + $0x158] sm:$0x1] %v1994_v37  ;;  %v4821_v28 = vshrl.u32 %v4397_v16, 16  ;;  %v7868_v3 = vrot.slane %v7587_v59, 5  ;;  %7348 = vrot.lane.b32.xlu1 %v7013_v43, %s12288_s19 }
 0x26d   : > { %v7588_v21 = vld [vmem:[#allocation2 + $0x140] sm:$0x1]  ;;  %v4819_v42 = vrot.slane %v4817_v29, 5  ;;  %v6465_v55 = vld [vmem:[#allocation2 + $0x134] sm:$0x1]  ;;  %v14197_v62 = vpop.f32.mrf.mxu2  ;;  %v7017_v32 = vor.u32 %v7016_v56, %v14176_v5  ;;  %v7321_v9 = vpop.permute.xlu1 %7320  ;;  %v5693_v52 = vrot.slane %v5691_v7, 4 }
 0x26e   : > { %v4814_v44 = vor.u32 %v4813_v14, %v4810_v53  ;;  %v7871_v39 = vrot.slane %v7588_v21, 5  ;;  %v5411_v18 = vld [vmem:[#allocation2 + $0x134] sm:$0x1]  ;;  %v7869_v19 = vsel %vm12704_vm11, %v10971_v25, %v7868_v3  ;;  %v7870_v20 = vrot.slane %v7868_v3, 4  ;;  %v6058_v63 = vld [vmem:[#allocation2 + $0x12c] sm:$0xf] }
 0x26f   : > { %v7020_v35 = vshll.u32 %v6465_v55, 16  ;;  %8044 = vst.msk [vmem:[#allocation3 + $0x218] sm:$0xf] %vm1055_vm1, %v7869_v19  ;;  %v1611_v50 = vshrl.u32 %v1043_v31, 16  ;;  %v1614_v47 = vshll.u32 %v1043_v31, 16  ;;  %v5694_v38 = vrot.slane %v5411_v18, 5 }
 0x270   : > { %v4815_v2 = vrot.slane %v4814_v44, 4  ;;  %7484 = vst.msk [vmem:[#allocation3 + $0x154] sm:$0xf] %vm4286_vm4, %v7321_v9  ;;  %v7872_v48 = vsel %vm12704_vm11, %v7870_v20, %v7871_v39  ;;  %v4398_v61 = vld [vmem:[#allocation2 + $0xc8] sm:$0x1]  ;;  %v4823_v23 = vrot.slane %v4821_v28, 4  ;;  %v903_v39 = vadd.f32 %v14096_v24, %v902_v1 }
 0x271   : > { %8045 = vst.msk [vmem:[#allocation3 + $0x224] sm:$0xf] %vm1055_vm1, %v7872_v48  ;;  %v14209_v8 = vrot.slane %v1611_v50, 7  ;;  %v1996_v40 = vld [vmem:[#allocation2 + $0x15c] sm:$0xf]  ;;  %v4827_v15 = vshll.u32 %v4398_v61, 16  ;;  %v7327_v53 = vpop.permute.xlu2 %7326  ;;  %v5695_v29 = vsel %vm12704_vm11, %v5693_v52, %v5694_v38 }
 0x272   : > { %v4820_v5 = vsel %vm12823_vm14, %v4815_v2, %v4819_v42  ;;  %v7018_v7 = vrot.slane %v7017_v32, 4  ;;  %v7022_v16 = vrot.slane %v7020_v35, 5  ;;  %v4824_v27 = vor.u32 %v4823_v23, %v4819_v42  ;;  %v6061_v4 = vld [vmem:[#allocation2 + $0x13c] sm:$0xf]  ;;  %v6466_v6 = vld [vmem:[#allocation2 + $0x138] sm:$0xf] }
 0x273   : > { %6228 = vrot.lane.b32.xlu2 %v6058_v63, %s12287_s11  ;;  %5309 = vst.msk [vmem:[#allocation3 + $0x16c] sm:$0xf] %vm1055_vm1, %v4820_v5  ;;  %v1616_v37 = vor.u32 %v1614_v47, %v14209_v8  ;;  %v1617_v34 = vrot.slane %v14209_v8, 4  ;;  %v4829_v17 = vrot.slane %v4827_v15, 5  ;;  %v6207_v14 = vpop.permute.xlu0 %6206  ;;  %v6467_v59 = vld [vmem:[#allocation2 + $0x13c] sm:$0xf]  ;;  %v904_v55 = vpop.f32.mrf.mxu1 }
 0x274   : > { %5981 = vst.msk [vmem:[#allocation3 + $0x16c] sm:$0xf] %vm3225_vm15, %v5820_v60  ;;  %6234 = vrot.lane.b32.xlu0 %v6061_v4, %s12287_s11  ;;  %v4825_v56 = vrot.slane %v4824_v27, 4  ;;  %v7025_v33 = vshrl.u32 %v6466_v6, 16  ;;  %5849 = vrot.lane.b32.xlu1 %v5695_v29, %s12286_s26  ;;  %v11153_v31 = vld [vmem:[#allocation3 + $0x15c] sm:$0xf0]  ;;  %v14232_v35 = vadd.f32 %v14096_v24, %v904_v55  ;;  %v7023_v9 = vsel %vm12823_vm14, %v7018_v7, %v7022_v16 }
 0x275   : > { %6366 = vst.msk [vmem:[#allocation3 + $0x16c] sm:$0xf] %vm3901_vm2, %v6205_v30  ;;  %v1997_v25 = vsel %vm12593_vm3, %v1616_v37, %v1996_v40  ;;  %v7028_v43 = vshll.u32 %v6466_v6, 16  ;;  %v7034_v28 = vshll.u32 %v6467_v59, 16  ;;  %v7038_v60 = vshrl.u32 %v6467_v59, 16  ;;  %v14225_v3 = vpop.f32.mrf.mxu2  ;;  %v5822_v18 = vpop.permute.xlu1 %5821 }
 0x276   : > { %v11255_v21 = vld [vmem:[#allocation3 + $0x218] sm:$0xf]  ;;  %1998 = vst [vmem:[#allocation2 + $0x15c] sm:$0xf] %v1997_v25  ;;  %v4830_v30 = vsel %vm12823_vm14, %v4825_v56, %v4829_v17  ;;  %v7027_v44 = vrot.slane %v7025_v33, 4  ;;  %v980_v42 = vmax.f32 %v900_v58, 0.0 }
 0x277   : > { %5310 = vst.msk [vmem:[#allocation3 + $0x178] sm:$0xf] %vm1055_vm1, %v4830_v30  ;;  %v11772_v19 = vld [vmem:[#allocation3 + $0x154] sm:$0xf]  ;;  %v7030_v20 = vrot.slane %v7028_v43, 5  ;;  %v7036_v32 = vrot.slane %v7034_v28, 5 }
 0x278   : > { %v11798_v63 = vld [vmem:[#allocation3 + $0x220] sm:$0xf0]  ;;  %5982 = vst.msk [vmem:[#allocation3 + $0x178] sm:$0xf] %vm3225_vm15, %v5822_v18  ;;  %v11156_v2 = vor.u32 %v11772_v19, %v11153_v31  ;;  %v1044_v52 = vpack.c.bf16 %v980_v42, %v980_v42  ;;  %v5412_v50 = vld [vmem:[#allocation2 + $0x138] sm:$0xe] }
 0x279   : > { %v11256_v1 = vor.u32 %v11798_v63, %v11255_v21  ;;  %6367 = vst.msk [vmem:[#allocation3 + $0x178] sm:$0xf] %vm3901_vm2, %v6207_v14  ;;  %v7031_v47 = vor.u32 %v7030_v20, %v7027_v44  ;;  %v5413_v48 = vld [vmem:[#allocation2 + $0x13c] sm:$0xf]  ;;  %v10940_v38 = vrot.slane %v5412_v50, 9  ;;  %v7040_v61 = vrot.slane %v7038_v60, 4 }
 0x27a   : > { %7487 = vst.msk [vmem:[#allocation3 + $0x178] sm:$0xf] %vm4286_vm4, %v7327_v53  ;;  %v1619_v23 = vshrl.u32 %v1044_v52, 16  ;;  %v1622_v5 = vshll.u32 %v1044_v52, 16  ;;  %v5698_v40 = vrot.slane %v5413_v48, 5  ;;  %v981_v15 = vmax.f32 %v903_v39, 0.0  ;;  %v14242_v17 = vpop.permute.xlu2 %6208 }
 0x27b   : > { %7350 = vrot.lane.b32.xlu2 %v7023_v9, %s12288_s19  ;;  %11459 = vmatmul.msk.bf16.gmra.mxu3 %vm8820_vm5, %v11256_v1  ;;  %v7032_v7 = vrot.slane %v7031_v47, 4  ;;  %v2000_v16 = vld [vmem:[#allocation2 + $0x164] sm:$0x1]  ;;  %v4400_v4 = vld [vmem:[#allocation2 + $0xe8] sm:$0xf]  ;;  %v7041_v58 = vor.u32 %v7040_v61, %v7036_v32  ;;  %v982_v37 = vmax.f32 %v14232_v35, 0.0  ;;  %v5824_v14 = vpop.permute.xlu0 %5823 }
 0x27c   : > { %9164 = vmatmul.bf16.gmra.mxu2 %v11156_v2  ;;  %v4399_v27 = vld [vmem:[#allocation2 + $0xe4] sm:$0xf]  ;;  %v1621_v6 = vrot.slane %v1619_v23, 7  ;;  %v5699_v53 = vsel %vm12704_vm11, %v10940_v38, %v5698_v40  ;;  %v4841_v25 = vshll.u32 %v4400_v4, 16  ;;  %v4845_v31 = vshrl.u32 %v4400_v4, 16 }
 0x27d   : > { %v4832_v29 = vshrl.u32 %v4399_v27, 16  ;;  %v4835_v56 = vshll.u32 %v4399_v27, 16  ;;  %v7589_v59 = vld [vmem:[#allocation2 + $0x144] sm:$0xe]  ;;  %v7037_v33 = vsel %vm12823_vm14, %v7032_v7, %v7036_v32  ;;  %5851 = vrot.lane.b32.xlu0 %v5699_v53, %s12286_s26  ;;  %v7590_v43 = vld [vmem:[#allocation2 + $0x148] sm:$0xf]  ;;  %v1045_v60 = vpack.c.bf16 %v981_v15, %v981_v15  ;;  %v14250_v21 = vpop.f32.mrf.mxu2  ;;  %v7325_v18 = vpop.permute.xlu1 %7324 }
 0x27e   : > { %v7591_v28 = vld [vmem:[#allocation2 + $0x14c] sm:$0x1]  ;;  %7352 = vrot.lane.b32.xlu1 %v7037_v33, %s12288_s19  ;;  %v1624_v30 = vor.u32 %v1622_v5, %v1621_v6  ;;  %v1626_v44 = vrot.slane %v1621_v6, 4  ;;  %v6468_v55 = vld [vmem:[#allocation2 + $0x140] sm:$0x1]  ;;  %v4843_v19 = vrot.slane %v4841_v25, 5 }
 0x27f   : > { %v4834_v42 = vrot.slane %v4832_v29, 4  ;;  %v4837_v39 = vrot.slane %v4835_v56, 5  ;;  %v10972_v20 = vrot.slane %v7589_v59, 9  ;;  %v7875_v32 = vrot.slane %v7590_v43, 5  ;;  %v5414_v63 = vld [vmem:[#allocation2 + $0x140] sm:$0x1]  ;;  %v907_v43 = vpop.f32.mrf.mxu1 }
 0x280   : > { %v7878_v35 = vrot.slane %v7591_v28, 5  ;;  %v6060_v9 = vld [vmem:[#allocation2 + $0x138] sm:$0xf]  ;;  %v1625_v2 = vsel %vm12664_vm6, %v1617_v34, %v1624_v30  ;;  %v2001_v52 = vsel %vm12690_vm8, %v1626_v44, %v2000_v16  ;;  %7486 = vst.msk [vmem:[#allocation3 + $0x16c] sm:$0xf] %vm4286_vm4, %v7325_v18  ;;  %v7042_v1 = vrot.slane %v7041_v58, 4 }
 0x281   : > { %v4838_v50 = vor.u32 %v4837_v39, %v4834_v42  ;;  %1999 = vst.msk [vmem:[#allocation2 + $0x160] sm:$0xf] %vm1055_vm1, %v1625_v2  ;;  %v7876_v47 = vsel %vm12704_vm11, %v10972_v20, %v7875_v32  ;;  %v7877_v48 = vrot.slane %v7875_v32, 4  ;;  %v7044_v38 = vshll.u32 %v6468_v55, 16  ;;  %v4401_v16 = vld [vmem:[#allocation2 + $0xec] sm:$0x1] }
 0x282   : > { %v5700_v61 = vrot.slane %v5698_v40, 4  ;;  %2002 = vst [vmem:[#allocation2 + $0x164] sm:$0x1] %v2001_v52  ;;  %v5701_v34 = vrot.slane %v5414_v63, 5  ;;  %v1628_v23 = vshrl.u32 %v1045_v60, 16  ;;  %v1631_v5 = vshll.u32 %v1045_v60, 16  ;;  %v7331_v4 = vpop.permute.xlu2 %7330 }
 0x283   : > { %6232 = vrot.lane.b32.xlu2 %v6060_v9, %s12287_s11  ;;  %v4839_v8 = vrot.slane %v4838_v50, 4  ;;  %v7879_v15 = vsel %vm12704_vm11, %v7877_v48, %v7878_v35  ;;  %8046 = vst.msk [vmem:[#allocation3 + $0x230] sm:$0xf] %vm1055_vm1, %v7876_v47  ;;  %v7046_v7 = vrot.slane %v7044_v38, 5  ;;  %v4847_v27 = vrot.slane %v4845_v31, 4  ;;  %v6211_v29 = vpop.permute.xlu0 %6210 }
 0x284   : > { %8047 = vst.msk [vmem:[#allocation3 + $0x23c] sm:$0xf] %vm1055_vm1, %v7879_v15  ;;  %v14269_v40 = vrot.slane %v1628_v23, 7  ;;  %v4851_v6 = vshll.u32 %v4401_v16, 16  ;;  %v6063_v53 = vld [vmem:[#allocation2 + $0x148] sm:$0xf]  ;;  %v1046_v56 = vpack.c.bf16 %v982_v37, %v982_v37  ;;  %v5702_v59 = vsel %vm12704_vm11, %v5700_v61, %v5701_v34 }
 0x285   : > { %v4844_v58 = vsel %vm12823_vm14, %v4839_v8, %v4843_v19  ;;  %v2003_v33 = vld [vmem:[#allocation2 + $0x168] sm:$0xf]  ;;  %v4848_v25 = vor.u32 %v4847_v27, %v4843_v19  ;;  %6238 = vrot.lane.b32.xlu0 %v6063_v53, %s12287_s11  ;;  %v14277_v28 = vpop.f32.mrf.mxu2  ;;  %v6469_v44 = vld [vmem:[#allocation2 + $0x144] sm:$0xf]  ;;  %v7047_v42 = vsel %vm12823_vm14, %v7042_v1, %v7046_v7  ;;  %v5826_v55 = vpop.permute.xlu1 %5825  ;;  %v14286_v19 = vadd.f32 %v14096_v24, %v907_v43  ;;  %v2007_v1 = vld [vmem:[#allocation2 + $0x170] sm:$0x1] }
 0x286   : > { %5311 = vst.msk [vmem:[#allocation3 + $0x184] sm:$0xf] %vm1055_vm1, %v4844_v58  ;;  %v11165_v31 = vld [vmem:[#allocation3 + $0x174] sm:$0xf0]  ;;  %5853 = vrot.lane.b32.xlu1 %v5702_v59, %s12286_s26  ;;  %v1633_v60 = vor.u32 %v1631_v5, %v14269_v40  ;;  %v1634_v37 = vrot.slane %v14269_v40, 4  ;;  %v4853_v30 = vrot.slane %v4851_v6, 5 }
 0x287   : > { %5983 = vst.msk [vmem:[#allocation3 + $0x184] sm:$0xf] %vm3225_vm15, %v5824_v14  ;;  %v4849_v39 = vrot.slane %v4848_v25, 4  ;;  %v11775_v18 = vld [vmem:[#allocation3 + $0x16c] sm:$0xf]  ;;  %v7049_v14 = vshrl.u32 %v6469_v44, 16 }
 0x288   : > { %6368 = vst.msk [vmem:[#allocation3 + $0x184] sm:$0xf] %vm3901_vm2, %v14242_v17  ;;  %v2004_v20 = vsel %vm12593_vm3, %v1633_v60, %v2003_v33  ;;  %v11168_v32 = vor.u32 %v11775_v18, %v11165_v31  ;;  %v6470_v35 = vld [vmem:[#allocation2 + $0x148] sm:$0xf]  ;;  %v7052_v63 = vshll.u32 %v6469_v44, 16  ;;  %v1636_v9 = vshrl.u32 %v1046_v56, 16  ;;  %v14302_v33 = vpop.f32.mrf.mxu1 }
 0x289   : > { %2005 = vst [vmem:[#allocation2 + $0x168] sm:$0xf] %v2004_v20  ;;  %v4854_v17 = vsel %vm12823_vm14, %v4849_v39, %v4853_v30  ;;  %v7051_v2 = vrot.slane %v7049_v14, 4  ;;  %v7058_v52 = vshll.u32 %v6470_v35, 16  ;;  %v7062_v50 = vshrl.u32 %v6470_v35, 16 }
 0x28a   : > { %v11267_v47 = vld [vmem:[#allocation3 + $0x230] sm:$0xf]  ;;  %5312 = vst.msk [vmem:[#allocation3 + $0x190] sm:$0xf] %vm1055_vm1, %v4854_v17  ;;  %v7054_v48 = vrot.slane %v7052_v63, 5  ;;  %v1638_v38 = vrot.slane %v1636_v9, 7 }
 0x28b   : > { %7354 = vrot.lane.b32.xlu2 %v7047_v42, %s12288_s19  ;;  %v11801_v61 = vld [vmem:[#allocation3 + $0x238] sm:$0xf0]  ;;  %5984 = vst.msk [vmem:[#allocation3 + $0x190] sm:$0xf] %vm3225_vm15, %v5826_v55  ;;  %v7060_v8 = vrot.slane %v7058_v52, 5  ;;  %v1639_v34 = vshll.u32 %v1046_v56, 16  ;;  %v14298_v27 = vpop.permute.xlu0 %5827 }
 0x28c   : > { %9169 = vmatmul.bf16.gmra.mxu2 %v11168_v32  ;;  %v11268_v23 = vor.u32 %v11801_v61, %v11267_v47  ;;  %6369 = vst.msk [vmem:[#allocation3 + $0x190] sm:$0xf] %vm3901_vm2, %v6211_v29  ;;  %v7055_v15 = vor.u32 %v7054_v48, %v7051_v2  ;;  %v1643_v7 = vrot.slane %v1638_v38, 4  ;;  %v5415_v16 = vld [vmem:[#allocation2 + $0x144] sm:$0xe]  ;;  %v7064_v58 = vrot.slane %v7062_v50, 4 }
 0x28d   : > { %v14295_v5 = vpop.permute.xlu2 %6212  ;;  %7489 = vst.msk [vmem:[#allocation3 + $0x190] sm:$0xf] %vm4286_vm4, %v7331_v4  ;;  %v1641_v40 = vor.u32 %v1639_v34, %v1638_v38  ;;  %v5416_v6 = vld [vmem:[#allocation2 + $0x148] sm:$0xf]  ;;  %v10941_v53 = vrot.slane %v5415_v16, 9  ;;  %v983_v59 = vmax.f32 %v14286_v19, 0.0  ;;  %v14305_v25 = vpop.f32.mrf.mxu2 }
 0x28e   : > { %11460 = vmatmul.msk.bf16.gmra.mxu3 %vm8820_vm5, %v11268_v23  ;;  %v7056_v56 = vrot.slane %v7055_v15, 4  ;;  %v2008_v29 = vsel %vm12690_vm8, %v1643_v7, %v2007_v1  ;;  %v5705_v31 = vrot.slane %v5416_v6, 5  ;;  %v4402_v43 = vld [vmem:[#allocation2 + $0xf0] sm:$0xf]  ;;  %v4403_v60 = vld [vmem:[#allocation2 + $0xf4] sm:$0xf]  ;;  %v7065_v30 = vor.u32 %v7064_v58, %v7060_v8  ;;  %v7329_v42 = vpop.permute.xlu1 %7328 }
 0x28f   : > { %v6062_v4 = vld [vmem:[#allocation2 + $0x144] sm:$0xf]  ;;  %v1642_v44 = vsel %vm12664_vm6, %v1634_v37, %v1641_v40  ;;  %2009 = vst [vmem:[#allocation2 + $0x170] sm:$0x1] %v2008_v29  ;;  %v4856_v39 = vshrl.u32 %v4402_v43, 16  ;;  %v4859_v55 = vshll.u32 %v4402_v43, 16  ;;  %v1047_v1 = vpack.c.bf16 %v983_v59, %v983_v59 }
 0x290   : > { %v4865_v18 = vshll.u32 %v4403_v60, 16  ;;  %v7061_v14 = vsel %vm12823_vm14, %v7056_v56, %v7060_v8  ;;  %2006 = vst.msk [vmem:[#allocation2 + $0x16c] sm:$0xf] %vm1055_vm1, %v1642_v44  ;;  %v5706_v19 = vsel %vm12704_vm11, %v10941_v53, %v5705_v31  ;;  %v4869_v20 = vshrl.u32 %v4403_v60, 16  ;;  %v7592_v32 = vld [vmem:[#allocation2 + $0x150] sm:$0xe]  ;;  %v912_v29 = vpop.f32.mrf.mxu1 }
 0x291   : > { %v7066_v35 = vrot.slane %v7065_v30, 4  ;;  %7356 = vrot.lane.b32.xlu1 %v7061_v14, %s12288_s19  ;;  %7488 = vst.msk [vmem:[#allocation3 + $0x184] sm:$0xf] %vm4286_vm4, %v7329_v42  ;;  %5855 = vrot.lane.b32.xlu0 %v5706_v19, %s12286_s26  ;;  %v4858_v37 = vrot.slane %v4856_v39, 4  ;;  %v4861_v63 = vrot.slane %v4859_v55, 5  ;;  %v10973_v17 = vrot.slane %v7592_v32, 9 }
 0x292   : > { %v4867_v9 = vrot.slane %v4865_v18, 5  ;;  %v7593_v2 = vld [vmem:[#allocation2 + $0x154] sm:$0xf]  ;;  %v7594_v52 = vld [vmem:[#allocation2 + $0x158] sm:$0x1]  ;;  %v5707_v23 = vrot.slane %v5705_v31, 4  ;;  %v910_v19 = vadd.f32 %v14096_v24, %v14302_v33 }
 0x293   : > { %6236 = vrot.lane.b32.xlu2 %v6062_v4, %s12287_s11  ;;  %v6471_v50 = vld [vmem:[#allocation2 + $0x14c] sm:$0x1]  ;;  %v4862_v47 = vor.u32 %v4861_v63, %v4858_v37  ;;  %v7882_v48 = vrot.slane %v7593_v2, 5  ;;  %v7885_v38 = vrot.slane %v7594_v52, 5  ;;  %v1645_v7 = vshrl.u32 %v1047_v1, 16  ;;  %v14322_v58 = vpop.permute.xlu0 %6214  ;;  %v11833_v4 = vld [vmem:[%s16673_s3 + $0x38] sm:$0xff] }
 0x294   : > { %v7068_v61 = vshll.u32 %v6471_v50, 16  ;;  %v5417_v8 = vld [vmem:[#allocation2 + $0x14c] sm:$0x1]  ;;  %v1648_v16 = vshll.u32 %v1047_v1, 16  ;;  %v4404_v59 = vld [vmem:[#allocation2 + $0xf8] sm:$0x1]  ;;  %8917 = vmatpush.bf16.msrb.mxu1 %v11833_v4 }
 0x295   : > { %v14320_v34 = vpop.permute.xlu2 %7334  ;;  %v5708_v15 = vrot.slane %v5417_v8, 5  ;;  %v4863_v40 = vrot.slane %v4862_v47, 4  ;;  %v7883_v6 = vsel %vm12704_vm11, %v10973_v17, %v7882_v48  ;;  %v7884_v53 = vrot.slane %v7882_v48, 4  ;;  %v14327_v43 = vpop.f32.mrf.mxu2  ;;  %v2010_v39 = vld [vmem:[#allocation2 + $0x174] sm:$0xf] }
 0x296   : > { %v7070_v56 = vrot.slane %v7068_v61, 5  ;;  %8048 = vst.msk [vmem:[#allocation3 + $0x248] sm:$0xf] %vm1055_vm1, %v7883_v6  ;;  %v14329_v60 = vrot.slane %v1645_v7, 7  ;;  %v4871_v31 = vrot.slane %v4869_v20, 4  ;;  %v4875_v30 = vshll.u32 %v4404_v59, 16  ;;  %v5830_v55 = vpop.permute.xlu1 %5829 }
 0x297   : > { %v4868_v44 = vsel %vm12823_vm14, %v4863_v40, %v4867_v9  ;;  %v5709_v42 = vsel %vm12704_vm11, %v5707_v23, %v5708_v15  ;;  %v6065_v18 = vld [vmem:[#allocation2 + $0x154] sm:$0xf]  ;;  %v11177_v14 = vld [vmem:[#allocation3 + $0x18c] sm:$0xf0]  ;;  %v913_v20 = vadd.f32 %v14096_v24, %v912_v29  ;;  %v7886_v32 = vsel %vm12704_vm11, %v7884_v53, %v7885_v38  ;;  %v6472_v33 = vld [vmem:[#allocation2 + $0x150] sm:$0xf] }
 0x298   : > { %5313 = vst.msk [vmem:[#allocation3 + $0x19c] sm:$0xf] %vm1055_vm1, %v4868_v44  ;;  %v1650_v37 = vor.u32 %v1648_v16, %v14329_v60  ;;  %v4872_v63 = vor.u32 %v4871_v31, %v4867_v9  ;;  %v4877_v17 = vrot.slane %v4875_v30, 5  ;;  %v11778_v2 = vld [vmem:[#allocation3 + $0x184] sm:$0xf]  ;;  %v7071_v52 = vsel %vm12823_vm14, %v7066_v35, %v7070_v56  ;;  %v914_v53 = vpop.f32.mrf.mxu1 }
 0x299   : > { %5985 = vst.msk [vmem:[#allocation3 + $0x19c] sm:$0xf] %vm3225_vm15, %v14298_v27  ;;  %5857 = vrot.lane.b32.xlu1 %v5709_v42, %s12286_s26  ;;  %6242 = vrot.lane.b32.xlu0 %v6065_v18, %s12287_s11  ;;  %v11180_v24 = vor.u32 %v11778_v2, %v11177_v14  ;;  %v6473_v50 = vld [vmem:[#allocation2 + $0x154] sm:$0xf]  ;;  %v7073_v27 = vshrl.u32 %v6472_v33, 16  ;;  %v7076_v47 = vshll.u32 %v6472_v33, 16 }
 0x29a   : > { %6370 = vst.msk [vmem:[#allocation3 + $0x19c] sm:$0xf] %vm3901_vm2, %v14295_v5  ;;  %v2011_v9 = vsel %vm12593_vm3, %v1650_v37, %v2010_v39  ;;  %v4873_v1 = vrot.slane %v4872_v63, 4  ;;  %v7082_v35 = vshll.u32 %v6473_v50, 16  ;;  %v7086_v48 = vshrl.u32 %v6473_v50, 16 }
 0x29b   : > { %7358 = vrot.lane.b32.xlu2 %v7071_v52, %s12288_s19  ;;  %8049 = vst.msk [vmem:[#allocation3 + $0x254] sm:$0xf] %vm1055_vm1, %v7886_v32  ;;  %v984_v38 = vmax.f32 %v910_v19, 0.0  ;;  %v985_v61 = vmax.f32 %v913_v20, 0.0  ;;  %v7075_v23 = vrot.slane %v7073_v27, 4  ;;  %v7078_v15 = vrot.slane %v7076_v47, 5  ;;  %v14361_v7 = vpop.permute.xlu0 %5831 }
 0x29c   : > { %9174 = vmatmul.bf16.gmra.mxu2 %v11180_v24  ;;  %2012 = vst [vmem:[#allocation2 + $0x174] sm:$0xf] %v2011_v9  ;;  %v4878_v5 = vsel %vm12823_vm14, %v4873_v1, %v4877_v17  ;;  %v7084_v16 = vrot.slane %v7082_v35, 5  ;;  %v7088_v6 = vrot.slane %v7086_v48, 4  ;;  %v5418_v31 = vld [vmem:[#allocation2 + $0x150] sm:$0xe] }
 0x29d   : > { %v14357_v8 = vpop.permute.xlu2 %6216  ;;  %5314 = vst.msk [vmem:[#allocation3 + $0x1a8] sm:$0xf] %vm1055_vm1, %v4878_v5  ;;  %v1048_v40 = vpack.c.bf16 %v984_v38, %v984_v38  ;;  %v11279_v56 = vld [vmem:[#allocation3 + $0x248] sm:$0xf]  ;;  %v7079_v59 = vor.u32 %v7078_v15, %v7075_v23  ;;  %v14365_v29 = vpop.f32.mrf.mxu2  ;;  %v5419_v30 = vld [vmem:[#allocation2 + $0x154] sm:$0xf]  ;;  %v14367_v4 = vpack.c.bf16 %v985_v61, %v985_v61 }
 0x29e   : > { %5986 = vst.msk [vmem:[#allocation3 + $0x1a8] sm:$0xf] %vm3225_vm15, %v5830_v55  ;;  %v6064_v44 = vld [vmem:[#allocation2 + $0x150] sm:$0xf]  ;;  %v7333_v18 = vpop.permute.xlu1 %7332  ;;  %v10942_v14 = vrot.slane %v5418_v31, 9  ;;  %v5712_v19 = vrot.slane %v5419_v30, 5 }
 0x29f   : > { %6371 = vst.msk [vmem:[#allocation3 + $0x1a8] sm:$0xf] %vm3901_vm2, %v14322_v58  ;;  %v1653_v42 = vshrl.u32 %v1048_v40, 16  ;;  %v1656_v39 = vshll.u32 %v1048_v40, 16  ;;  %v1651_v20 = vrot.slane %v14329_v60, 4  ;;  %v7080_v55 = vrot.slane %v7079_v59, 4 }
 0x2a0   : > { %7491 = vst.msk [vmem:[#allocation3 + $0x1a8] sm:$0xf] %vm4286_vm4, %v14320_v34  ;;  %v2014_v32 = vld [vmem:[#allocation2 + $0x17c] sm:$0x1]  ;;  %v14377_v63 = vld [vmem:[%s16676_s6] ss:$0 sm:$0xff]  ;;  %v5713_v60 = vsel %vm12704_vm11, %v10942_v14, %v5712_v19  ;;  %v7089_v34 = vor.u32 %v7088_v6, %v7084_v16 }
 0x2a1   : > { %v4405_v37 = vld [vmem:[#allocation2 + $0xfc] sm:$0xf]  ;;  %v14380_v58 = vadd.f32 %v14377_v63, %v914_v53  ;;  %v1655_v17 = vrot.slane %v1653_v42, 7  ;;  %7490 = vst.msk [vmem:[#allocation3 + $0x19c] sm:$0xf] %vm4286_vm4, %v7333_v18  ;;  %v7085_v33 = vsel %vm12823_vm14, %v7080_v55, %v7084_v16  ;;  %5859 = vrot.lane.b32.xlu0 %v5713_v60, %s12286_s26  ;;  %v1662_v1 = vshrl.u32 %v14367_v4, 16 }
 0x2a2   : > { %v4406_v2 = vld [vmem:[#allocation2 + $0x100] sm:$0xf]  ;;  %v4880_v52 = vshrl.u32 %v4405_v37, 16  ;;  %v11804_v24 = vld [vmem:[#allocation3 + $0x250] sm:$0xf0]  ;;  %v4883_v50 = vshll.u32 %v4405_v37, 16  ;;  %7360 = vrot.lane.b32.xlu1 %v7085_v33, %s12288_s19  ;;  %v917_v33 = vpop.f32.mrf.mxu1 }
 0x2a3   : > { %6240 = vrot.lane.b32.xlu2 %v6064_v44, %s12287_s11  ;;  %v4889_v9 = vshll.u32 %v4406_v2, 16  ;;  %v11280_v27 = vor.u32 %v11804_v24, %v11279_v56  ;;  %v1658_v47 = vor.u32 %v1656_v39, %v1655_v17  ;;  %v1660_v35 = vrot.slane %v1655_v17, 4  ;;  %v7595_v38 = vld [vmem:[#allocation2 + $0x15c] sm:$0xe]  ;;  %v7596_v40 = vld [vmem:[#allocation2 + $0x160] sm:$0xf] }
 0x2a4   : > { %v4882_v48 = vrot.slane %v4880_v52, 4  ;;  %v4885_v5 = vrot.slane %v4883_v50, 5  ;;  %v4893_v15 = vshrl.u32 %v4406_v2, 16  ;;  %v10974_v16 = vrot.slane %v7595_v38, 9  ;;  %v14393_v6 = vpop.permute.xlu0 %6218  ;;  %v7597_v59 = vld [vmem:[#allocation2 + $0x164] sm:$0x1] }
 0x2a5   : > { %v14391_v61 = vpop.permute.xlu2 %7338  ;;  %v4891_v23 = vrot.slane %v4889_v9, 5  ;;  %11461 = vmatmul.msk.bf16.gmra.mxu3 %vm8820_vm5, %v11280_v27  ;;  %v1659_v53 = vsel %vm12664_vm6, %v1651_v20, %v1658_v47  ;;  %v2015_v56 = vsel %vm12690_vm8, %v1660_v35, %v2014_v32  ;;  %v7889_v31 = vrot.slane %v7596_v40, 5  ;;  %v6474_v30 = vld [vmem:[#allocation2 + $0x158] sm:$0x1]  ;;  %v14401_v55 = vpop.f32.mrf.mxu2  ;;  %v2017_v9 = vld [vmem:[#allocation2 + $0x180] sm:$0xf] }
 0x2a6   : > { %v7090_v44 = vrot.slane %v7089_v34, 4  ;;  %2013 = vst.msk [vmem:[#allocation2 + $0x178] sm:$0xf] %vm1055_vm1, %v1659_v53  ;;  %v4886_v42 = vor.u32 %v4885_v5, %v4882_v48  ;;  %v7892_v39 = vrot.slane %v7597_v59, 5  ;;  %v7092_v18 = vshll.u32 %v6474_v30, 16  ;;  %v5834_v32 = vpop.permute.xlu1 %5833 }
 0x2a7   : > { %v5420_v14 = vld [vmem:[#allocation2 + $0x158] sm:$0x1]  ;;  %2016 = vst [vmem:[#allocation2 + $0x17c] sm:$0x1] %v2015_v56  ;;  %v7890_v37 = vsel %vm12704_vm11, %v10974_v16, %v7889_v31  ;;  %v7891_v20 = vrot.slane %v7889_v31, 4  ;;  %v5714_v17 = vrot.slane %v5712_v19, 4  ;;  %v14433_v31 = vadd.f32 %v14377_v63, %v917_v33 }
 0x2a8   : > { %v5715_v60 = vrot.slane %v5420_v14, 5  ;;  %v4887_v2 = vrot.slane %v4886_v42, 4  ;;  %8050 = vst.msk [vmem:[#allocation3 + $0x260] sm:$0xf] %vm1055_vm1, %v7890_v37  ;;  %v7094_v52 = vrot.slane %v7092_v18, 5  ;;  %v14406_v34 = vrot.slane %v1662_v1, 7 }
 0x2a9   : > { %v1665_v24 = vshll.u32 %v14367_v4, 16  ;;  %v7893_v50 = vsel %vm12704_vm11, %v7891_v20, %v7892_v39  ;;  %v4407_v27 = vld [vmem:[#allocation2 + $0x104] sm:$0x1]  ;;  %v4895_v47 = vrot.slane %v4893_v15, 4  ;;  %v986_v35 = vmax.f32 %v14380_v58, 0.0 }
 0x2aa   : > { %v4892_v19 = vsel %vm12823_vm14, %v4887_v2, %v4891_v23  ;;  %8051 = vst.msk [vmem:[#allocation3 + $0x26c] sm:$0xf] %vm1055_vm1, %v7893_v50  ;;  %v7095_v1 = vsel %vm12823_vm14, %v7090_v44, %v7094_v52  ;;  %v5716_v4 = vsel %vm12704_vm11, %v5714_v17, %v5715_v60  ;;  %v6067_v38 = vld [vmem:[#allocation2 + $0x160] sm:$0xf]  ;;  %v4899_v5 = vshll.u32 %v4407_v27, 16 }
 0x2ab   : > { %v1667_v48 = vor.u32 %v1665_v24, %v14406_v34  ;;  %5315 = vst.msk [vmem:[#allocation3 + $0x1b4] sm:$0xf] %vm1055_vm1, %v4892_v19  ;;  %7362 = vrot.lane.b32.xlu2 %v7095_v1, %s12288_s19  ;;  %5861 = vrot.lane.b32.xlu1 %v5716_v4, %s12286_s26  ;;  %v4896_v58 = vor.u32 %v4895_v47, %v4891_v23  ;;  %v11781_v15 = vld [vmem:[#allocation3 + $0x19c] sm:$0xf]  ;;  %v11189_v53 = vld [vmem:[#allocation3 + $0x1a4] sm:$0xf0]  ;;  %v14445_v47 = vpop.f32.mrf.mxu1 }
 0x2ac   : > { %5987 = vst.msk [vmem:[#allocation3 + $0x1b4] sm:$0xf] %vm3225_vm15, %v14361_v7  ;;  %6246 = vrot.lane.b32.xlu0 %v6067_v38, %s12287_s11  ;;  %v1050_v56 = vpack.c.bf16 %v986_v35, %v986_v35  ;;  %v14430_v59 = vpop.permute.xlu0 %5835  ;;  %v1668_v23 = vrot.slane %v14406_v34, 4  ;;  %v4901_v30 = vrot.slane %v4899_v5, 5  ;;  %v11192_v44 = vor.u32 %v11781_v15, %v11189_v53  ;;  %v6475_v42 = vld [vmem:[#allocation2 + $0x15c] sm:$0xf] }
 0x2ad   : > { %v2018_v40 = vsel %vm12593_vm3, %v1667_v48, %v2017_v9  ;;  %v14427_v16 = vpop.permute.xlu2 %6220  ;;  %6372 = vst.msk [vmem:[#allocation3 + $0x1b4] sm:$0xf] %vm3901_vm2, %v14357_v8  ;;  %v4897_v7 = vrot.slane %v4896_v58, 4  ;;  %v6476_v39 = vld [vmem:[#allocation2 + $0x160] sm:$0xf]  ;;  %v14438_v18 = vpop.f32.mrf.mxu2  ;;  %v7097_v20 = vshrl.u32 %v6475_v42, 16 }
 0x2ae   : > { %2019 = vst [vmem:[#allocation2 + $0x180] sm:$0xf] %v2018_v40  ;;  %9179 = vmatmul.bf16.gmra.mxu2 %v11192_v44  ;;  %v7100_v17 = vshll.u32 %v6475_v42, 16  ;;  %v7106_v60 = vshll.u32 %v6476_v39, 16  ;;  %v7337_v2 = vpop.permute.xlu1 %7336  ;;  %v6066_v8 = vld [vmem:[#allocation2 + $0x15c] sm:$0xf] }
 0x2af   : > { %v11291_v14 = vld [vmem:[#allocation3 + $0x260] sm:$0xf]  ;;  %v4902_v37 = vsel %vm12823_vm14, %v4897_v7, %v4901_v30  ;;  %v7110_v52 = vshrl.u32 %v6476_v39, 16  ;;  %v1670_v34 = vshrl.u32 %v1050_v56, 16  ;;  %v1673_v24 = vshll.u32 %v1050_v56, 16 }
 0x2b0   : > { %5316 = vst.msk [vmem:[#allocation3 + $0x1c0] sm:$0xf] %vm1055_vm1, %v4902_v37  ;;  %v987_v33 = vmax.f32 %v14433_v31, 0.0  ;;  %v7099_v9 = vrot.slane %v7097_v20, 4  ;;  %v7102_v27 = vrot.slane %v7100_v17, 5  ;;  %v7108_v19 = vrot.slane %v7106_v60, 5 }
 0x2b1   : > { %v11807_v50 = vld [vmem:[#allocation3 + $0x268] sm:$0xf0]  ;;  %5988 = vst.msk [vmem:[#allocation3 + $0x1c0] sm:$0xf] %vm3225_vm15, %v5834_v32  ;;  %v1672_v1 = vrot.slane %v1670_v34, 7 }
 0x2b2   : > { %v11292_v35 = vor.u32 %v11807_v50, %v11291_v14  ;;  %6373 = vst.msk [vmem:[#allocation3 + $0x1c0] sm:$0xf] %vm3901_vm2, %v14393_v6  ;;  %v2021_v4 = vld [vmem:[#allocation2 + $0x188] sm:$0x1]  ;;  %v7103_v48 = vor.u32 %v7102_v27, %v7099_v9  ;;  %v5421_v38 = vld [vmem:[#allocation2 + $0x15c] sm:$0xe] }
 0x2b3   : > { %7493 = vst.msk [vmem:[#allocation3 + $0x1c0] sm:$0xf] %vm4286_vm4, %v14391_v61  ;;  %6244 = vrot.lane.b32.xlu2 %v6066_v8, %s12287_s11  ;;  %v5422_v58 = vld [vmem:[#allocation2 + $0x160] sm:$0xf]  ;;  %v1675_v32 = vor.u32 %v1673_v24, %v1672_v1  ;;  %v1677_v5 = vrot.slane %v1672_v1, 4  ;;  %v10943_v40 = vrot.slane %v5421_v38, 9  ;;  %v1051_v24 = vpack.c.bf16 %v987_v33, %v987_v33 }
 0x2b4   : > { %7492 = vst.msk [vmem:[#allocation3 + $0x1b4] sm:$0xf] %vm4286_vm4, %v7337_v2  ;;  %v5719_v53 = vrot.slane %v5422_v58, 5  ;;  %v14455_v6 = vpop.permute.xlu0 %6222  ;;  %v7104_v56 = vrot.slane %v7103_v48, 4  ;;  %v4408_v31 = vld [vmem:[#allocation2 + $0x108] sm:$0xf] }
 0x2b5   : > { %v14452_v15 = vpop.permute.xlu2 %7342  ;;  %11462 = vmatmul.msk.bf16.gmra.mxu3 %vm8820_vm5, %v11292_v35  ;;  %v7112_v61 = vrot.slane %v7110_v52, 4  ;;  %v1676_v7 = vsel %vm12664_vm6, %v1668_v23, %v1675_v32  ;;  %v2022_v30 = vsel %vm12690_vm8, %v1677_v5, %v2021_v4  ;;  %v4409_v42 = vld [vmem:[#allocation2 + $0x10c] sm:$0xf]  ;;  %v7598_v39 = vld [vmem:[#allocation2 + $0x168] sm:$0xe]  ;;  %v14464_v14 = vpop.f32.mrf.mxu2  ;;  %v4904_v20 = vshrl.u32 %v4408_v31, 16 }
 0x2b6   : > { %v5720_v44 = vsel %vm12704_vm11, %v10943_v40, %v5719_v53  ;;  %v7109_v37 = vsel %vm12823_vm14, %v7104_v56, %v7108_v19  ;;  %2020 = vst.msk [vmem:[#allocation2 + $0x184] sm:$0xf] %vm1055_vm1, %v1676_v7  ;;  %v4907_v17 = vshll.u32 %v4408_v31, 16  ;;  %v4913_v23 = vshll.u32 %v4409_v42, 16  ;;  %v14470_v60 = vpop.permute.xlu1 %5837  ;;  %v7599_v8 = vld [vmem:[#allocation2 + $0x16c] sm:$0xf]  ;;  %v14475_v7 = vpop.f32.mrf.mxu1 }
 0x2b7   : > { %5863 = vrot.lane.b32.xlu0 %v5720_v44, %s12286_s26  ;;  %7364 = vrot.lane.b32.xlu1 %v7109_v37, %s12288_s19  ;;  %2023 = vst [vmem:[#allocation2 + $0x188] sm:$0x1] %v2022_v30  ;;  %v4917_v2 = vshrl.u32 %v4409_v42, 16  ;;  %v10975_v52 = vrot.slane %v7598_v39, 9  ;;  %v7113_v34 = vor.u32 %v7112_v61, %v7108_v19  ;;  %v4906_v50 = vrot.slane %v4904_v20, 4 }
 0x2b8   : > { %v4909_v9 = vrot.slane %v4907_v17, 5  ;;  %v4915_v27 = vrot.slane %v4913_v23, 5  ;;  %v7600_v35 = vld [vmem:[#allocation2 + $0x170] sm:$0x1]  ;;  %v7896_v1 = vrot.slane %v7599_v8, 5  ;;  %v5721_v33 = vrot.slane %v5719_v53, 4 }
 0x2b9   : > { %v7899_v4 = vrot.slane %v7600_v35, 5  ;;  %v6477_v48 = vld [vmem:[#allocation2 + $0x164] sm:$0x1]  ;;  %v7114_v38 = vrot.slane %v7113_v34, 4  ;;  %v4410_v31 = vld [vmem:[#allocation2 + $0x110] sm:$0x1]  ;;  %v920_v34 = vadd.f32 %v14377_v63, %v14445_v47 }
 0x2ba   : > { %v5423_v58 = vld [vmem:[#allocation2 + $0x164] sm:$0x1]  ;;  %v4910_v32 = vor.u32 %v4909_v9, %v4906_v50  ;;  %v7897_v5 = vsel %vm12704_vm11, %v10975_v52, %v7896_v1  ;;  %v7898_v40 = vrot.slane %v7896_v1, 4  ;;  %v7116_v56 = vshll.u32 %v6477_v48, 16  ;;  %v6069_v52 = vld [vmem:[#allocation2 + $0x16c] sm:$0xf] }
 0x2bb   : > { %8052 = vst.msk [vmem:[#allocation3 + $0x278] sm:$0xf] %vm1055_vm1, %v7897_v5  ;;  %v5722_v19 = vrot.slane %v5423_v58, 5  ;;  %v1679_v61 = vshrl.u32 %v1051_v24, 16  ;;  %v1682_v30 = vshll.u32 %v1051_v24, 16  ;;  %v4919_v17 = vrot.slane %v4917_v2, 4 }
 0x2bc   : > { %v14480_v42 = vpop.permute.xlu0 %5839  ;;  %v4911_v39 = vrot.slane %v4910_v32, 4  ;;  %v7900_v37 = vsel %vm12704_vm11, %v7898_v40, %v7899_v4  ;;  %v7118_v20 = vrot.slane %v7116_v56, 5  ;;  %v4923_v8 = vshll.u32 %v4410_v31, 16  ;;  %v14491_v24 = vld [vmem:[#allocation2 + $0x174] sm:$0xe] }
 0x2bd   : > { %v14478_v44 = vpop.permute.xlu2 %6224  ;;  %8053 = vst.msk [vmem:[#allocation3 + $0x284] sm:$0xf] %vm1055_vm1, %v7900_v37  ;;  %v14485_v23 = vrot.slane %v1679_v61, 7  ;;  %v14487_v53 = vpop.f32.mrf.mxu2  ;;  %v14493_v50 = vld [vmem:[#allocation2 + $0x180] sm:$0xe]  ;;  %v5723_v35 = vsel %vm12704_vm11, %v5721_v33, %v5722_v19  ;;  %v4920_v4 = vor.u32 %v4919_v17, %v4915_v27  ;;  %v11832_v37 = vld [vmem:[%s16673_s3 + $0x30] sm:$0xff] }
 0x2be   : > { %v4916_v9 = vsel %vm12823_vm14, %v4911_v39, %v4915_v27  ;;  %v7119_v2 = vsel %vm12823_vm14, %v7114_v38, %v7118_v20  ;;  %v2024_v1 = vld [vmem:[#allocation2 + $0x18c] sm:$0xf]  ;;  %v11784_v48 = vld [vmem:[#allocation3 + $0x1b4] sm:$0xf]  ;;  %v11201_v58 = vld [vmem:[#allocation3 + $0x1bc] sm:$0xf0]  ;;  %v7341_v47 = vpop.permute.xlu1 %7340  ;;  %8918 = vmatpush.bf16.msrb.mxu1 %v11832_v37 }
 0x2bf   : > { %6250 = vrot.lane.b32.xlu0 %v6069_v52, %s12287_s11  ;;  %5317 = vst.msk [vmem:[#allocation3 + $0x1cc] sm:$0xf] %vm1055_vm1, %v4916_v9  ;;  %7366 = vrot.lane.b32.xlu2 %v7119_v2, %s12288_s19  ;;  %v1684_v32 = vor.u32 %v1682_v30, %v14485_v23  ;;  %v4925_v5 = vrot.slane %v4923_v8, 5  ;;  %v11204_v38 = vor.u32 %v11784_v48, %v11201_v58  ;;  %v6478_v40 = vld [vmem:[#allocation2 + $0x168] sm:$0xf]  ;;  %v4921_v27 = vrot.slane %v4920_v4, 4  ;;  %v14519_v52 = vpop.f32.mrf.mxu3 }
 0x2c0   : > { %5865 = vrot.lane.b32.xlu1 %v5723_v35, %s12286_s26  ;;  %v14506_v56 = vld [vmem:[#allocation2 + $0x178] sm:$0xf]  ;;  %5989 = vst.msk [vmem:[#allocation3 + $0x1cc] sm:$0xf] %vm3225_vm15, %v14430_v59  ;;  %v6479_v31 = vld [vmem:[#allocation2 + $0x16c] sm:$0xf] }
 0x2c1   : > { %v7121_v33 = vshrl.u32 %v6478_v40, 16  ;;  %6374 = vst.msk [vmem:[#allocation3 + $0x1cc] sm:$0xf] %vm3901_vm2, %v14427_v16  ;;  %v2025_v19 = vsel %vm12593_vm3, %v1684_v32, %v2024_v1  ;;  %9184 = vmatmul.bf16.gmra.mxu2 %v11204_v38  ;;  %v7124_v61 = vshll.u32 %v6478_v40, 16  ;;  %v7130_v30 = vshll.u32 %v6479_v31, 16 }
 0x2c2   : > { %v7134_v39 = vshrl.u32 %v6479_v31, 16  ;;  %v11303_v20 = vld [vmem:[#allocation3 + $0x278] sm:$0xf]  ;;  %2026 = vst [vmem:[#allocation2 + $0x18c] sm:$0xf] %v2025_v19  ;;  %v4926_v59 = vsel %vm12823_vm14, %v4921_v27, %v4925_v5  ;;  %v988_v8 = vmax.f32 %v920_v34, 0.0  ;;  %v14530_v32 = vadd.f32 %v14377_v63, %v14475_v7  ;;  %v924_v5 = vpop.f32.mrf.mxu1 }
 0x2c3   : > { %v7123_v17 = vrot.slane %v7121_v33, 4  ;;  %16722 = vst [vmem:[#allocation19_spill] sm:$0xff] %v14519_v52  ;;  %v10976_v16 = vrot.slane %v14491_v24, 9  ;;  %v7126_v2 = vrot.slane %v7124_v61, 5  ;;  %v7132_v35 = vrot.slane %v7130_v30, 5 }
 0x2c4   : > { %5318 = vst.msk [vmem:[#allocation3 + $0x1d8] sm:$0xf] %vm1055_vm1, %v4926_v59  ;;  %v11810_v4 = vld [vmem:[#allocation3 + $0x280] sm:$0xf0]  ;;  %v6068_v48 = vld [vmem:[#allocation2 + $0x168] sm:$0xf]  ;;  %v1052_v58 = vpack.c.bf16 %v988_v8, %v988_v8  ;;  %v14532_v24 = vpop.permute.xlu0 %6226 }
 0x2c5   : > { %v14524_v1 = vpop.permute.xlu2 %7346  ;;  %5990 = vst.msk [vmem:[#allocation3 + $0x1d8] sm:$0xf] %vm3225_vm15, %v14470_v60  ;;  %v5424_v34 = vld [vmem:[#allocation2 + $0x168] sm:$0xe]  ;;  %v11304_v38 = vor.u32 %v11810_v4, %v11303_v20  ;;  %v7127_v40 = vor.u32 %v7126_v2, %v7123_v17  ;;  %v5425_v27 = vld [vmem:[#allocation2 + $0x16c] sm:$0xf]  ;;  %v14537_v60 = vpop.f32.mrf.mxu2 }
 0x2c6   : > { %6375 = vst.msk [vmem:[#allocation3 + $0x1d8] sm:$0xf] %vm3901_vm2, %v14455_v6  ;;  %v10944_v31 = vrot.slane %v5424_v34, 9  ;;  %v7903_v33 = vrot.slane %v14506_v56, 5  ;;  %v1687_v19 = vshrl.u32 %v1052_v58, 16  ;;  %v1690_v7 = vshll.u32 %v1052_v58, 16  ;;  %v14541_v37 = vpop.permute.xlu1 %5841 }
 0x2c7   : > { %7495 = vst.msk [vmem:[#allocation3 + $0x1d8] sm:$0xf] %vm4286_vm4, %v14452_v15  ;;  %v5726_v61 = vrot.slane %v5425_v27, 5  ;;  %v7136_v30 = vrot.slane %v7134_v39, 4  ;;  %11463 = vmatmul.msk.bf16.gmra.mxu3 %vm8820_vm5, %v11304_v38  ;;  %v1685_v6 = vrot.slane %v14485_v23, 4  ;;  %6248 = vrot.lane.b32.xlu2 %v6068_v48, %s12287_s11  ;;  %v7128_v20 = vrot.slane %v7127_v40, 4 }
 0x2c8   : > { %7494 = vst.msk [vmem:[#allocation3 + $0x1cc] sm:$0xf] %vm4286_vm4, %v7341_v47  ;;  %v4411_v56 = vld [vmem:[#allocation2 + $0x114] sm:$0xf]  ;;  %v7904_v59 = vsel %vm12704_vm11, %v10976_v16, %v7903_v33  ;;  %v925_v15 = vadd.f32 %v14377_v63, %v924_v5  ;;  %v1689_v17 = vrot.slane %v1687_v19, 7  ;;  %v7905_v34 = vrot.slane %v7903_v33, 4 }
 0x2c9   : > { %v5727_v39 = vsel %vm12704_vm11, %v10944_v31, %v5726_v61  ;;  %v4412_v8 = vld [vmem:[#allocation2 + $0x118] sm:$0xf]  ;;  %v4928_v2 = vshrl.u32 %v4411_v56, 16  ;;  %v4931_v4 = vshll.u32 %v4411_v56, 16  ;;  %v7133_v23 = vsel %vm12823_vm14, %v7128_v20, %v7132_v35  ;;  %v2028_v48 = vld [vmem:[#allocation2 + $0x194] sm:$0x1] }
 0x2ca   : > { %5867 = vrot.lane.b32.xlu0 %v5727_v39, %s12286_s26  ;;  %v4937_v47 = vshll.u32 %v4412_v8, 16  ;;  %v7603_v58 = vld [vmem:[#allocation2 + $0x17c] sm:$0x1]  ;;  %v7137_v38 = vor.u32 %v7136_v30, %v7132_v35  ;;  %7368 = vrot.lane.b32.xlu1 %v7133_v23, %s12288_s19  ;;  %v1692_v63 = vor.u32 %v1690_v7, %v1689_v17  ;;  %v1694_v16 = vrot.slane %v1689_v17, 4  ;;  %8054 = vst.msk [vmem:[#allocation3 + $0x290] sm:$0xf] %vm1055_vm1, %v7904_v59  ;;  %v14567_v59 = vpop.f32.mrf.mxu3 }
 0x2cb   : > { %v4930_v5 = vrot.slane %v4928_v2, 4  ;;  %v4941_v40 = vshrl.u32 %v4412_v8, 16  ;;  %v4933_v27 = vrot.slane %v4931_v4, 5  ;;  %v7906_v19 = vrot.slane %v7603_v58, 5  ;;  %v6480_v56 = vld [vmem:[#allocation2 + $0x170] sm:$0x1] }
 0x2cc   : > { %v4939_v31 = vrot.slane %v4937_v47, 5  ;;  %v7138_v20 = vrot.slane %v7137_v38, 4  ;;  %v14559_v39 = vld [vmem:[#allocation2 + $0x184] sm:$0xf]  ;;  %v1693_v35 = vsel %vm12664_vm6, %v1685_v6, %v1692_v63  ;;  %v2029_v33 = vsel %vm12690_vm8, %v1694_v16, %v2028_v48  ;;  %v5426_v30 = vld [vmem:[#allocation2 + $0x170] sm:$0x1]  ;;  %v14565_v8 = vpop.permute.xlu0 %5843 }
 0x2cd   : > { %v14557_v9 = vpop.permute.xlu2 %6228  ;;  %v7140_v7 = vshll.u32 %v6480_v56, 16  ;;  %v5728_v17 = vrot.slane %v5726_v61, 4  ;;  %16723 = vst [vmem:[#allocation20_spill] sm:$0xff] %v14567_v59  ;;  %v4934_v2 = vor.u32 %v4933_v27, %v4930_v5  ;;  %v7907_v4 = vsel %vm12704_vm11, %v7905_v34, %v7906_v19  ;;  %v4413_v6 = vld [vmem:[#allocation2 + $0x11c] sm:$0x1]  ;;  %v14573_v58 = vpop.f32.mrf.mxu2 }
 0x2ce   : > { %2027 = vst.msk [vmem:[#allocation2 + $0x190] sm:$0xf] %vm1055_vm1, %v1693_v35  ;;  %v5729_v23 = vrot.slane %v5426_v30, 5  ;;  %v989_v47 = vmax.f32 %v14530_v32, 0.0  ;;  %v4943_v38 = vrot.slane %v4941_v40, 4  ;;  %v4947_v61 = vshll.u32 %v4413_v6, 16  ;;  %v14575_v16 = vpop.permute.xlu1 %7344 }
 0x2cf   : > { %2030 = vst [vmem:[#allocation2 + $0x194] sm:$0x1] %v2029_v33  ;;  %v7142_v48 = vrot.slane %v7140_v7, 5  ;;  %v990_v63 = vmax.f32 %v925_v15, 0.0  ;;  %v4935_v56 = vrot.slane %v4934_v2, 4  ;;  %v7910_v32 = vrot.slane %v14559_v39, 5 }
 0x2d0   : > { %8055 = vst.msk [vmem:[#allocation3 + $0x29c] sm:$0xf] %vm1055_vm1, %v7907_v4  ;;  %v5730_v5 = vsel %vm12704_vm11, %v5728_v17, %v5729_v23  ;;  %v1053_v34 = vpack.c.bf16 %v989_v47, %v989_v47  ;;  %v6071_v27 = vld [vmem:[#allocation2 + $0x178] sm:$0xf]  ;;  %v4944_v35 = vor.u32 %v4943_v38, %v4939_v31  ;;  %v4949_v33 = vrot.slane %v4947_v61, 5 }
 0x2d1   : > { %v7143_v19 = vsel %vm12823_vm14, %v7138_v20, %v7142_v48  ;;  %v11787_v40 = vld [vmem:[#allocation3 + $0x1cc] sm:$0xf]  ;;  %v11213_v7 = vld [vmem:[#allocation3 + $0x1d4] sm:$0xf0]  ;;  %v1054_v15 = vpack.c.bf16 %v990_v63, %v990_v63  ;;  %v4940_v30 = vsel %vm12823_vm14, %v4935_v56, %v4939_v31  ;;  %v2031_v20 = vld [vmem:[#allocation2 + $0x198] sm:$0xf] }
 0x2d2   : > { %7370 = vrot.lane.b32.xlu2 %v7143_v19, %s12288_s19  ;;  %v1696_v2 = vshrl.u32 %v1053_v34, 16  ;;  %v1699_v4 = vshll.u32 %v1053_v34, 16  ;;  %6254 = vrot.lane.b32.xlu0 %v6071_v27, %s12287_s11  ;;  %v11216_v17 = vor.u32 %v11787_v40, %v11213_v7  ;;  %5319 = vst.msk [vmem:[#allocation3 + $0x1e4] sm:$0xf] %vm1055_vm1, %v4940_v30  ;;  %v4945_v23 = vrot.slane %v4944_v35, 4 }
 0x2d3   : > { %5869 = vrot.lane.b32.xlu1 %v5730_v5, %s12286_s26  ;;  %v6481_v47 = vld [vmem:[#allocation2 + $0x174] sm:$0xf]  ;;  %v1704_v6 = vshrl.u32 %v1054_v15, 16  ;;  %5991 = vst.msk [vmem:[#allocation3 + $0x1e4] sm:$0xf] %vm3225_vm15, %v14480_v42 }
 0x2d4   : > { %v1698_v48 = vrot.slane %v1696_v2, 7  ;;  %9189 = vmatmul.bf16.gmra.mxu2 %v11216_v17  ;;  %v14591_v31 = vld [vmem:[#allocation2 + $0x178] sm:$0xf]  ;;  %v7145_v38 = vshrl.u32 %v6481_v47, 16  ;;  %6376 = vst.msk [vmem:[#allocation3 + $0x1e4] sm:$0xf] %vm3901_vm2, %v14478_v44  ;;  %v4950_v56 = vsel %vm12823_vm14, %v4945_v23, %v4949_v33  ;;  %v14600_v27 = vpop.permute.xlu0 %6230  ;;  %v14612_v23 = vpop.f32.mrf.mxu3 }
 0x2d5   : > { %v14593_v61 = vpop.permute.xlu2 %7350  ;;  %v11315_v63 = vld [vmem:[#allocation3 + $0x290] sm:$0xf]  ;;  %v7148_v5 = vshll.u32 %v6481_v47, 16  ;;  %v7154_v34 = vshll.u32 %v14591_v31, 16  ;;  %5320 = vst.msk [vmem:[#allocation3 + $0x1f0] sm:$0xf] %vm1055_vm1, %v4950_v56  ;;  %v14604_v7 = vpop.f32.mrf.mxu2 }
 0x2d6   : > { %v1701_v42 = vor.u32 %v1699_v4, %v1698_v48  ;;  %v1702_v19 = vrot.slane %v1698_v48, 4  ;;  %v7147_v35 = vrot.slane %v7145_v38, 4  ;;  %v7158_v40 = vshrl.u32 %v14591_v31, 16  ;;  %5992 = vst.msk [vmem:[#allocation3 + $0x1f0] sm:$0xf] %vm3225_vm15, %v14541_v37  ;;  %v14610_v17 = vpop.permute.xlu1 %5845 }
 0x2d7   : > { %v11813_v30 = vld [vmem:[#allocation3 + $0x298] sm:$0xf0]  ;;  %v6070_v44 = vld [vmem:[#allocation2 + $0x174] sm:$0xf]  ;;  %v7150_v33 = vrot.slane %v7148_v5, 5  ;;  %v14608_v2 = vrot.slane %v7154_v34, 5 }
 0x2d8   : > { %16724 = vst [vmem:[#allocation21_spill] sm:$0xff] %v14612_v23  ;;  %v11316_v4 = vor.u32 %v11813_v30, %v11315_v63  ;;  %v2032_v47 = vsel %vm12593_vm3, %v1701_v42, %v2031_v20  ;;  %v1706_v48 = vrot.slane %v1704_v6, 7  ;;  %v1707_v31 = vshll.u32 %v1054_v15, 16  ;;  %v2035_v38 = vld [vmem:[#allocation2 + $0x1a0] sm:$0x1] }
 0x2d9   : > { %6377 = vst.msk [vmem:[#allocation3 + $0x1f0] sm:$0xf] %vm3901_vm2, %v14532_v24  ;;  %v7151_v37 = vor.u32 %v7150_v33, %v7147_v35  ;;  %v5427_v56 = vld [vmem:[#allocation2 + $0x174] sm:$0xe]  ;;  %v5428_v5 = vld [vmem:[#allocation2 + $0x178] sm:$0xf] }
 0x2da   : > { %2033 = vst [vmem:[#allocation2 + $0x198] sm:$0xf] %v2032_v47  ;;  %11464 = vmatmul.msk.bf16.gmra.mxu3 %vm8820_vm5, %v11316_v4  ;;  %6252 = vrot.lane.b32.xlu2 %v6070_v44, %s12287_s11  ;;  %v1709_v63 = vor.u32 %v1707_v31, %v1706_v48  ;;  %v1711_v22 = vrot.slane %v1706_v48, 4  ;;  %v10945_v20 = vrot.slane %v5427_v56, 9  ;;  %v5733_v34 = vrot.slane %v5428_v5, 5 }
 0x2db   : > { %7497 = vst.msk [vmem:[#allocation3 + $0x1f0] sm:$0xf] %vm4286_vm4, %v14524_v1  ;;  %v7152_v42 = vrot.slane %v7151_v37, 4  ;;  %v4414_v24 = vld [vmem:[#allocation2 + $0x120] sm:$0xf]  ;;  %v16725_v15 = vrot.slane %v14493_v50, 9 }
 0x2dc   : > { %7496 = vst.msk [vmem:[#allocation3 + $0x1e4] sm:$0xf] %vm4286_vm4, %v14575_v16  ;;  %v7912_v1 = vrot.slane %v7910_v32, 4  ;;  %v1710_v35 = vsel %vm12664_vm6, %v1702_v19, %v1709_v63  ;;  %v2036_v30 = vsel %vm12690_vm8, %v1711_v22, %v2035_v38  ;;  %v5734_v16 = vsel %vm12704_vm11, %v10945_v20, %v5733_v34  ;;  %v4415_v44 = vld [vmem:[#allocation2 + $0x124] sm:$0xf]  ;;  %v11831_v50 = vld [vmem:[%s16673_s3 + $0x28] sm:$0xff] }
 0x2dd   : > { %v7911_v6 = vsel %vm12704_vm11, %v16725_v15, %v7910_v32  ;;  %v4952_v33 = vshrl.u32 %v4414_v24, 16  ;;  %v7606_v4 = vld [vmem:[#allocation2 + $0x188] sm:$0x1]  ;;  %v14638_v47 = vpop.permute.xlu2 %6232  ;;  %v7157_v36 = vsel %vm12823_vm14, %v7152_v42, %v14608_v2  ;;  %2034 = vst.msk [vmem:[#allocation2 + $0x19c] sm:$0xf] %vm1055_vm1, %v1710_v35  ;;  %5871 = vrot.lane.b32.xlu0 %v5734_v16, %s12286_s26  ;;  %v4955_v41 = vshll.u32 %v4414_v24, 16  ;;  %8919 = vmatpush.bf16.msrb.mxu1 %v11831_v50 }
 0x2de   : > { %v4961_v39 = vshll.u32 %v4415_v44, 16  ;;  %v4965_v32 = vshrl.u32 %v4415_v44, 16  ;;  %v14648_v19 = vpop.permute.xlu0 %5847  ;;  %7372 = vrot.lane.b32.xlu1 %v7157_v36, %s12288_s19  ;;  %2037 = vst [vmem:[#allocation2 + $0x1a0] sm:$0x1] %v2036_v30  ;;  %v7913_v31 = vrot.slane %v7606_v4, 5  ;;  %v14651_v37 = vpop.f32.mrf.mxu2  ;;  %v7160_v63 = vrot.slane %v7158_v40, 4 }
 0x2df   : > { %v4954_v48 = vrot.slane %v4952_v33, 4  ;;  %v6483_v38 = vld [vmem:[#allocation2 + $0x17c] sm:$0x1]  ;;  %v4957_v56 = vrot.slane %v4955_v41, 5  ;;  %8056 = vst.msk [vmem:[#allocation3 + $0x2a8] sm:$0xf] %vm1055_vm1, %v7911_v6  ;;  %v14654_v20 = vpop.permute.xlu1 %7348  ;;  %v14660_v4 = vpop.f32.mrf.mxu3 }
 0x2e0   : > { %v4963_v5 = vrot.slane %v4961_v39, 5  ;;  %v7164_v22 = vshll.u32 %v6483_v38, 16  ;;  %v7914_v42 = vsel %vm12704_vm11, %v7912_v1, %v7913_v31  ;;  %v5429_v24 = vld [vmem:[#allocation2 + $0x17c] sm:$0x1]  ;;  %v5735_v15 = vrot.slane %v5733_v34, 4  ;;  %16726 = vst [vmem:[#allocation22_spill] sm:$0xff] %v14660_v4 }
 0x2e1   : > { %v4967_v35 = vrot.slane %v4965_v32, 4  ;;  %v4958_v30 = vor.u32 %v4957_v56, %v4954_v48  ;;  %8057 = vst.msk [vmem:[#allocation3 + $0x2b4] sm:$0xf] %vm1055_vm1, %v7914_v42  ;;  %v7161_v16 = vor.u32 %v7160_v63, %v14608_v2  ;;  %v4416_v33 = vld [vmem:[#allocation2 + $0x128] sm:$0x1]  ;;  %v5736_v6 = vrot.slane %v5429_v24, 5 }
 0x2e2   : > { %v7166_v44 = vrot.slane %v7164_v22, 5  ;;  %v4971_v50 = vshll.u32 %v4416_v33, 16  ;;  %v14662_v41 = vld [vmem:[#allocation2 + $0x18c] sm:$0xe]  ;;  %v11225_v31 = vld [vmem:[#allocation3 + $0x1ec] sm:$0xf0] }
 0x2e3   : > { %v4968_v40 = vor.u32 %v4967_v35, %v4963_v5  ;;  %v11790_v36 = vld [vmem:[#allocation3 + $0x1e4] sm:$0xf]  ;;  %v4959_v39 = vrot.slane %v4958_v30, 4  ;;  %v7162_v1 = vrot.slane %v7161_v16, 4  ;;  %v14664_v34 = vld [vmem:[#allocation2 + $0x190] sm:$0xf]  ;;  %v5737_v32 = vsel %vm12704_vm11, %v5735_v15, %v5736_v6 }
 0x2e4   : > { %v4973_v2 = vrot.slane %v4971_v50, 5  ;;  %v6073_v38 = vld [vmem:[#allocation2 + $0x184] sm:$0xf]  ;;  %v11228_v56 = vor.u32 %v11790_v36, %v11225_v31  ;;  %v6484_v63 = vld [vmem:[#allocation2 + $0x180] sm:$0xf]  ;;  %v10978_v6 = vrot.slane %v14662_v41, 9 }
 0x2e5   : > { %v4969_v48 = vrot.slane %v4968_v40, 4  ;;  %v14668_v22 = vpop.permute.xlu2 %7354  ;;  %v4964_v42 = vsel %vm12823_vm14, %v4959_v39, %v4963_v5  ;;  %v7167_v24 = vsel %vm12823_vm14, %v7162_v1, %v7166_v44  ;;  %6258 = vrot.lane.b32.xlu0 %v6073_v38, %s12287_s11  ;;  %v6485_v35 = vld [vmem:[#allocation2 + $0x184] sm:$0xf]  ;;  %v7169_v30 = vshrl.u32 %v6484_v63, 16  ;;  %v5430_v33 = vld [vmem:[#allocation2 + $0x180] sm:$0xe] }
 0x2e6   : > { %v7172_v16 = vshll.u32 %v6484_v63, 16  ;;  %v14675_v15 = vpop.permute.xlu0 %6234  ;;  %5321 = vst.msk [vmem:[#allocation3 + $0x1fc] sm:$0xf] %vm1055_vm1, %v4964_v42  ;;  %v11327_v40 = vld [vmem:[#allocation3 + $0x2a8] sm:$0xf]  ;;  %7374 = vrot.lane.b32.xlu2 %v7167_v24, %s12288_s19  ;;  %5873 = vrot.lane.b32.xlu1 %v5737_v32, %s12286_s26  ;;  %v7178_v44 = vshll.u32 %v6485_v35, 16  ;;  %v14683_v50 = vpop.f32.mrf.mxu2 }
 0x2e7   : > { %v4974_v5 = vsel %vm12823_vm14, %v4969_v48, %v4973_v2  ;;  %5993 = vst.msk [vmem:[#allocation3 + $0x1fc] sm:$0xf] %vm3225_vm15, %v14565_v8  ;;  %9194 = vmatmul.bf16.gmra.mxu2 %v11228_v56  ;;  %v7171_v36 = vrot.slane %v7169_v30, 4  ;;  %v5431_v41 = vld [vmem:[#allocation2 + $0x184] sm:$0xf]  ;;  %v14687_v1 = vpop.permute.xlu1 %5849  ;;  %v7182_v32 = vshrl.u32 %v6485_v35, 16 }
 0x2e8   : > { %v7174_v39 = vrot.slane %v7172_v16, 5  ;;  %6378 = vst.msk [vmem:[#allocation3 + $0x1fc] sm:$0xf] %vm3901_vm2, %v14557_v9  ;;  %v11816_v31 = vld [vmem:[#allocation3 + $0x2b0] sm:$0xf0]  ;;  %v10946_v38 = vrot.slane %v5430_v33, 9 }
 0x2e9   : > { %v11328_v63 = vor.u32 %v11816_v31, %v11327_v40  ;;  %5322 = vst.msk [vmem:[#allocation3 + $0x208] sm:$0xf] %vm1055_vm1, %v4974_v5  ;;  %v5740_v2 = vrot.slane %v5431_v41, 5  ;;  %v4417_v42 = vld [vmem:[#allocation2 + $0x12c] sm:$0xf]  ;;  %v7917_v8 = vrot.slane %v14664_v34, 5  ;;  %v14698_v5 = vpop.f32.mrf.mxu3 }
 0x2ea   : > { %v7175_v48 = vor.u32 %v7174_v39, %v7171_v36  ;;  %5994 = vst.msk [vmem:[#allocation3 + $0x208] sm:$0xf] %vm3225_vm15, %v14610_v17  ;;  %v4418_v56 = vld [vmem:[#allocation2 + $0x130] sm:$0xf]  ;;  %v4976_v24 = vshrl.u32 %v4417_v42, 16  ;;  %v4979_v30 = vshll.u32 %v4417_v42, 16 }
 0x2eb   : > { %11465 = vmatmul.msk.bf16.gmra.mxu3 %vm8820_vm5, %v11328_v63  ;;  %6379 = vst.msk [vmem:[#allocation3 + $0x208] sm:$0xf] %vm3901_vm2, %v14600_v27  ;;  %v6072_v9 = vld [vmem:[#allocation2 + $0x180] sm:$0xf]  ;;  %v7180_v16 = vrot.slane %v7178_v44, 5  ;;  %v4985_v33 = vshll.u32 %v4418_v56, 16  ;;  %v5741_v17 = vsel %vm12704_vm11, %v10946_v38, %v5740_v2  ;;  %v7918_v44 = vsel %vm12704_vm11, %v10978_v6, %v7917_v8 }
 0x2ec   : > { %v7176_v35 = vrot.slane %v7175_v48, 4  ;;  %v4989_v40 = vshrl.u32 %v4418_v56, 16  ;;  %16727 = vst [vmem:[#allocation23_spill] sm:$0xff] %v14698_v5  ;;  %v14700_v36 = vld [vmem:[#allocation2 + $0x198] sm:$0xe]  ;;  %v4978_v39 = vrot.slane %v4976_v24, 4 }
 0x2ed   : > { %v14702_v34 = vld [vmem:[#allocation2 + $0x19c] sm:$0xf]  ;;  %7499 = vst.msk [vmem:[#allocation3 + $0x208] sm:$0xf] %vm4286_vm4, %v14593_v61  ;;  %v4981_v41 = vrot.slane %v4979_v30, 5  ;;  %v14710_v31 = vpop.permute.xlu2 %6236  ;;  %5875 = vrot.lane.b32.xlu0 %v5741_v17, %s12286_s26  ;;  %v4987_v61 = vrot.slane %v4985_v33, 5 }
 0x2ee   : > { %v7609_v27 = vld [vmem:[#allocation2 + $0x194] sm:$0x1]  ;;  %v7181_v63 = vsel %vm12823_vm14, %v7176_v35, %v7180_v16  ;;  %7498 = vst.msk [vmem:[#allocation3 + $0x1fc] sm:$0xf] %vm4286_vm4, %v14654_v20  ;;  %v7919_v48 = vrot.slane %v7917_v8, 4  ;;  %6256 = vrot.lane.b32.xlu2 %v6072_v9, %s12287_s11  ;;  %v7184_v56 = vrot.slane %v7182_v32, 4  ;;  %v14720_v30 = vpop.f32.mrf.mxu2 }
 0x2ef   : > { %v7920_v42 = vrot.slane %v7609_v27, 5  ;;  %7376 = vrot.lane.b32.xlu1 %v7181_v63, %s12288_s19  ;;  %v4982_v38 = vor.u32 %v4981_v41, %v4978_v39  ;;  %8058 = vst.msk [vmem:[#allocation3 + $0x2c0] sm:$0xf] %vm1055_vm1, %v7918_v44  ;;  %v6486_v6 = vld [vmem:[#allocation2 + $0x188] sm:$0x1]  ;;  %v5742_v24 = vrot.slane %v5740_v2, 4  ;;  %v14724_v27 = vpop.permute.xlu0 %5851 }
 0x2f0   : > { %v7188_v35 = vshll.u32 %v6486_v6, 16  ;;  %v5432_v17 = vld [vmem:[#allocation2 + $0x188] sm:$0x1]  ;;  %v4419_v33 = vld [vmem:[#allocation2 + $0x134] sm:$0x1]  ;;  %v4991_v8 = vrot.slane %v4989_v40, 4  ;;  %v7185_v39 = vor.u32 %v7184_v56, %v7180_v16  ;;  %v7353_v63 = vpop.permute.xlu1 %7352 }
 0x2f1   : > { %v7921_v20 = vsel %vm12704_vm11, %v7919_v48, %v7920_v42  ;;  %v4983_v9 = vrot.slane %v4982_v38, 4  ;;  %v5743_v41 = vrot.slane %v5432_v17, 5  ;;  %v4995_v44 = vshll.u32 %v4419_v33, 16  ;;  %v6075_v6 = vld [vmem:[#allocation2 + $0x190] sm:$0xf] }
 0x2f2   : > { %8059 = vst.msk [vmem:[#allocation3 + $0x2cc] sm:$0xf] %vm1055_vm1, %v7921_v20  ;;  %v10979_v32 = vrot.slane %v14700_v36, 9  ;;  %v7190_v2 = vrot.slane %v7188_v35, 5  ;;  %v4992_v5 = vor.u32 %v4991_v8, %v4987_v61  ;;  %v7924_v4 = vrot.slane %v14702_v34, 5 }
 0x2f3   : > { %v4988_v48 = vsel %vm12823_vm14, %v4983_v9, %v4987_v61  ;;  %v7186_v42 = vrot.slane %v7185_v39, 4  ;;  %v4997_v40 = vrot.slane %v4995_v44, 5  ;;  %v6487_v23 = vld [vmem:[#allocation2 + $0x18c] sm:$0xf]  ;;  %v6488_v38 = vld [vmem:[#allocation2 + $0x190] sm:$0xf]  ;;  %v5744_v34 = vsel %vm12704_vm11, %v5742_v24, %v5743_v41  ;;  %v14745_v44 = vpop.f32.mrf.mxu3 }
 0x2f4   : > { %5323 = vst.msk [vmem:[#allocation3 + $0x214] sm:$0xf] %vm1055_vm1, %v4988_v48  ;;  %v4993_v16 = vrot.slane %v4992_v5, 4  ;;  %v11237_v56 = vld [vmem:[#allocation3 + $0x204] sm:$0xf0]  ;;  %v7193_v20 = vshrl.u32 %v6487_v23, 16 }
 0x2f5   : > { %5995 = vst.msk [vmem:[#allocation3 + $0x214] sm:$0xf] %vm3225_vm15, %v14648_v19  ;;  %v7191_v36 = vsel %vm12823_vm14, %v7186_v42, %v7190_v2  ;;  %v11793_v61 = vld [vmem:[#allocation3 + $0x1fc] sm:$0xf]  ;;  %v7196_v35 = vshll.u32 %v6487_v23, 16  ;;  %v7202_v17 = vshll.u32 %v6488_v38, 16  ;;  %v14738_v33 = vpop.permute.xlu2 %7358  ;;  %6262 = vrot.lane.b32.xlu0 %v6075_v6, %s12287_s11 }
 0x2f6   : > { %6380 = vst.msk [vmem:[#allocation3 + $0x214] sm:$0xf] %vm3901_vm2, %v14638_v47  ;;  %v11339_v5 = vld [vmem:[#allocation3 + $0x2c0] sm:$0xf]  ;;  %v4998_v8 = vsel %vm12823_vm14, %v4993_v16, %v4997_v40  ;;  %v11240_v19 = vor.u32 %v11793_v61, %v11237_v56  ;;  %v7195_v9 = vrot.slane %v7193_v20, 4  ;;  %v7206_v39 = vshrl.u32 %v6488_v38, 16  ;;  %7378 = vrot.lane.b32.xlu2 %v7191_v36, %s12288_s19  ;;  %v14750_v41 = vpop.f32.mrf.mxu2 }
 0x2f7   : > { %16728 = vst [vmem:[#allocation24_spill] sm:$0xff] %v14745_v44  ;;  %5877 = vrot.lane.b32.xlu1 %v5744_v34, %s12286_s26  ;;  %v7198_v23 = vrot.slane %v7196_v35, 5  ;;  %v7204_v24 = vrot.slane %v7202_v17, 5  ;;  %v5433_v47 = vld [vmem:[#allocation2 + $0x18c] sm:$0xe]  ;;  %v7925_v34 = vsel %vm12704_vm11, %v10979_v32, %v7924_v4  ;;  %v14762_v61 = vpop.permute.xlu0 %6238  ;;  %v7926_v32 = vrot.slane %v7924_v4, 4 }
 0x2f8   : > { %5324 = vst.msk [vmem:[#allocation3 + $0x220] sm:$0xf] %vm1055_vm1, %v4998_v8  ;;  %9199 = vmatmul.bf16.gmra.mxu2 %v11240_v19  ;;  %v5434_v48 = vld [vmem:[#allocation2 + $0x190] sm:$0xf]  ;;  %v10947_v6 = vrot.slane %v5433_v47, 9 }
 0x2f9   : > { %v11819_v2 = vld [vmem:[#allocation3 + $0x2c8] sm:$0xf0]  ;;  %5996 = vst.msk [vmem:[#allocation3 + $0x220] sm:$0xf] %vm3225_vm15, %v14687_v1  ;;  %v7199_v40 = vor.u32 %v7198_v23, %v7195_v9  ;;  %v5747_v38 = vrot.slane %v5434_v48, 5  ;;  %v14760_v1 = vpop.permute.xlu1 %5853  ;;  %v7208_v23 = vrot.slane %v7206_v39, 4 }
 0x2fa   : > { %v11340_v42 = vor.u32 %v11819_v2, %v11339_v5  ;;  %6381 = vst.msk [vmem:[#allocation3 + $0x220] sm:$0xf] %vm3901_vm2, %v14675_v15  ;;  %v4420_v16 = vld [vmem:[#allocation2 + $0x138] sm:$0xf]  ;;  %v4421_v56 = vld [vmem:[#allocation2 + $0x13c] sm:$0xf] }
 0x2fb   : > { %7501 = vst.msk [vmem:[#allocation3 + $0x220] sm:$0xf] %vm4286_vm4, %v14668_v22  ;;  %v5000_v20 = vshrl.u32 %v4420_v16, 16  ;;  %v5003_v36 = vshll.u32 %v4420_v16, 16  ;;  %v7200_v35 = vrot.slane %v7199_v40, 4  ;;  %v5009_v15 = vshll.u32 %v4421_v56, 16 }
 0x2fc   : > { %7500 = vst.msk [vmem:[#allocation3 + $0x214] sm:$0xf] %vm4286_vm4, %v7353_v63  ;;  %v5013_v17 = vshrl.u32 %v4421_v56, 16  ;;  %v11830_v5 = vld [vmem:[%s16673_s3 + $0x20] sm:$0xff]  ;;  %11466 = vmatmul.msk.bf16.gmra.mxu3 %vm8820_vm5, %v11340_v42  ;;  %v6074_v22 = vld [vmem:[#allocation2 + $0x18c] sm:$0xf]  ;;  %v5748_v47 = vsel %vm12704_vm11, %v10947_v6, %v5747_v38  ;;  %v7209_v56 = vor.u32 %v7208_v23, %v7204_v24 }
 0x2fd   : > { %v5002_v8 = vrot.slane %v5000_v20, 4  ;;  %v5005_v19 = vrot.slane %v5003_v36, 5  ;;  %v7612_v9 = vld [vmem:[#allocation2 + $0x1a0] sm:$0x1]  ;;  %v5011_v2 = vrot.slane %v5009_v15, 5  ;;  %v14772_v40 = vpop.permute.xlu2 %6240  ;;  %8920 = vmatpush.bf16.msrb.mxu1 %v11830_v5  ;;  %v7205_v42 = vsel %vm12823_vm14, %v7200_v35, %v7204_v24  ;;  %5879 = vrot.lane.b32.xlu0 %v5748_v47, %s12286_s26  ;;  %v14784_v24 = vpop.f32.mrf.mxu3 }
 0x2fe   : > { %v7927_v48 = vrot.slane %v7612_v9, 5  ;;  %8060 = vst.msk [vmem:[#allocation3 + $0x2d8] sm:$0xf] %vm1055_vm1, %v7925_v34  ;;  %v6489_v63 = vld [vmem:[#allocation2 + $0x194] sm:$0x1]  ;;  %6260 = vrot.lane.b32.xlu2 %v6074_v22, %s12287_s11  ;;  %v5015_v36 = vrot.slane %v5013_v17, 4 }
 0x2ff   : > { %v5006_v16 = vor.u32 %v5005_v19, %v5002_v8  ;;  %v7212_v4 = vshll.u32 %v6489_v63, 16  ;;  %v5435_v39 = vld [vmem:[#allocation2 + $0x194] sm:$0x1]  ;;  %v4422_v20 = vld [vmem:[#allocation2 + $0x140] sm:$0x1]  ;;  %7380 = vrot.lane.b32.xlu1 %v7205_v42, %s12288_s19  ;;  %v14781_v15 = vpop.f32.mrf.mxu2  ;;  %v5749_v35 = vrot.slane %v5747_v38, 4 }
 0x300   : > { %v7928_v6 = vsel %vm12704_vm11, %v7926_v32, %v7927_v48  ;;  %v5019_v34 = vshll.u32 %v4422_v20, 16  ;;  %16729 = vst [vmem:[#allocation25_spill] sm:$0xff] %v14781_v15  ;;  %v5750_v8 = vrot.slane %v5435_v39, 5  ;;  %v7210_v19 = vrot.slane %v7209_v56, 4  ;;  %v6490_v17 = vld [vmem:[#allocation2 + $0x198] sm:$0xf] }
 0x301   : > { %v5007_v5 = vrot.slane %v5006_v16, 4  ;;  %8061 = vst.msk [vmem:[#allocation3 + $0x2e4] sm:$0xf] %vm1055_vm1, %v7928_v6  ;;  %v7214_v9 = vrot.slane %v7212_v4, 5  ;;  %v5016_v23 = vor.u32 %v5015_v36, %v5011_v2  ;;  %v6491_v48 = vld [vmem:[#allocation2 + $0x19c] sm:$0xf] }
 0x302   : > { %16730 = vst [vmem:[#allocation26_spill] sm:$0xff] %v14784_v24  ;;  %v5021_v22 = vrot.slane %v5019_v34, 5  ;;  %v11249_v47 = vld [vmem:[#allocation3 + $0x21c] sm:$0xf0]  ;;  %v6077_v16 = vld [vmem:[#allocation2 + $0x19c] sm:$0xf] }
 0x303   : > { %v5012_v63 = vsel %vm12823_vm14, %v5007_v5, %v5011_v2  ;;  %v11796_v32 = vld [vmem:[#allocation3 + $0x214] sm:$0xf]  ;;  %v5017_v42 = vrot.slane %v5016_v23, 4  ;;  %v7217_v20 = vshrl.u32 %v6490_v17, 16  ;;  %v7220_v38 = vshll.u32 %v6490_v17, 16  ;;  %v7357_v36 = vpop.permute.xlu1 %7356  ;;  %v14791_v34 = vpop.permute.xlu0 %5855 }
 0x304   : > { %5325 = vst.msk [vmem:[#allocation3 + $0x22c] sm:$0xf] %vm1055_vm1, %v5012_v63  ;;  %v11252_v4 = vor.u32 %v11796_v32, %v11249_v47  ;;  %v7226_v39 = vshll.u32 %v6491_v48, 16  ;;  %v7230_v6 = vshrl.u32 %v6491_v48, 16  ;;  %v5436_v63 = vld [vmem:[#allocation2 + $0x198] sm:$0xe]  ;;  %v7215_v17 = vsel %vm12823_vm14, %v7210_v19, %v7214_v9 }
 0x305   : > { %5997 = vst.msk [vmem:[#allocation3 + $0x22c] sm:$0xf] %vm3225_vm15, %v14724_v27  ;;  %v11351_v56 = vld [vmem:[#allocation3 + $0x2d8] sm:$0xf]  ;;  %v5022_v2 = vsel %vm12823_vm14, %v5017_v42, %v5021_v22  ;;  %v7219_v5 = vrot.slane %v7217_v20, 4  ;;  %v7222_v23 = vrot.slane %v7220_v38, 5  ;;  %v5751_v27 = vsel %vm12704_vm11, %v5749_v35, %v5750_v8  ;;  %6266 = vrot.lane.b32.xlu0 %v6077_v16, %s12287_s11  ;;  %v14807_v19 = vpop.permute.xlu2 %7362 }
 0x306   : > { %6382 = vst.msk [vmem:[#allocation3 + $0x22c] sm:$0xf] %vm3901_vm2, %v14710_v31  ;;  %v7228_v47 = vrot.slane %v7226_v39, 5  ;;  %v5437_v32 = vld [vmem:[#allocation2 + $0x19c] sm:$0xf]  ;;  %v10948_v48 = vrot.slane %v5436_v63, 9  ;;  %7382 = vrot.lane.b32.xlu2 %v7215_v17, %s12288_s19 }
 0x307   : > { %5326 = vst.msk [vmem:[#allocation3 + $0x238] sm:$0xf] %vm1055_vm1, %v5022_v2  ;;  %5881 = vrot.lane.b32.xlu1 %v5751_v27, %s12286_s26  ;;  %v7223_v22 = vor.u32 %v7222_v23, %v7219_v5  ;;  %v5754_v9 = vrot.slane %v5437_v32, 5  ;;  %v7232_v35 = vrot.slane %v7230_v6, 4  ;;  %v14809_v8 = vpop.f32.mrf.mxu2  ;;  %v14811_v42 = vld [vmem:[#allocation2 + $0xc] sm:$0xf] }
 0x308   : > { %v11822_v31 = vld [vmem:[#allocation3 + $0x2e0] sm:$0xf0]  ;;  %5998 = vst.msk [vmem:[#allocation3 + $0x238] sm:$0xf] %vm3225_vm15, %v14760_v1  ;;  %9204 = vmatmul.bf16.gmra.mxu2 %v11252_v4  ;;  %v4423_v20 = vld [vmem:[#allocation2 + $0x144] sm:$0xf] }
 0x309   : > { %16731 = vst [vmem:[#allocation27_spill] sm:$0xff] %v14809_v8  ;;  %v11352_v16 = vor.u32 %v11822_v31, %v11351_v56  ;;  %v4424_v38 = vld [vmem:[#allocation2 + $0x148] sm:$0xf]  ;;  %v7224_v1 = vrot.slane %v7223_v22, 4  ;;  %v5024_v39 = vshrl.u32 %v4423_v20, 16  ;;  %v5027_v2 = vshll.u32 %v4423_v20, 16 }
 0x30a   : > { %6383 = vst.msk [vmem:[#allocation3 + $0x238] sm:$0xf] %vm3901_vm2, %v14762_v61  ;;  %v11881_v6 = vld [vmem:[%s16675_s5 + $0x18] sm:$0xff]  ;;  %v5033_v5 = vshll.u32 %v4424_v38, 16  ;;  %v5037_v56 = vshrl.u32 %v4424_v38, 16  ;;  %v7233_v63 = vor.u32 %v7232_v35, %v7228_v47  ;;  %v14821_v61 = vpop.f32.mrf.mxu3 }
 0x30b   : > { %7503 = vst.msk [vmem:[#allocation3 + $0x238] sm:$0xf] %vm4286_vm4, %v14738_v33  ;;  %v6492_v23 = vld [vmem:[#allocation2 + $0x1a0] sm:$0x1]  ;;  %v5026_v4 = vrot.slane %v5024_v39, 4  ;;  %v5029_v17 = vrot.slane %v5027_v2, 5  ;;  %9880 = vmatpush.bf16.msrb.mxu3 %v11881_v6  ;;  %v5858_v20 = vpop.permute.xlu1 %5857  ;;  %v14829_v35 = vpop.permute.xlu0 %6242  ;;  %v7229_v24 = vsel %vm12823_vm14, %v7224_v1, %v7228_v47 }
 0x30c   : > { %7502 = vst.msk [vmem:[#allocation3 + $0x22c] sm:$0xf] %vm4286_vm4, %v7357_v36  ;;  %v7236_v27 = vshll.u32 %v6492_v23, 16  ;;  %v5438_v32 = vld [vmem:[#allocation2 + $0x1a0] sm:$0x1]  ;;  %v11845_v33 = vld [vmem:[%s16674_s4 + $0x8] sm:$0xff]  ;;  %11467 = vmatmul.msk.bf16.gmra.mxu3 %vm8820_vm5, %v11352_v16  ;;  %v5755_v36 = vsel %vm12704_vm11, %v10948_v48, %v5754_v9 }
 0x30d   : > { %16732 = vst [vmem:[#allocation28_spill] sm:$0xff] %v14821_v61  ;;  %v5035_v31 = vrot.slane %v5033_v5, 5  ;;  %v4425_v22 = vld [vmem:[#allocation2 + $0x14c] sm:$0x1]  ;;  %v6076_v39 = vld [vmem:[#allocation2 + $0x198] sm:$0xf]  ;;  %v5030_v2 = vor.u32 %v5029_v17, %v5026_v4  ;;  %10159 = vmatpush.bf16.msrb.mxu0 %v11845_v33  ;;  %5883 = vrot.lane.b32.xlu0 %v5755_v36, %s12286_s26 }
 0x30e   : > { %v7234_v23 = vrot.slane %v7233_v63, 4  ;;  %v5039_v6 = vrot.slane %v5037_v56, 4  ;;  %v5043_v61 = vshll.u32 %v4425_v22, 16  ;;  %v5756_v16 = vrot.slane %v5754_v9, 4  ;;  %v6493_v5 = vld [vmem:[#allocation2 + $0x1a4] sm:$0xf]  ;;  %6264 = vrot.lane.b32.xlu2 %v6076_v39, %s12287_s11 }
 0x30f   : > { %v5757_v48 = vrot.slane %v5438_v32, 5  ;;  %v6494_v44 = vld [vmem:[#allocation2 + $0x1a8] sm:$0xf]  ;;  %7384 = vrot.lane.b32.xlu1 %v7229_v24, %s12288_s19  ;;  %v5031_v38 = vrot.slane %v5030_v2, 4  ;;  %v7238_v59 = vrot.slane %v7236_v27, 5  ;;  %v14837_v56 = vpop.f32.mrf.mxu2  ;;  %v7241_v33 = vshrl.u32 %v6493_v5, 16  ;;  %v14841_v32 = vpop.permute.xlu2 %6244 }
 0x310   : > { %v5040_v4 = vor.u32 %v5039_v6, %v5035_v31  ;;  %v5045_v63 = vrot.slane %v5043_v61, 5  ;;  %16733 = vst [vmem:[#allocation29_spill] sm:$0xff] %v14837_v56  ;;  %v2166_v17 = vld [vmem:[#allocation2] sm:$0xf]  ;;  %v7244_v22 = vshll.u32 %v6493_v5, 16  ;;  %v7250_v47 = vshll.u32 %v6494_v44, 16 }
 0x311   : > { %v7254_v1 = vshrl.u32 %v6494_v44, 16  ;;  %v2167_v36 = vld [vmem:[#allocation2 + $0x4] sm:$0xf]  ;;  %v5036_v9 = vsel %vm12823_vm14, %v5031_v38, %v5035_v31  ;;  %v6079_v52 = vld [vmem:[#allocation2 + $0x1a8] sm:$0xf]  ;;  %v2266_v2 = vshrl.u32 %v2166_v17, 16  ;;  %v5758_v44 = vsel %vm12704_vm11, %v5756_v16, %v5757_v48 }
 0x312   : > { %v5041_v39 = vrot.slane %v5040_v4, 4  ;;  %v2269_v27 = vshll.u32 %v2166_v17, 16  ;;  %v11829_v61 = vld [vmem:[%s16673_s3 + $0x18] sm:$0xff]  ;;  %5327 = vst.msk [vmem:[#allocation3 + $0x244] sm:$0xf] %vm1055_vm1, %v5036_v9  ;;  %v7243_v5 = vrot.slane %v7241_v33, 4  ;;  %v7239_v33 = vsel %vm12823_vm14, %v7234_v23, %v7238_v59 }
 0x313   : > { %v11799_v24 = vld [vmem:[#allocation3 + $0x22c] sm:$0xf]  ;;  %v11261_v6 = vld [vmem:[#allocation3 + $0x234] sm:$0xf0]  ;;  %v7246_v56 = vrot.slane %v7244_v22, 5  ;;  %v2268_v38 = vrot.slane %v2266_v2, 4  ;;  %8921 = vmatpush.bf16.msrb.mxu1 %v11829_v61 }
 0x314   : > { %5999 = vst.msk [vmem:[#allocation3 + $0x244] sm:$0xf] %vm3225_vm15, %v14791_v34  ;;  %v5046_v31 = vsel %vm12823_vm14, %v5041_v39, %v5045_v63  ;;  %v2271_v4 = vrot.slane %v2269_v27, 5  ;;  %v2275_v17 = vshll.u32 %v2167_v36, 16  ;;  %v11264_v9 = vor.u32 %v11799_v24, %v11261_v6  ;;  %v4426_v48 = vld [vmem:[#allocation2 + $0x150] sm:$0xf]  ;;  %v7361_v2 = vpop.permute.xlu1 %7360 }
 0x315   : > { %6384 = vst.msk [vmem:[#allocation3 + $0x244] sm:$0xf] %vm3901_vm2, %v14772_v40  ;;  %v7247_v8 = vor.u32 %v7246_v56, %v7243_v5  ;;  %v7252_v15 = vrot.slane %v7250_v47, 5  ;;  %v2279_v16 = vshrl.u32 %v2167_v36, 16  ;;  %v4427_v22 = vld [vmem:[#allocation2 + $0x154] sm:$0xf]  ;;  %6270 = vrot.lane.b32.xlu0 %v6079_v52, %s12287_s11  ;;  %v5860_v36 = vpop.permute.xlu0 %5859 }
 0x316   : > { %5328 = vst.msk [vmem:[#allocation3 + $0x250] sm:$0xf] %vm1055_vm1, %v5046_v31  ;;  %v2272_v34 = vor.u32 %v2271_v4, %v2268_v38  ;;  %v5048_v63 = vshrl.u32 %v4426_v48, 16  ;;  %v7256_v39 = vrot.slane %v7254_v1, 4  ;;  %v2277_v40 = vrot.slane %v2275_v17, 5  ;;  %7386 = vrot.lane.b32.xlu2 %v7239_v33, %s12288_s19 }
 0x317   : > { %6000 = vst.msk [vmem:[#allocation3 + $0x250] sm:$0xf] %vm3225_vm15, %v5858_v20  ;;  %v5051_v24 = vshll.u32 %v4426_v48, 16  ;;  %v5057_v56 = vshll.u32 %v4427_v22, 16  ;;  %v5061_v47 = vshrl.u32 %v4427_v22, 16  ;;  %5885 = vrot.lane.b32.xlu1 %v5758_v44, %s12286_s26  ;;  %v14864_v27 = vpop.f32.mrf.mxu2  ;;  %v7248_v52 = vrot.slane %v7247_v8, 4 }
 0x318   : > { %6385 = vst.msk [vmem:[#allocation3 + $0x250] sm:$0xf] %vm3901_vm2, %v14829_v35  ;;  %v2273_v59 = vrot.slane %v2272_v34, 4  ;;  %v5050_v23 = vrot.slane %v5048_v63, 4  ;;  %v6495_v1 = vld [vmem:[#allocation2 + $0x1ac] sm:$0x1]  ;;  %9209 = vmatmul.bf16.gmra.mxu2 %v11264_v9  ;;  %v7257_v6 = vor.u32 %v7256_v39, %v7252_v15 }
 0x319   : > { %7505 = vst.msk [vmem:[#allocation3 + $0x250] sm:$0xf] %vm4286_vm4, %v14807_v19  ;;  %v5053_v20 = vrot.slane %v5051_v24, 5  ;;  %v5059_v61 = vrot.slane %v5057_v56, 5  ;;  %v2168_v5 = vld [vmem:[#allocation2 + $0x8] sm:$0x1]  ;;  %v7367_v34 = vpop.permute.xlu2 %7366 }
 0x31a   : > { %7504 = vst.msk [vmem:[#allocation3 + $0x244] sm:$0xf] %vm4286_vm4, %v7361_v2  ;;  %v2281_v44 = vrot.slane %v2279_v16, 4  ;;  %v7260_v38 = vshll.u32 %v6495_v1, 16  ;;  %v4428_v35 = vld [vmem:[#allocation2 + $0x158] sm:$0x1]  ;;  %v2278_v19 = vsel %vm12823_vm14, %v2273_v59, %v2277_v40  ;;  %v7253_v16 = vsel %vm12823_vm14, %v7248_v52, %v7252_v15 }
 0x31b   : > { %v5054_v31 = vor.u32 %v5053_v20, %v5050_v23  ;;  %v5063_v4 = vrot.slane %v5061_v47, 4  ;;  %v16734_v17 = vshrl.u32 %v14811_v42, 16  ;;  %v6078_v33 = vld [vmem:[#allocation2 + $0x1a4] sm:$0xf]  ;;  %v2285_v8 = vshll.u32 %v2168_v5, 16 }
 0x31c   : > { %v5067_v9 = vshll.u32 %v4428_v35, 16  ;;  %v14875_v22 = vld [vmem:[#allocation2 + $0x4] sm:$0xf]  ;;  %v2282_v39 = vor.u32 %v2281_v44, %v2277_v40  ;;  %v3292_v24 = vld [vmem:[#allocation2 + $0x8] sm:$0x1]  ;;  %v7258_v47 = vrot.slane %v7257_v6, 4 }
 0x31d   : > { %v14871_v48 = vrot.slane %v16734_v17, 4  ;;  %v5055_v63 = vrot.slane %v5054_v31, 4  ;;  %v5064_v2 = vor.u32 %v5063_v4, %v5059_v61  ;;  %v4429_v56 = vld [vmem:[#allocation2 + $0x15c] sm:$0xf]  ;;  %v3487_v1 = vrot.slane %v14875_v22, 5  ;;  %3033 = vrot.lane.b32.xlu0 %v2278_v19, %s12286_s26  ;;  %v5862_v4 = vpop.permute.xlu1 %5861 }
 0x31e   : > { %v5069_v23 = vrot.slane %v5067_v9, 5  ;;  %v2293_v20 = vshll.u32 %v14811_v42, 16  ;;  %v4430_v17 = vld [vmem:[#allocation2 + $0x160] sm:$0xf]  ;;  %v7262_v5 = vrot.slane %v7260_v38, 5  ;;  %v5072_v52 = vshrl.u32 %v4429_v56, 16  ;;  %6268 = vrot.lane.b32.xlu2 %v6078_v33, %s12287_s11  ;;  %v6247_v33 = vpop.permute.xlu0 %6246 }
 0x31f   : > { %v5060_v59 = vsel %vm12823_vm14, %v5055_v63, %v5059_v61  ;;  %v5065_v35 = vrot.slane %v5064_v2, 4  ;;  %v2170_v15 = vld [vmem:[#allocation2 + $0x10] sm:$0xf]  ;;  %7388 = vrot.lane.b32.xlu1 %v7253_v16, %s12288_s19  ;;  %v2287_v40 = vrot.slane %v2285_v8, 5  ;;  %v3489_v42 = vrot.slane %v3487_v1, 4  ;;  %v14889_v44 = vpop.f32.mrf.mxu2 }
 0x320   : > { %5329 = vst.msk [vmem:[#allocation3 + $0x25c] sm:$0xf] %vm1055_vm1, %v5060_v59  ;;  %v3490_v6 = vrot.slane %v3292_v24, 5  ;;  %v5075_v31 = vshll.u32 %v4429_v56, 16  ;;  %v2283_v61 = vrot.slane %v2282_v39, 4  ;;  %v5074_v19 = vrot.slane %v5072_v52, 4 }
 0x321   : > { %6001 = vst.msk [vmem:[#allocation3 + $0x25c] sm:$0xf] %vm3225_vm15, %v5860_v36  ;;  %v5070_v38 = vsel %vm12823_vm14, %v5065_v35, %v5069_v23  ;;  %v5081_v9 = vshll.u32 %v4430_v17, 16  ;;  %v11802_v8 = vld [vmem:[#allocation3 + $0x244] sm:$0xf]  ;;  %v5085_v63 = vshrl.u32 %v4430_v17, 16  ;;  %v6249_v36 = vpop.permute.xlu2 %6248 }
 0x322   : > { %6386 = vst.msk [vmem:[#allocation3 + $0x25c] sm:$0xf] %vm3901_vm2, %v14841_v32  ;;  %v5077_v16 = vrot.slane %v5075_v31, 5  ;;  %v11273_v2 = vld [vmem:[#allocation3 + $0x24c] sm:$0xf0]  ;;  %v2295_v24 = vrot.slane %v2293_v20, 5  ;;  %v3491_v39 = vsel %vm12704_vm11, %v3489_v42, %v3490_v6  ;;  %v7263_v32 = vsel %vm12823_vm14, %v7258_v47, %v7262_v5 }
 0x323   : > { %5330 = vst.msk [vmem:[#allocation3 + $0x268] sm:$0xf] %vm1055_vm1, %v5070_v38  ;;  %v5083_v56 = vrot.slane %v5081_v9, 5  ;;  %v2299_v23 = vshll.u32 %v2170_v15, 16  ;;  %v4431_v35 = vld [vmem:[#allocation2 + $0x164] sm:$0x1]  ;;  %v2288_v17 = vsel %vm12823_vm14, %v2283_v61, %v2287_v40  ;;  %v11276_v20 = vor.u32 %v11802_v8, %v11273_v2 }
 0x324   : > { %6002 = vst.msk [vmem:[#allocation3 + $0x268] sm:$0xf] %vm3225_vm15, %v5862_v4  ;;  %v5078_v59 = vor.u32 %v5077_v16, %v5074_v19  ;;  %v5087_v52 = vrot.slane %v5085_v63, 4  ;;  %v5091_v31 = vshll.u32 %v4431_v35, 16  ;;  %v3290_v38 = vld [vmem:[#allocation2] sm:$0xe]  ;;  %v2296_v47 = vor.u32 %v2295_v24, %v14871_v48 }
 0x325   : > { %6387 = vst.msk [vmem:[#allocation3 + $0x268] sm:$0xf] %vm3901_vm2, %v6247_v33  ;;  %3711 = vrot.lane.b32.xlu0 %v3491_v39, %s12287_s11  ;;  %v2303_v42 = vshrl.u32 %v2170_v15, 16  ;;  %v10885_v61 = vrot.slane %v3290_v38, 9  ;;  %v14917_v19 = vld [vmem:[#allocation2 + $0x10] sm:$0xf] }
 0x326   : > { %7507 = vst.msk [vmem:[#allocation3 + $0x268] sm:$0xf] %vm4286_vm4, %v7367_v34  ;;  %v5079_v4 = vrot.slane %v5078_v59, 4  ;;  %v5088_v9 = vor.u32 %v5087_v52, %v5083_v56  ;;  %v5093_v6 = vrot.slane %v5091_v31, 5  ;;  %7390 = vrot.lane.b32.xlu2 %v7263_v32, %s12288_s19  ;;  %v2301_v34 = vrot.slane %v2299_v23, 5 }
 0x327   : > { %3035 = vrot.lane.b32.xlu1 %v2288_v17, %s12286_s26  ;;  %v14913_v33 = vpop.f32.mrf.mxu2  ;;  %v4432_v8 = vld [vmem:[#allocation2 + $0x168] sm:$0xf]  ;;  %v4433_v16 = vld [vmem:[#allocation2 + $0x16c] sm:$0xf]  ;;  %v2305_v48 = vrot.slane %v2303_v42, 4  ;;  %v2297_v39 = vrot.slane %v2296_v47, 4  ;;  %v3488_v52 = vsel %vm12704_vm11, %v10885_v61, %v3487_v1 }
 0x328   : > { %v5084_v5 = vsel %vm12823_vm14, %v5079_v4, %v5083_v56  ;;  %v5089_v40 = vrot.slane %v5088_v9, 4  ;;  %9214 = vmatmul.bf16.gmra.mxu2 %v11276_v20  ;;  %v2172_v2 = vld [vmem:[#allocation2 + $0x18] sm:$0xf]  ;;  %v5096_v24 = vshrl.u32 %v4432_v8, 16  ;;  %v5099_v23 = vshll.u32 %v4432_v8, 16 }
 0x329   : > { %5331 = vst.msk [vmem:[#allocation3 + $0x274] sm:$0xf] %vm1055_vm1, %v5084_v5  ;;  %v5864_v63 = vpop.permute.xlu0 %5863  ;;  %v7365_v56 = vpop.permute.xlu1 %7364  ;;  %v5105_v59 = vshll.u32 %v4433_v16, 16  ;;  %v5109_v35 = vshrl.u32 %v4433_v16, 16  ;;  %v2171_v32 = vld [vmem:[#allocation2 + $0x14] sm:$0x1]  ;;  %v2302_v31 = vsel %vm12823_vm14, %v2297_v39, %v2301_v34  ;;  %v2306_v22 = vor.u32 %v2305_v48, %v2301_v34 }
 0x32a   : > { %v5094_v15 = vsel %vm12823_vm14, %v5089_v40, %v5093_v6  ;;  %6003 = vst.msk [vmem:[#allocation3 + $0x274] sm:$0xf] %vm3225_vm15, %v5864_v63  ;;  %v5098_v17 = vrot.slane %v5096_v24, 4  ;;  %v3494_v38 = vrot.slane %v14917_v19, 5  ;;  %v5101_v4 = vrot.slane %v5099_v23, 5 }
 0x32b   : > { %5332 = vst.msk [vmem:[#allocation3 + $0x280] sm:$0xf] %vm1055_vm1, %v5094_v15  ;;  %v5107_v9 = vrot.slane %v5105_v59, 5  ;;  %v3966_v42 = vld [vmem:[#allocation2 + $0xc] sm:$0xf]  ;;  %v2314_v6 = vshrl.u32 %v2172_v2, 16 }
 0x32c   : > { %7506 = vst.msk [vmem:[#allocation3 + $0x25c] sm:$0xf] %vm4286_vm4, %v7365_v56  ;;  %v7371_v20 = vpop.permute.xlu2 %7370  ;;  %v4434_v1 = vld [vmem:[#allocation2 + $0x170] sm:$0x1]  ;;  %v3295_v47 = vld [vmem:[#allocation2 + $0x14] sm:$0x1]  ;;  %v5102_v40 = vor.u32 %v5101_v4, %v5098_v17 }
 0x32d   : > { %6388 = vst.msk [vmem:[#allocation3 + $0x274] sm:$0xf] %vm3901_vm2, %v6249_v36  ;;  %3037 = vrot.lane.b32.xlu0 %v2302_v31, %s12286_s26  ;;  %v2317_v5 = vshll.u32 %v2172_v2, 16  ;;  %v5111_v61 = vrot.slane %v5109_v35, 4  ;;  %v5115_v15 = vshll.u32 %v4434_v1, 16  ;;  %v2309_v36 = vshll.u32 %v2171_v32, 16 }
 0x32e   : > { %3709 = vrot.lane.b32.xlu2 %v3488_v52, %s12287_s11  ;;  %v3496_v8 = vrot.slane %v3494_v38, 4  ;;  %v5103_v16 = vrot.slane %v5102_v40, 4  ;;  %v2307_v56 = vrot.slane %v2306_v22, 4  ;;  %v3497_v34 = vrot.slane %v3295_v47, 5  ;;  %v2173_v39 = vld [vmem:[#allocation2 + $0x1c] sm:$0xf] }
 0x32f   : > { %4094 = vrot.lane.b32.xlu1 %v3966_v42, %s12288_s19  ;;  %v5112_v63 = vor.u32 %v5111_v61, %v5107_v9  ;;  %v5117_v24 = vrot.slane %v5115_v15, 5  ;;  %v2316_v23 = vrot.slane %v2314_v6, 4  ;;  %v11285_v31 = vld [vmem:[#allocation3 + $0x264] sm:$0xf0]  ;;  %v2319_v2 = vrot.slane %v2317_v5, 5  ;;  %v11828_v22 = vld [vmem:[%s16673_s3 + $0x10] sm:$0xff] }
 0x330   : > { %v2311_v17 = vrot.slane %v2309_v36, 5  ;;  %v5108_v4 = vsel %vm12823_vm14, %v5103_v16, %v5107_v9  ;;  %v4435_v1 = vld [vmem:[#allocation2 + $0x174] sm:$0xf]  ;;  %v3967_v6 = vld [vmem:[#allocation2 + $0x10] sm:$0xf]  ;;  %v3498_v47 = vsel %vm12704_vm11, %v3496_v8, %v3497_v34  ;;  %v2323_v5 = vshll.u32 %v2173_v39, 16  ;;  %8922 = vmatpush.bf16.msrb.mxu1 %v11828_v22 }
 0x331   : > { %v6251_v48 = vpop.permute.xlu0 %6250  ;;  %v14935_v42 = vpop.f32.mrf.mxu2  ;;  %v5113_v35 = vrot.slane %v5112_v63, 4  ;;  %v2327_v9 = vshrl.u32 %v2173_v39, 16  ;;  %v4436_v15 = vld [vmem:[#allocation2 + $0x178] sm:$0xf]  ;;  %v5120_v36 = vshrl.u32 %v4435_v1, 16  ;;  %v2320_v16 = vor.u32 %v2319_v2, %v2316_v23 }
 0x332   : > { %v5866_v59 = vpop.permute.xlu1 %5865  ;;  %v2312_v61 = vsel %vm12823_vm14, %v2307_v56, %v2311_v17  ;;  %5333 = vst.msk [vmem:[#allocation3 + $0x28c] sm:$0xf] %vm1055_vm1, %v5108_v4  ;;  %v5123_v63 = vshll.u32 %v4435_v1, 16  ;;  %v5129_v56 = vshll.u32 %v4436_v15, 16  ;;  %v3293_v34 = vld [vmem:[#allocation2 + $0xc] sm:$0xe] }
 0x333   : > { %v11805_v52 = vld [vmem:[#allocation3 + $0x25c] sm:$0xf]  ;;  %6004 = vst.msk [vmem:[#allocation3 + $0x280] sm:$0xf] %vm3225_vm15, %v5866_v59  ;;  %v5118_v40 = vsel %vm12823_vm14, %v5113_v35, %v5117_v24  ;;  %v5122_v24 = vrot.slane %v5120_v36, 4  ;;  %v2329_v39 = vrot.slane %v2327_v9, 4 }
 0x334   : > { %v11288_v32 = vor.u32 %v11805_v52, %v11285_v31  ;;  %6389 = vst.msk [vmem:[#allocation3 + $0x280] sm:$0xf] %vm3901_vm2, %v6251_v48  ;;  %v6253_v8 = vpop.permute.xlu2 %6252  ;;  %v5125_v48 = vrot.slane %v5123_v63, 5  ;;  %v14956_v59 = vld [vmem:[#allocation2 + $0x1c] sm:$0xf]  ;;  %v5133_v52 = vshrl.u32 %v4436_v15, 16 }
 0x335   : > { %3715 = vrot.lane.b32.xlu0 %v3498_v47, %s12287_s11  ;;  %7509 = vst.msk [vmem:[#allocation3 + $0x280] sm:$0xf] %vm4286_vm4, %v7371_v20  ;;  %v2325_v20 = vrot.slane %v2323_v5, 5  ;;  %v2321_v31 = vrot.slane %v2320_v16, 4  ;;  %v14958_v17 = vld [vmem:[#allocation2 + $0x1c] sm:$0xf] }
 0x336   : > { %4096 = vrot.lane.b32.xlu2 %v3967_v6, %s12288_s19  ;;  %5334 = vst.msk [vmem:[#allocation3 + $0x298] sm:$0xf] %vm1055_vm1, %v5118_v40  ;;  %v5126_v35 = vor.u32 %v5125_v48, %v5122_v24  ;;  %v10886_v23 = vrot.slane %v3293_v34, 9  ;;  %v2175_v4 = vld [vmem:[#allocation2 + $0x24] sm:$0xf]  ;;  %v16689_v5 = vrot.slane %v14956_v59, 5 }
 0x337   : > { %3039 = vrot.lane.b32.xlu1 %v2312_v61, %s12286_s26  ;;  %v3968_v22 = vld [vmem:[#allocation2 + $0x18] sm:$0xf]  ;;  %v2326_v1 = vsel %vm12823_vm14, %v2321_v31, %v2325_v20  ;;  %v2174_v47 = vld [vmem:[#allocation2 + $0x20] sm:$0x1]  ;;  %v2330_v36 = vor.u32 %v2329_v39, %v2325_v20  ;;  %v4437_v16 = vld [vmem:[#allocation2 + $0x17c] sm:$0x1] }
 0x338   : > { %9219 = vmatmul.bf16.gmra.mxu2 %v11288_v32  ;;  %v5131_v32 = vrot.slane %v5129_v56, 5  ;;  %v5127_v40 = vrot.slane %v5126_v35, 4  ;;  %v14965_v61 = vld [vmem:[#allocation2 + $0x18] sm:$0xe]  ;;  %v3495_v9 = vsel %vm12704_vm11, %v10886_v23, %v3494_v38  ;;  %v5135_v63 = vrot.slane %v5133_v52, 4 }
 0x339   : > { %v14960_v2 = vpop.f32.mrf.mxu2  ;;  %v2338_v24 = vshrl.u32 %v2175_v4, 16  ;;  %v2341_v56 = vshll.u32 %v2175_v4, 16  ;;  %v5139_v38 = vshll.u32 %v4437_v16, 16  ;;  %v7714_v34 = vrot.slane %v14958_v17, 5  ;;  %v3298_v20 = vld [vmem:[#allocation2 + $0x20] sm:$0x1] }
 0x33a   : > { %16735 = vst [vmem:[#allocation30_spill] sm:$0xff] %v14960_v2  ;;  %v5132_v19 = vsel %vm12823_vm14, %v5127_v40, %v5131_v32  ;;  %v2333_v48 = vshll.u32 %v2174_v47, 16  ;;  %v5136_v39 = vor.u32 %v5135_v63, %v5131_v32  ;;  %v3503_v31 = vrot.slane %v16689_v5, 4  ;;  %v2176_v35 = vld [vmem:[#allocation2 + $0x28] sm:$0xf] }
 0x33b   : > { %5335 = vst.msk [vmem:[#allocation3 + $0x2a4] sm:$0xf] %vm1055_vm1, %v5132_v19  ;;  %v5141_v23 = vrot.slane %v5139_v38, 5  ;;  %v2331_v4 = vrot.slane %v2330_v36, 4  ;;  %v2340_v40 = vrot.slane %v2338_v24, 4  ;;  %v2343_v17 = vrot.slane %v2341_v56, 5 }
 0x33c   : > { %v5868_v6 = vpop.permute.xlu0 %5867  ;;  %v7369_v15 = vpop.permute.xlu1 %7368  ;;  %v3969_v47 = vld [vmem:[#allocation2 + $0x1c] sm:$0xf]  ;;  %v7716_v16 = vrot.slane %v7714_v34, 4  ;;  %v11297_v38 = vld [vmem:[#allocation3 + $0x27c] sm:$0xf0]  ;;  %v2351_v36 = vshrl.u32 %v2176_v35, 16 }
 0x33d   : > { %3041 = vrot.lane.b32.xlu0 %v2326_v1, %s12286_s26  ;;  %6005 = vst.msk [vmem:[#allocation3 + $0x28c] sm:$0xf] %vm3225_vm15, %v5868_v6  ;;  %v10949_v1 = vrot.slane %v14965_v61, 9  ;;  %v3504_v6 = vrot.slane %v3298_v20, 5  ;;  %v3296_v20 = vld [vmem:[#allocation2 + $0x18] sm:$0xe] }
 0x33e   : > { %3713 = vrot.lane.b32.xlu2 %v3495_v9, %s12287_s11  ;;  %7508 = vst.msk [vmem:[#allocation3 + $0x274] sm:$0xf] %vm4286_vm4, %v7369_v15  ;;  %v7522_v9 = vld [vmem:[#allocation2 + $0x20] sm:$0x1]  ;;  %v2347_v15 = vshll.u32 %v2176_v35, 16  ;;  %v2344_v35 = vor.u32 %v2343_v17, %v2340_v40 }
 0x33f   : > { %4098 = vrot.lane.b32.xlu1 %v3968_v22, %s12288_s19  ;;  %6390 = vst.msk [vmem:[#allocation3 + $0x28c] sm:$0xf] %vm3901_vm2, %v6253_v8  ;;  %v5137_v22 = vrot.slane %v5136_v39, 4  ;;  %v2335_v8 = vrot.slane %v2333_v48, 5  ;;  %v3505_v63 = vsel %vm12704_vm11, %v3503_v31, %v3504_v6  ;;  %v4438_v39 = vld [vmem:[#allocation2 + $0x180] sm:$0xf] }
 0x340   : > { %v7375_v52 = vpop.permute.xlu2 %7374  ;;  %v5147_v6 = vshll.u32 %v4438_v39, 16  ;;  %v15001_v40 = vld [vmem:[#allocation2 + $0x28] sm:$0xf] }
 0x341   : > { %v5142_v32 = vsel %vm12823_vm14, %v5137_v22, %v5141_v23  ;;  %v2336_v61 = vsel %vm12823_vm14, %v2331_v4, %v2335_v8  ;;  %v4439_v23 = vld [vmem:[#allocation2 + $0x184] sm:$0xf]  ;;  %v5144_v22 = vshrl.u32 %v4438_v39, 16  ;;  %v2040_v4 = vld [vmem:[#allocation2 + $0xc] sm:$0xf]  ;;  %v7717_v8 = vrot.slane %v7522_v9, 5 }
 0x342   : > { %5336 = vst.msk [vmem:[#allocation3 + $0x2b0] sm:$0xf] %vm1055_vm1, %v5142_v32  ;;  %v2349_v32 = vrot.slane %v2347_v15, 5  ;;  %v5153_v2 = vshll.u32 %v4439_v23, 16  ;;  %v10887_v9 = vrot.slane %v3296_v20, 9  ;;  %v2345_v15 = vrot.slane %v2344_v35, 4 }
 0x343   : > { %2104 = vst.msk [vmem:[#allocation3 + $0x18] sm:$0xf] %vm1055_vm1, %v2040_v4  ;;  %v7718_v17 = vsel %vm12704_vm11, %v7716_v16, %v7717_v8  ;;  %v3970_v16 = vld [vmem:[#allocation2 + $0x24] sm:$0xf]  ;;  %v16737_v20 = vrot.slane %v14956_v59, 5  ;;  %v11880_v59 = vld [vmem:[%s16675_s5 + $0x10] sm:$0xff] }
 0x344   : > { %v6255_v19 = vpop.permute.xlu0 %6254  ;;  %v14992_v48 = vpop.f32.mrf.mxu2  ;;  %v5155_v39 = vrot.slane %v5153_v2, 5  ;;  %8001 = vst.msk [vmem:[#allocation3 + $0x14] sm:$0xf] %vm1055_vm1, %v7718_v17  ;;  %9881 = vmatpush.bf16.msrb.mxu3 %v11880_v59  ;;  %v4441_v59 = vld [vmem:[#allocation2 + $0x18c] sm:$0xf] }
 0x345   : > { %v5870_v24 = vpop.permute.xlu1 %5869  ;;  %3719 = vrot.lane.b32.xlu0 %v3505_v63, %s12287_s11  ;;  %v11808_v56 = vld [vmem:[#allocation3 + $0x274] sm:$0xf]  ;;  %16736 = vst [vmem:[#allocation31_spill] sm:$0xff] %v14992_v48  ;;  %v2041_v63 = vld [vmem:[#allocation2 + $0x10] sm:$0xf]  ;;  %v5146_v48 = vrot.slane %v5144_v22, 4 }
 0x346   : > { %4100 = vrot.lane.b32.xlu2 %v3969_v47, %s12288_s19  ;;  %6006 = vst.msk [vmem:[#allocation3 + $0x298] sm:$0xf] %vm3225_vm15, %v5870_v24  ;;  %v11300_v31 = vor.u32 %v11808_v56, %v11297_v38  ;;  %v7715_v47 = vsel %vm12704_vm11, %v10949_v1, %v7714_v34  ;;  %v2353_v38 = vrot.slane %v2351_v36, 4  ;;  %v5157_v24 = vshrl.u32 %v4439_v23, 16  ;;  %v2178_v56 = vld [vmem:[#allocation2 + $0x30] sm:$0xf] }
 0x347   : > { %3043 = vrot.lane.b32.xlu1 %v2336_v61, %s12286_s26  ;;  %6391 = vst.msk [vmem:[#allocation3 + $0x298] sm:$0xf] %vm3901_vm2, %v6255_v19  ;;  %v5149_v61 = vrot.slane %v5147_v6, 5  ;;  %v2350_v34 = vsel %vm12823_vm14, %v2345_v15, %v2349_v32  ;;  %v16690_v1 = vrot.slane %v15001_v40, 5  ;;  %v2362_v35 = vshrl.u32 %v2178_v56, 16 }
 0x348   : > { %v6257_v5 = vpop.permute.xlu2 %6256  ;;  %7511 = vst.msk [vmem:[#allocation3 + $0x298] sm:$0xf] %vm4286_vm4, %v7375_v52  ;;  %9224 = vmatmul.bf16.gmra.mxu2 %v11300_v31  ;;  %v2177_v52 = vld [vmem:[#allocation2 + $0x2c] sm:$0x1]  ;;  %v2354_v31 = vor.u32 %v2353_v38, %v2349_v32  ;;  %v2365_v22 = vshll.u32 %v2178_v56, 16  ;;  %v5159_v4 = vrot.slane %v5157_v24, 4 }
 0x349   : > { %v5150_v19 = vor.u32 %v5149_v61, %v5146_v48  ;;  %2105 = vst.msk [vmem:[#allocation3 + $0x24] sm:$0xf] %vm1055_vm1, %v2041_v63  ;;  %v3502_v48 = vsel %vm12704_vm11, %v10887_v9, %v16737_v20  ;;  %v4440_v6 = vld [vmem:[#allocation2 + $0x188] sm:$0x1]  ;;  %v2357_v63 = vshll.u32 %v2177_v52, 16  ;;  %v3510_v17 = vrot.slane %v16690_v1, 4 }
 0x34a   : > { %8000 = vst.msk [vmem:[#allocation3 + $0x8] sm:$0xf] %vm1055_vm1, %v7715_v47  ;;  %v3301_v61 = vld [vmem:[#allocation2 + $0x2c] sm:$0x1]  ;;  %v5163_v32 = vshll.u32 %v4440_v6, 16  ;;  %v5160_v15 = vor.u32 %v5159_v4, %v5155_v39 }
 0x34b   : > { %v5151_v36 = vrot.slane %v5150_v19, 4  ;;  %v2179_v9 = vld [vmem:[#allocation2 + $0x34] sm:$0xf]  ;;  %v2355_v19 = vrot.slane %v2354_v31, 4  ;;  %v2042_v56 = vld [vmem:[#allocation2 + $0x18] sm:$0xf] }
 0x34c   : > { %v15017_v23 = vpop.f32.mrf.mxu2  ;;  %v5165_v24 = vrot.slane %v5163_v32, 5  ;;  %v3511_v52 = vrot.slane %v3301_v61, 5  ;;  %v2359_v20 = vrot.slane %v2357_v63, 5  ;;  %v2375_v6 = vshrl.u32 %v2179_v9, 16  ;;  %2106 = vst.msk [vmem:[#allocation3 + $0x30] sm:$0xf] %vm1055_vm1, %v2042_v56 }
 0x34d   : > { %3045 = vrot.lane.b32.xlu0 %v2350_v34, %s12286_s26  ;;  %16738 = vst [vmem:[#allocation32_spill] sm:$0xff] %v15017_v23  ;;  %v5156_v2 = vsel %vm12823_vm14, %v5151_v36, %v5155_v39  ;;  %v2364_v34 = vrot.slane %v2362_v35, 4  ;;  %v2367_v36 = vrot.slane %v2365_v22, 5  ;;  %v3971_v4 = vld [vmem:[#allocation2 + $0x28] sm:$0xf] }
 0x34e   : > { %3717 = vrot.lane.b32.xlu2 %v3502_v48, %s12287_s11  ;;  %5337 = vst.msk [vmem:[#allocation3 + $0x2bc] sm:$0xf] %vm1055_vm1, %v5156_v2  ;;  %v2371_v48 = vshll.u32 %v2179_v9, 16  ;;  %v3512_v2 = vsel %vm12704_vm11, %v3510_v17, %v3511_v52  ;;  %v2360_v31 = vsel %vm12823_vm14, %v2355_v19, %v2359_v20  ;;  %v11827_v22 = vld [vmem:[%s16673_s3 + $0x8] sm:$0xff]  ;;  %v5168_v17 = vshrl.u32 %v4441_v59, 16 }
 0x34f   : > { %4102 = vrot.lane.b32.xlu1 %v3970_v16, %s12288_s19  ;;  %v5872_v8 = vpop.permute.xlu0 %5871  ;;  %v5161_v16 = vrot.slane %v5160_v15, 4  ;;  %v2368_v35 = vor.u32 %v2367_v36, %v2364_v34  ;;  %v5171_v9 = vshll.u32 %v4441_v59, 16  ;;  %v11309_v56 = vld [vmem:[#allocation3 + $0x294] sm:$0xf0]  ;;  %v2377_v52 = vrot.slane %v2375_v6, 4  ;;  %8923 = vmatpush.bf16.msrb.mxu1 %v11827_v22 }
 0x350   : > { %v7379_v47 = vpop.permute.xlu2 %7378  ;;  %v7373_v38 = vpop.permute.xlu1 %7372  ;;  %6007 = vst.msk [vmem:[#allocation3 + $0x2a4] sm:$0xf] %vm3225_vm15, %v5872_v8  ;;  %v4442_v8 = vld [vmem:[#allocation2 + $0x190] sm:$0xf]  ;;  %v2373_v32 = vrot.slane %v2371_v48, 5 }
 0x351   : > { %7510 = vst.msk [vmem:[#allocation3 + $0x28c] sm:$0xf] %vm4286_vm4, %v7373_v38  ;;  %v5166_v39 = vsel %vm12823_vm14, %v5161_v16, %v5165_v24  ;;  %v15048_v38 = vld [vmem:[#allocation2 + $0x34] sm:$0xf]  ;;  %v5177_v34 = vshll.u32 %v4442_v8, 16  ;;  %v5170_v16 = vrot.slane %v5168_v17, 4 }
 0x352   : > { %6392 = vst.msk [vmem:[#allocation3 + $0x2a4] sm:$0xf] %vm3901_vm2, %v6257_v5  ;;  %v3299_v5 = vld [vmem:[#allocation2 + $0x24] sm:$0xe]  ;;  %v5173_v20 = vrot.slane %v5171_v9, 5  ;;  %v2369_v48 = vrot.slane %v2368_v35, 4 }
 0x353   : > { %5338 = vst.msk [vmem:[#allocation3 + $0x2c8] sm:$0xf] %vm1055_vm1, %v5166_v39  ;;  %v7523_v39 = vld [vmem:[#allocation2 + $0x24] sm:$0xe]  ;;  %v10888_v59 = vrot.slane %v3299_v5, 9  ;;  %v5179_v9 = vrot.slane %v5177_v34, 5 }
 0x354   : > { %v2181_v1 = vld [vmem:[#allocation2 + $0x3c] sm:$0xf]  ;;  %v5174_v6 = vor.u32 %v5173_v20, %v5170_v16  ;;  %v2374_v22 = vsel %vm12823_vm14, %v2369_v48, %v2373_v32  ;;  %v4443_v34 = vld [vmem:[#allocation2 + $0x194] sm:$0x1]  ;;  %v10950_v20 = vrot.slane %v7523_v39, 9 }
 0x355   : > { %3723 = vrot.lane.b32.xlu0 %v3512_v2, %s12287_s11  ;;  %v2043_v2 = vld [vmem:[#allocation2 + $0x1c] sm:$0xf]  ;;  %v3304_v17 = vld [vmem:[#allocation2 + $0x38] sm:$0x1] }
 0x356   : > { %4104 = vrot.lane.b32.xlu2 %v3971_v4, %s12288_s19  ;;  %v5181_v4 = vshrl.u32 %v4442_v8, 16  ;;  %2107 = vst.msk [vmem:[#allocation3 + $0x3c] sm:$0xf] %vm1055_vm1, %v2043_v2  ;;  %v5175_v5 = vrot.slane %v5174_v6, 4 }
 0x357   : > { %3047 = vrot.lane.b32.xlu1 %v2360_v31, %s12286_s26  ;;  %v6259_v63 = vpop.permute.xlu0 %6258  ;;  %v15046_v61 = vpop.f32.mrf.mxu2  ;;  %v7524_v31 = vld [vmem:[#allocation2 + $0x28] sm:$0xf] }
 0x358   : > { %16739 = vst [vmem:[#allocation33_spill] sm:$0xff] %v15046_v61  ;;  %v6261_v15 = vpop.permute.xlu2 %6260  ;;  %v5874_v19 = vpop.permute.xlu1 %5873  ;;  %v11811_v24 = vld [vmem:[#allocation3 + $0x28c] sm:$0xf]  ;;  %v7721_v8 = vrot.slane %v7524_v31, 5  ;;  %v5183_v16 = vrot.slane %v5181_v4, 4 }
 0x359   : > { %6008 = vst.msk [vmem:[#allocation3 + $0x2b0] sm:$0xf] %vm3225_vm15, %v5874_v19  ;;  %v11312_v36 = vor.u32 %v11811_v24, %v11309_v56  ;;  %v2180_v19 = vld [vmem:[#allocation2 + $0x38] sm:$0x1]  ;;  %v3972_v24 = vld [vmem:[#allocation2 + $0x30] sm:$0xf] }
 0x35a   : > { %6393 = vst.msk [vmem:[#allocation3 + $0x2b0] sm:$0xf] %vm3901_vm2, %v6259_v63  ;;  %v16740_v63 = vrot.slane %v15001_v40, 5  ;;  %v2386_v56 = vshrl.u32 %v2181_v1, 16  ;;  %v2381_v40 = vshll.u32 %v2180_v19, 16  ;;  %v5184_v6 = vor.u32 %v5183_v16, %v5179_v9 }
 0x35b   : > { %7513 = vst.msk [vmem:[#allocation3 + $0x2b0] sm:$0xf] %vm4286_vm4, %v7379_v47  ;;  %9229 = vmatmul.bf16.gmra.mxu2 %v11312_v36  ;;  %v2378_v47 = vor.u32 %v2377_v52, %v2373_v32  ;;  %v2389_v36 = vshll.u32 %v2181_v1, 16  ;;  %v16742_v32 = vrot.slane %v15048_v38, 5  ;;  %v2182_v31 = vld [vmem:[#allocation2 + $0x40] sm:$0xf]  ;;  %v5180_v1 = vsel %vm12823_vm14, %v5175_v5, %v5179_v9 }
 0x35c   : > { %v3509_v35 = vsel %vm12704_vm11, %v10888_v59, %v16740_v63  ;;  %v5187_v59 = vshll.u32 %v4443_v34, 16  ;;  %v7722_v19 = vsel %vm12704_vm11, %v10950_v20, %v7721_v8  ;;  %5339 = vst.msk [vmem:[#allocation3 + $0x2d4] sm:$0xf] %vm1055_vm1, %v5180_v1  ;;  %v2399_v5 = vshrl.u32 %v2182_v31, 16  ;;  %v7525_v16 = vld [vmem:[#allocation2 + $0x2c] sm:$0x1] }
 0x35d   : > { %3049 = vrot.lane.b32.xlu0 %v2374_v22, %s12286_s26  ;;  %v3517_v52 = vrot.slane %v16742_v32, 4  ;;  %v2379_v39 = vrot.slane %v2378_v47, 4  ;;  %v2391_v34 = vrot.slane %v2389_v36, 5  ;;  %v2395_v32 = vshll.u32 %v2182_v31, 16  ;;  %8002 = vst.msk [vmem:[#allocation3 + $0x20] sm:$0xf] %vm1055_vm1, %v7722_v19 }
 0x35e   : > { %3721 = vrot.lane.b32.xlu2 %v3509_v35, %s12287_s11  ;;  %v5189_v4 = vrot.slane %v5187_v59, 5  ;;  %v2388_v35 = vrot.slane %v2386_v56, 4  ;;  %v7723_v56 = vrot.slane %v7721_v8, 4  ;;  %v4444_v20 = vld [vmem:[#allocation2 + $0x198] sm:$0xf] }
 0x35f   : > { %4106 = vrot.lane.b32.xlu1 %v3972_v24, %s12288_s19  ;;  %v5876_v2 = vpop.permute.xlu0 %5875  ;;  %v15064_v48 = vpop.f32.mrf.mxu2  ;;  %v3518_v24 = vrot.slane %v3304_v17, 5  ;;  %v3973_v17 = vld [vmem:[#allocation2 + $0x34] sm:$0xf]  ;;  %v5192_v31 = vshrl.u32 %v4444_v20, 16  ;;  %v5195_v1 = vshll.u32 %v4444_v20, 16 }
 0x360   : > { %16741 = vst [vmem:[#allocation34_spill] sm:$0xff] %v15064_v48  ;;  %v7383_v63 = vpop.permute.xlu2 %7382  ;;  %v2383_v48 = vrot.slane %v2381_v40, 5  ;;  %v2392_v36 = vor.u32 %v2391_v34, %v2388_v35  ;;  %v4445_v40 = vld [vmem:[#allocation2 + $0x19c] sm:$0xf] }
 0x361   : > { %v7377_v22 = vpop.permute.xlu1 %7376  ;;  %6009 = vst.msk [vmem:[#allocation3 + $0x2bc] sm:$0xf] %vm3225_vm15, %v5876_v2  ;;  %v5185_v2 = vrot.slane %v5184_v6, 4  ;;  %v3519_v9 = vsel %vm12704_vm11, %v3517_v52, %v3518_v24  ;;  %v2397_v52 = vrot.slane %v2395_v32, 5  ;;  %v7724_v6 = vrot.slane %v7525_v16, 5 }
 0x362   : > { %7512 = vst.msk [vmem:[#allocation3 + $0x2a4] sm:$0xf] %vm4286_vm4, %v7377_v22  ;;  %v3302_v22 = vld [vmem:[#allocation2 + $0x30] sm:$0xe]  ;;  %v11321_v19 = vld [vmem:[#allocation3 + $0x2ac] sm:$0xf0] }
 0x363   : > { %6394 = vst.msk [vmem:[#allocation3 + $0x2bc] sm:$0xf] %vm3901_vm2, %v6261_v15  ;;  %v5190_v47 = vsel %vm12823_vm14, %v5185_v2, %v5189_v4  ;;  %v2384_v15 = vsel %vm12823_vm14, %v2379_v39, %v2383_v48  ;;  %v2401_v24 = vrot.slane %v2399_v5, 4  ;;  %v5201_v2 = vshll.u32 %v4445_v40, 16 }
 0x364   : > { %5340 = vst.msk [vmem:[#allocation3 + $0x2e0] sm:$0xf] %vm1055_vm1, %v5190_v47  ;;  %v5194_v35 = vrot.slane %v5192_v31, 4  ;;  %v5197_v34 = vrot.slane %v5195_v1, 5  ;;  %v7725_v47 = vsel %vm12704_vm11, %v7723_v56, %v7724_v6  ;;  %v2393_v16 = vrot.slane %v2392_v36, 4 }
 0x365   : > { %3727 = vrot.lane.b32.xlu0 %v3519_v9, %s12287_s11  ;;  %v15088_v9 = vld [vmem:[#allocation2 + $0x40] sm:$0xf]  ;;  %v10889_v5 = vrot.slane %v3302_v22, 9  ;;  %v2183_v31 = vld [vmem:[#allocation2 + $0x44] sm:$0x1] }
 0x366   : > { %4108 = vrot.lane.b32.xlu2 %v3973_v17, %s12288_s19  ;;  %v2184_v17 = vld [vmem:[#allocation2 + $0x48] sm:$0xf]  ;;  %v5198_v20 = vor.u32 %v5197_v34, %v5194_v35  ;;  %v16691_v1 = vrot.slane %v15088_v9, 5  ;;  %8003 = vst.msk [vmem:[#allocation3 + $0x2c] sm:$0xf] %vm1055_vm1, %v7725_v47  ;;  %v2405_v34 = vshll.u32 %v2183_v31, 16 }
 0x367   : > { %3051 = vrot.lane.b32.xlu1 %v2384_v15, %s12286_s26  ;;  %v6263_v59 = vpop.permute.xlu0 %6262  ;;  %v5205_v15 = vshrl.u32 %v4445_v40, 16  ;;  %v3974_v56 = vld [vmem:[#allocation2 + $0x3c] sm:$0xf]  ;;  %v2410_v22 = vshrl.u32 %v2184_v17, 16  ;;  %v2413_v6 = vshll.u32 %v2184_v17, 16 }
 0x368   : > { %v6265_v48 = vpop.permute.xlu2 %6264  ;;  %v5199_v40 = vrot.slane %v5198_v20, 4  ;;  %v3307_v47 = vld [vmem:[#allocation2 + $0x44] sm:$0x1]  ;;  %v3524_v17 = vrot.slane %v16691_v1, 4  ;;  %v2407_v1 = vrot.slane %v2405_v34, 5 }
 0x369   : > { %v5878_v39 = vpop.permute.xlu1 %5877  ;;  %v11814_v4 = vld [vmem:[#allocation3 + $0x2a4] sm:$0xf]  ;;  %v2038_v34 = vld [vmem:[#allocation2] sm:$0xf] }
 0x36a   : > { %6010 = vst.msk [vmem:[#allocation3 + $0x2c8] sm:$0xf] %vm3225_vm15, %v5878_v39  ;;  %v11324_v8 = vor.u32 %v11814_v4, %v11321_v19  ;;  %v15093_v32 = vpop.f32.mrf.mxu2  ;;  %v2398_v39 = vsel %vm12823_vm14, %v2393_v16, %v2397_v52  ;;  %v5203_v4 = vrot.slane %v5201_v2, 5  ;;  %v4446_v19 = vld [vmem:[#allocation2 + $0x1a0] sm:$0x1]  ;;  %v5207_v2 = vrot.slane %v5205_v15, 4 }
 0x36b   : > { %6395 = vst.msk [vmem:[#allocation3 + $0x2c8] sm:$0xf] %vm3901_vm2, %v6263_v59  ;;  %v16744_v59 = vrot.slane %v15048_v38, 5  ;;  %v15110_v38 = vld [vmem:[#allocation2 + $0x34] sm:$0xf]  ;;  %v5211_v16 = vshll.u32 %v4446_v19, 16 }
 0x36c   : > { %16743 = vst [vmem:[#allocation35_spill] sm:$0xff] %v15093_v32  ;;  %9234 = vmatmul.bf16.gmra.mxu2 %v11324_v8  ;;  %v11826_v8 = vld [vmem:[%s16673_s3] sm:$0xff]  ;;  %v2185_v15 = vld [vmem:[#allocation2 + $0x4c] sm:$0xf]  ;;  %v5204_v20 = vsel %vm12823_vm14, %v5199_v40, %v5203_v4  ;;  %v3525_v19 = vrot.slane %v3307_v47, 5  ;;  %v2415_v32 = vrot.slane %v2413_v6, 5 }
 0x36d   : > { %7515 = vst.msk [vmem:[#allocation3 + $0x2c8] sm:$0xf] %vm4286_vm4, %v7383_v63  ;;  %v3516_v36 = vsel %vm12704_vm11, %v10889_v5, %v16744_v59  ;;  %3053 = vrot.lane.b32.xlu0 %v2398_v39, %s12286_s26  ;;  %v2402_v63 = vor.u32 %v2401_v24, %v2397_v52  ;;  %v15112_v52 = vld [vmem:[#allocation2 + $0x30] sm:$0xe]  ;;  %v5208_v39 = vor.u32 %v5207_v2, %v5203_v4  ;;  %v2044_v59 = vld [vmem:[#allocation2 + $0x24] sm:$0xf] }
 0x36e   : > { %3725 = vrot.lane.b32.xlu2 %v3516_v36, %s12287_s11  ;;  %8924 = vmatpush.bf16.msrb.mxu1 %v11826_v8  ;;  %v2419_v23 = vshll.u32 %v2185_v15, 16  ;;  %5341 = vst.msk [vmem:[#allocation3 + $0x2ec] sm:$0xf] %vm1055_vm1, %v5204_v20  ;;  %v7728_v4 = vrot.slane %v15110_v38, 5  ;;  %v3526_v40 = vsel %vm12704_vm11, %v3524_v17, %v3525_v19  ;;  %v15131_v2 = vld [vmem:[#allocation2 + $0x3c] sm:$0xe] }
 0x36f   : > { %4110 = vrot.lane.b32.xlu1 %v3974_v56, %s12288_s19  ;;  %v5880_v35 = vpop.permute.xlu0 %5879  ;;  %v2403_v31 = vrot.slane %v2402_v63, 4  ;;  %v5213_v56 = vrot.slane %v5211_v16, 5  ;;  %v5209_v61 = vrot.slane %v5208_v39, 4  ;;  %2108 = vst.msk [vmem:[#allocation3 + $0x48] sm:$0xf] %vm1055_vm1, %v2044_v59  ;;  %v2423_v38 = vshrl.u32 %v2185_v15, 16 }
 0x370   : > { %v7387_v24 = vpop.permute.xlu2 %7386  ;;  %6011 = vst.msk [vmem:[#allocation3 + $0x2d4] sm:$0xf] %vm3225_vm15, %v5880_v35  ;;  %v2412_v35 = vrot.slane %v2410_v22, 4  ;;  %v3975_v6 = vld [vmem:[#allocation2 + $0x40] sm:$0xf]  ;;  %v2421_v17 = vrot.slane %v2419_v23, 5 }
 0x371   : > { %v7381_v5 = vpop.permute.xlu1 %7380  ;;  %6396 = vst.msk [vmem:[#allocation3 + $0x2d4] sm:$0xf] %vm3901_vm2, %v6265_v48  ;;  %v5214_v63 = vsel %vm12823_vm14, %v5209_v61, %v5213_v56  ;;  %v10951_v48 = vrot.slane %v15112_v52, 9  ;;  %v2408_v22 = vsel %vm12823_vm14, %v2403_v31, %v2407_v1  ;;  %v3305_v8 = vld [vmem:[#allocation2 + $0x3c] sm:$0xe]  ;;  %v7730_v20 = vrot.slane %v7728_v4, 4 }
 0x372   : > { %7514 = vst.msk [vmem:[#allocation3 + $0x2bc] sm:$0xf] %vm4286_vm4, %v7381_v5  ;;  %v15121_v36 = vpop.f32.mrf.mxu2  ;;  %v2416_v61 = vor.u32 %v2415_v32, %v2412_v35  ;;  %v2039_v47 = vld [vmem:[#allocation2 + $0x4] sm:$0xf]  ;;  %v7528_v16 = vld [vmem:[#allocation2 + $0x38] sm:$0x1] }
 0x373   : > { %16745 = vst [vmem:[#allocation36_spill] sm:$0xff] %v15121_v36  ;;  %v7530_v52 = vld [vmem:[#allocation2 + $0x40] sm:$0xf]  ;;  %v2045_v1 = vld [vmem:[#allocation2 + $0x28] sm:$0xf]  ;;  %v2425_v32 = vrot.slane %v2423_v38, 4 }
 0x374   : > { %5342 = vst.msk [vmem:[#allocation3 + $0x2f8] sm:$0xf] %vm1055_vm1, %v5214_v63  ;;  %v11333_v56 = vld [vmem:[#allocation3 + $0x2c4] sm:$0xf0]  ;;  %v15142_v19 = vld [vmem:[#allocation2 + $0x4c] sm:$0xf] }
 0x375   : > { %3731 = vrot.lane.b32.xlu0 %v3526_v40, %s12287_s11  ;;  %2102 = vst.msk [vmem:[#allocation3] sm:$0xf] %vm1055_vm1, %v2038_v34  ;;  %v7731_v35 = vrot.slane %v7528_v16, 5  ;;  %v10952_v40 = vrot.slane %v15131_v2, 9  ;;  %v10890_v63 = vrot.slane %v3305_v8, 9  ;;  %v3529_v16 = vrot.slane %v15142_v19, 5 }
 0x376   : > { %4112 = vrot.lane.b32.xlu2 %v3975_v6, %s12288_s19  ;;  %2103 = vst.msk [vmem:[#allocation3 + $0xc] sm:$0xf] %vm1055_vm1, %v2039_v47  ;;  %v7729_v6 = vsel %vm12704_vm11, %v10951_v48, %v7728_v4  ;;  %v2186_v34 = vld [vmem:[#allocation2 + $0x50] sm:$0x1]  ;;  %v2187_v47 = vld [vmem:[#allocation2 + $0x54] sm:$0xf]  ;;  %v2426_v48 = vor.u32 %v2425_v32, %v2421_v17 }
 0x377   : > { %3055 = vrot.lane.b32.xlu1 %v2408_v22, %s12286_s26  ;;  %v6267_v5 = vpop.permute.xlu0 %6266  ;;  %v2417_v22 = vrot.slane %v2416_v61, 4  ;;  %v7732_v38 = vsel %vm12704_vm11, %v7730_v20, %v7731_v35  ;;  %2109 = vst.msk [vmem:[#allocation3 + $0x54] sm:$0xf] %vm1055_vm1, %v2045_v1  ;;  %v2046_v8 = vld [vmem:[#allocation2 + $0x30] sm:$0xf]  ;;  %v7735_v61 = vrot.slane %v7530_v52, 5 }
 0x378   : > { %v6269_v39 = vpop.permute.xlu2 %6268  ;;  %v16747_v4 = vrot.slane %v15088_v9, 5  ;;  %8004 = vst.msk [vmem:[#allocation3 + $0x38] sm:$0xf] %vm1055_vm1, %v7729_v6  ;;  %v7531_v20 = vld [vmem:[#allocation2 + $0x44] sm:$0x1]  ;;  %v2434_v1 = vshrl.u32 %v2187_v47, 16 }
 0x379   : > { %v5882_v31 = vpop.permute.xlu1 %5881  ;;  %v11817_v15 = vld [vmem:[#allocation3 + $0x2bc] sm:$0xf]  ;;  %v2422_v2 = vsel %vm12823_vm14, %v2417_v22, %v2421_v17  ;;  %8005 = vst.msk [vmem:[#allocation3 + $0x44] sm:$0xf] %vm1055_vm1, %v7732_v38  ;;  %v7737_v52 = vrot.slane %v7735_v61, 4  ;;  %v3531_v32 = vrot.slane %v3529_v16, 4 }
 0x37a   : > { %6012 = vst.msk [vmem:[#allocation3 + $0x2e0] sm:$0xf] %vm3225_vm15, %v5882_v31  ;;  %v11336_v59 = vor.u32 %v11817_v15, %v11333_v56  ;;  %v2429_v31 = vshll.u32 %v2186_v34, 16  ;;  %v2437_v15 = vshll.u32 %v2187_v47, 16  ;;  %v3310_v56 = vld [vmem:[#allocation2 + $0x50] sm:$0x1]  ;;  %v7736_v34 = vsel %vm12704_vm11, %v10952_v40, %v7735_v61 }
 0x37b   : > { %6397 = vst.msk [vmem:[#allocation3 + $0x2e0] sm:$0xf] %vm3901_vm2, %v6267_v5  ;;  %v15146_v23 = vpop.f32.mrf.mxu2  ;;  %v3976_v5 = vld [vmem:[#allocation2 + $0x48] sm:$0xf]  ;;  %v7738_v22 = vrot.slane %v7531_v20, 5  ;;  %v2427_v6 = vrot.slane %v2426_v48, 4 }
 0x37c   : > { %16746 = vst [vmem:[#allocation37_spill] sm:$0xff] %v15146_v23  ;;  %9239 = vmatmul.bf16.gmra.mxu2 %v11336_v59  ;;  %v2188_v59 = vld [vmem:[#allocation2 + $0x58] sm:$0xf]  ;;  %v3532_v38 = vrot.slane %v3310_v56, 5  ;;  %v2048_v20 = vld [vmem:[#allocation2 + $0x3c] sm:$0xf] }
 0x37d   : > { %7517 = vst.msk [vmem:[#allocation3 + $0x2e0] sm:$0xf] %vm4286_vm4, %v7387_v24  ;;  %v3523_v24 = vsel %vm12704_vm11, %v10890_v63, %v16747_v4  ;;  %3057 = vrot.lane.b32.xlu0 %v2422_v2, %s12286_s26  ;;  %v2047_v63 = vld [vmem:[#allocation2 + $0x34] sm:$0xf]  ;;  %v2436_v2 = vrot.slane %v2434_v1, 4  ;;  %v2431_v4 = vrot.slane %v2429_v31, 5 }
 0x37e   : > { %3729 = vrot.lane.b32.xlu2 %v3523_v24, %s12287_s11  ;;  %2110 = vst.msk [vmem:[#allocation3 + $0x60] sm:$0xf] %vm1055_vm1, %v2046_v8  ;;  %v2439_v8 = vrot.slane %v2437_v15, 5  ;;  %v2443_v24 = vshll.u32 %v2188_v59, 16  ;;  %v3533_v48 = vsel %vm12704_vm11, %v3531_v32, %v3532_v38  ;;  %v2447_v61 = vshrl.u32 %v2188_v59, 16 }
 0x37f   : > { %4114 = vrot.lane.b32.xlu1 %v3976_v5, %s12288_s19  ;;  %v5884_v9 = vpop.permute.xlu0 %5883  ;;  %v7739_v5 = vsel %vm12704_vm11, %v7737_v52, %v7738_v22  ;;  %2111 = vst.msk [vmem:[#allocation3 + $0x6c] sm:$0xf] %vm1055_vm1, %v2047_v63  ;;  %v2432_v40 = vsel %vm12823_vm14, %v2427_v6, %v2431_v4  ;;  %v2050_v31 = vld [vmem:[#allocation2 + $0x48] sm:$0xf]  ;;  %v7533_v52 = vld [vmem:[#allocation2 + $0x4c] sm:$0xf] }
 0x380   : > { %v7391_v35 = vpop.permute.xlu2 %7390  ;;  %6013 = vst.msk [vmem:[#allocation3 + $0x2ec] sm:$0xf] %vm3225_vm15, %v5884_v9  ;;  %v3977_v9 = vld [vmem:[#allocation2 + $0x4c] sm:$0xf]  ;;  %v7532_v1 = vld [vmem:[#allocation2 + $0x48] sm:$0xe]  ;;  %v2440_v15 = vor.u32 %v2439_v8, %v2436_v2 }
 0x381   : > { %v7385_v17 = vpop.permute.xlu1 %7384  ;;  %6398 = vst.msk [vmem:[#allocation3 + $0x2ec] sm:$0xf] %vm3901_vm2, %v6269_v39  ;;  %v2049_v39 = vld [vmem:[#allocation2 + $0x40] sm:$0xf]  ;;  %v2445_v32 = vrot.slane %v2443_v24, 5  ;;  %v2449_v38 = vrot.slane %v2447_v61, 4 }
 0x382   : > { %7516 = vst.msk [vmem:[#allocation3 + $0x2d4] sm:$0xf] %vm4286_vm4, %v7385_v17  ;;  %v3308_v17 = vld [vmem:[#allocation2 + $0x48] sm:$0xe]  ;;  %v2441_v8 = vrot.slane %v2440_v15, 4  ;;  %v10953_v4 = vrot.slane %v7532_v1, 9 }
 0x383   : > { %v15174_v47 = vpop.f32.mrf.mxu2  ;;  %8006 = vst.msk [vmem:[#allocation3 + $0x50] sm:$0xf] %vm1055_vm1, %v7736_v34  ;;  %v10891_v24 = vrot.slane %v3308_v17, 9  ;;  %v7742_v61 = vrot.slane %v7533_v52, 5  ;;  %v2051_v1 = vld [vmem:[#allocation2 + $0x4c] sm:$0xf] }
 0x384   : > { %16748 = vst [vmem:[#allocation38_spill] sm:$0xff] %v15174_v47  ;;  %v11345_v6 = vld [vmem:[#allocation3 + $0x2dc] sm:$0xf0]  ;;  %v11879_v52 = vld [vmem:[%s16675_s5 + $0x8] sm:$0xff]  ;;  %v2198_v47 = vld [vmem:[#allocation2 + $0x80] sm:$0x1] }
 0x385   : > { %3735 = vrot.lane.b32.xlu0 %v3533_v48, %s12287_s11  ;;  %8007 = vst.msk [vmem:[#allocation3 + $0x5c] sm:$0xf] %vm1055_vm1, %v7739_v5  ;;  %v15192_v5 = vld [vmem:[#allocation2 + $0x58] sm:$0xf]  ;;  %v2189_v48 = vld [vmem:[#allocation2 + $0x5c] sm:$0x1]  ;;  %v3530_v15 = vsel %vm12704_vm11, %v10891_v24, %v3529_v16  ;;  %v7743_v19 = vsel %vm12704_vm11, %v10953_v4, %v7742_v61  ;;  %9882 = vmatpush.bf16.msrb.mxu3 %v11879_v52 }
 0x386   : > { %4116 = vrot.lane.b32.xlu2 %v3977_v9, %s12288_s19  ;;  %2112 = vst.msk [vmem:[#allocation3 + $0x78] sm:$0xf] %vm1055_vm1, %v2048_v20  ;;  %v2190_v20 = vld [vmem:[#allocation2 + $0x60] sm:$0xf]  ;;  %v2446_v9 = vsel %vm12823_vm14, %v2441_v8, %v2445_v32  ;;  %v2191_v24 = vld [vmem:[#allocation2 + $0x64] sm:$0xf] }
 0x387   : > { %3059 = vrot.lane.b32.xlu1 %v2432_v40, %s12286_s26  ;;  %v6271_v56 = vpop.permute.xlu0 %6270  ;;  %2113 = vst.msk [vmem:[#allocation3 + $0x84] sm:$0xf] %vm1055_vm1, %v2049_v39  ;;  %v3536_v39 = vrot.slane %v15192_v5, 5  ;;  %v7534_v40 = vld [vmem:[#allocation2 + $0x50] sm:$0x1]  ;;  %v2461_v17 = vshll.u32 %v2190_v20, 16 }
 0x388   : > { %v3710_v63 = vpop.permute.xlu2 %3709  ;;  %2114 = vst.msk [vmem:[#allocation3 + $0x90] sm:$0xf] %vm1055_vm1, %v2050_v31  ;;  %v3978_v31 = vld [vmem:[#allocation2 + $0x54] sm:$0xf]  ;;  %v2204_v23 = vld [vmem:[#allocation2 + $0x98] sm:$0x1] }
 0x389   : > { %v5886_v22 = vpop.permute.xlu1 %5885  ;;  %v11820_v59 = vld [vmem:[#allocation3 + $0x2d4] sm:$0xf]  ;;  %2115 = vst.msk [vmem:[#allocation3 + $0x9c] sm:$0xf] %vm1055_vm1, %v2051_v1  ;;  %v3538_v8 = vrot.slane %v3536_v39, 4 }
 0x38a   : > { %6014 = vst.msk [vmem:[#allocation3 + $0x2f8] sm:$0xf] %vm3225_vm15, %v5886_v22  ;;  %v11348_v34 = vor.u32 %v11820_v59, %v11345_v6  ;;  %v7744_v22 = vrot.slane %v7742_v61, 4  ;;  %v2453_v59 = vshll.u32 %v2189_v48, 16  ;;  %v7745_v6 = vrot.slane %v7534_v40, 5 }
 0x38b   : > { %6399 = vst.msk [vmem:[#allocation3 + $0x2f8] sm:$0xf] %vm3901_vm2, %v6271_v56  ;;  %v15195_v2 = vpop.f32.mrf.mxu2  ;;  %v2458_v56 = vshrl.u32 %v2190_v20, 16  ;;  %v2463_v61 = vrot.slane %v2461_v17, 5 }
 0x38c   : > { %16749 = vst [vmem:[#allocation39_spill] sm:$0xff] %v15195_v2  ;;  %9244 = vmatmul.bf16.gmra.mxu2 %v11348_v34  ;;  %v7746_v20 = vsel %vm12704_vm11, %v7744_v22, %v7745_v6 }
 0x38d   : > { %7519 = vst.msk [vmem:[#allocation3 + $0x2f8] sm:$0xf] %vm4286_vm4, %v7391_v35  ;;  %3061 = vrot.lane.b32.xlu0 %v2446_v9, %s12286_s26  ;;  %v2450_v35 = vor.u32 %v2449_v38, %v2445_v32  ;;  %v3313_v32 = vld [vmem:[#allocation2 + $0x5c] sm:$0x1]  ;;  %v2460_v40 = vrot.slane %v2458_v56, 4 }
 0x38e   : > { %3733 = vrot.lane.b32.xlu2 %v3530_v15, %s12287_s11  ;;  %8008 = vst.msk [vmem:[#allocation3 + $0x68] sm:$0xf] %vm1055_vm1, %v7743_v19  ;;  %v3539_v48 = vrot.slane %v3313_v32, 5  ;;  %v11844_v15 = vld [vmem:[%s16674_s4] sm:$0xff]  ;;  %v2471_v19 = vshrl.u32 %v2191_v24, 16 }
 0x38f   : > { %4118 = vrot.lane.b32.xlu1 %v3978_v31, %s12288_s19  ;;  %v3034_v16 = vpop.permute.xlu0 %3033  ;;  %v2451_v4 = vrot.slane %v2450_v35, 4  ;;  %v2455_v31 = vrot.slane %v2453_v59, 5  ;;  %v2467_v35 = vshll.u32 %v2191_v24, 16  ;;  %8009 = vst.msk [vmem:[#allocation3 + $0x74] sm:$0xf] %vm1055_vm1, %v7746_v20  ;;  %10160 = vmatpush.bf16.msrb.mxu0 %v11844_v15  ;;  %v2464_v22 = vor.u32 %v2463_v61, %v2460_v40 }
 0x390   : > { %v4097_v38 = vpop.permute.xlu2 %4096  ;;  %3226 = vst.msk [vmem:[#allocation3] sm:$0xf] %vm3225_vm15, %v3034_v16  ;;  %v3540_v1 = vsel %vm12704_vm11, %v3538_v8, %v3539_v48  ;;  %v2052_v56 = vld [vmem:[#allocation2 + $0x54] sm:$0xf]  ;;  %v7536_v59 = vld [vmem:[#allocation2 + $0x58] sm:$0xf] }
 0x391   : > { %v7389_v34 = vpop.permute.xlu1 %7388  ;;  %3902 = vst.msk [vmem:[#allocation3] sm:$0xf] %vm3901_vm2, %v3710_v63  ;;  %v2456_v52 = vsel %vm12823_vm14, %v2451_v4, %v2455_v31  ;;  %v3979_v63 = vld [vmem:[#allocation2 + $0x58] sm:$0xf]  ;;  %v7535_v16 = vld [vmem:[#allocation2 + $0x54] sm:$0xe] }
 0x392   : > { %7518 = vst.msk [vmem:[#allocation3 + $0x2ec] sm:$0xf] %vm4286_vm4, %v7389_v34  ;;  %v3311_v4 = vld [vmem:[#allocation2 + $0x54] sm:$0xe]  ;;  %v2469_v20 = vrot.slane %v2467_v35, 5  ;;  %v2473_v48 = vrot.slane %v2471_v19, 4 }
 0x393   : > { %v15222_v9 = vpop.f32.mrf.mxu2  ;;  %2116 = vst.msk [vmem:[#allocation3 + $0xa8] sm:$0xf] %vm1055_vm1, %v2052_v56  ;;  %v15237_v31 = vld [vmem:[#allocation2 + $0x64] sm:$0xf]  ;;  %v2465_v40 = vrot.slane %v2464_v22, 4 }
 0x394   : > { %16750 = vst [vmem:[#allocation40_spill] sm:$0xff] %v15222_v9  ;;  %v11357_v17 = vld [vmem:[#allocation3 + $0x2f4] sm:$0xf0]  ;;  %v2193_v61 = vld [vmem:[#allocation2 + $0x6c] sm:$0xf]  ;;  %v16692_v56 = vrot.slane %v15237_v31, 5 }
 0x395   : > { %3739 = vrot.lane.b32.xlu0 %v3540_v1, %s12287_s11  ;;  %v10954_v1 = vrot.slane %v7535_v16, 9  ;;  %v2470_v35 = vsel %vm12823_vm14, %v2465_v40, %v2469_v20  ;;  %v7537_v19 = vld [vmem:[#allocation2 + $0x5c] sm:$0x1]  ;;  %v2474_v16 = vor.u32 %v2473_v48, %v2469_v20 }
 0x396   : > { %4120 = vrot.lane.b32.xlu2 %v3979_v63, %s12288_s19  ;;  %v2192_v63 = vld [vmem:[#allocation2 + $0x68] sm:$0x1]  ;;  %v15322_v9 = vld [vmem:[#allocation2 + $0x7c] sm:$0xf] }
 0x397   : > { %3063 = vrot.lane.b32.xlu1 %v2456_v52, %s12286_s26  ;;  %v3712_v32 = vpop.permute.xlu0 %3711  ;;  %v10892_v52 = vrot.slane %v3311_v4, 9  ;;  %v2477_v40 = vshll.u32 %v2192_v63, 16 }
 0x398   : > { %v3714_v34 = vpop.permute.xlu2 %3713 }
 0x399   : > { %v3036_v6 = vpop.permute.xlu1 %3035  ;;  %v11823_v8 = vld [vmem:[#allocation3 + $0x2ec] sm:$0xf]  ;;  %v3537_v22 = vsel %vm12704_vm11, %v10892_v52, %v3536_v39  ;;  %v3316_v39 = vld [vmem:[#allocation2 + $0x68] sm:$0x1]  ;;  %v3545_v52 = vrot.slane %v16692_v56, 4 }
 0x39a   : > { %3227 = vst.msk [vmem:[#allocation3 + $0xc] sm:$0xf] %vm3225_vm15, %v3036_v6  ;;  %v11360_v24 = vor.u32 %v11823_v8, %v11357_v17  ;;  %v7749_v17 = vrot.slane %v7536_v59, 5  ;;  %v3980_v6 = vld [vmem:[#allocation2 + $0x60] sm:$0xf]  ;;  %v2485_v8 = vshll.u32 %v2193_v61, 16 }
 0x39b   : > { %3903 = vst.msk [vmem:[#allocation3 + $0xc] sm:$0xf] %vm3901_vm2, %v3712_v32  ;;  %v15240_v15 = vpop.f32.mrf.mxu2  ;;  %v2053_v32 = vld [vmem:[#allocation2 + $0x58] sm:$0xf] }
 0x39c   : > { %16751 = vst [vmem:[#allocation41_spill] sm:$0xff] %v15240_v15  ;;  %9249 = vmatmul.bf16.gmra.mxu2 %v11360_v24  ;;  %v7750_v4 = vsel %vm12704_vm11, %v10954_v1, %v7749_v17  ;;  %v7751_v59 = vrot.slane %v7749_v17, 4  ;;  %v7752_v24 = vrot.slane %v7537_v19, 5  ;;  %v2475_v1 = vrot.slane %v2474_v16, 4  ;;  %v15278_v15 = vld [vmem:[#allocation2 + $0x70] sm:$0xf] }
 0x39d   : > { %4288 = vst.msk [vmem:[#allocation3 + $0xc] sm:$0xf] %vm4286_vm4, %v4097_v38  ;;  %3065 = vrot.lane.b32.xlu0 %v2470_v35, %s12286_s26  ;;  %v2482_v38 = vshrl.u32 %v2193_v61, 16  ;;  %v2194_v35 = vld [vmem:[#allocation2 + $0x70] sm:$0xf]  ;;  %v3546_v19 = vrot.slane %v3316_v39, 5 }
 0x39e   : > { %3737 = vrot.lane.b32.xlu2 %v3537_v22, %s12287_s11  ;;  %2117 = vst.msk [vmem:[#allocation3 + $0xb4] sm:$0xf] %vm1055_vm1, %v2053_v32  ;;  %v7753_v61 = vsel %vm12704_vm11, %v7751_v59, %v7752_v24  ;;  %v15266_v22 = vpop.f32.mrf.mxu3  ;;  %v2479_v32 = vrot.slane %v2477_v40, 5  ;;  %v2491_v59 = vshll.u32 %v2194_v35, 16  ;;  %v2054_v24 = vld [vmem:[#allocation2 + $0x60] sm:$0xf] }
 0x39f   : > { %4122 = vrot.lane.b32.xlu1 %v3980_v6, %s12288_s19  ;;  %v3038_v5 = vpop.permute.xlu0 %3037  ;;  %8010 = vst.msk [vmem:[#allocation3 + $0x80] sm:$0xf] %vm1055_vm1, %v7750_v4  ;;  %v2484_v17 = vrot.slane %v2482_v38, 4  ;;  %v2487_v6 = vrot.slane %v2485_v8, 5  ;;  %v3547_v4 = vsel %vm12704_vm11, %v3545_v52, %v3546_v19  ;;  %v7538_v38 = vld [vmem:[#allocation2 + $0x60] sm:$0xe] }
 0x3a0   : > { %v4101_v48 = vpop.permute.xlu2 %4100  ;;  %3228 = vst.msk [vmem:[#allocation3 + $0x18] sm:$0xf] %vm3225_vm15, %v3038_v5  ;;  %v2480_v16 = vsel %vm12823_vm14, %v2475_v1, %v2479_v32  ;;  %v3981_v5 = vld [vmem:[#allocation2 + $0x64] sm:$0xf] }
 0x3a1   : > { %v4095_v20 = vpop.permute.xlu1 %4094  ;;  %3904 = vst.msk [vmem:[#allocation3 + $0x18] sm:$0xf] %vm3901_vm2, %v3714_v34  ;;  %v2495_v34 = vshrl.u32 %v2194_v35, 16  ;;  %v11732_v8 = vld [vmem:[#allocation3 + $0x10] sm:$0xf0]  ;;  %v2488_v40 = vor.u32 %v2487_v6, %v2484_v17 }
 0x3a2   : > { %4287 = vst.msk [vmem:[#allocation3] sm:$0xf] %vm4286_vm4, %v4095_v20  ;;  %v7539_v39 = vld [vmem:[#allocation2 + $0x64] sm:$0xf]  ;;  %v10991_v20 = vld [vmem:[#allocation3 + $0x8] sm:$0xf] }
 0x3a3   : > { %v15264_v63 = vpop.f32.mrf.mxu2  ;;  %8011 = vst.msk [vmem:[#allocation3 + $0x8c] sm:$0xf] %vm1055_vm1, %v7753_v61  ;;  %v3314_v61 = vld [vmem:[#allocation2 + $0x60] sm:$0xe]  ;;  %v2489_v17 = vrot.slane %v2488_v40, 4  ;;  %v16755_v40 = vrot.slane %v15237_v31, 5 }
 0x3a4   : > { %16752 = vst [vmem:[#allocation42_spill] sm:$0xff] %v15264_v63  ;;  %v11731_v32 = vld [vmem:[#allocation3 + $0x8] sm:$0xf0]  ;;  %v2493_v63 = vrot.slane %v2491_v59, 5  ;;  %v2196_v6 = vld [vmem:[#allocation2 + $0x78] sm:$0xf] }
 0x3a5   : > { %3743 = vrot.lane.b32.xlu0 %v3547_v4, %s12287_s11  ;;  %2118 = vst.msk [vmem:[#allocation3 + $0xc0] sm:$0xf] %vm1055_vm1, %v2054_v24  ;;  %v10992_v4 = vor.u32 %v11732_v8, %v10991_v20  ;;  %v2497_v24 = vrot.slane %v2495_v34, 4  ;;  %v10893_v59 = vrot.slane %v3314_v61, 9  ;;  %v2195_v8 = vld [vmem:[#allocation2 + $0x74] sm:$0x1] }
 0x3a6   : > { %4124 = vrot.lane.b32.xlu2 %v3981_v5, %s12288_s19  ;;  %v10955_v5 = vrot.slane %v7538_v38, 9  ;;  %v7540_v20 = vld [vmem:[#allocation2 + $0x68] sm:$0x1]  ;;  %v2506_v61 = vshrl.u32 %v2196_v6, 16 }
 0x3a7   : > { %3067 = vrot.lane.b32.xlu1 %v2480_v16, %s12286_s26  ;;  %v3716_v52 = vpop.permute.xlu0 %3715  ;;  %v3544_v38 = vsel %vm12704_vm11, %v10893_v59, %v16755_v40  ;;  %v7759_v34 = vrot.slane %v7540_v20, 5  ;;  %v3319_v59 = vld [vmem:[#allocation2 + $0x74] sm:$0x1]  ;;  %v2197_v20 = vld [vmem:[#allocation2 + $0x7c] sm:$0xf] }
 0x3a8   : > { %v3718_v56 = vpop.permute.xlu2 %3717  ;;  %v2508_v40 = vrot.slane %v2506_v61, 4 }
 0x3a9   : > { %v3040_v19 = vpop.permute.xlu1 %3039  ;;  %v10983_v1 = vld [vmem:[#allocation3] sm:$0xf] }
 0x3aa   : > { %3229 = vst.msk [vmem:[#allocation3 + $0x24] sm:$0xf] %vm3225_vm15, %v3040_v19  ;;  %v10984_v35 = vor.u32 %v11731_v32, %v10983_v1  ;;  %v2494_v19 = vsel %vm12823_vm14, %v2489_v17, %v2493_v63  ;;  %v7756_v1 = vrot.slane %v7539_v39, 5  ;;  %v3982_v32 = vld [vmem:[#allocation2 + $0x6c] sm:$0xf] }
 0x3ab   : > { %3905 = vst.msk [vmem:[#allocation3 + $0x24] sm:$0xf] %vm3901_vm2, %v3716_v52  ;;  %v15281_v16 = vpop.f32.mrf.mxu2  ;;  %v15288_v52 = vpop.f32.mrf.mxu3 }
 0x3ac   : > { %16753 = vst [vmem:[#allocation43_spill] sm:$0xff] %v15281_v16  ;;  %8925 = vmatmul.bf16.vlgmr.msrb.gmra.mxu1 %v10984_v35  ;;  %11437 = vmatmul.msk.bf16.vlgmr.msrb.gmra.mxu2 %vm8820_vm5, %v10992_v4  ;;  %v2055_v35 = vld [vmem:[#allocation2 + $0x64] sm:$0xf]  ;;  %v2509_v4 = vshll.u32 %v2196_v6, 16  ;;  %v7757_v39 = vsel %vm12704_vm11, %v10955_v5, %v7756_v1  ;;  %v7758_v17 = vrot.slane %v7756_v1, 4  ;;  %v2501_v16 = vshll.u32 %v2195_v8, 16 }
 0x3ad   : > { %4290 = vst.msk [vmem:[#allocation3 + $0x24] sm:$0xf] %vm4286_vm4, %v4101_v48  ;;  %3069 = vrot.lane.b32.xlu0 %v2494_v19, %s12286_s26  ;;  %v2498_v48 = vor.u32 %v2497_v24, %v2493_v63  ;;  %v16756_v19 = vrot.slane %v15278_v15, 5  ;;  %v3553_v1 = vrot.slane %v3319_v59, 5 }
 0x3ae   : > { %16754 = vst [vmem:[#allocation44_spill] sm:$0xff] %v15288_v52  ;;  %3741 = vrot.lane.b32.xlu2 %v3544_v38, %s12287_s11  ;;  %v7760_v6 = vsel %vm12704_vm11, %v7758_v17, %v7759_v34  ;;  %v2511_v38 = vrot.slane %v2509_v4, 5  ;;  %v7541_v17 = vld [vmem:[#allocation2 + $0x6c] sm:$0xe]  ;;  %v7542_v4 = vld [vmem:[#allocation2 + $0x70] sm:$0xf] }
 0x3af   : > { %4126 = vrot.lane.b32.xlu1 %v3982_v32, %s12288_s19  ;;  %2119 = vst.msk [vmem:[#allocation3 + $0xcc] sm:$0xf] %vm1055_vm1, %v2055_v35  ;;  %v3042_v31 = vpop.permute.xlu0 %3041  ;;  %v3552_v32 = vrot.slane %v16756_v19, 4  ;;  %v2499_v5 = vrot.slane %v2498_v48, 4  ;;  %v2503_v35 = vrot.slane %v2501_v16, 5  ;;  %v10956_v2 = vrot.slane %v7541_v17, 9 }
 0x3b0   : > { %8012 = vst.msk [vmem:[#allocation3 + $0x98] sm:$0xf] %vm1055_vm1, %v7757_v39  ;;  %v4105_v24 = vpop.permute.xlu2 %4104  ;;  %v2056_v19 = vld [vmem:[#allocation2 + $0x6c] sm:$0xf]  ;;  %v3983_v48 = vld [vmem:[#allocation2 + $0x70] sm:$0xf]  ;;  %v2512_v61 = vor.u32 %v2511_v38, %v2508_v40 }
 0x3b1   : > { %v4099_v63 = vpop.permute.xlu1 %4098  ;;  %3230 = vst.msk [vmem:[#allocation3 + $0x30] sm:$0xf] %vm3225_vm15, %v3042_v31  ;;  %v3554_v39 = vsel %vm12704_vm11, %v3552_v32, %v3553_v1  ;;  %v2515_v31 = vshll.u32 %v2197_v20, 16  ;;  %v2504_v34 = vsel %vm12823_vm14, %v2499_v5, %v2503_v35  ;;  %v11735_v16 = vld [vmem:[#allocation3 + $0x28] sm:$0xf0] }
 0x3b2   : > { %4289 = vst.msk [vmem:[#allocation3 + $0x18] sm:$0xf] %vm4286_vm4, %v4099_v63  ;;  %v11003_v63 = vld [vmem:[#allocation3 + $0x20] sm:$0xf]  ;;  %v2513_v38 = vrot.slane %v2512_v61, 4  ;;  %v16760_v61 = vrot.slane %v15278_v15, 5 }
 0x3b3   : > { %3906 = vst.msk [vmem:[#allocation3 + $0x30] sm:$0xf] %vm3901_vm2, %v3718_v56  ;;  %v15308_v8 = vpop.f32.mrf.mxu2  ;;  %v2519_v56 = vshrl.u32 %v2197_v20, 16  ;;  %v15319_v59 = vpop.f32.mrf.mxu3  ;;  %v2517_v20 = vrot.slane %v2515_v31, 5 }
 0x3b4   : > { %16757 = vst [vmem:[#allocation45_spill] sm:$0xff] %v15308_v8 }
 0x3b5   : > { %8013 = vst.msk [vmem:[#allocation3 + $0xa4] sm:$0xf] %vm1055_vm1, %v7760_v6  ;;  %3747 = vrot.lane.b32.xlu0 %v3554_v39, %s12287_s11  ;;  %v3317_v6 = vld [vmem:[#allocation2 + $0x6c] sm:$0xe]  ;;  %v11734_v39 = vld [vmem:[#allocation3 + $0x20] sm:$0xf0] }
 0x3b6   : > { %2120 = vst.msk [vmem:[#allocation3 + $0xd8] sm:$0xf] %vm1055_vm1, %v2056_v19  ;;  %4128 = vrot.lane.b32.xlu2 %v3983_v48, %s12288_s19  ;;  %v11004_v19 = vor.u32 %v11735_v16, %v11003_v63  ;;  %v2199_v48 = vld [vmem:[#allocation2 + $0x84] sm:$0xf]  ;;  %v10894_v31 = vrot.slane %v3317_v6, 9  ;;  %v2518_v16 = vsel %vm12823_vm14, %v2513_v38, %v2517_v20  ;;  %v2525_v38 = vshll.u32 %v2198_v47, 16 }
 0x3b7   : > { %3071 = vrot.lane.b32.xlu1 %v2504_v34, %s12286_s26  ;;  %16758 = vst [vmem:[#allocation46_spill] sm:$0xff] %v15319_v59  ;;  %v3720_v32 = vpop.permute.xlu0 %3719  ;;  %v2521_v34 = vrot.slane %v2519_v56, 4  ;;  %v7543_v63 = vld [vmem:[#allocation2 + $0x74] sm:$0x1]  ;;  %v2533_v6 = vshll.u32 %v2199_v48, 16 }
 0x3b8   : > { %v3722_v1 = vpop.permute.xlu2 %3721  ;;  %v3551_v17 = vsel %vm12704_vm11, %v10894_v31, %v16760_v61  ;;  %v3322_v56 = vld [vmem:[#allocation2 + $0x80] sm:$0x1] }
 0x3b9   : > { %v3044_v5 = vpop.permute.xlu1 %3043  ;;  %v10995_v35 = vld [vmem:[#allocation3 + $0x18] sm:$0xf]  ;;  %v2535_v61 = vrot.slane %v2533_v6, 5 }
 0x3ba   : > { %3231 = vst.msk [vmem:[#allocation3 + $0x3c] sm:$0xf] %vm3225_vm15, %v3044_v5  ;;  %v10996_v8 = vor.u32 %v11734_v39, %v10995_v35  ;;  %v7763_v5 = vrot.slane %v7542_v4, 5  ;;  %v3984_v35 = vld [vmem:[#allocation2 + $0x78] sm:$0xf] }
 0x3bb   : > { %3907 = vst.msk [vmem:[#allocation3 + $0x3c] sm:$0xf] %vm3901_vm2, %v3720_v32  ;;  %v15325_v40 = vpop.f32.mrf.mxu2  ;;  %v2057_v32 = vld [vmem:[#allocation2 + $0x70] sm:$0xf] }
 0x3bc   : > { %16759 = vst [vmem:[#allocation47_spill] sm:$0xff] %v15325_v40  ;;  %11438 = vmatmul.msk.bf16.gmra.mxu2 %vm8820_vm5, %v11004_v19  ;;  %8930 = vmatmul.bf16.gmra.mxu1 %v10996_v8  ;;  %v2530_v8 = vshrl.u32 %v2199_v48, 16  ;;  %v7764_v4 = vsel %vm12704_vm11, %v10956_v2, %v7763_v5  ;;  %v7765_v39 = vrot.slane %v7763_v5, 4  ;;  %v7766_v19 = vrot.slane %v7543_v63, 5  ;;  %v2200_v63 = vld [vmem:[#allocation2 + $0x88] sm:$0xf] }
 0x3bd   : > { %4292 = vst.msk [vmem:[#allocation3 + $0x3c] sm:$0xf] %vm4286_vm4, %v4105_v24  ;;  %3073 = vrot.lane.b32.xlu0 %v2518_v16, %s12286_s26  ;;  %v2522_v24 = vor.u32 %v2521_v34, %v2517_v20  ;;  %v16761_v34 = vrot.slane %v15322_v9, 5  ;;  %v3560_v5 = vrot.slane %v3322_v56, 5  ;;  %v7544_v56 = vld [vmem:[#allocation2 + $0x78] sm:$0xe] }
 0x3be   : > { %2121 = vst.msk [vmem:[#allocation3 + $0xe4] sm:$0xf] %vm1055_vm1, %v2057_v32  ;;  %3745 = vrot.lane.b32.xlu2 %v3551_v17, %s12287_s11  ;;  %v7767_v48 = vsel %vm12704_vm11, %v7765_v39, %v7766_v19  ;;  %v15348_v32 = vpop.f32.mrf.mxu3  ;;  %v2527_v17 = vrot.slane %v2525_v38, 5  ;;  %v2539_v19 = vshll.u32 %v2200_v63, 16  ;;  %v7545_v38 = vld [vmem:[#allocation2 + $0x7c] sm:$0xf] }
 0x3bf   : > { %4130 = vrot.lane.b32.xlu1 %v3984_v35, %s12288_s19  ;;  %v3046_v15 = vpop.permute.xlu0 %3045  ;;  %8014 = vst.msk [vmem:[#allocation3 + $0xb0] sm:$0xf] %vm1055_vm1, %v7764_v4  ;;  %v3559_v16 = vrot.slane %v16761_v34, 4  ;;  %v2523_v2 = vrot.slane %v2522_v24, 4  ;;  %v2532_v35 = vrot.slane %v2530_v8, 4 }
 0x3c0   : > { %v4109_v20 = vpop.permute.xlu2 %4108  ;;  %3232 = vst.msk [vmem:[#allocation3 + $0x48] sm:$0xf] %vm3225_vm15, %v3046_v15  ;;  %v2058_v4 = vld [vmem:[#allocation2 + $0x78] sm:$0xf]  ;;  %v3985_v15 = vld [vmem:[#allocation2 + $0x7c] sm:$0xf] }
 0x3c1   : > { %v4103_v31 = vpop.permute.xlu1 %4102  ;;  %16762 = vst [vmem:[#allocation48_spill] sm:$0xff] %v15348_v32  ;;  %v3561_v39 = vsel %vm12704_vm11, %v3559_v16, %v3560_v5  ;;  %v2528_v24 = vsel %vm12823_vm14, %v2523_v2, %v2527_v17  ;;  %v11738_v8 = vld [vmem:[#allocation3 + $0x40] sm:$0xf0]  ;;  %v2536_v6 = vor.u32 %v2535_v61, %v2532_v35  ;;  %v3320_v16 = vld [vmem:[#allocation2 + $0x78] sm:$0xe]  ;;  %v2541_v2 = vrot.slane %v2539_v19, 5 }
 0x3c2   : > { %4291 = vst.msk [vmem:[#allocation3 + $0x30] sm:$0xf] %vm4286_vm4, %v4103_v31  ;;  %v11015_v31 = vld [vmem:[#allocation3 + $0x38] sm:$0xf]  ;;  %v2202_v35 = vld [vmem:[#allocation2 + $0x90] sm:$0xf] }
 0x3c3   : > { %3908 = vst.msk [vmem:[#allocation3 + $0x48] sm:$0xf] %vm3901_vm2, %v3722_v1  ;;  %v15352_v47 = vpop.f32.mrf.mxu2  ;;  %v2543_v1 = vshrl.u32 %v2200_v63, 16  ;;  %v11016_v17 = vor.u32 %v11738_v8, %v11015_v31  ;;  %v15364_v40 = vld [vmem:[#allocation2 + $0x88] sm:$0xf]  ;;  %v10957_v61 = vrot.slane %v7544_v56, 9 }
 0x3c4   : > { %16763 = vst [vmem:[#allocation49_spill] sm:$0xff] %v15352_v47  ;;  %v11737_v47 = vld [vmem:[#allocation3 + $0x38] sm:$0xf0]  ;;  %v7546_v31 = vld [vmem:[#allocation2 + $0x80] sm:$0x1] }
 0x3c5   : > { %8015 = vst.msk [vmem:[#allocation3 + $0xbc] sm:$0xf] %vm1055_vm1, %v7767_v48  ;;  %3751 = vrot.lane.b32.xlu0 %v3561_v39, %s12287_s11  ;;  %v2545_v39 = vrot.slane %v2543_v1, 4  ;;  %v2201_v8 = vld [vmem:[#allocation2 + $0x8c] sm:$0x1]  ;;  %v7773_v1 = vrot.slane %v7546_v31, 5 }
 0x3c6   : > { %2122 = vst.msk [vmem:[#allocation3 + $0xf0] sm:$0xf] %vm1055_vm1, %v2058_v4  ;;  %4132 = vrot.lane.b32.xlu2 %v3985_v15, %s12288_s19  ;;  %v15367_v15 = vpop.f32.mrf.mxu3  ;;  %v3986_v56 = vld [vmem:[#allocation2 + $0x84] sm:$0xf] }
 0x3c7   : > { %3075 = vrot.lane.b32.xlu1 %v2528_v24, %s12286_s26  ;;  %v3724_v34 = vpop.permute.xlu0 %3723  ;;  %v2537_v24 = vrot.slane %v2536_v6, 4  ;;  %16764 = vst [vmem:[#allocation50_spill] sm:$0xff] %v15367_v15  ;;  %v7770_v6 = vrot.slane %v7545_v38, 5  ;;  %v3325_v15 = vld [vmem:[#allocation2 + $0x8c] sm:$0x1] }
 0x3c8   : > { %v3726_v5 = vpop.permute.xlu2 %3725 }
 0x3c9   : > { %v3048_v48 = vpop.permute.xlu1 %3047  ;;  %v11007_v4 = vld [vmem:[#allocation3 + $0x30] sm:$0xf]  ;;  %v7771_v38 = vsel %vm12704_vm11, %v10957_v61, %v7770_v6 }
 0x3ca   : > { %3233 = vst.msk [vmem:[#allocation3 + $0x54] sm:$0xf] %vm3225_vm15, %v3048_v48  ;;  %v11008_v63 = vor.u32 %v11737_v47, %v11007_v4  ;;  %v10895_v48 = vrot.slane %v3320_v16, 9  ;;  %v2542_v47 = vsel %vm12823_vm14, %v2537_v24, %v2541_v2  ;;  %v16766_v4 = vrot.slane %v15322_v9, 5 }
 0x3cb   : > { %3909 = vst.msk [vmem:[#allocation3 + $0x54] sm:$0xf] %vm3901_vm2, %v3724_v34  ;;  %v15371_v19 = vpop.f32.mrf.mxu2  ;;  %v2059_v34 = vld [vmem:[#allocation2 + $0x7c] sm:$0xf]  ;;  %v2557_v16 = vshll.u32 %v2202_v35, 16  ;;  %v7772_v24 = vrot.slane %v7770_v6, 4 }
 0x3cc   : > { %11439 = vmatmul.msk.bf16.gmra.mxu2 %vm8820_vm5, %v11016_v17  ;;  %4294 = vst.msk [vmem:[#allocation3 + $0x54] sm:$0xf] %vm4286_vm4, %v4109_v20  ;;  %8935 = vmatmul.bf16.gmra.mxu1 %v11008_v63  ;;  %v3558_v17 = vsel %vm12704_vm11, %v10895_v48, %v16766_v4  ;;  %v2546_v20 = vor.u32 %v2545_v39, %v2541_v2  ;;  %v2554_v63 = vshrl.u32 %v2202_v35, 16  ;;  %v16767_v39 = vrot.slane %v15364_v40, 5  ;;  %v2203_v6 = vld [vmem:[#allocation2 + $0x94] sm:$0xf] }
 0x3cd   : > { %16765 = vst [vmem:[#allocation51_spill] sm:$0xff] %v15371_v19  ;;  %3077 = vrot.lane.b32.xlu0 %v2542_v47, %s12286_s26  ;;  %v2549_v19 = vshll.u32 %v2201_v8, 16  ;;  %v7774_v35 = vsel %vm12704_vm11, %v7772_v24, %v7773_v1  ;;  %v3567_v8 = vrot.slane %v3325_v15, 5  ;;  %v11878_v4 = vld [vmem:[%s16675_s5] sm:$0xff]  ;;  %v3987_v15 = vld [vmem:[#allocation2 + $0x88] sm:$0xf] }
 0x3ce   : > { %2123 = vst.msk [vmem:[#allocation3 + $0xfc] sm:$0xf] %vm1055_vm1, %v2059_v34  ;;  %3749 = vrot.lane.b32.xlu2 %v3558_v17, %s12287_s11  ;;  %v3566_v47 = vrot.slane %v16767_v39, 4  ;;  %v2547_v61 = vrot.slane %v2546_v20, 4  ;;  %v2556_v31 = vrot.slane %v2554_v63, 4  ;;  %v2559_v34 = vrot.slane %v2557_v16, 5  ;;  %v15402_v24 = vpop.f32.mrf.mxu3  ;;  %9883 = vmatpush.bf16.msrb.mxu3 %v11878_v4 }
 0x3cf   : > { %4134 = vrot.lane.b32.xlu1 %v3986_v56, %s12288_s19  ;;  %v3050_v9 = vpop.permute.xlu0 %3049  ;;  %8016 = vst.msk [vmem:[#allocation3 + $0xc8] sm:$0xf] %vm1055_vm1, %v7771_v38  ;;  %v2551_v56 = vrot.slane %v2549_v19, 5  ;;  %v2563_v38 = vshll.u32 %v2203_v6, 16  ;;  %v2060_v20 = vld [vmem:[#allocation2 + $0x84] sm:$0xf] }
 0x3d0   : > { %v4113_v2 = vpop.permute.xlu2 %4112  ;;  %3234 = vst.msk [vmem:[#allocation3 + $0x60] sm:$0xf] %vm3225_vm15, %v3050_v9  ;;  %v3568_v1 = vsel %vm12704_vm11, %v3566_v47, %v3567_v8  ;;  %v2567_v19 = vshrl.u32 %v2203_v6, 16  ;;  %v7547_v63 = vld [vmem:[#allocation2 + $0x84] sm:$0xe]  ;;  %v2560_v9 = vor.u32 %v2559_v34, %v2556_v31 }
 0x3d1   : > { %v4107_v48 = vpop.permute.xlu1 %4106  ;;  %3910 = vst.msk [vmem:[#allocation3 + $0x60] sm:$0xf] %vm3901_vm2, %v3726_v5  ;;  %v2552_v5 = vsel %vm12823_vm14, %v2547_v61, %v2551_v56  ;;  %v11741_v16 = vld [vmem:[#allocation3 + $0x58] sm:$0xf0]  ;;  %v11027_v39 = vld [vmem:[#allocation3 + $0x50] sm:$0xf] }
 0x3d2   : > { %4293 = vst.msk [vmem:[#allocation3 + $0x48] sm:$0xf] %vm4286_vm4, %v4107_v48  ;;  %v7548_v48 = vld [vmem:[#allocation2 + $0x88] sm:$0xf]  ;;  %v11028_v6 = vor.u32 %v11741_v16, %v11027_v39  ;;  %v2205_v31 = vld [vmem:[#allocation2 + $0x9c] sm:$0xf] }
 0x3d3   : > { %8017 = vst.msk [vmem:[#allocation3 + $0xd4] sm:$0xf] %vm1055_vm1, %v7774_v35  ;;  %v15398_v17 = vpop.f32.mrf.mxu2  ;;  %v3323_v35 = vld [vmem:[#allocation2 + $0x84] sm:$0xe]  ;;  %v10958_v34 = vrot.slane %v7547_v63, 9  ;;  %v7777_v16 = vrot.slane %v7548_v48, 5 }
 0x3d4   : > { %16768 = vst [vmem:[#allocation52_spill] sm:$0xff] %v15398_v17  ;;  %v11740_v17 = vld [vmem:[#allocation3 + $0x50] sm:$0xf0]  ;;  %v2061_v39 = vld [vmem:[#allocation2 + $0x88] sm:$0xf]  ;;  %v2581_v48 = vshll.u32 %v2205_v31, 16 }
 0x3d5   : > { %16769 = vst [vmem:[#allocation53_spill] sm:$0xff] %v15402_v24  ;;  %3755 = vrot.lane.b32.xlu0 %v3568_v1, %s12287_s11  ;;  %v2565_v1 = vrot.slane %v2563_v38, 5  ;;  %v15411_v24 = vld [vmem:[#allocation2 + $0x94] sm:$0xf] }
 0x3d6   : > { %2124 = vst.msk [vmem:[#allocation3 + $0x108] sm:$0xf] %vm1055_vm1, %v2060_v20  ;;  %4136 = vrot.lane.b32.xlu2 %v3987_v15, %s12288_s19  ;;  %v2569_v20 = vrot.slane %v2567_v19, 4  ;;  %v10896_v15 = vrot.slane %v3323_v35, 9  ;;  %v7549_v19 = vld [vmem:[#allocation2 + $0x8c] sm:$0x1] }
 0x3d7   : > { %3079 = vrot.lane.b32.xlu1 %v2552_v5, %s12286_s26  ;;  %v3728_v47 = vpop.permute.xlu0 %3727  ;;  %v2561_v5 = vrot.slane %v2560_v9, 4  ;;  %v16770_v9 = vrot.slane %v15364_v40, 5  ;;  %2125 = vst.msk [vmem:[#allocation3 + $0x114] sm:$0xf] %vm1055_vm1, %v2061_v39  ;;  %v7779_v40 = vrot.slane %v7777_v16, 4 }
 0x3d8   : > { %v3730_v61 = vpop.permute.xlu2 %3729 }
 0x3d9   : > { %v3052_v8 = vpop.permute.xlu1 %3051  ;;  %v11019_v56 = vld [vmem:[#allocation3 + $0x48] sm:$0xf]  ;;  %v2566_v38 = vsel %vm12823_vm14, %v2561_v5, %v2565_v1  ;;  %v3565_v63 = vsel %vm12704_vm11, %v10896_v15, %v16770_v9  ;;  %v2573_v15 = vshll.u32 %v2204_v23, 16 }
 0x3da   : > { %3235 = vst.msk [vmem:[#allocation3 + $0x6c] sm:$0xf] %vm3225_vm15, %v3052_v8  ;;  %v11020_v4 = vor.u32 %v11740_v17, %v11019_v56  ;;  %v16693_v17 = vrot.slane %v15411_v24, 5  ;;  %v3988_v8 = vld [vmem:[#allocation2 + $0x90] sm:$0xf]  ;;  %v7778_v56 = vsel %vm12704_vm11, %v10958_v34, %v7777_v16 }
 0x3db   : > { %3911 = vst.msk [vmem:[#allocation3 + $0x6c] sm:$0xf] %vm3901_vm2, %v3728_v47  ;;  %v2578_v47 = vshrl.u32 %v2205_v31, 16  ;;  %v2575_v9 = vrot.slane %v2573_v15, 5 }
 0x3dc   : > { %11440 = vmatmul.msk.bf16.gmra.mxu2 %vm8820_vm5, %v11028_v6  ;;  %4296 = vst.msk [vmem:[#allocation3 + $0x6c] sm:$0xf] %vm4286_vm4, %v4113_v2  ;;  %8940 = vmatmul.bf16.gmra.mxu1 %v11020_v4  ;;  %v2570_v2 = vor.u32 %v2569_v20, %v2565_v1  ;;  %v7780_v6 = vrot.slane %v7549_v19, 5  ;;  %v15431_v4 = vpop.f32.mrf.mxu3  ;;  %v3328_v1 = vld [vmem:[#allocation2 + $0x98] sm:$0x1]  ;;  %v3573_v39 = vrot.slane %v16693_v17, 4 }
 0x3dd   : > { %3081 = vrot.lane.b32.xlu0 %v2566_v38, %s12286_s26  ;;  %16772 = vst [vmem:[#allocation55_spill] sm:$0xff] %v15431_v4  ;;  %v2206_v19 = vld [vmem:[#allocation2 + $0xa0] sm:$0xf]  ;;  %v3574_v23 = vrot.slane %v3328_v1, 5  ;;  %v2580_v16 = vrot.slane %v2578_v47, 4 }
 0x3de   : > { %v15425_v35 = vpop.f32.mrf.mxu2  ;;  %3753 = vrot.lane.b32.xlu2 %v3565_v63, %s12287_s11  ;;  %8018 = vst.msk [vmem:[#allocation3 + $0xe0] sm:$0xf] %vm1055_vm1, %v7778_v56  ;;  %v7781_v31 = vsel %vm12704_vm11, %v7779_v40, %v7780_v6  ;;  %v2571_v34 = vrot.slane %v2570_v2, 4  ;;  %v2062_v63 = vld [vmem:[#allocation2 + $0x90] sm:$0xf] }
 0x3df   : > { %16771 = vst [vmem:[#allocation54_spill] sm:$0xff] %v15425_v35  ;;  %4138 = vrot.lane.b32.xlu1 %v3988_v8, %s12288_s19  ;;  %v3054_v5 = vpop.permute.xlu0 %3053  ;;  %v2583_v8 = vrot.slane %v2581_v48, 5  ;;  %v3575_v56 = vsel %vm12704_vm11, %v3573_v39, %v3574_v23  ;;  %v3989_v2 = vld [vmem:[#allocation2 + $0x94] sm:$0xf]  ;;  %v7550_v6 = vld [vmem:[#allocation2 + $0x90] sm:$0xe] }
 0x3e0   : > { %v4117_v38 = vpop.permute.xlu2 %4116  ;;  %3236 = vst.msk [vmem:[#allocation3 + $0x78] sm:$0xf] %vm3225_vm15, %v3054_v5  ;;  %v2587_v5 = vshll.u32 %v2206_v19, 16  ;;  %v2576_v40 = vsel %vm12823_vm14, %v2571_v34, %v2575_v9  ;;  %v11744_v48 = vld [vmem:[#allocation3 + $0x70] sm:$0xf0] }
 0x3e1   : > { %v4111_v20 = vpop.permute.xlu1 %4110  ;;  %3912 = vst.msk [vmem:[#allocation3 + $0x78] sm:$0xf] %vm3901_vm2, %v3730_v61  ;;  %v2591_v61 = vshrl.u32 %v2206_v19, 16  ;;  %v2584_v15 = vor.u32 %v2583_v8, %v2580_v16  ;;  %v7551_v1 = vld [vmem:[#allocation2 + $0x94] sm:$0xf] }
 0x3e2   : > { %4295 = vst.msk [vmem:[#allocation3 + $0x60] sm:$0xf] %vm4286_vm4, %v4111_v20  ;;  %v11039_v20 = vld [vmem:[#allocation3 + $0x68] sm:$0xf]  ;;  %v2589_v17 = vrot.slane %v2587_v5, 5 }
 0x3e3   : > { %8019 = vst.msk [vmem:[#allocation3 + $0xec] sm:$0xf] %vm1055_vm1, %v7781_v31  ;;  %v3326_v31 = vld [vmem:[#allocation2 + $0x90] sm:$0xe]  ;;  %v11743_v9 = vld [vmem:[#allocation3 + $0x68] sm:$0xf0]  ;;  %v11040_v19 = vor.u32 %v11744_v48, %v11039_v20 }
 0x3e4   : > { %2126 = vst.msk [vmem:[#allocation3 + $0x120] sm:$0xf] %vm1055_vm1, %v2062_v63  ;;  %v15455_v35 = vld [vmem:[#allocation2 + $0xa0] sm:$0xf]  ;;  %v2585_v16 = vrot.slane %v2584_v15, 4  ;;  %v10897_v5 = vrot.slane %v3326_v31, 9 }
 0x3e5   : > { %3759 = vrot.lane.b32.xlu0 %v3575_v56, %s12287_s11  ;;  %v15452_v56 = vpop.f32.mrf.mxu3  ;;  %v2208_v8 = vld [vmem:[#allocation2 + $0xa8] sm:$0xf]  ;;  %v2207_v4 = vld [vmem:[#allocation2 + $0xa4] sm:$0x1]  ;;  %v16694_v48 = vrot.slane %v15455_v35, 5  ;;  %v7784_v20 = vrot.slane %v7551_v1, 5 }
 0x3e6   : > { %v15448_v47 = vpop.f32.mrf.mxu2  ;;  %4140 = vrot.lane.b32.xlu2 %v3989_v2, %s12288_s19  ;;  %16774 = vst [vmem:[#allocation57_spill] sm:$0xff] %v15452_v56  ;;  %v10959_v2 = vrot.slane %v7550_v6, 9  ;;  %v16775_v15 = vrot.slane %v15411_v24, 5  ;;  %v2605_v1 = vshll.u32 %v2208_v8, 16 }
 0x3e7   : > { %16773 = vst [vmem:[#allocation56_spill] sm:$0xff] %v15448_v47  ;;  %3083 = vrot.lane.b32.xlu1 %v2576_v40, %s12286_s26  ;;  %v3732_v39 = vpop.permute.xlu0 %3731  ;;  %v2593_v40 = vrot.slane %v2591_v61, 4  ;;  %v7552_v61 = vld [vmem:[#allocation2 + $0x98] sm:$0x1]  ;;  %v7786_v24 = vrot.slane %v7784_v20, 4 }
 0x3e8   : > { %v3734_v63 = vpop.permute.xlu2 %3733  ;;  %v3572_v6 = vsel %vm12704_vm11, %v10897_v5, %v16775_v15  ;;  %v7785_v31 = vsel %vm12704_vm11, %v10959_v2, %v7784_v20  ;;  %v2597_v5 = vshll.u32 %v2207_v4, 16  ;;  %v3331_v15 = vld [vmem:[#allocation2 + $0xa4] sm:$0x1]  ;;  %v2209_v20 = vld [vmem:[#allocation2 + $0xac] sm:$0xf] }
 0x3e9   : > { %v3056_v23 = vpop.permute.xlu1 %3055  ;;  %v11031_v34 = vld [vmem:[#allocation3 + $0x60] sm:$0xf]  ;;  %8020 = vst.msk [vmem:[#allocation3 + $0xf8] sm:$0xf] %vm1055_vm1, %v7785_v31  ;;  %v3581_v4 = vrot.slane %v3331_v15, 5 }
 0x3ea   : > { %3237 = vst.msk [vmem:[#allocation3 + $0x84] sm:$0xf] %vm3225_vm15, %v3056_v23  ;;  %v11032_v47 = vor.u32 %v11743_v9, %v11031_v34  ;;  %v2590_v23 = vsel %vm12823_vm14, %v2585_v16, %v2589_v17  ;;  %v2063_v34 = vld [vmem:[#allocation2 + $0x94] sm:$0xf]  ;;  %v3990_v9 = vld [vmem:[#allocation2 + $0x9c] sm:$0xf] }
 0x3eb   : > { %3913 = vst.msk [vmem:[#allocation3 + $0x84] sm:$0xf] %vm3901_vm2, %v3732_v39  ;;  %v2064_v31 = vld [vmem:[#allocation2 + $0x9c] sm:$0xf]  ;;  %v7554_v15 = vld [vmem:[#allocation2 + $0xa0] sm:$0xf] }
 0x3ec   : > { %11441 = vmatmul.msk.bf16.gmra.mxu2 %vm8820_vm5, %v11040_v19  ;;  %4298 = vst.msk [vmem:[#allocation3 + $0x84] sm:$0xf] %vm4286_vm4, %v4117_v38  ;;  %8945 = vmatmul.bf16.gmra.mxu1 %v11032_v47  ;;  %v2594_v38 = vor.u32 %v2593_v40, %v2589_v17  ;;  %v2602_v47 = vshrl.u32 %v2208_v8, 16  ;;  %v7787_v19 = vrot.slane %v7552_v61, 5 }
 0x3ed   : > { %3085 = vrot.lane.b32.xlu0 %v2590_v23, %s12286_s26  ;;  %2127 = vst.msk [vmem:[#allocation3 + $0x12c] sm:$0xf] %vm1055_vm1, %v2063_v34  ;;  %v3580_v23 = vrot.slane %v16694_v48, 4  ;;  %v2607_v34 = vrot.slane %v2605_v1, 5  ;;  %v2611_v48 = vshll.u32 %v2209_v20, 16 }
 0x3ee   : > { %3757 = vrot.lane.b32.xlu2 %v3572_v6, %s12287_s11  ;;  %v7788_v8 = vsel %vm12704_vm11, %v7786_v24, %v7787_v19  ;;  %v2595_v2 = vrot.slane %v2594_v38, 4  ;;  %v2604_v61 = vrot.slane %v2602_v47, 4  ;;  %v2599_v6 = vrot.slane %v2597_v5, 5  ;;  %2128 = vst.msk [vmem:[#allocation3 + $0x138] sm:$0xf] %vm1055_vm1, %v2064_v31 }
 0x3ef   : > { %v15469_v39 = vpop.f32.mrf.mxu2  ;;  %4142 = vrot.lane.b32.xlu1 %v3990_v9, %s12288_s19  ;;  %v3058_v16 = vpop.permute.xlu0 %3057  ;;  %8021 = vst.msk [vmem:[#allocation3 + $0x104] sm:$0xf] %vm1055_vm1, %v7788_v8  ;;  %v3991_v24 = vld [vmem:[#allocation2 + $0xa0] sm:$0xf]  ;;  %v15492_v47 = vld [vmem:[#allocation2 + $0x9c] sm:$0xe] }
 0x3f0   : > { %16776 = vst [vmem:[#allocation58_spill] sm:$0xff] %v15469_v39  ;;  %v4121_v40 = vpop.permute.xlu2 %4120  ;;  %v15483_v9 = vpop.f32.mrf.mxu3  ;;  %v2600_v38 = vsel %vm12823_vm14, %v2595_v2, %v2599_v6  ;;  %v11747_v19 = vld [vmem:[#allocation3 + $0x88] sm:$0xf0]  ;;  %v2608_v5 = vor.u32 %v2607_v34, %v2604_v61  ;;  %v2211_v61 = vld [vmem:[#allocation2 + $0xb4] sm:$0xf]  ;;  %v10960_v34 = vrot.slane %v15492_v47, 9 }
 0x3f1   : > { %v4115_v17 = vpop.permute.xlu1 %4114  ;;  %3238 = vst.msk [vmem:[#allocation3 + $0x90] sm:$0xf] %vm3225_vm15, %v3058_v16  ;;  %v3582_v16 = vsel %vm12704_vm11, %v3580_v23, %v3581_v4  ;;  %v3329_v8 = vld [vmem:[#allocation2 + $0x9c] sm:$0xe] }
 0x3f2   : > { %4297 = vst.msk [vmem:[#allocation3 + $0x78] sm:$0xf] %vm4286_vm4, %v4115_v17  ;;  %v11051_v17 = vld [vmem:[#allocation3 + $0x80] sm:$0xf] }
 0x3f3   : > { %3914 = vst.msk [vmem:[#allocation3 + $0x90] sm:$0xf] %vm3901_vm2, %v3734_v63  ;;  %v2615_v63 = vshrl.u32 %v2209_v20, 16  ;;  %v11746_v31 = vld [vmem:[#allocation3 + $0x80] sm:$0xf0]  ;;  %v11052_v20 = vor.u32 %v11747_v19, %v11051_v17 }
 0x3f4   : > { %16777 = vst [vmem:[#allocation59_spill] sm:$0xff] %v15483_v9  ;;  %v15499_v9 = vld [vmem:[#allocation2 + $0xac] sm:$0xf]  ;;  %v2210_v17 = vld [vmem:[#allocation2 + $0xb0] sm:$0x1] }
 0x3f5   : > { %3763 = vrot.lane.b32.xlu0 %v3582_v16, %s12287_s11  ;;  %v2613_v16 = vrot.slane %v2611_v48, 5  ;;  %v10898_v48 = vrot.slane %v3329_v8, 9  ;;  %v2626_v8 = vshrl.u32 %v2211_v61, 16 }
 0x3f6   : > { %4144 = vrot.lane.b32.xlu2 %v3991_v24, %s12288_s19  ;;  %v3992_v24 = vld [vmem:[#allocation2 + $0xa8] sm:$0xf] }
 0x3f7   : > { %v15494_v1 = vpop.f32.mrf.mxu2  ;;  %3087 = vrot.lane.b32.xlu1 %v2600_v38, %s12286_s26  ;;  %v3736_v23 = vpop.permute.xlu0 %3735  ;;  %v2609_v38 = vrot.slane %v2608_v5, 4  ;;  %v16780_v5 = vrot.slane %v15455_v35, 5  ;;  %v7555_v35 = vld [vmem:[#allocation2 + $0xa4] sm:$0x1]  ;;  %v2628_v32 = vrot.slane %v2626_v8, 4 }
 0x3f8   : > { %16778 = vst [vmem:[#allocation60_spill] sm:$0xff] %v15494_v1  ;;  %v3738_v2 = vpop.permute.xlu2 %3737  ;;  %v2617_v1 = vrot.slane %v2615_v63, 4  ;;  %v7794_v52 = vrot.slane %v7555_v35, 5 }
 0x3f9   : > { %v3060_v4 = vpop.permute.xlu1 %3059  ;;  %v11043_v6 = vld [vmem:[#allocation3 + $0x78] sm:$0xf]  ;;  %v2614_v19 = vsel %vm12823_vm14, %v2609_v38, %v2613_v16  ;;  %v3579_v47 = vsel %vm12704_vm11, %v10898_v48, %v16780_v5  ;;  %v7613_v38 = vld [vmem:[#allocation2 + $0x1a4] sm:$0xe]  ;;  %v7615_v5 = vld [vmem:[#allocation2 + $0x1ac] sm:$0x1] }
 0x3fa   : > { %3239 = vst.msk [vmem:[#allocation3 + $0x9c] sm:$0xf] %vm3225_vm15, %v3060_v4  ;;  %v11044_v39 = vor.u32 %v11746_v31, %v11043_v6  ;;  %v7791_v4 = vrot.slane %v7554_v15, 5  ;;  %v2065_v6 = vld [vmem:[#allocation2 + $0xa0] sm:$0xf]  ;;  %v2629_v31 = vshll.u32 %v2211_v61, 16 }
 0x3fb   : > { %3915 = vst.msk [vmem:[#allocation3 + $0x9c] sm:$0xf] %vm3901_vm2, %v3736_v23  ;;  %v15508_v23 = vpop.f32.mrf.mxu3  ;;  %v2212_v15 = vld [vmem:[#allocation2 + $0xb8] sm:$0xf]  ;;  %v7614_v48 = vld [vmem:[#allocation2 + $0x1a8] sm:$0xf] }
 0x3fc   : > { %11442 = vmatmul.msk.bf16.gmra.mxu2 %vm8820_vm5, %v11052_v20  ;;  %4300 = vst.msk [vmem:[#allocation3 + $0x9c] sm:$0xf] %vm4286_vm4, %v4121_v40  ;;  %8950 = vmatmul.bf16.gmra.mxu1 %v11044_v39  ;;  %v2618_v39 = vor.u32 %v2617_v1, %v2613_v16  ;;  %v3334_v40 = vld [vmem:[#allocation2 + $0xb0] sm:$0x1]  ;;  %v16782_v61 = vrot.slane %v15499_v9, 5  ;;  %v7934_v56 = vrot.slane %v7615_v5, 5 }
 0x3fd   : > { %16779 = vst [vmem:[#allocation61_spill] sm:$0xff] %v15508_v23  ;;  %3089 = vrot.lane.b32.xlu0 %v2614_v19, %s12286_s26  ;;  %v2621_v23 = vshll.u32 %v2210_v17, 16  ;;  %v10980_v19 = vrot.slane %v7613_v38, 9  ;;  %v2631_v59 = vrot.slane %v2629_v31, 5  ;;  %v7792_v17 = vsel %vm12704_vm11, %v10960_v34, %v7791_v4  ;;  %v3993_v5 = vld [vmem:[#allocation2 + $0xac] sm:$0xf] }
 0x3fe   : > { %2129 = vst.msk [vmem:[#allocation3 + $0x144] sm:$0xf] %vm1055_vm1, %v2065_v6  ;;  %3761 = vrot.lane.b32.xlu2 %v3579_v47, %s12287_s11  ;;  %v3587_v6 = vrot.slane %v16782_v61, 4  ;;  %v2619_v47 = vrot.slane %v2618_v39, 4  ;;  %v3588_v38 = vrot.slane %v3334_v40, 5 }
 0x3ff   : > { %v15516_v20 = vpop.f32.mrf.mxu2  ;;  %4146 = vrot.lane.b32.xlu1 %v3992_v24, %s12288_s19  ;;  %v3062_v63 = vpop.permute.xlu0 %3061  ;;  %v7793_v24 = vrot.slane %v7791_v4, 4  ;;  %v2623_v61 = vrot.slane %v2621_v23, 5  ;;  %8022 = vst.msk [vmem:[#allocation3 + $0x110] sm:$0xf] %vm1055_vm1, %v7792_v17  ;;  %v2632_v4 = vor.u32 %v2631_v59, %v2628_v32  ;;  %v2639_v23 = vshrl.u32 %v2212_v15, 16 }
 0x400   : > { %16781 = vst [vmem:[#allocation62_spill] sm:$0xff] %v15516_v20  ;;  %v4125_v16 = vpop.permute.xlu2 %4124  ;;  %v7931_v20 = vrot.slane %v7614_v48, 5  ;;  %v2635_v48 = vshll.u32 %v2212_v15, 16  ;;  %v3589_v39 = vsel %vm12704_vm11, %v3587_v6, %v3588_v38  ;;  %v2066_v40 = vld [vmem:[#allocation2 + $0xa8] sm:$0xf] }
 0x401   : > { %v4119_v1 = vpop.permute.xlu1 %4118  ;;  %3240 = vst.msk [vmem:[#allocation3 + $0xa8] sm:$0xf] %vm3225_vm15, %v3062_v63  ;;  %v2624_v34 = vsel %vm12823_vm14, %v2619_v47, %v2623_v61  ;;  %v2214_v6 = vld [vmem:[#allocation2 + $0xd8] sm:$0xf]  ;;  %v7557_v59 = vld [vmem:[#allocation2 + $0xac] sm:$0xf] }
 0x402   : > { %4299 = vst.msk [vmem:[#allocation3 + $0x90] sm:$0xf] %vm4286_vm4, %v4119_v1  ;;  %v7932_v63 = vsel %vm12704_vm11, %v10980_v19, %v7931_v20  ;;  %v7933_v36 = vrot.slane %v7931_v20, 4  ;;  %v7556_v20 = vld [vmem:[#allocation2 + $0xa8] sm:$0xe]  ;;  %v2637_v1 = vrot.slane %v2635_v48, 5 }
 0x403   : > { %3916 = vst.msk [vmem:[#allocation3 + $0xa8] sm:$0xf] %vm3901_vm2, %v3738_v2  ;;  %v7795_v2 = vsel %vm12704_vm11, %v7793_v24, %v7794_v52  ;;  %v11750_v52 = vld [vmem:[#allocation3 + $0xa0] sm:$0xf0]  ;;  %v15545_v35 = vpop.f32.mrf.mxu3  ;;  %v11749_v47 = vld [vmem:[#allocation3 + $0x98] sm:$0xf0] }
 0x404   : > { %8062 = vst.msk [vmem:[#allocation3 + $0x2f0] sm:$0xf] %vm1055_vm1, %v7932_v63  ;;  %v7935_v8 = vsel %vm12704_vm11, %v7933_v36, %v7934_v56  ;;  %v11063_v36 = vld [vmem:[#allocation3 + $0x98] sm:$0xf]  ;;  %v2633_v63 = vrot.slane %v2632_v4, 4  ;;  %v2641_v61 = vrot.slane %v2639_v23, 4 }
 0x405   : > { %3767 = vrot.lane.b32.xlu0 %v3589_v39, %s12287_s11  ;;  %8063 = vst.msk [vmem:[#allocation3 + $0x2fc] sm:$0xf] %vm1055_vm1, %v7935_v8  ;;  %v3332_v56 = vld [vmem:[#allocation2 + $0xa8] sm:$0xe]  ;;  %v11064_v17 = vor.u32 %v11750_v52, %v11063_v36  ;;  %v2650_v39 = vshrl.u32 %v2214_v6, 16  ;;  %v2653_v8 = vshll.u32 %v2214_v6, 16 }
 0x406   : > { %4148 = vrot.lane.b32.xlu2 %v3993_v5, %s12288_s19  ;;  %8023 = vst.msk [vmem:[#allocation3 + $0x11c] sm:$0xf] %vm1055_vm1, %v7795_v2  ;;  %v15550_v5 = vld [vmem:[#allocation2 + $0xb8] sm:$0xf]  ;;  %v10899_v2 = vrot.slane %v3332_v56, 9  ;;  %v2638_v36 = vsel %vm12823_vm14, %v2633_v63, %v2637_v1  ;;  %v7798_v56 = vrot.slane %v7557_v59, 5 }
 0x407   : > { %v15541_v31 = vpop.f32.mrf.mxu2  ;;  %3091 = vrot.lane.b32.xlu1 %v2624_v34, %s12286_s26  ;;  %v3740_v19 = vpop.permute.xlu0 %3739  ;;  %2130 = vst.msk [vmem:[#allocation3 + $0x150] sm:$0xf] %vm1055_vm1, %v2066_v40  ;;  %v2213_v34 = vld [vmem:[#allocation2 + $0xbc] sm:$0x1]  ;;  %v10961_v40 = vrot.slane %v7556_v20, 9  ;;  %v2655_v63 = vrot.slane %v2653_v8, 5 }
 0x408   : > { %16783 = vst [vmem:[#allocation63_spill] sm:$0xff] %v15541_v31  ;;  %v3742_v15 = vpop.permute.xlu2 %3741  ;;  %v7558_v52 = vld [vmem:[#allocation2 + $0xb0] sm:$0x1]  ;;  %v2645_v4 = vshll.u32 %v2213_v34, 16 }
 0x409   : > { %v3064_v32 = vpop.permute.xlu1 %3063  ;;  %v11055_v24 = vld [vmem:[#allocation3 + $0x90] sm:$0xf] }
 0x40a   : > { %3241 = vst.msk [vmem:[#allocation3 + $0xb4] sm:$0xf] %vm3225_vm15, %v3064_v32  ;;  %v11056_v38 = vor.u32 %v11749_v47, %v11055_v24  ;;  %v3994_v32 = vld [vmem:[#allocation2 + $0xb4] sm:$0xf]  ;;  %v2067_v47 = vld [vmem:[#allocation2 + $0xac] sm:$0xf] }
 0x40b   : > { %3917 = vst.msk [vmem:[#allocation3 + $0xb4] sm:$0xf] %vm3901_vm2, %v3740_v19  ;;  %v11363_v48 = vld [vmem:[#allocation3 + $0x2f0] sm:$0xf]  ;;  %v16784_v19 = vrot.slane %v15499_v9, 5  ;;  %v15574_v8 = vpop.f32.mrf.mxu3 }
 0x40c   : > { %11443 = vmatmul.msk.bf16.gmra.mxu2 %vm8820_vm5, %v11064_v17  ;;  %4302 = vst.msk [vmem:[#allocation3 + $0xb4] sm:$0xf] %vm4286_vm4, %v4125_v16  ;;  %8955 = vmatmul.bf16.gmra.mxu1 %v11056_v38  ;;  %v11825_v23 = vld [vmem:[#allocation3 + $0x2f8] sm:$0xf0]  ;;  %v2642_v16 = vor.u32 %v2641_v61, %v2637_v1  ;;  %v2215_v17 = vld [vmem:[#allocation2 + $0xdc] sm:$0xf] }
 0x40d   : > { %v3586_v6 = vsel %vm12704_vm11, %v10899_v2, %v16784_v19  ;;  %3093 = vrot.lane.b32.xlu0 %v2638_v36, %s12286_s26  ;;  %v11364_v24 = vor.u32 %v11825_v23, %v11363_v48  ;;  %v2652_v38 = vrot.slane %v2650_v39, 4  ;;  %2131 = vst.msk [vmem:[#allocation3 + $0x15c] sm:$0xf] %vm1055_vm1, %v2067_v47  ;;  %v3337_v2 = vld [vmem:[#allocation2 + $0xbc] sm:$0x1]  ;;  %v7800_v1 = vrot.slane %v7798_v56, 4 }
 0x40e   : > { %3765 = vrot.lane.b32.xlu2 %v3586_v6, %s12287_s11  ;;  %v7801_v61 = vrot.slane %v7558_v52, 5  ;;  %v16786_v36 = vrot.slane %v15550_v5, 5  ;;  %v7799_v39 = vsel %vm12704_vm11, %v10961_v40, %v7798_v56  ;;  %v2643_v34 = vrot.slane %v2642_v16, 4  ;;  %v11753_v56 = vld [vmem:[#allocation3 + $0xb8] sm:$0xf0] }
 0x40f   : > { %v15563_v20 = vpop.f32.mrf.mxu2  ;;  %4150 = vrot.lane.b32.xlu1 %v3994_v32, %s12288_s19  ;;  %v3066_v9 = vpop.permute.xlu0 %3065  ;;  %11468 = vmatmul.msk.bf16.gmra.mxu3 %vm8820_vm5, %v11364_v24  ;;  %v2659_v32 = vshll.u32 %v2215_v17, 16  ;;  %v3595_v52 = vrot.slane %v3337_v2, 5  ;;  %v2656_v6 = vor.u32 %v2655_v63, %v2652_v38  ;;  %v2663_v24 = vshrl.u32 %v2215_v17, 16  ;;  %8024 = vst.msk [vmem:[#allocation3 + $0x128] sm:$0xf] %vm1055_vm1, %v7799_v39 }
 0x410   : > { %16785 = vst [vmem:[#allocation64_spill] sm:$0xff] %v15563_v20  ;;  %v4129_v48 = vpop.permute.xlu2 %4128  ;;  %v3594_v23 = vrot.slane %v16786_v36, 4  ;;  %v7802_v19 = vsel %vm12704_vm11, %v7800_v1, %v7801_v61  ;;  %v2647_v47 = vrot.slane %v2645_v4, 5  ;;  %v2216_v17 = vld [vmem:[#allocation2 + $0xe0] sm:$0x1] }
 0x411   : > { %v4123_v59 = vpop.permute.xlu1 %4122  ;;  %3242 = vst.msk [vmem:[#allocation3 + $0xc0] sm:$0xf] %vm3225_vm15, %v3066_v9  ;;  %v3995_v9 = vld [vmem:[#allocation2 + $0xb8] sm:$0xf]  ;;  %v2661_v1 = vrot.slane %v2659_v32, 5  ;;  %v2657_v4 = vrot.slane %v2656_v6, 4 }
 0x412   : > { %4301 = vst.msk [vmem:[#allocation3 + $0xa8] sm:$0xf] %vm4286_vm4, %v4123_v59  ;;  %v3596_v40 = vsel %vm12704_vm11, %v3594_v23, %v3595_v52  ;;  %v2648_v16 = vsel %vm12823_vm14, %v2643_v34, %v2647_v47  ;;  %v2665_v38 = vrot.slane %v2663_v24, 4  ;;  %v7559_v63 = vld [vmem:[#allocation2 + $0xb4] sm:$0xe]  ;;  %v2669_v24 = vshll.u32 %v2216_v17, 16 }
 0x413   : > { %3918 = vst.msk [vmem:[#allocation3 + $0xc0] sm:$0xf] %vm3901_vm2, %v3742_v15  ;;  %v2068_v15 = vld [vmem:[#allocation2 + $0xb4] sm:$0xf]  ;;  %v11075_v61 = vld [vmem:[#allocation3 + $0xb0] sm:$0xf]  ;;  %v15599_v20 = vpop.f32.mrf.mxu3 }
 0x414   : > { %8025 = vst.msk [vmem:[#allocation3 + $0x134] sm:$0xf] %vm1055_vm1, %v7802_v19  ;;  %v3335_v36 = vld [vmem:[#allocation2 + $0xb4] sm:$0xe]  ;;  %v15592_v23 = vld [vmem:[#allocation2 + $0xdc] sm:$0xf]  ;;  %v11076_v6 = vor.u32 %v11753_v56, %v11075_v61 }
 0x415   : > { %3771 = vrot.lane.b32.xlu0 %v3596_v40, %s12287_s11  ;;  %2132 = vst.msk [vmem:[#allocation3 + $0x168] sm:$0xf] %vm1055_vm1, %v2068_v15  ;;  %v11752_v19 = vld [vmem:[#allocation3 + $0xb0] sm:$0xf0]  ;;  %v7560_v47 = vld [vmem:[#allocation2 + $0xb8] sm:$0xf] }
 0x416   : > { %4152 = vrot.lane.b32.xlu2 %v3995_v9, %s12288_s19  ;;  %v2217_v52 = vld [vmem:[#allocation2 + $0xe4] sm:$0xf]  ;;  %v2666_v9 = vor.u32 %v2665_v38, %v2661_v1  ;;  %v3340_v15 = vld [vmem:[#allocation2 + $0xe0] sm:$0x1]  ;;  %16788 = vst [vmem:[#allocation66_spill] sm:$0xff] %v15599_v20  ;;  %v11846_v56 = vld [vmem:[%s12476_s15] sm:$0xff] }
 0x417   : > { %v15587_v2 = vpop.f32.mrf.mxu2  ;;  %3095 = vrot.lane.b32.xlu1 %v2648_v16, %s12286_s26  ;;  %v3744_v59 = vpop.permute.xlu0 %3743  ;;  %v2662_v16 = vsel %vm12823_vm14, %v2657_v4, %v2661_v1  ;;  %v2674_v61 = vshrl.u32 %v2217_v52, 16  ;;  %v2677_v17 = vshll.u32 %v2217_v52, 16  ;;  %v16789_v4 = vrot.slane %v15550_v5, 5 }
 0x418   : > { %16787 = vst [vmem:[#allocation65_spill] sm:$0xff] %v15587_v2  ;;  %v3746_v34 = vpop.permute.xlu2 %3745  ;;  %v2671_v38 = vrot.slane %v2669_v24, 5  ;;  %v3602_v52 = vrot.slane %v3340_v15, 5 }
 0x419   : > { %v3068_v39 = vpop.permute.xlu1 %3067  ;;  %v11067_v32 = vld [vmem:[#allocation3 + $0xa8] sm:$0xf]  ;;  %v2679_v24 = vrot.slane %v2677_v17, 5 }
 0x41a   : > { %3243 = vst.msk [vmem:[#allocation3 + $0xcc] sm:$0xf] %vm3225_vm15, %v3068_v39  ;;  %v11068_v40 = vor.u32 %v11752_v19, %v11067_v32  ;;  %v10900_v39 = vrot.slane %v3335_v36, 9  ;;  %v10962_v32 = vrot.slane %v7559_v63, 9  ;;  %v3996_v19 = vld [vmem:[#allocation2 + $0xc0] sm:$0xf] }
 0x41b   : > { %3919 = vst.msk [vmem:[#allocation3 + $0xcc] sm:$0xf] %vm3901_vm2, %v3744_v59  ;;  %v7805_v59 = vrot.slane %v7560_v47, 5  ;;  %v16791_v36 = vrot.slane %v15592_v23, 5  ;;  %v7561_v47 = vld [vmem:[#allocation2 + $0xbc] sm:$0x1] }
 0x41c   : > { %11444 = vmatmul.msk.bf16.gmra.mxu2 %vm8820_vm5, %v11076_v6  ;;  %4304 = vst.msk [vmem:[#allocation3 + $0xcc] sm:$0xf] %vm4286_vm4, %v4129_v48  ;;  %8960 = vmatmul.bf16.gmra.mxu1 %v11068_v40  ;;  %v3593_v1 = vsel %vm12704_vm11, %v10900_v39, %v16789_v4  ;;  %v2667_v48 = vrot.slane %v2666_v9, 4  ;;  %v2676_v40 = vrot.slane %v2674_v61, 4  ;;  %v7808_v39 = vrot.slane %v7561_v47, 5 }
 0x41d   : > { %3097 = vrot.lane.b32.xlu0 %v2662_v16, %s12286_s26  ;;  %v3601_v63 = vrot.slane %v16791_v36, 4  ;;  %v7806_v5 = vsel %vm12704_vm11, %v10962_v32, %v7805_v59  ;;  %v7807_v16 = vrot.slane %v7805_v59, 4  ;;  %v2218_v9 = vld [vmem:[#allocation2 + $0xe8] sm:$0xf]  ;;  %v2069_v32 = vld [vmem:[#allocation2 + $0xb8] sm:$0xf]  ;;  %v15630_v36 = vpop.f32.mrf.mxu3 }
 0x41e   : > { %3769 = vrot.lane.b32.xlu2 %v3593_v1, %s12287_s11  ;;  %8026 = vst.msk [vmem:[#allocation3 + $0x140] sm:$0xf] %vm1055_vm1, %v7806_v5  ;;  %v2672_v61 = vsel %vm12823_vm14, %v2667_v48, %v2671_v38  ;;  %v2680_v17 = vor.u32 %v2679_v24, %v2676_v40  ;;  %v2683_v59 = vshll.u32 %v2218_v9, 16  ;;  %v3338_v1 = vld [vmem:[#allocation2 + $0xd8] sm:$0xe]  ;;  %v2687_v5 = vshrl.u32 %v2218_v9, 16 }
 0x41f   : > { %v15609_v2 = vpop.f32.mrf.mxu2  ;;  %4154 = vrot.lane.b32.xlu1 %v3996_v19, %s12288_s19  ;;  %v3070_v6 = vpop.permute.xlu0 %3069  ;;  %11613 = vmatmul.msk.bf16.vlgmr.msrb.gmra.mxu3 %vm661_vm0, %v11846_v56  ;;  %v7809_v15 = vsel %vm12704_vm11, %v7807_v16, %v7808_v39  ;;  %v3603_v56 = vsel %vm12704_vm11, %v3601_v63, %v3602_v52  ;;  %2133 = vst.msk [vmem:[#allocation3 + $0x174] sm:$0xf] %vm1055_vm1, %v2069_v32  ;;  %v3997_v47 = vld [vmem:[#allocation2 + $0xc4] sm:$0xf]  ;;  %v7562_v48 = vld [vmem:[#allocation2 + $0xc0] sm:$0xe] }
 0x420   : > { %16790 = vst [vmem:[#allocation67_spill] sm:$0xff] %v15609_v2  ;;  %v4133_v4 = vpop.permute.xlu2 %4132  ;;  %v11756_v38 = vld [vmem:[#allocation3 + $0xd0] sm:$0xf0]  ;;  %v11087_v52 = vld [vmem:[#allocation3 + $0xc8] sm:$0xf]  ;;  %v10901_v40 = vrot.slane %v3338_v1, 9 }
 0x421   : > { %v4127_v19 = vpop.permute.xlu1 %4126  ;;  %3244 = vst.msk [vmem:[#allocation3 + $0xd8] sm:$0xf] %vm3225_vm15, %v3070_v6  ;;  %v7563_v63 = vld [vmem:[#allocation2 + $0xc4] sm:$0xf]  ;;  %v2681_v24 = vrot.slane %v2680_v17, 4  ;;  %v2685_v16 = vrot.slane %v2683_v59, 5 }
 0x422   : > { %4303 = vst.msk [vmem:[#allocation3 + $0xc0] sm:$0xf] %vm4286_vm4, %v4127_v19  ;;  %v2220_v9 = vld [vmem:[#allocation2 + $0xf0] sm:$0xf]  ;;  %v15638_v2 = vld [vmem:[#allocation2 + $0xe8] sm:$0xf] }
 0x423   : > { %3920 = vst.msk [vmem:[#allocation3 + $0xd8] sm:$0xf] %vm3901_vm2, %v3746_v34  ;;  %v11755_v32 = vld [vmem:[#allocation3 + $0xc8] sm:$0xf0]  ;;  %v15643_v1 = vld [vmem:[%s16677_s7] ss:$0 sm:$0xff] }
 0x424   : > { %8027 = vst.msk [vmem:[#allocation3 + $0x14c] sm:$0xf] %vm1055_vm1, %v7809_v15  ;;  %v2219_v17 = vld [vmem:[#allocation2 + $0xec] sm:$0x1]  ;;  %v16794_v59 = vrot.slane %v15592_v23, 5  ;;  %v7812_v31 = vrot.slane %v7563_v63, 5 }
 0x425   : > { %16792 = vst [vmem:[#allocation68_spill] sm:$0xff] %v15630_v36  ;;  %3775 = vrot.lane.b32.xlu0 %v3603_v56, %s12287_s11  ;;  %v3998_v36 = vld [vmem:[#allocation2 + $0xe4] sm:$0xf]  ;;  %v2693_v23 = vshll.u32 %v2219_v17, 16 }
 0x426   : > { %4156 = vrot.lane.b32.xlu2 %v3997_v47, %s12288_s19  ;;  %v2689_v47 = vrot.slane %v2687_v5, 4  ;;  %v3600_v5 = vsel %vm12704_vm11, %v10901_v40, %v16794_v59  ;;  %v7814_v40 = vrot.slane %v7812_v31, 4  ;;  %v3343_v59 = vld [vmem:[#allocation2 + $0xec] sm:$0x1] }
 0x427   : > { %v15633_v34 = vpop.f32.mrf.mxu2  ;;  %3099 = vrot.lane.b32.xlu1 %v2672_v61, %s12286_s26  ;;  %v3748_v6 = vpop.permute.xlu0 %3747  ;;  %v11088_v61 = vor.u32 %v11756_v38, %v11087_v52  ;;  %v11847_v38 = vld [vmem:[%s12476_s15 + $0x8] sm:$0xff]  ;;  %v2698_v52 = vshrl.u32 %v2220_v9, 16 }
 0x428   : > { %16793 = vst [vmem:[#allocation69_spill] sm:$0xff] %v15633_v34  ;;  %v3750_v56 = vpop.permute.xlu2 %3749 }
 0x429   : > { %v8926_v39 = vpop.f32.mrf.mxu1  ;;  %v3072_v19 = vpop.permute.xlu1 %3071  ;;  %v11079_v15 = vld [vmem:[#allocation3 + $0xc0] sm:$0xf] }
 0x42a   : > { %3245 = vst.msk [vmem:[#allocation3 + $0xe4] sm:$0xf] %vm3225_vm15, %v3072_v19  ;;  %v11080_v34 = vor.u32 %v11755_v32, %v11079_v15  ;;  %v2701_v19 = vshll.u32 %v2220_v9, 16  ;;  %v10963_v15 = vrot.slane %v7562_v48, 9  ;;  %v2686_v32 = vsel %vm12823_vm14, %v2681_v24, %v2685_v16  ;;  %v15661_v9 = vpop.f32.mrf.mxu3 }
 0x42b   : > { %3921 = vst.msk [vmem:[#allocation3 + $0xe4] sm:$0xf] %vm3901_vm2, %v3748_v6  ;;  %v16695_v6 = vrot.slane %v15638_v2, 5  ;;  %v8927_v24 = vadd.f32 %v15643_v1, %v8926_v39 }
 0x42c   : > { %11445 = vmatmul.msk.bf16.gmra.mxu2 %vm8820_vm5, %v11088_v61  ;;  %4306 = vst.msk [vmem:[#allocation3 + $0xe4] sm:$0xf] %vm4286_vm4, %v4133_v4  ;;  %8965 = vmatmul.bf16.gmra.mxu1 %v11080_v34  ;;  %v2690_v4 = vor.u32 %v2689_v47, %v2685_v16  ;;  %v7564_v34 = vld [vmem:[#allocation2 + $0xc8] sm:$0x1]  ;;  %v7813_v48 = vsel %vm12704_vm11, %v10963_v15, %v7812_v31  ;;  %v2700_v16 = vrot.slane %v2698_v52, 4  ;;  %v2703_v47 = vrot.slane %v2701_v19, 5 }
 0x42d   : > { %3101 = vrot.lane.b32.xlu0 %v2686_v32, %s12286_s26  ;;  %16795 = vst [vmem:[#allocation70_spill] sm:$0xff] %v15661_v9  ;;  %v3608_v17 = vrot.slane %v16695_v6, 4  ;;  %v2221_v31 = vld [vmem:[#allocation2 + $0xf4] sm:$0xf]  ;;  %v3609_v52 = vrot.slane %v3343_v59, 5 }
 0x42e   : > { %3773 = vrot.lane.b32.xlu2 %v3600_v5, %s12287_s11  ;;  %8028 = vst.msk [vmem:[#allocation3 + $0x158] sm:$0xf] %vm1055_vm1, %v7813_v48  ;;  %v7815_v5 = vrot.slane %v7564_v34, 5  ;;  %v2691_v9 = vrot.slane %v2690_v4, 4  ;;  %v9096_v48 = vadd.f32 %v13860_v26, %v8927_v24  ;;  %v2707_v20 = vshll.u32 %v2221_v31, 16 }
 0x42f   : > { %v9264_v61 = vpop.f32.mrf.mxu2  ;;  %4158 = vrot.lane.b32.xlu1 %v3998_v36, %s12288_s19  ;;  %v3074_v63 = vpop.permute.xlu0 %3073  ;;  %11614 = vmatmul.msk.bf16.gmra.mxu3 %vm661_vm0, %v11847_v38  ;;  %v2695_v38 = vrot.slane %v2693_v23, 5  ;;  %v2711_v6 = vshrl.u32 %v2221_v31, 16  ;;  %v3610_v34 = vsel %vm12704_vm11, %v3608_v17, %v3609_v52  ;;  %v3999_v23 = vld [vmem:[#allocation2 + $0xe8] sm:$0xf]  ;;  %v11099_v26 = vld [vmem:[#allocation3 + $0xe0] sm:$0xf] }
 0x430   : > { %3246 = vst.msk [vmem:[#allocation3 + $0xf0] sm:$0xf] %vm3225_vm15, %v3074_v63  ;;  %v4137_v39 = vpop.permute.xlu2 %4136  ;;  %v7816_v19 = vsel %vm12704_vm11, %v7814_v40, %v7815_v5  ;;  %v2704_v63 = vor.u32 %v2703_v47, %v2700_v16  ;;  %v11759_v24 = vld [vmem:[#allocation3 + $0xe8] sm:$0xf0]  ;;  %v3341_v47 = vld [vmem:[#allocation2 + $0xe4] sm:$0xe] }
 0x431   : > { %v8928_v36 = vpop.f32.mrf.mxu1  ;;  %v4131_v32 = vpop.permute.xlu1 %4130  ;;  %3922 = vst.msk [vmem:[#allocation3 + $0xf0] sm:$0xf] %vm3901_vm2, %v3750_v56  ;;  %v2696_v56 = vsel %vm12823_vm14, %v2691_v9, %v2695_v38  ;;  %v2713_v17 = vrot.slane %v2711_v6, 4  ;;  %v2222_v6 = vld [vmem:[#allocation2 + $0xf8] sm:$0x1] }
 0x432   : > { %v8929_v15 = vadd.f32 %v15643_v1, %v8928_v36  ;;  %4305 = vst.msk [vmem:[#allocation3 + $0xd8] sm:$0xf] %vm4286_vm4, %v4131_v32  ;;  %v9265_v36 = vadd.f32 %v9264_v61, %v9096_v48  ;;  %v2705_v32 = vrot.slane %v2704_v63, 4  ;;  %v2709_v61 = vrot.slane %v2707_v20, 5  ;;  %v15684_v38 = vpop.f32.mrf.mxu3  ;;  %v11848_v63 = vld [vmem:[%s12476_s15 + $0x10] sm:$0xff] }
 0x433   : > { %8029 = vst.msk [vmem:[#allocation3 + $0x164] sm:$0xf] %vm1055_vm1, %v7816_v19  ;;  %v11758_v5 = vld [vmem:[#allocation3 + $0xe0] sm:$0xf0]  ;;  %v10902_v20 = vrot.slane %v3341_v47, 9  ;;  %v16796_v47 = vrot.slane %v15638_v2, 5 }
 0x434   : > { %v9098_v4 = vadd.f32 %v13905_v49, %v8929_v15  ;;  %v2223_v15 = vld [vmem:[#allocation2 + $0xfc] sm:$0xf]  ;;  %v9424_v52 = vmax.f32 %v9265_v36, 0.0 }
 0x435   : > { %3779 = vrot.lane.b32.xlu0 %v3610_v34, %s12287_s11  ;;  %v11100_v34 = vor.u32 %v11759_v24, %v11099_v26  ;;  %v2722_v36 = vshrl.u32 %v2223_v15, 16  ;;  %v2710_v26 = vsel %vm12823_vm14, %v2705_v32, %v2709_v61  ;;  %v2073_v32 = vld [vmem:[#allocation2 + $0xe8] sm:$0xf] }
 0x436   : > { %4160 = vrot.lane.b32.xlu2 %v3999_v23, %s12288_s19  ;;  %2137 = vst.msk [vmem:[#allocation3 + $0x1a4] sm:$0xf] %vm1055_vm1, %v2073_v32  ;;  %v2074_v32 = vld [vmem:[#allocation2 + $0xf0] sm:$0xf] }
 0x437   : > { %v9266_v40 = vpop.f32.mrf.mxu2  ;;  %3103 = vrot.lane.b32.xlu1 %v2696_v56, %s12286_s26  ;;  %v3752_v16 = vpop.permute.xlu0 %3751  ;;  %v15687_v56 = vld [vmem:[#allocation2 + $0xf4] sm:$0xf]  ;;  %v2724_v2 = vrot.slane %v2722_v36, 4  ;;  %2138 = vst.msk [vmem:[#allocation3 + $0x1b0] sm:$0xf] %vm1055_vm1, %v2074_v32 }
 0x438   : > { %v9267_v59 = vadd.f32 %v9266_v40, %v9098_v4  ;;  %v3754_v48 = vpop.permute.xlu2 %3753  ;;  %v2725_v40 = vshll.u32 %v2223_v15, 16  ;;  %v3613_v24 = vrot.slane %v15687_v56, 5 }
 0x439   : > { %v3076_v49 = vpop.permute.xlu1 %3075  ;;  %v8931_v31 = vpop.f32.mrf.mxu1  ;;  %v11091_v9 = vld [vmem:[#allocation3 + $0xd8] sm:$0xf] }
 0x43a   : > { %v9425_v19 = vmax.f32 %v9267_v59, 0.0  ;;  %3247 = vst.msk [vmem:[#allocation3 + $0xfc] sm:$0xf] %vm3225_vm15, %v3076_v49  ;;  %v11092_v4 = vor.u32 %v11758_v5, %v11091_v9  ;;  %v2072_v59 = vld [vmem:[#allocation2 + $0xe4] sm:$0xf]  ;;  %v3607_v49 = vsel %vm12704_vm11, %v10902_v20, %v16796_v47  ;;  %v2717_v9 = vshll.u32 %v2222_v6, 16  ;;  %v15714_v36 = vpop.f32.mrf.mxu3 }
 0x43b   : > { %3923 = vst.msk [vmem:[#allocation3 + $0xfc] sm:$0xf] %vm3901_vm2, %v3752_v16  ;;  %v4000_v16 = vld [vmem:[#allocation2 + $0xf0] sm:$0xf]  ;;  %v3346_v5 = vld [vmem:[#allocation2 + $0xf8] sm:$0x1] }
 0x43c   : > { %v9488_v23 = vpack.c.bf16 %v9425_v19, %v9424_v52  ;;  %11446 = vmatmul.msk.bf16.gmra.mxu2 %vm8820_vm5, %v11100_v34  ;;  %4308 = vst.msk [vmem:[#allocation3 + $0xfc] sm:$0xf] %vm4286_vm4, %v4137_v39  ;;  %8970 = vmatmul.bf16.gmra.mxu1 %v11092_v4  ;;  %v2714_v39 = vor.u32 %v2713_v17, %v2709_v61  ;;  %v2727_v34 = vrot.slane %v2725_v40, 5  ;;  %v3615_v4 = vrot.slane %v3613_v24, 4  ;;  %v2224_v6 = vld [vmem:[#allocation2 + $0x100] sm:$0xf] }
 0x43d   : > { %3105 = vrot.lane.b32.xlu0 %v2710_v26, %s12286_s26  ;;  %2136 = vst.msk [vmem:[#allocation3 + $0x198] sm:$0xf] %vm1055_vm1, %v2072_v59  ;;  %v8932_v52 = vadd.f32 %v15643_v1, %v8931_v31  ;;  %v3616_v20 = vrot.slane %v3346_v5, 5  ;;  %v3344_v26 = vld [vmem:[#allocation2 + $0xf0] sm:$0xe]  ;;  %v2731_v47 = vshll.u32 %v2224_v6, 16 }
 0x43e   : > { %11653 = vmatmul.msk.bf16.vlgmr.msrb.gmra.mxu0 %vm8820_vm5, %v9488_v23  ;;  %3777 = vrot.lane.b32.xlu2 %v3607_v49, %s12287_s11  ;;  %v2715_v59 = vrot.slane %v2714_v39, 4  ;;  %v2735_v49 = vshrl.u32 %v2224_v6, 16 }
 0x43f   : > { %v9269_v15 = vpop.f32.mrf.mxu2  ;;  %4162 = vrot.lane.b32.xlu1 %v4000_v16, %s12288_s19  ;;  %v3078_v19 = vpop.permute.xlu0 %3077  ;;  %11615 = vmatmul.msk.bf16.gmra.mxu3 %vm661_vm0, %v11848_v63  ;;  %v2719_v63 = vrot.slane %v2717_v9, 5  ;;  %v9101_v40 = vadd.f32 %v13944_v0, %v8932_v52  ;;  %v2728_v16 = vor.u32 %v2727_v34, %v2724_v2  ;;  %v3617_v5 = vsel %vm12704_vm11, %v3615_v4, %v3616_v20  ;;  %v4001_v9 = vld [vmem:[#allocation2 + $0xf4] sm:$0xf] }
 0x440   : > { %3248 = vst.msk [vmem:[#allocation3 + $0x108] sm:$0xf] %vm3225_vm15, %v3078_v19  ;;  %v4141_v23 = vpop.permute.xlu2 %4140  ;;  %v2075_v0 = vld [vmem:[#allocation2 + $0xf4] sm:$0xf]  ;;  %v10903_v2 = vrot.slane %v3344_v26, 9  ;;  %v2733_v4 = vrot.slane %v2731_v47, 5 }
 0x441   : > { %v4135_v61 = vpop.permute.xlu1 %4134  ;;  %v8933_v17 = vpop.f32.mrf.mxu1  ;;  %3924 = vst.msk [vmem:[#allocation3 + $0x108] sm:$0xf] %vm3901_vm2, %v3754_v48  ;;  %v9270_v19 = vadd.f32 %v9269_v15, %v9101_v40  ;;  %v2720_v39 = vsel %vm12823_vm14, %v2715_v59, %v2719_v63  ;;  %v11762_v52 = vld [vmem:[#allocation3 + $0x100] sm:$0xf0]  ;;  %v2737_v20 = vrot.slane %v2735_v49, 4  ;;  %v11849_v49 = vld [vmem:[%s12476_s15 + $0x18] sm:$0xff] }
 0x442   : > { %4307 = vst.msk [vmem:[#allocation3 + $0xf0] sm:$0xf] %vm4286_vm4, %v4135_v61  ;;  %v8934_v31 = vadd.f32 %v15643_v1, %v8933_v17  ;;  %v2729_v17 = vrot.slane %v2728_v16, 4  ;;  %v2226_v40 = vld [vmem:[#allocation2 + $0x108] sm:$0xf] }
 0x443   : > { %2139 = vst.msk [vmem:[#allocation3 + $0x1bc] sm:$0xf] %vm1055_vm1, %v2075_v0  ;;  %v11761_v63 = vld [vmem:[#allocation3 + $0xf8] sm:$0xf0]  ;;  %v15728_v0 = vld [vmem:[#allocation2 + $0x100] sm:$0xf] }
 0x444   : > { %v9103_v61 = vadd.f32 %v13984_v10, %v8934_v31  ;;  %v11111_v10 = vld [vmem:[#allocation3 + $0xf8] sm:$0xf]  ;;  %v2225_v16 = vld [vmem:[#allocation2 + $0x104] sm:$0x1] }
 0x445   : > { %3783 = vrot.lane.b32.xlu0 %v3617_v5, %s12287_s11  ;;  %v9426_v5 = vmax.f32 %v9270_v19, 0.0  ;;  %v11112_v26 = vor.u32 %v11762_v52, %v11111_v10  ;;  %v2749_v19 = vshll.u32 %v2226_v40, 16  ;;  %v3620_v52 = vrot.slane %v15728_v0, 5  ;;  %v4002_v10 = vld [vmem:[#allocation2 + $0xfc] sm:$0xf] }
 0x446   : > { %4164 = vrot.lane.b32.xlu2 %v4001_v9, %s12288_s19 }
 0x447   : > { %v9271_v48 = vpop.f32.mrf.mxu2  ;;  %3107 = vrot.lane.b32.xlu1 %v2720_v39, %s12286_s26  ;;  %v3756_v34 = vpop.permute.xlu0 %3755  ;;  %v2751_v56 = vrot.slane %v2749_v19, 5 }
 0x448   : > { %v9272_v15 = vadd.f32 %v9271_v48, %v9103_v61  ;;  %v3758_v39 = vpop.permute.xlu2 %3757  ;;  %v2746_v61 = vshrl.u32 %v2226_v40, 16  ;;  %v2734_v48 = vsel %vm12823_vm14, %v2729_v17, %v2733_v4 }
 0x449   : > { %v3080_v6 = vpop.permute.xlu1 %3079  ;;  %v8936_v31 = vpop.f32.mrf.mxu1  ;;  %v11103_v59 = vld [vmem:[#allocation3 + $0xf0] sm:$0xf] }
 0x44a   : > { %v9427_v32 = vmax.f32 %v9272_v15, 0.0  ;;  %3249 = vst.msk [vmem:[#allocation3 + $0x114] sm:$0xf] %vm3225_vm15, %v3080_v6  ;;  %v11104_v9 = vor.u32 %v11761_v63, %v11103_v59  ;;  %v15737_v15 = vpop.f32.mrf.mxu3  ;;  %v2741_v6 = vshll.u32 %v2225_v16, 16  ;;  %v3349_v59 = vld [vmem:[#allocation2 + $0x104] sm:$0x1]  ;;  %v8937_v17 = vadd.f32 %v15643_v1, %v8936_v31 }
 0x44b   : > { %3925 = vst.msk [vmem:[#allocation3 + $0x114] sm:$0xf] %vm3901_vm2, %v3756_v34  ;;  %v3614_v34 = vsel %vm12704_vm11, %v10903_v2, %v3613_v24  ;;  %v3622_v24 = vrot.slane %v3620_v52, 4  ;;  %v3623_v2 = vrot.slane %v3349_v59, 5 }
 0x44c   : > { %v9489_v47 = vpack.c.bf16 %v9427_v32, %v9426_v5  ;;  %11447 = vmatmul.msk.bf16.gmra.mxu2 %vm8820_vm5, %v11112_v26  ;;  %4310 = vst.msk [vmem:[#allocation3 + $0x114] sm:$0xf] %vm4286_vm4, %v4141_v23  ;;  %8975 = vmatmul.bf16.gmra.mxu1 %v11104_v9  ;;  %v2738_v23 = vor.u32 %v2737_v20, %v2733_v4  ;;  %v2748_v5 = vrot.slane %v2746_v61, 4  ;;  %v2227_v4 = vld [vmem:[#allocation2 + $0x10c] sm:$0xf]  ;;  %v2743_v16 = vrot.slane %v2741_v6, 5 }
 0x44d   : > { %3109 = vrot.lane.b32.xlu0 %v2734_v48, %s12286_s26  ;;  %v2755_v19 = vshll.u32 %v2227_v4, 16  ;;  %v2759_v48 = vshrl.u32 %v2227_v4, 16  ;;  %v11765_v6 = vld [vmem:[#allocation3 + $0x118] sm:$0xf0] }
 0x44e   : > { %11654 = vmatmul.msk.bf16.gmra.mxu0 %vm8820_vm5, %v9489_v47  ;;  %3781 = vrot.lane.b32.xlu2 %v3614_v34, %s12287_s11  ;;  %v2739_v31 = vrot.slane %v2738_v23, 4  ;;  %v9106_v47 = vadd.f32 %v14018_v12, %v8937_v17  ;;  %v2752_v61 = vor.u32 %v2751_v56, %v2748_v5  ;;  %v2076_v34 = vld [vmem:[#allocation2 + $0xfc] sm:$0xf]  ;;  %v4003_v23 = vld [vmem:[#allocation2 + $0x100] sm:$0xf] }
 0x44f   : > { %v9274_v63 = vpop.f32.mrf.mxu2  ;;  %4166 = vrot.lane.b32.xlu1 %v4002_v10, %s12288_s19  ;;  %v3082_v40 = vpop.permute.xlu0 %3081  ;;  %11616 = vmatmul.msk.bf16.gmra.mxu3 %vm661_vm0, %v11849_v49  ;;  %v3347_v49 = vld [vmem:[#allocation2 + $0xfc] sm:$0xe]  ;;  %v3624_v10 = vsel %vm12704_vm11, %v3622_v24, %v3623_v2  ;;  %2140 = vst.msk [vmem:[#allocation3 + $0x1c8] sm:$0xf] %vm1055_vm1, %v2076_v34  ;;  %v2077_v12 = vld [vmem:[#allocation2 + $0x100] sm:$0xf] }
 0x450   : > { %3250 = vst.msk [vmem:[#allocation3 + $0x120] sm:$0xf] %vm3225_vm15, %v3082_v40  ;;  %v4145_v20 = vpop.permute.xlu2 %4144  ;;  %v9275_v59 = vadd.f32 %v9274_v63, %v9106_v47  ;;  %v10904_v17 = vrot.slane %v3347_v49, 9  ;;  %v11123_v5 = vld [vmem:[#allocation3 + $0x110] sm:$0xf]  ;;  %v2757_v24 = vrot.slane %v2755_v19, 5 }
 0x451   : > { %v4139_v32 = vpop.permute.xlu1 %4138  ;;  %v8938_v26 = vpop.f32.mrf.mxu1  ;;  %3926 = vst.msk [vmem:[#allocation3 + $0x120] sm:$0xf] %vm3901_vm2, %v3758_v39  ;;  %v2761_v2 = vrot.slane %v2759_v48, 4  ;;  %v2229_v47 = vld [vmem:[#allocation2 + $0x114] sm:$0xf] }
 0x452   : > { %4309 = vst.msk [vmem:[#allocation3 + $0x108] sm:$0xf] %vm4286_vm4, %v4139_v32  ;;  %v8939_v9 = vadd.f32 %v15643_v1, %v8938_v26  ;;  %v2744_v32 = vsel %vm12823_vm14, %v2739_v31, %v2743_v16  ;;  %v15766_v63 = vpop.f32.mrf.mxu3  ;;  %v2753_v26 = vrot.slane %v2752_v61, 4  ;;  %v2228_v61 = vld [vmem:[#allocation2 + $0x110] sm:$0x1] }
 0x453   : > { %2141 = vst.msk [vmem:[#allocation3 + $0x1d4] sm:$0xf] %vm1055_vm1, %v2077_v12  ;;  %v11764_v16 = vld [vmem:[#allocation3 + $0x110] sm:$0xf0]  ;;  %v15769_v12 = vld [vmem:[#allocation2 + $0x10c] sm:$0xf] }
 0x454   : > { %v9108_v40 = vadd.f32 %v14048_v45, %v8939_v9  ;;  %v11850_v48 = vld [vmem:[%s12476_s15 + $0x20] sm:$0xff] }
 0x455   : > { %3787 = vrot.lane.b32.xlu0 %v3624_v10, %s12287_s11  ;;  %v9428_v10 = vmax.f32 %v9275_v59, 0.0  ;;  %v2773_v59 = vshll.u32 %v2229_v47, 16 }
 0x456   : > { %4168 = vrot.lane.b32.xlu2 %v4003_v23, %s12288_s19 }
 0x457   : > { %v9276_v39 = vpop.f32.mrf.mxu2  ;;  %3111 = vrot.lane.b32.xlu1 %v2744_v32, %s12286_s26  ;;  %v3760_v56 = vpop.permute.xlu0 %3759  ;;  %v11124_v32 = vor.u32 %v11765_v6, %v11123_v5  ;;  %v3627_v6 = vrot.slane %v15769_v12, 5  ;;  %v3621_v5 = vsel %vm12704_vm11, %v10904_v17, %v3620_v52  ;;  %v2775_v0 = vrot.slane %v2773_v59, 5 }
 0x458   : > { %v9277_v45 = vadd.f32 %v9276_v39, %v9108_v40  ;;  %v3762_v49 = vpop.permute.xlu2 %3761  ;;  %v2770_v40 = vshrl.u32 %v2229_v47, 16  ;;  %v2758_v39 = vsel %vm12823_vm14, %v2753_v26, %v2757_v24 }
 0x459   : > { %v3084_v4 = vpop.permute.xlu1 %3083  ;;  %v8941_v9 = vpop.f32.mrf.mxu1  ;;  %v11115_v31 = vld [vmem:[#allocation3 + $0x108] sm:$0xf]  ;;  %v3629_v52 = vrot.slane %v3627_v6, 4 }
 0x45a   : > { %v9429_v34 = vmax.f32 %v9277_v45, 0.0  ;;  %3251 = vst.msk [vmem:[#allocation3 + $0x12c] sm:$0xf] %vm3225_vm15, %v3084_v4  ;;  %v11116_v23 = vor.u32 %v11764_v16, %v11115_v31  ;;  %v4004_v45 = vld [vmem:[#allocation2 + $0x108] sm:$0xf]  ;;  %v8942_v26 = vadd.f32 %v15643_v1, %v8941_v9  ;;  %v2772_v47 = vrot.slane %v2770_v40, 4 }
 0x45b   : > { %3927 = vst.msk [vmem:[#allocation3 + $0x12c] sm:$0xf] %vm3901_vm2, %v3760_v56  ;;  %v2765_v56 = vshll.u32 %v2228_v61, 16  ;;  %v3352_v4 = vld [vmem:[#allocation2 + $0x110] sm:$0x1] }
 0x45c   : > { %v9490_v19 = vpack.c.bf16 %v9429_v34, %v9428_v10  ;;  %11448 = vmatmul.msk.bf16.gmra.mxu2 %vm8820_vm5, %v11124_v32  ;;  %4312 = vst.msk [vmem:[#allocation3 + $0x12c] sm:$0xf] %vm4286_vm4, %v4145_v20  ;;  %8980 = vmatmul.bf16.gmra.mxu1 %v11116_v23  ;;  %v2762_v20 = vor.u32 %v2761_v2, %v2757_v24  ;;  %v3630_v17 = vrot.slane %v3352_v4, 5  ;;  %v2230_v24 = vld [vmem:[#allocation2 + $0x118] sm:$0xf]  ;;  %v15791_v2 = vpop.f32.mrf.mxu3 }
 0x45d   : > { %3113 = vrot.lane.b32.xlu0 %v2758_v39, %s12286_s26  ;;  %v2767_v61 = vrot.slane %v2765_v56, 5  ;;  %v2776_v40 = vor.u32 %v2775_v0, %v2772_v47  ;;  %v2779_v59 = vshll.u32 %v2230_v24, 16  ;;  %v2783_v39 = vshrl.u32 %v2230_v24, 16  ;;  %v11768_v56 = vld [vmem:[#allocation3 + $0x130] sm:$0xf0] }
 0x45e   : > { %11655 = vmatmul.msk.bf16.gmra.mxu0 %vm8820_vm5, %v9490_v19  ;;  %3785 = vrot.lane.b32.xlu2 %v3621_v5, %s12287_s11  ;;  %v2763_v23 = vrot.slane %v2762_v20, 4  ;;  %v9111_v19 = vadd.f32 %v14083_v51, %v8942_v26  ;;  %v2078_v5 = vld [vmem:[#allocation2 + $0x108] sm:$0xf]  ;;  %v4005_v20 = vld [vmem:[#allocation2 + $0x10c] sm:$0xf] }
 0x45f   : > { %v9279_v31 = vpop.f32.mrf.mxu2  ;;  %4170 = vrot.lane.b32.xlu1 %v4004_v45, %s12288_s19  ;;  %v3086_v16 = vpop.permute.xlu0 %3085  ;;  %11617 = vmatmul.msk.bf16.gmra.mxu3 %vm661_vm0, %v11850_v48  ;;  %v3350_v48 = vld [vmem:[#allocation2 + $0x108] sm:$0xe]  ;;  %v3631_v45 = vsel %vm12704_vm11, %v3629_v52, %v3630_v17  ;;  %2142 = vst.msk [vmem:[#allocation3 + $0x1e0] sm:$0xf] %vm1055_vm1, %v2078_v5  ;;  %v2079_v51 = vld [vmem:[#allocation2 + $0x10c] sm:$0xf] }
 0x460   : > { %3252 = vst.msk [vmem:[#allocation3 + $0x138] sm:$0xf] %vm3225_vm15, %v3086_v16  ;;  %v4149_v32 = vpop.permute.xlu2 %4148  ;;  %v9280_v4 = vadd.f32 %v9279_v31, %v9111_v19  ;;  %v10905_v26 = vrot.slane %v3350_v48, 9  ;;  %v2777_v0 = vrot.slane %v2776_v40, 4  ;;  %v2785_v52 = vrot.slane %v2783_v39, 4 }
 0x461   : > { %v4143_v10 = vpop.permute.xlu1 %4142  ;;  %v8943_v34 = vpop.f32.mrf.mxu1  ;;  %3928 = vst.msk [vmem:[#allocation3 + $0x138] sm:$0xf] %vm3901_vm2, %v3762_v49  ;;  %v2231_v40 = vld [vmem:[#allocation2 + $0x11c] sm:$0x1] }
 0x462   : > { %4311 = vst.msk [vmem:[#allocation3 + $0x120] sm:$0xf] %vm4286_vm4, %v4143_v10  ;;  %v8944_v9 = vadd.f32 %v15643_v1, %v8943_v34  ;;  %v2768_v10 = vsel %vm12823_vm14, %v2763_v23, %v2767_v61  ;;  %v2781_v34 = vrot.slane %v2779_v59, 5  ;;  %v2232_v61 = vld [vmem:[#allocation2 + $0x120] sm:$0xf]  ;;  %v9430_v19 = vmax.f32 %v9280_v4, 0.0 }
 0x463   : > { %2143 = vst.msk [vmem:[#allocation3 + $0x1ec] sm:$0xf] %vm1055_vm1, %v2079_v51  ;;  %v11767_v23 = vld [vmem:[#allocation3 + $0x128] sm:$0xf0]  ;;  %v2797_v51 = vshll.u32 %v2232_v61, 16 }
 0x464   : > { %v9113_v16 = vadd.f32 %v14120_v11, %v8944_v9  ;;  %v11135_v11 = vld [vmem:[#allocation3 + $0x128] sm:$0xf]  ;;  %v15811_v59 = vpop.f32.mrf.mxu3 }
 0x465   : > { %3791 = vrot.lane.b32.xlu0 %v3631_v45, %s12287_s11  ;;  %v11136_v48 = vor.u32 %v11768_v56, %v11135_v11  ;;  %v11851_v4 = vld [vmem:[%s12476_s15 + $0x28] sm:$0xff]  ;;  %v3628_v11 = vsel %vm12704_vm11, %v10905_v26, %v3627_v6  ;;  %v2799_v12 = vrot.slane %v2797_v51, 5 }
 0x466   : > { %4172 = vrot.lane.b32.xlu2 %v4005_v20, %s12288_s19  ;;  %v15808_v20 = vld [vmem:[#allocation2 + $0x118] sm:$0xf] }
 0x467   : > { %v9281_v49 = vpop.f32.mrf.mxu2  ;;  %3115 = vrot.lane.b32.xlu1 %v2768_v10, %s12286_s26  ;;  %v3764_v47 = vpop.permute.xlu0 %3763  ;;  %v3634_v56 = vrot.slane %v15808_v20, 5 }
 0x468   : > { %v9282_v31 = vadd.f32 %v9281_v49, %v9113_v16  ;;  %v3766_v5 = vpop.permute.xlu2 %3765  ;;  %v2794_v16 = vshrl.u32 %v2232_v61, 16  ;;  %v2782_v49 = vsel %vm12823_vm14, %v2777_v0, %v2781_v34 }
 0x469   : > { %v3088_v17 = vpop.permute.xlu1 %3087  ;;  %v8946_v24 = vpop.f32.mrf.mxu1  ;;  %v11127_v9 = vld [vmem:[#allocation3 + $0x120] sm:$0xf]  ;;  %v3636_v6 = vrot.slane %v3634_v56, 4 }
 0x46a   : > { %v9431_v45 = vmax.f32 %v9282_v31, 0.0  ;;  %3253 = vst.msk [vmem:[#allocation3 + $0x144] sm:$0xf] %vm3225_vm15, %v3088_v17  ;;  %v11128_v10 = vor.u32 %v11767_v23, %v11127_v9  ;;  %v4006_v31 = vld [vmem:[#allocation2 + $0x114] sm:$0xf]  ;;  %v8947_v0 = vadd.f32 %v15643_v1, %v8946_v24  ;;  %v2796_v61 = vrot.slane %v2794_v16, 4 }
 0x46b   : > { %3929 = vst.msk [vmem:[#allocation3 + $0x144] sm:$0xf] %vm3901_vm2, %v3764_v47  ;;  %v2789_v47 = vshll.u32 %v2231_v40, 16  ;;  %v3355_v17 = vld [vmem:[#allocation2 + $0x11c] sm:$0x1] }
 0x46c   : > { %v9491_v39 = vpack.c.bf16 %v9431_v45, %v9430_v19  ;;  %11449 = vmatmul.msk.bf16.gmra.mxu2 %vm8820_vm5, %v11136_v48  ;;  %4314 = vst.msk [vmem:[#allocation3 + $0x144] sm:$0xf] %vm4286_vm4, %v4149_v32  ;;  %8985 = vmatmul.bf16.gmra.mxu1 %v11128_v10  ;;  %v2786_v32 = vor.u32 %v2785_v52, %v2781_v34  ;;  %v3637_v26 = vrot.slane %v3355_v17, 5  ;;  %v2233_v34 = vld [vmem:[#allocation2 + $0x124] sm:$0xf]  ;;  %v15838_v17 = vpop.f32.mrf.mxu3 }
 0x46d   : > { %3117 = vrot.lane.b32.xlu0 %v2782_v49, %s12286_s26  ;;  %v2791_v10 = vrot.slane %v2789_v47, 5  ;;  %v9116_v40 = vadd.f32 %v14148_v13, %v8947_v0  ;;  %v2803_v16 = vshll.u32 %v2233_v34, 16  ;;  %v2807_v51 = vshrl.u32 %v2233_v34, 16  ;;  %v4007_v49 = vld [vmem:[#allocation2 + $0x118] sm:$0xf] }
 0x46e   : > { %11656 = vmatmul.msk.bf16.gmra.mxu0 %vm8820_vm5, %v9491_v39  ;;  %3789 = vrot.lane.b32.xlu2 %v3628_v11, %s12287_s11  ;;  %v2787_v24 = vrot.slane %v2786_v32, 4  ;;  %v3353_v39 = vld [vmem:[#allocation2 + $0x114] sm:$0xe]  ;;  %v2070_v11 = vld [vmem:[#allocation2 + $0xd8] sm:$0xf] }
 0x46f   : > { %v9284_v9 = vpop.f32.mrf.mxu2  ;;  %4174 = vrot.lane.b32.xlu1 %v4006_v31, %s12288_s19  ;;  %v3090_v23 = vpop.permute.xlu0 %3089  ;;  %11618 = vmatmul.msk.bf16.gmra.mxu3 %vm661_vm0, %v11851_v4  ;;  %v2800_v4 = vor.u32 %v2799_v12, %v2796_v61  ;;  %v3638_v31 = vsel %vm12704_vm11, %v3636_v6, %v3637_v26  ;;  %2134 = vst.msk [vmem:[#allocation3 + $0x180] sm:$0xf] %vm1055_vm1, %v2070_v11  ;;  %v2080_v13 = vld [vmem:[#allocation2 + $0x114] sm:$0xf]  ;;  %v11147_v0 = vld [vmem:[#allocation3 + $0x140] sm:$0xf] }
 0x470   : > { %3254 = vst.msk [vmem:[#allocation3 + $0x150] sm:$0xf] %vm3225_vm15, %v3090_v23  ;;  %v4153_v52 = vpop.permute.xlu2 %4152  ;;  %v9285_v23 = vadd.f32 %v9284_v9, %v9116_v40  ;;  %v2792_v32 = vsel %vm12823_vm14, %v2787_v24, %v2791_v10  ;;  %v11771_v61 = vld [vmem:[#allocation3 + $0x148] sm:$0xf0]  ;;  %v10906_v12 = vrot.slane %v3353_v39, 9  ;;  %v2805_v6 = vrot.slane %v2803_v16, 5 }
 0x471   : > { %v4147_v19 = vpop.permute.xlu1 %4146  ;;  %v8948_v45 = vpop.f32.mrf.mxu1  ;;  %3930 = vst.msk [vmem:[#allocation3 + $0x150] sm:$0xf] %vm3901_vm2, %v3766_v5  ;;  %v2081_v5 = vld [vmem:[#allocation2 + $0x118] sm:$0xf]  ;;  %v2809_v26 = vrot.slane %v2807_v51, 4  ;;  %v11148_v11 = vor.u32 %v11771_v61, %v11147_v0  ;;  %v11852_v51 = vld [vmem:[%s12476_s15 + $0x30] sm:$0xff] }
 0x472   : > { %4313 = vst.msk [vmem:[#allocation3 + $0x138] sm:$0xf] %vm4286_vm4, %v4147_v19  ;;  %v8949_v48 = vadd.f32 %v15643_v1, %v8948_v45  ;;  %v2801_v45 = vrot.slane %v2800_v4, 4  ;;  %v2235_v40 = vld [vmem:[#allocation2 + $0x12c] sm:$0xf] }
 0x473   : > { %2144 = vst.msk [vmem:[#allocation3 + $0x1f8] sm:$0xf] %vm1055_vm1, %v2080_v13  ;;  %v11770_v10 = vld [vmem:[#allocation3 + $0x140] sm:$0xf0]  ;;  %v2234_v4 = vld [vmem:[#allocation2 + $0x128] sm:$0x1] }
 0x474   : > { %v9118_v19 = vadd.f32 %v14174_v57, %v8949_v48  ;;  %2145 = vst.msk [vmem:[#allocation3 + $0x204] sm:$0xf] %vm1055_vm1, %v2081_v5  ;;  %v2818_v13 = vshrl.u32 %v2235_v40, 16  ;;  %v4008_v5 = vld [vmem:[#allocation2 + $0x120] sm:$0xf] }
 0x475   : > { %3795 = vrot.lane.b32.xlu0 %v3638_v31, %s12287_s11  ;;  %v9432_v31 = vmax.f32 %v9285_v23, 0.0  ;;  %v2821_v23 = vshll.u32 %v2235_v40, 16  ;;  %v2071_v61 = vld [vmem:[#allocation2 + $0xdc] sm:$0xf] }
 0x476   : > { %4176 = vrot.lane.b32.xlu2 %v4007_v49, %s12288_s19  ;;  %2135 = vst.msk [vmem:[#allocation3 + $0x18c] sm:$0xf] %vm1055_vm1, %v2071_v61  ;;  %v2082_v61 = vld [vmem:[#allocation2 + $0x120] sm:$0xf] }
 0x477   : > { %v9286_v47 = vpop.f32.mrf.mxu2  ;;  %3119 = vrot.lane.b32.xlu1 %v2792_v32, %s12286_s26  ;;  %v3768_v9 = vpop.permute.xlu0 %3767  ;;  %2146 = vst.msk [vmem:[#allocation3 + $0x210] sm:$0xf] %vm1055_vm1, %v2082_v61 }
 0x478   : > { %v9287_v57 = vadd.f32 %v9286_v47, %v9118_v19  ;;  %v3770_v39 = vpop.permute.xlu2 %3769  ;;  %v15850_v19 = vld [vmem:[#allocation2 + $0x124] sm:$0xf]  ;;  %v2806_v47 = vsel %vm12823_vm14, %v2801_v45, %v2805_v6  ;;  %v15868_v45 = vpop.f32.mrf.mxu3 }
 0x479   : > { %v3092_v34 = vpop.permute.xlu1 %3091  ;;  %v8951_v48 = vpop.f32.mrf.mxu1  ;;  %v11139_v24 = vld [vmem:[#allocation3 + $0x138] sm:$0xf]  ;;  %v3641_v0 = vrot.slane %v15850_v19, 5 }
 0x47a   : > { %v9433_v49 = vmax.f32 %v9287_v57, 0.0  ;;  %3255 = vst.msk [vmem:[#allocation3 + $0x15c] sm:$0xf] %vm3225_vm15, %v3092_v34  ;;  %v11140_v32 = vor.u32 %v11770_v10, %v11139_v24  ;;  %v3635_v57 = vsel %vm12704_vm11, %v10906_v12, %v3634_v56  ;;  %v3358_v34 = vld [vmem:[#allocation2 + $0x128] sm:$0x1]  ;;  %v8952_v10 = vadd.f32 %v15643_v1, %v8951_v48 }
 0x47b   : > { %3931 = vst.msk [vmem:[#allocation3 + $0x15c] sm:$0xf] %vm3901_vm2, %v3768_v9  ;;  %v2813_v9 = vshll.u32 %v2234_v4, 16  ;;  %v2820_v56 = vrot.slane %v2818_v13, 4  ;;  %v2823_v12 = vrot.slane %v2821_v23, 5 }
 0x47c   : > { %v9492_v16 = vpack.c.bf16 %v9433_v49, %v9432_v31  ;;  %11450 = vmatmul.msk.bf16.gmra.mxu2 %vm8820_vm5, %v11148_v11  ;;  %4316 = vst.msk [vmem:[#allocation3 + $0x15c] sm:$0xf] %vm4286_vm4, %v4153_v52  ;;  %8990 = vmatmul.bf16.gmra.mxu1 %v11140_v32  ;;  %v2810_v52 = vor.u32 %v2809_v26, %v2805_v6  ;;  %v3643_v26 = vrot.slane %v3641_v0, 4  ;;  %v3644_v31 = vrot.slane %v3358_v34, 5  ;;  %v2236_v49 = vld [vmem:[#allocation2 + $0x130] sm:$0xf] }
 0x47d   : > { %3121 = vrot.lane.b32.xlu0 %v2806_v47, %s12286_s26  ;;  %v2815_v4 = vrot.slane %v2813_v9, 5  ;;  %v2824_v13 = vor.u32 %v2823_v12, %v2820_v56  ;;  %v2827_v23 = vshll.u32 %v2236_v49, 16  ;;  %v11774_v9 = vld [vmem:[#allocation3 + $0x160] sm:$0xf0] }
 0x47e   : > { %11657 = vmatmul.msk.bf16.gmra.mxu0 %vm8820_vm5, %v9492_v16  ;;  %3793 = vrot.lane.b32.xlu2 %v3635_v57, %s12287_s11  ;;  %v2811_v48 = vrot.slane %v2810_v52, 4  ;;  %v9121_v16 = vadd.f32 %v14197_v62, %v8952_v10  ;;  %v3645_v47 = vsel %vm12704_vm11, %v3643_v26, %v3644_v31  ;;  %v4009_v52 = vld [vmem:[#allocation2 + $0x124] sm:$0xf] }
 0x47f   : > { %v9289_v24 = vpop.f32.mrf.mxu2  ;;  %4178 = vrot.lane.b32.xlu1 %v4008_v5, %s12288_s19  ;;  %v3094_v20 = vpop.permute.xlu0 %3093  ;;  %11619 = vmatmul.msk.bf16.gmra.mxu3 %vm661_vm0, %v11852_v51  ;;  %v3356_v51 = vld [vmem:[#allocation2 + $0x120] sm:$0xe]  ;;  %v2831_v5 = vshrl.u32 %v2236_v49, 16  ;;  %v2083_v62 = vld [vmem:[#allocation2 + $0x124] sm:$0xf]  ;;  %v2825_v12 = vrot.slane %v2824_v13, 4 }
 0x480   : > { %3256 = vst.msk [vmem:[#allocation3 + $0x168] sm:$0xf] %vm3225_vm15, %v3094_v20  ;;  %v4157_v11 = vpop.permute.xlu2 %4156  ;;  %v9290_v57 = vadd.f32 %v9289_v24, %v9121_v16  ;;  %v2816_v20 = vsel %vm12823_vm14, %v2811_v48, %v2815_v4  ;;  %v10907_v10 = vrot.slane %v3356_v51, 9  ;;  %v2238_v48 = vld [vmem:[#allocation2 + $0x138] sm:$0xf] }
 0x481   : > { %v4151_v40 = vpop.permute.xlu1 %4150  ;;  %v8953_v6 = vpop.f32.mrf.mxu1  ;;  %3932 = vst.msk [vmem:[#allocation3 + $0x168] sm:$0xf] %vm3901_vm2, %v3770_v39  ;;  %v2237_v13 = vld [vmem:[#allocation2 + $0x134] sm:$0x1] }
 0x482   : > { %4315 = vst.msk [vmem:[#allocation3 + $0x150] sm:$0xf] %vm4286_vm4, %v4151_v40  ;;  %v8954_v32 = vadd.f32 %v15643_v1, %v8953_v6  ;;  %v2829_v40 = vrot.slane %v2827_v23, 5  ;;  %v2833_v6 = vrot.slane %v2831_v5, 4  ;;  %v9434_v4 = vmax.f32 %v9290_v57, 0.0  ;;  %v11853_v5 = vld [vmem:[%s12476_s15 + $0x38] sm:$0xff] }
 0x483   : > { %2147 = vst.msk [vmem:[#allocation3 + $0x21c] sm:$0xf] %vm1055_vm1, %v2083_v62  ;;  %v2842_v57 = vshrl.u32 %v2238_v48, 16 }
 0x484   : > { %v9123_v34 = vadd.f32 %v14225_v3, %v8954_v32  ;;  %v11159_v3 = vld [vmem:[#allocation3 + $0x158] sm:$0xf]  ;;  %v11773_v32 = vld [vmem:[#allocation3 + $0x158] sm:$0xf0]  ;;  %v2830_v62 = vsel %vm12823_vm14, %v2825_v12, %v2829_v40 }
 0x485   : > { %3799 = vrot.lane.b32.xlu0 %v3645_v47, %s12287_s11  ;;  %v11160_v51 = vor.u32 %v11774_v9, %v11159_v3  ;;  %v4010_v9 = vld [vmem:[#allocation2 + $0x12c] sm:$0xf]  ;;  %v2837_v3 = vshll.u32 %v2237_v13, 16 }
 0x486   : > { %4180 = vrot.lane.b32.xlu2 %v4009_v52, %s12288_s19  ;;  %v2845_v52 = vshll.u32 %v2238_v48, 16 }
 0x487   : > { %v9291_v39 = vpop.f32.mrf.mxu2  ;;  %3123 = vrot.lane.b32.xlu1 %v2816_v20, %s12286_s26  ;;  %v3772_v56 = vpop.permute.xlu0 %3771  ;;  %v15890_v20 = vld [vmem:[#allocation2 + $0x130] sm:$0xf] }
 0x488   : > { %v9292_v24 = vadd.f32 %v9291_v39, %v9123_v34  ;;  %v3774_v47 = vpop.permute.xlu2 %3773  ;;  %v15892_v34 = vpop.f32.mrf.mxu3  ;;  %v3648_v39 = vrot.slane %v15890_v20, 5  ;;  %v2847_v19 = vrot.slane %v2845_v52, 5 }
 0x489   : > { %v3096_v26 = vpop.permute.xlu1 %3095  ;;  %v8956_v31 = vpop.f32.mrf.mxu1  ;;  %v11151_v49 = vld [vmem:[#allocation3 + $0x150] sm:$0xf] }
 0x48a   : > { %v9435_v16 = vmax.f32 %v9292_v24, 0.0  ;;  %3257 = vst.msk [vmem:[#allocation3 + $0x174] sm:$0xf] %vm3225_vm15, %v3096_v26  ;;  %v11152_v61 = vor.u32 %v11773_v32, %v11151_v49  ;;  %v3642_v24 = vsel %vm12704_vm11, %v10907_v10, %v3641_v0  ;;  %v8957_v12 = vadd.f32 %v15643_v1, %v8956_v31  ;;  %v15918_v1 = vld [vmem:[%s16677_s7] ss:$0 sm:$0xff] }
 0x48b   : > { %3933 = vst.msk [vmem:[#allocation3 + $0x174] sm:$0xf] %vm3901_vm2, %v3772_v56  ;;  %v3361_v56 = vld [vmem:[#allocation2 + $0x134] sm:$0x1]  ;;  %v2844_v32 = vrot.slane %v2842_v57, 4  ;;  %v3650_v0 = vrot.slane %v3648_v39, 4 }
 0x48c   : > { %v9493_v23 = vpack.c.bf16 %v9435_v16, %v9434_v4  ;;  %11451 = vmatmul.msk.bf16.gmra.mxu2 %vm8820_vm5, %v11160_v51  ;;  %4318 = vst.msk [vmem:[#allocation3 + $0x174] sm:$0xf] %vm4286_vm4, %v4157_v11  ;;  %8995 = vmatmul.bf16.gmra.mxu1 %v11152_v61  ;;  %v2834_v11 = vor.u32 %v2833_v6, %v2829_v40  ;;  %v3651_v10 = vrot.slane %v3361_v56, 5  ;;  %v2239_v40 = vld [vmem:[#allocation2 + $0x13c] sm:$0xf]  ;;  %v2839_v51 = vrot.slane %v2837_v3, 5 }
 0x48d   : > { %3125 = vrot.lane.b32.xlu0 %v2830_v62, %s12286_s26  ;;  %v9126_v13 = vadd.f32 %v14250_v21, %v8957_v12  ;;  %v2851_v57 = vshll.u32 %v2239_v40, 16  ;;  %v2855_v52 = vshrl.u32 %v2239_v40, 16  ;;  %v4011_v3 = vld [vmem:[#allocation2 + $0x130] sm:$0xf]  ;;  %v2241_v40 = vld [vmem:[#allocation2 + $0x144] sm:$0xf] }
 0x48e   : > { %11658 = vmatmul.msk.bf16.gmra.mxu0 %vm8820_vm5, %v9493_v23  ;;  %3797 = vrot.lane.b32.xlu2 %v3642_v24, %s12287_s11  ;;  %v2835_v16 = vrot.slane %v2834_v11, 4  ;;  %v3359_v23 = vld [vmem:[#allocation2 + $0x12c] sm:$0xe]  ;;  %v3652_v62 = vsel %vm12704_vm11, %v3650_v0, %v3651_v10  ;;  %v2085_v21 = vld [vmem:[#allocation2 + $0x130] sm:$0xf] }
 0x48f   : > { %v9294_v26 = vpop.f32.mrf.mxu2  ;;  %4182 = vrot.lane.b32.xlu1 %v4010_v9, %s12288_s19  ;;  %v3098_v49 = vpop.permute.xlu0 %3097  ;;  %11620 = vmatmul.msk.bf16.gmra.mxu3 %vm661_vm0, %v11853_v5  ;;  %v2848_v5 = vor.u32 %v2847_v19, %v2844_v32  ;;  %v2084_v9 = vld [vmem:[#allocation2 + $0x12c] sm:$0xf]  ;;  %v10908_v12 = vrot.slane %v3359_v23, 9  ;;  %2149 = vst.msk [vmem:[#allocation3 + $0x234] sm:$0xf] %vm1055_vm1, %v2085_v21  ;;  %v2853_v32 = vrot.slane %v2851_v57, 5 }
 0x490   : > { %3258 = vst.msk [vmem:[#allocation3 + $0x180] sm:$0xf] %vm3225_vm15, %v3098_v49  ;;  %v4161_v6 = vpop.permute.xlu2 %4160  ;;  %v9295_v24 = vadd.f32 %v9294_v26, %v9126_v13  ;;  %v2840_v11 = vsel %vm12823_vm14, %v2835_v16, %v2839_v51  ;;  %v2857_v19 = vrot.slane %v2855_v52, 4  ;;  %v15936_v23 = vld [vmem:[#allocation2 + $0x13c] sm:$0xf]  ;;  %v11854_v52 = vld [vmem:[%s12476_s15 + $0x40] sm:$0xff] }
 0x491   : > { %v4155_v48 = vpop.permute.xlu1 %4154  ;;  %v8958_v4 = vpop.f32.mrf.mxu1  ;;  %3934 = vst.msk [vmem:[#allocation3 + $0x180] sm:$0xf] %vm3901_vm2, %v3774_v47  ;;  %v3649_v21 = vsel %vm12704_vm11, %v10908_v12, %v3648_v39 }
 0x492   : > { %4317 = vst.msk [vmem:[#allocation3 + $0x168] sm:$0xf] %vm4286_vm4, %v4155_v48  ;;  %v8959_v31 = vadd.f32 %v15918_v1, %v8958_v4  ;;  %v15922_v61 = vpop.f32.mrf.mxu3 }
 0x493   : > { %2148 = vst.msk [vmem:[#allocation3 + $0x228] sm:$0xf] %vm1055_vm1, %v2084_v9  ;;  %v11776_v10 = vld [vmem:[#allocation3 + $0x170] sm:$0xf0]  ;;  %v2866_v9 = vshrl.u32 %v2241_v40, 16 }
 0x494   : > { %v9128_v56 = vadd.f32 %v14277_v28, %v8959_v31  ;;  %v2849_v28 = vrot.slane %v2848_v5, 4  ;;  %v9436_v31 = vmax.f32 %v9295_v24, 0.0 }
 0x495   : > { %3803 = vrot.lane.b32.xlu0 %v3652_v62, %s12287_s11  ;;  %v2240_v62 = vld [vmem:[#allocation2 + $0x140] sm:$0x1] }
 0x496   : > { %4184 = vrot.lane.b32.xlu2 %v4011_v3, %s12288_s19  ;;  %v2854_v24 = vsel %vm12823_vm14, %v2849_v28, %v2853_v32  ;;  %v4012_v3 = vld [vmem:[#allocation2 + $0x138] sm:$0xf] }
 0x497   : > { %v9296_v47 = vpop.f32.mrf.mxu2  ;;  %3127 = vrot.lane.b32.xlu1 %v2840_v11, %s12286_s26  ;;  %v3776_v49 = vpop.permute.xlu0 %3775  ;;  %v3655_v11 = vrot.slane %v15936_v23, 5 }
 0x498   : > { %v9297_v26 = vadd.f32 %v9296_v47, %v9128_v56  ;;  %v3778_v51 = vpop.permute.xlu2 %3777  ;;  %v2869_v56 = vshll.u32 %v2241_v40, 16  ;;  %v2861_v47 = vshll.u32 %v2240_v62, 16 }
 0x499   : > { %v3100_v48 = vpop.permute.xlu1 %3099  ;;  %v8961_v4 = vpop.f32.mrf.mxu1  ;;  %v11163_v0 = vld [vmem:[#allocation3 + $0x168] sm:$0xf]  ;;  %v3657_v39 = vrot.slane %v3655_v11, 4 }
 0x49a   : > { %v9437_v16 = vmax.f32 %v9297_v26, 0.0  ;;  %3259 = vst.msk [vmem:[#allocation3 + $0x18c] sm:$0xf] %vm3225_vm15, %v3100_v48  ;;  %v11164_v13 = vor.u32 %v11776_v10, %v11163_v0  ;;  %v15939_v5 = vpop.f32.mrf.mxu3  ;;  %v3364_v26 = vld [vmem:[#allocation2 + $0x140] sm:$0x1]  ;;  %v8962_v28 = vadd.f32 %v15918_v1, %v8961_v4  ;;  %v2868_v0 = vrot.slane %v2866_v9, 4 }
 0x49b   : > { %3935 = vst.msk [vmem:[#allocation3 + $0x18c] sm:$0xf] %vm3901_vm2, %v3776_v49  ;;  %v2871_v20 = vrot.slane %v2869_v56, 5  ;;  %v3658_v12 = vrot.slane %v3364_v26, 5 }
 0x49c   : > { %v9494_v57 = vpack.c.bf16 %v9437_v16, %v9436_v31  ;;  %4320 = vst.msk [vmem:[#allocation3 + $0x18c] sm:$0xf] %vm4286_vm4, %v4161_v6  ;;  %9000 = vmatmul.bf16.gmra.mxu1 %v11164_v13  ;;  %v2858_v6 = vor.u32 %v2857_v19, %v2853_v32  ;;  %v2242_v32 = vld [vmem:[#allocation2 + $0x148] sm:$0xf]  ;;  %v2863_v16 = vrot.slane %v2861_v47, 5  ;;  %v9131_v62 = vadd.f32 %v14305_v25, %v8962_v28 }
 0x49d   : > { %3129 = vrot.lane.b32.xlu0 %v2854_v24, %s12286_s26  ;;  %v2875_v9 = vshll.u32 %v2242_v32, 16  ;;  %v2879_v56 = vshrl.u32 %v2242_v32, 16  ;;  %v3659_v24 = vsel %vm12704_vm11, %v3657_v39, %v3658_v12  ;;  %v4013_v47 = vld [vmem:[#allocation2 + $0x13c] sm:$0xf]  ;;  %v2244_v32 = vld [vmem:[#allocation2 + $0x150] sm:$0xf] }
 0x49e   : > { %11659 = vmatmul.msk.bf16.gmra.mxu0 %vm8820_vm5, %v9494_v57  ;;  %3801 = vrot.lane.b32.xlu2 %v3649_v21, %s12287_s11  ;;  %v2859_v4 = vrot.slane %v2858_v6, 4  ;;  %v3362_v57 = vld [vmem:[#allocation2 + $0x138] sm:$0xe]  ;;  %v2087_v25 = vld [vmem:[#allocation2 + $0x13c] sm:$0xf] }
 0x49f   : > { %v9299_v49 = vpop.f32.mrf.mxu2  ;;  %4186 = vrot.lane.b32.xlu1 %v4012_v3, %s12288_s19  ;;  %v3102_v48 = vpop.permute.xlu0 %3101  ;;  %11621 = vmatmul.msk.bf16.gmra.mxu3 %vm661_vm0, %v11854_v52  ;;  %v2872_v52 = vor.u32 %v2871_v20, %v2868_v0  ;;  %v2086_v3 = vld [vmem:[#allocation2 + $0x138] sm:$0xf]  ;;  %v10909_v28 = vrot.slane %v3362_v57, 9  ;;  %2151 = vst.msk [vmem:[#allocation3 + $0x24c] sm:$0xf] %vm1055_vm1, %v2087_v25  ;;  %v2877_v0 = vrot.slane %v2875_v9, 5 }
 0x4a0   : > { %3260 = vst.msk [vmem:[#allocation3 + $0x198] sm:$0xf] %vm3225_vm15, %v3102_v48  ;;  %v4165_v19 = vpop.permute.xlu2 %4164  ;;  %v9300_v21 = vadd.f32 %v9299_v49, %v9131_v62  ;;  %v2864_v6 = vsel %vm12823_vm14, %v2859_v4, %v2863_v16  ;;  %v2881_v20 = vrot.slane %v2879_v56, 4  ;;  %v15976_v57 = vld [vmem:[#allocation2 + $0x148] sm:$0xf]  ;;  %v11855_v56 = vld [vmem:[%s12476_s15 + $0x48] sm:$0xff] }
 0x4a1   : > { %v4159_v10 = vpop.permute.xlu1 %4158  ;;  %v8963_v40 = vpop.f32.mrf.mxu1  ;;  %3936 = vst.msk [vmem:[#allocation3 + $0x198] sm:$0xf] %vm3901_vm2, %v3778_v51  ;;  %v3656_v25 = vsel %vm12704_vm11, %v10909_v28, %v3655_v11 }
 0x4a2   : > { %4319 = vst.msk [vmem:[#allocation3 + $0x180] sm:$0xf] %vm4286_vm4, %v4159_v10  ;;  %v8964_v31 = vadd.f32 %v15918_v1, %v8963_v40  ;;  %v15962_v13 = vpop.f32.mrf.mxu3 }
 0x4a3   : > { %2150 = vst.msk [vmem:[#allocation3 + $0x240] sm:$0xf] %vm1055_vm1, %v2086_v3  ;;  %v11779_v12 = vld [vmem:[#allocation3 + $0x188] sm:$0xf0]  ;;  %v2890_v3 = vshrl.u32 %v2244_v32, 16 }
 0x4a4   : > { %v9133_v26 = vadd.f32 %v14327_v43, %v8964_v31  ;;  %v2873_v43 = vrot.slane %v2872_v52, 4  ;;  %v9438_v31 = vmax.f32 %v9300_v21, 0.0 }
 0x4a5   : > { %3807 = vrot.lane.b32.xlu0 %v3659_v24, %s12287_s11  ;;  %v2243_v24 = vld [vmem:[#allocation2 + $0x14c] sm:$0x1] }
 0x4a6   : > { %4188 = vrot.lane.b32.xlu2 %v4013_v47, %s12288_s19  ;;  %v2878_v21 = vsel %vm12823_vm14, %v2873_v43, %v2877_v0  ;;  %v4014_v47 = vld [vmem:[#allocation2 + $0x144] sm:$0xf] }
 0x4a7   : > { %v9301_v51 = vpop.f32.mrf.mxu2  ;;  %3131 = vrot.lane.b32.xlu1 %v2864_v6, %s12286_s26  ;;  %v3780_v48 = vpop.permute.xlu0 %3779  ;;  %v3662_v6 = vrot.slane %v15976_v57, 5 }
 0x4a8   : > { %v9302_v49 = vadd.f32 %v9301_v51, %v9133_v26  ;;  %v3782_v16 = vpop.permute.xlu2 %3781  ;;  %v2893_v26 = vshll.u32 %v2244_v32, 16  ;;  %v2885_v51 = vshll.u32 %v2243_v24, 16 }
 0x4a9   : > { %v3104_v10 = vpop.permute.xlu1 %3103  ;;  %v8966_v40 = vpop.f32.mrf.mxu1  ;;  %v11175_v39 = vld [vmem:[#allocation3 + $0x180] sm:$0xf]  ;;  %v3664_v11 = vrot.slane %v3662_v6, 4 }
 0x4aa   : > { %v9439_v4 = vmax.f32 %v9302_v49, 0.0  ;;  %3261 = vst.msk [vmem:[#allocation3 + $0x1a4] sm:$0xf] %vm3225_vm15, %v3104_v10  ;;  %v11176_v62 = vor.u32 %v11779_v12, %v11175_v39  ;;  %v15979_v52 = vpop.f32.mrf.mxu3  ;;  %v3367_v49 = vld [vmem:[#allocation2 + $0x14c] sm:$0x1]  ;;  %v8967_v43 = vadd.f32 %v15918_v1, %v8966_v40  ;;  %v2892_v39 = vrot.slane %v2890_v3, 4 }
 0x4ab   : > { %3937 = vst.msk [vmem:[#allocation3 + $0x1a4] sm:$0xf] %vm3901_vm2, %v3780_v48  ;;  %v2895_v23 = vrot.slane %v2893_v26, 5  ;;  %v3665_v28 = vrot.slane %v3367_v49, 5 }
 0x4ac   : > { %v9495_v9 = vpack.c.bf16 %v9439_v4, %v9438_v31  ;;  %4322 = vst.msk [vmem:[#allocation3 + $0x1a4] sm:$0xf] %vm4286_vm4, %v4165_v19  ;;  %9005 = vmatmul.bf16.gmra.mxu1 %v11176_v62  ;;  %v2882_v19 = vor.u32 %v2881_v20, %v2877_v0  ;;  %v2245_v0 = vld [vmem:[#allocation2 + $0x154] sm:$0xf]  ;;  %v2887_v4 = vrot.slane %v2885_v51, 5  ;;  %v9136_v24 = vadd.f32 %v14365_v29, %v8967_v43 }
 0x4ad   : > { %3133 = vrot.lane.b32.xlu0 %v2878_v21, %s12286_s26  ;;  %v2899_v3 = vshll.u32 %v2245_v0, 16  ;;  %v2903_v26 = vshrl.u32 %v2245_v0, 16  ;;  %v3666_v21 = vsel %vm12704_vm11, %v3664_v11, %v3665_v28  ;;  %v4015_v51 = vld [vmem:[#allocation2 + $0x148] sm:$0xf] }
 0x4ae   : > { %11660 = vmatmul.msk.bf16.gmra.mxu0 %vm8820_vm5, %v9495_v9  ;;  %3805 = vrot.lane.b32.xlu2 %v3656_v25, %s12287_s11  ;;  %v2883_v40 = vrot.slane %v2882_v19, 4  ;;  %v3365_v9 = vld [vmem:[#allocation2 + $0x144] sm:$0xe]  ;;  %v2089_v29 = vld [vmem:[#allocation2 + $0x148] sm:$0xf] }
 0x4af   : > { %v9304_v48 = vpop.f32.mrf.mxu2  ;;  %4190 = vrot.lane.b32.xlu1 %v4014_v47, %s12288_s19  ;;  %v3106_v10 = vpop.permute.xlu0 %3105  ;;  %11622 = vmatmul.msk.bf16.gmra.mxu3 %vm661_vm0, %v11855_v56  ;;  %v2896_v56 = vor.u32 %v2895_v23, %v2892_v39  ;;  %v2088_v47 = vld [vmem:[#allocation2 + $0x144] sm:$0xf]  ;;  %v10910_v43 = vrot.slane %v3365_v9, 9  ;;  %2153 = vst.msk [vmem:[#allocation3 + $0x264] sm:$0xf] %vm1055_vm1, %v2089_v29  ;;  %v2901_v39 = vrot.slane %v2899_v3, 5 }
 0x4b0   : > { %3262 = vst.msk [vmem:[#allocation3 + $0x1b0] sm:$0xf] %vm3225_vm15, %v3106_v10  ;;  %v4169_v20 = vpop.permute.xlu2 %4168  ;;  %v9305_v25 = vadd.f32 %v9304_v48, %v9136_v24  ;;  %v2888_v19 = vsel %vm12823_vm14, %v2883_v40, %v2887_v4  ;;  %v2246_v23 = vld [vmem:[#allocation2 + $0x158] sm:$0x1] }
 0x4b1   : > { %v4163_v12 = vpop.permute.xlu1 %4162  ;;  %v8968_v32 = vpop.f32.mrf.mxu1  ;;  %3938 = vst.msk [vmem:[#allocation3 + $0x1b0] sm:$0xf] %vm3901_vm2, %v3782_v16 }
 0x4b2   : > { %4321 = vst.msk [vmem:[#allocation3 + $0x198] sm:$0xf] %vm4286_vm4, %v4163_v12  ;;  %v8969_v31 = vadd.f32 %v15918_v1, %v8968_v32  ;;  %v16002_v62 = vpop.f32.mrf.mxu3  ;;  %v2905_v12 = vrot.slane %v2903_v26, 4  ;;  %v9440_v40 = vmax.f32 %v9305_v25, 0.0  ;;  %v11856_v25 = vld [vmem:[%s12476_s15 + $0x50] sm:$0xff] }
 0x4b3   : > { %2152 = vst.msk [vmem:[#allocation3 + $0x258] sm:$0xf] %vm1055_vm1, %v2088_v47  ;;  %v11782_v0 = vld [vmem:[#allocation3 + $0x1a0] sm:$0xf0] }
 0x4b4   : > { %v9138_v49 = vadd.f32 %v14401_v55, %v8969_v31  ;;  %v2897_v55 = vrot.slane %v2896_v56, 4  ;;  %v16015_v31 = vld [vmem:[#allocation2 + $0x154] sm:$0xf] }
 0x4b5   : > { %3811 = vrot.lane.b32.xlu0 %v3666_v21, %s12287_s11  ;;  %v2247_v21 = vld [vmem:[#allocation2 + $0x15c] sm:$0xf]  ;;  %v3669_v29 = vrot.slane %v16015_v31, 5  ;;  %v2251_v31 = vld [vmem:[#allocation2 + $0x16c] sm:$0xf] }
 0x4b6   : > { %4192 = vrot.lane.b32.xlu2 %v4015_v51, %s12288_s19  ;;  %v2902_v26 = vsel %vm12823_vm14, %v2897_v55, %v2901_v39  ;;  %v3370_v51 = vld [vmem:[#allocation2 + $0x158] sm:$0x1] }
 0x4b7   : > { %v9306_v16 = vpop.f32.mrf.mxu2  ;;  %3135 = vrot.lane.b32.xlu1 %v2888_v19, %s12286_s26  ;;  %v3784_v10 = vpop.permute.xlu0 %3783  ;;  %v2906_v19 = vor.u32 %v2905_v12, %v2901_v39 }
 0x4b8   : > { %v9307_v48 = vadd.f32 %v9306_v16, %v9138_v49  ;;  %v3786_v24 = vpop.permute.xlu2 %3785  ;;  %v2909_v49 = vshll.u32 %v2246_v23, 16  ;;  %v2914_v16 = vshrl.u32 %v2247_v21, 16  ;;  %v16039_v23 = vld [vmem:[%s16678_s8] ss:$0 sm:$0xff] }
 0x4b9   : > { %v3108_v32 = vpop.permute.xlu1 %3107  ;;  %v8971_v11 = vpop.f32.mrf.mxu1  ;;  %v11187_v28 = vld [vmem:[#allocation3 + $0x198] sm:$0xf] }
 0x4ba   : > { %v9441_v4 = vmax.f32 %v9307_v48, 0.0  ;;  %3263 = vst.msk [vmem:[#allocation3 + $0x1bc] sm:$0xf] %vm3225_vm15, %v3108_v32  ;;  %v11188_v9 = vor.u32 %v11782_v0, %v11187_v28  ;;  %v16019_v56 = vpop.f32.mrf.mxu3  ;;  %v2917_v48 = vshll.u32 %v2247_v21, 16  ;;  %v8972_v55 = vadd.f32 %v15918_v1, %v8971_v11 }
 0x4bb   : > { %v10162_v47 = vpop.f32.mrf.mxu0  ;;  %3939 = vst.msk [vmem:[#allocation3 + $0x1bc] sm:$0xf] %vm3901_vm2, %v3784_v10  ;;  %v4016_v10 = vld [vmem:[#allocation2 + $0x150] sm:$0xf]  ;;  %v2911_v12 = vrot.slane %v2909_v49, 5  ;;  %v3672_v28 = vrot.slane %v3370_v51, 5 }
 0x4bc   : > { %v9496_v3 = vpack.c.bf16 %v9441_v4, %v9440_v40  ;;  %4324 = vst.msk [vmem:[#allocation3 + $0x1bc] sm:$0xf] %vm4286_vm4, %v4169_v20  ;;  %9010 = vmatmul.bf16.gmra.mxu1 %v11188_v9  ;;  %v3663_v20 = vsel %vm12704_vm11, %v10910_v43, %v3662_v6  ;;  %v10163_v39 = vadd.f32 %v10162_v47, %v15962_v13  ;;  %v2248_v6 = vld [vmem:[#allocation2 + $0x160] sm:$0xf]  ;;  %v2907_v40 = vrot.slane %v2906_v19, 4 }
 0x4bd   : > { %3137 = vrot.lane.b32.xlu0 %v2902_v26, %s12286_s26  ;;  %v3671_v11 = vrot.slane %v3669_v29, 4  ;;  %v2916_v13 = vrot.slane %v2914_v16, 4  ;;  %v2919_v4 = vrot.slane %v2917_v48, 5  ;;  %v3368_v51 = vld [vmem:[#allocation2 + $0x150] sm:$0xe] }
 0x4be   : > { %11661 = vmatmul.msk.bf16.gmra.mxu0 %vm8820_vm5, %v9496_v3  ;;  %3809 = vrot.lane.b32.xlu2 %v3663_v20, %s12287_s11  ;;  %v2923_v3 = vshll.u32 %v2248_v6, 16  ;;  %v10326_v49 = vadd.f32 %v16039_v23, %v10163_v39  ;;  %v2912_v16 = vsel %vm12823_vm14, %v2907_v40, %v2911_v12  ;;  %v2927_v20 = vshrl.u32 %v2248_v6, 16  ;;  %v4017_v39 = vld [vmem:[#allocation2 + $0x154] sm:$0xf] }
 0x4bf   : > { %v9309_v32 = vpop.f32.mrf.mxu2  ;;  %4194 = vrot.lane.b32.xlu1 %v4016_v10, %s12288_s19  ;;  %v3110_v57 = vpop.permute.xlu0 %3109  ;;  %11623 = vmatmul.msk.bf16.gmra.mxu3 %vm661_vm0, %v11856_v25  ;;  %v9141_v25 = vadd.f32 %v14438_v18, %v8972_v55  ;;  %v3673_v48 = vsel %vm12704_vm11, %v3671_v11, %v3672_v28  ;;  %v2920_v10 = vor.u32 %v2919_v4, %v2916_v13  ;;  %v2091_v18 = vld [vmem:[#allocation2 + $0x154] sm:$0xf]  ;;  %v10911_v55 = vrot.slane %v3368_v51, 9  ;;  %v2250_v11 = vld [vmem:[#allocation2 + $0x168] sm:$0xf] }
 0x4c0   : > { %3264 = vst.msk [vmem:[#allocation3 + $0x1c8] sm:$0xf] %vm3225_vm15, %v3110_v57  ;;  %v4173_v9 = vpop.permute.xlu2 %4172  ;;  %v2090_v57 = vld [vmem:[#allocation2 + $0x150] sm:$0xf]  ;;  %v2925_v12 = vrot.slane %v2923_v3, 5 }
 0x4c1   : > { %v4167_v43 = vpop.permute.xlu1 %4166  ;;  %v8973_v0 = vpop.f32.mrf.mxu1  ;;  %3940 = vst.msk [vmem:[#allocation3 + $0x1c8] sm:$0xf] %vm3901_vm2, %v3786_v24  ;;  %v9310_v24 = vadd.f32 %v9309_v32, %v9141_v25  ;;  %v10390_v32 = vmax.f32 %v10326_v49, 0.0  ;;  %v2921_v25 = vrot.slane %v2920_v10, 4 }
 0x4c2   : > { %4323 = vst.msk [vmem:[#allocation3 + $0x1b0] sm:$0xf] %vm4286_vm4, %v4167_v43  ;;  %v8974_v21 = vadd.f32 %v15918_v1, %v8973_v0  ;;  %v16048_v26 = vpop.f32.mrf.mxu3 }
 0x4c3   : > { %v10164_v47 = vpop.f32.mrf.mxu0  ;;  %2154 = vst.msk [vmem:[#allocation3 + $0x270] sm:$0xf] %vm1055_vm1, %v2090_v57  ;;  %v16065_v57 = vld [vmem:[#allocation2 + $0x160] sm:$0xf] }
 0x4c4   : > { %v10165_v19 = vadd.f32 %v10164_v47, %v15979_v52  ;;  %v9143_v0 = vadd.f32 %v14464_v14, %v8974_v21  ;;  %2155 = vst.msk [vmem:[#allocation3 + $0x27c] sm:$0xf] %vm1055_vm1, %v2091_v18  ;;  %v2249_v14 = vld [vmem:[#allocation2 + $0x164] sm:$0x1]  ;;  %v11785_v47 = vld [vmem:[#allocation3 + $0x1b8] sm:$0xf0] }
 0x4c5   : > { %3815 = vrot.lane.b32.xlu0 %v3673_v48, %s12287_s11  ;;  %v2941_v18 = vshll.u32 %v2250_v11, 16 }
 0x4c6   : > { %v10327_v43 = vadd.f32 %v16039_v23, %v10165_v19  ;;  %4196 = vrot.lane.b32.xlu2 %v4017_v39, %s12288_s19  ;;  %v2929_v19 = vrot.slane %v2927_v20, 4  ;;  %v2938_v39 = vshrl.u32 %v2250_v11, 16  ;;  %v11857_v20 = vld [vmem:[%s12476_s15 + $0x58] sm:$0xff]  ;;  %v3373_v11 = vld [vmem:[#allocation2 + $0x164] sm:$0x1] }
 0x4c7   : > { %v9311_v52 = vpop.f32.mrf.mxu2  ;;  %3139 = vrot.lane.b32.xlu1 %v2912_v16, %s12286_s26  ;;  %v3788_v40 = vpop.permute.xlu0 %3787  ;;  %v9442_v16 = vmax.f32 %v9310_v24, 0.0  ;;  %v2926_v24 = vsel %vm12823_vm14, %v2921_v25, %v2925_v12 }
 0x4c8   : > { %v10391_v28 = vmax.f32 %v10327_v43, 0.0  ;;  %v9312_v6 = vadd.f32 %v9311_v52, %v9143_v0  ;;  %v3790_v3 = vpop.permute.xlu2 %3789  ;;  %v2930_v52 = vor.u32 %v2929_v19, %v2925_v12  ;;  %v2943_v12 = vrot.slane %v2941_v18, 5 }
 0x4c9   : > { %v3112_v13 = vpop.permute.xlu1 %3111  ;;  %v8976_v4 = vpop.f32.mrf.mxu1  ;;  %v11199_v21 = vld [vmem:[#allocation3 + $0x1b0] sm:$0xf] }
 0x4ca   : > { %v11886_v48 = vpack.c.bf16 %v10391_v28, %v10390_v32  ;;  %v9443_v51 = vmax.f32 %v9312_v6, 0.0  ;;  %3265 = vst.msk [vmem:[#allocation3 + $0x1d4] sm:$0xf] %vm3225_vm15, %v3112_v13  ;;  %v11200_v49 = vor.u32 %v11785_v47, %v11199_v21  ;;  %v16068_v0 = vpop.f32.mrf.mxu3  ;;  %v2933_v32 = vshll.u32 %v2249_v14, 16  ;;  %v4018_v6 = vld [vmem:[#allocation2 + $0x15c] sm:$0xf] }
 0x4cb   : > { %v10167_v43 = vpop.f32.mrf.mxu0  ;;  %3941 = vst.msk [vmem:[#allocation3 + $0x1d4] sm:$0xf] %vm3901_vm2, %v3788_v40  ;;  %v3676_v28 = vrot.slane %v16065_v57, 5  ;;  %v3670_v40 = vsel %vm12704_vm11, %v10911_v55, %v3669_v29  ;;  %v8977_v14 = vadd.f32 %v15918_v1, %v8976_v4  ;;  %v2931_v55 = vrot.slane %v2930_v52, 4  ;;  %v2254_v57 = vld [vmem:[#allocation2 + $0x178] sm:$0xf] }
 0x4cc   : > { %11887 = vst [vmem:[%s16071_s30] sm:$0xff] %v11886_v48   ;;  %v9497_v10 = vpack.c.bf16 %v9443_v51, %v9442_v16  ;;  %9015 = vmatmul.bf16.gmra.mxu1 %v11200_v49  ;;  %v10168_v21 = vadd.f32 %v10167_v43, %v16002_v62  ;;  %v2935_v19 = vrot.slane %v2933_v32, 5  ;;  %v3679_v48 = vrot.slane %v3373_v11, 5 }
 0x4cd   : > { %4326 = vst.msk [vmem:[#allocation3 + $0x1d4] sm:$0xf] %vm4286_vm4, %v4173_v9  ;;  %3141 = vrot.lane.b32.xlu0 %v2926_v24, %s12286_s26  ;;  %v2940_v9 = vrot.slane %v2938_v39, 4  ;;  %v3678_v16 = vrot.slane %v3676_v28, 4  ;;  %v2947_v43 = vshll.u32 %v2251_v31, 16  ;;  %v2951_v52 = vshrl.u32 %v2251_v31, 16 }
 0x4ce   : > { %11662 = vmatmul.msk.bf16.gmra.mxu0 %vm8820_vm5, %v9497_v10  ;;  %3813 = vrot.lane.b32.xlu2 %v3670_v40, %s12287_s11  ;;  %v10328_v18 = vadd.f32 %v16039_v23, %v10168_v21  ;;  %v9146_v10 = vadd.f32 %v14487_v53, %v8977_v14  ;;  %v3371_v24 = vld [vmem:[#allocation2 + $0x15c] sm:$0xe]  ;;  %v2936_v32 = vsel %vm12823_vm14, %v2931_v55, %v2935_v19  ;;  %v2093_v53 = vld [vmem:[#allocation2 + $0x160] sm:$0xf] }
 0x4cf   : > { %v9314_v13 = vpop.f32.mrf.mxu2  ;;  %4198 = vrot.lane.b32.xlu1 %v4018_v6, %s12288_s19  ;;  %v3114_v47 = vpop.permute.xlu0 %3113  ;;  %11624 = vmatmul.msk.bf16.gmra.mxu3 %vm661_vm0, %v11857_v20  ;;  %v2944_v49 = vor.u32 %v2943_v12, %v2940_v9  ;;  %v3680_v6 = vsel %vm12704_vm11, %v3678_v16, %v3679_v48  ;;  %v2092_v40 = vld [vmem:[#allocation2 + $0x15c] sm:$0xf]  ;;  %v4019_v12 = vld [vmem:[#allocation2 + $0x160] sm:$0xf]  ;;  %v10912_v14 = vrot.slane %v3371_v24, 9  ;;  %v2953_v55 = vrot.slane %v2951_v52, 4 }
 0x4d0   : > { %3266 = vst.msk [vmem:[#allocation3 + $0x1e0] sm:$0xf] %vm3225_vm15, %v3114_v47  ;;  %v4177_v51 = vpop.permute.xlu2 %4176  ;;  %v2949_v47 = vrot.slane %v2947_v43, 5  ;;  %v2253_v24 = vld [vmem:[#allocation2 + $0x174] sm:$0xf] }
 0x4d1   : > { %v4171_v25 = vpop.permute.xlu1 %4170  ;;  %v8978_v29 = vpop.f32.mrf.mxu1  ;;  %3942 = vst.msk [vmem:[#allocation3 + $0x1e0] sm:$0xf] %vm3901_vm2, %v3790_v3  ;;  %v9315_v3 = vadd.f32 %v9314_v13, %v9146_v10  ;;  %v2945_v21 = vrot.slane %v2944_v49, 4  ;;  %v10392_v13 = vmax.f32 %v10328_v18, 0.0 }
 0x4d2   : > { %4325 = vst.msk [vmem:[#allocation3 + $0x1c8] sm:$0xf] %vm4286_vm4, %v4171_v25  ;;  %v8979_v4 = vadd.f32 %v15918_v1, %v8978_v29  ;;  %v16096_v39 = vpop.f32.mrf.mxu3  ;;  %v2252_v29 = vld [vmem:[#allocation2 + $0x170] sm:$0x1] }
 0x4d3   : > { %v10169_v62 = vpop.f32.mrf.mxu0  ;;  %2156 = vst.msk [vmem:[#allocation3 + $0x288] sm:$0xf] %vm1055_vm1, %v2092_v40  ;;  %v9444_v10 = vmax.f32 %v9315_v3, 0.0  ;;  %v2950_v40 = vsel %vm12823_vm14, %v2945_v21, %v2949_v47  ;;  %v2957_v3 = vshll.u32 %v2252_v29, 16 }
 0x4d4   : > { %v10170_v20 = vadd.f32 %v10169_v62, %v16019_v56  ;;  %v9148_v9 = vadd.f32 %v14537_v60, %v8979_v4  ;;  %2157 = vst.msk [vmem:[#allocation3 + $0x294] sm:$0xf] %vm1055_vm1, %v2093_v53  ;;  %v11788_v4 = vld [vmem:[#allocation3 + $0x1d0] sm:$0xf0]  ;;  %v16112_v62 = vld [vmem:[#allocation2 + $0x16c] sm:$0xf] }
 0x4d5   : > { %3819 = vrot.lane.b32.xlu0 %v3680_v6, %s12287_s11  ;;  %v3683_v53 = vrot.slane %v16112_v62, 5  ;;  %v2959_v29 = vrot.slane %v2957_v3, 5  ;;  %v2257_v62 = vld [vmem:[#allocation2 + $0x184] sm:$0xf] }
 0x4d6   : > { %v10329_v11 = vadd.f32 %v16039_v23, %v10170_v20  ;;  %4200 = vrot.lane.b32.xlu2 %v4019_v12, %s12288_s19  ;;  %v2954_v12 = vor.u32 %v2953_v55, %v2949_v47 }
 0x4d7   : > { %v9316_v56 = vpop.f32.mrf.mxu2  ;;  %3143 = vrot.lane.b32.xlu1 %v2936_v32, %s12286_s26  ;;  %v3792_v60 = vpop.permute.xlu0 %3791 }
 0x4d8   : > { %v10393_v31 = vmax.f32 %v10329_v11, 0.0  ;;  %v9317_v25 = vadd.f32 %v9316_v56, %v9148_v9  ;;  %v3794_v43 = vpop.permute.xlu2 %3793  ;;  %v3376_v11 = vld [vmem:[#allocation2 + $0x170] sm:$0x1]  ;;  %v2962_v56 = vshrl.u32 %v2253_v24, 16 }
 0x4d9   : > { %v3116_v19 = vpop.permute.xlu1 %3115  ;;  %v8981_v16 = vpop.f32.mrf.mxu1  ;;  %v11211_v48 = vld [vmem:[#allocation3 + $0x1c8] sm:$0xf]  ;;  %v11858_v9 = vld [vmem:[%s12476_s15 + $0x60] sm:$0xff]  ;;  %v3686_v55 = vrot.slane %v3376_v11, 5 }
 0x4da   : > { %v11891_v20 = vpack.c.bf16 %v10393_v31, %v10392_v13  ;;  %v9445_v49 = vmax.f32 %v9317_v25, 0.0  ;;  %3267 = vst.msk [vmem:[#allocation3 + $0x1ec] sm:$0xf] %vm3225_vm15, %v3116_v19  ;;  %v11212_v18 = vor.u32 %v11788_v4, %v11211_v48  ;;  %v16116_v52 = vpop.f32.mrf.mxu3  ;;  %v2965_v13 = vshll.u32 %v2253_v24, 16  ;;  %v4020_v31 = vld [vmem:[#allocation2 + $0x168] sm:$0xf] }
 0x4db   : > { %v10172_v32 = vpop.f32.mrf.mxu0  ;;  %3943 = vst.msk [vmem:[#allocation3 + $0x1ec] sm:$0xf] %vm3901_vm2, %v3792_v60  ;;  %v3677_v25 = vsel %vm12704_vm11, %v10912_v14, %v3676_v28  ;;  %v2955_v28 = vrot.slane %v2954_v12, 4  ;;  %v3685_v14 = vrot.slane %v3683_v53, 4  ;;  %v2964_v4 = vrot.slane %v2962_v56, 4 }
 0x4dc   : > { %12043 = vst [vmem:[%s16071_s30 + $0x8] sm:$0xff] %v11891_v20   ;;  %v9498_v6 = vpack.c.bf16 %v9445_v49, %v9444_v10  ;;  %9020 = vmatmul.bf16.gmra.mxu1 %v11212_v18  ;;  %v10173_v47 = vadd.f32 %v10172_v32, %v16048_v26  ;;  %v2967_v10 = vrot.slane %v2965_v13, 5  ;;  %v2971_v49 = vshll.u32 %v2254_v57, 16  ;;  %v2094_v56 = vld [vmem:[#allocation2 + $0x168] sm:$0xf] }
 0x4dd   : > { %4328 = vst.msk [vmem:[#allocation3 + $0x1ec] sm:$0xf] %vm4286_vm4, %v4177_v51  ;;  %3145 = vrot.lane.b32.xlu0 %v2950_v40, %s12286_s26  ;;  %v8982_v51 = vadd.f32 %v15918_v1, %v8981_v16  ;;  %v3374_v40 = vld [vmem:[#allocation2 + $0x168] sm:$0xe]  ;;  %v2960_v3 = vsel %vm12823_vm14, %v2955_v28, %v2959_v29  ;;  %v3687_v11 = vsel %vm12704_vm11, %v3685_v14, %v3686_v55  ;;  %v2975_v12 = vshrl.u32 %v2254_v57, 16 }
 0x4de   : > { %11663 = vmatmul.msk.bf16.gmra.mxu0 %vm8820_vm5, %v9498_v6  ;;  %3817 = vrot.lane.b32.xlu2 %v3677_v25, %s12287_s11  ;;  %v10330_v24 = vadd.f32 %v16039_v23, %v10173_v47  ;;  %v4021_v25 = vld [vmem:[#allocation2 + $0x16c] sm:$0xf]  ;;  %2158 = vst.msk [vmem:[#allocation3 + $0x2a0] sm:$0xf] %vm1055_vm1, %v2094_v56  ;;  %v2973_v47 = vrot.slane %v2971_v49, 5 }
 0x4df   : > { %v9319_v21 = vpop.f32.mrf.mxu2  ;;  %4202 = vrot.lane.b32.xlu1 %v4020_v31, %s12288_s19  ;;  %v3118_v60 = vpop.permute.xlu0 %3117  ;;  %11625 = vmatmul.msk.bf16.gmra.mxu3 %vm661_vm0, %v11858_v9  ;;  %v9151_v32 = vadd.f32 %v14573_v58, %v8982_v51  ;;  %v2968_v9 = vor.u32 %v2967_v10, %v2964_v4  ;;  %v2095_v58 = vld [vmem:[#allocation2 + $0x16c] sm:$0xf]  ;;  %v10913_v51 = vrot.slane %v3374_v40, 9  ;;  %v2256_v57 = vld [vmem:[#allocation2 + $0x180] sm:$0xf]  ;;  %v2977_v10 = vrot.slane %v2975_v12, 4 }
 0x4e0   : > { %3268 = vst.msk [vmem:[#allocation3 + $0x1f8] sm:$0xf] %vm3225_vm15, %v3118_v60  ;;  %v4181_v16 = vpop.permute.xlu2 %4180  ;;  %v2989_v56 = vshll.u32 %v2256_v57, 16  ;;  %v11859_v12 = vld [vmem:[%s12476_s15 + $0x68] sm:$0xff] }
 0x4e1   : > { %v4175_v19 = vpop.permute.xlu1 %4174  ;;  %v8983_v48 = vpop.f32.mrf.mxu1  ;;  %3944 = vst.msk [vmem:[#allocation3 + $0x1f8] sm:$0xf] %vm3901_vm2, %v3794_v43  ;;  %v9320_v43 = vadd.f32 %v9319_v21, %v9151_v32  ;;  %v10394_v21 = vmax.f32 %v10330_v24, 0.0  ;;  %v2969_v4 = vrot.slane %v2968_v9, 4 }
 0x4e2   : > { %4327 = vst.msk [vmem:[#allocation3 + $0x1e0] sm:$0xf] %vm4286_vm4, %v4175_v19  ;;  %v8984_v26 = vadd.f32 %v15918_v1, %v8983_v48  ;;  %v16141_v18 = vpop.f32.mrf.mxu3 }
 0x4e3   : > { %v10174_v20 = vpop.f32.mrf.mxu0  ;;  %2159 = vst.msk [vmem:[#allocation3 + $0x2ac] sm:$0xf] %vm1055_vm1, %v2095_v58  ;;  %v4022_v58 = vld [vmem:[#allocation2 + $0x174] sm:$0xf] }
 0x4e4   : > { %v10175_v6 = vadd.f32 %v10174_v20, %v16068_v0  ;;  %v9153_v31 = vadd.f32 %v14604_v7, %v8984_v26  ;;  %v2255_v7 = vld [vmem:[#allocation2 + $0x17c] sm:$0x1]  ;;  %v9446_v26 = vmax.f32 %v9320_v43, 0.0  ;;  %v2974_v43 = vsel %vm12823_vm14, %v2969_v4, %v2973_v47 }
 0x4e5   : > { %3823 = vrot.lane.b32.xlu0 %v3687_v11, %s12287_s11  ;;  %v11791_v14 = vld [vmem:[#allocation3 + $0x1e8] sm:$0xf0]  ;;  %v2986_v11 = vshrl.u32 %v2256_v57, 16 }
 0x4e6   : > { %v10331_v13 = vadd.f32 %v16039_v23, %v10175_v6  ;;  %4204 = vrot.lane.b32.xlu2 %v4021_v25, %s12288_s19  ;;  %v16158_v6 = vld [vmem:[#allocation2 + $0x178] sm:$0xf] }
 0x4e7   : > { %v9321_v0 = vpop.f32.mrf.mxu2  ;;  %3147 = vrot.lane.b32.xlu1 %v2960_v3, %s12286_s26  ;;  %v3796_v55 = vpop.permute.xlu0 %3795  ;;  %v3690_v25 = vrot.slane %v16158_v6, 5 }
 0x4e8   : > { %v10395_v60 = vmax.f32 %v10331_v13, 0.0  ;;  %v9322_v29 = vadd.f32 %v9321_v0, %v9153_v31  ;;  %v3798_v49 = vpop.permute.xlu2 %3797  ;;  %v2978_v13 = vor.u32 %v2977_v10, %v2973_v47  ;;  %v2981_v31 = vshll.u32 %v2255_v7, 16 }
 0x4e9   : > { %v3120_v19 = vpop.permute.xlu1 %3119  ;;  %v8986_v48 = vpop.f32.mrf.mxu1  ;;  %v11223_v28 = vld [vmem:[#allocation3 + $0x1e0] sm:$0xf]  ;;  %v3684_v0 = vsel %vm12704_vm11, %v10913_v51, %v3683_v53  ;;  %v2991_v47 = vrot.slane %v2989_v56, 5  ;;  %v2999_v56 = vshrl.u32 %v2257_v62, 16 }
 0x4ea   : > { %v11896_v20 = vpack.c.bf16 %v10395_v60, %v10394_v21  ;;  %v9447_v32 = vmax.f32 %v9322_v29, 0.0  ;;  %3269 = vst.msk [vmem:[#allocation3 + $0x204] sm:$0xf] %vm3225_vm15, %v3120_v19  ;;  %v11224_v24 = vor.u32 %v11791_v14, %v11223_v28  ;;  %v16161_v3 = vpop.f32.mrf.mxu3  ;;  %v3379_v21 = vld [vmem:[#allocation2 + $0x17c] sm:$0x1]  ;;  %v8987_v29 = vadd.f32 %v15918_v1, %v8986_v48 }
 0x4eb   : > { %v10177_v40 = vpop.f32.mrf.mxu0  ;;  %3945 = vst.msk [vmem:[#allocation3 + $0x204] sm:$0xf] %vm3901_vm2, %v3796_v55  ;;  %v2979_v51 = vrot.slane %v2978_v13, 4  ;;  %v2983_v19 = vrot.slane %v2981_v31, 5  ;;  %v3692_v28 = vrot.slane %v3690_v25, 4  ;;  %v3693_v14 = vrot.slane %v3379_v21, 5 }
 0x4ec   : > { %12044 = vst [vmem:[%s16071_s30 + $0x10] sm:$0xff] %v11896_v20   ;;  %v9499_v9 = vpack.c.bf16 %v9447_v32, %v9446_v26  ;;  %9025 = vmatmul.bf16.gmra.mxu1 %v11224_v24  ;;  %v10178_v55 = vadd.f32 %v10177_v40, %v16096_v39  ;;  %v2995_v26 = vshll.u32 %v2257_v62, 16  ;;  %v9156_v24 = vadd.f32 %v14651_v37, %v8987_v29  ;;  %v4023_v31 = vld [vmem:[#allocation2 + $0x178] sm:$0xf] }
 0x4ed   : > { %4330 = vst.msk [vmem:[#allocation3 + $0x204] sm:$0xf] %vm4286_vm4, %v4181_v16  ;;  %3149 = vrot.lane.b32.xlu0 %v2974_v43, %s12286_s26  ;;  %v2988_v16 = vrot.slane %v2986_v11, 4  ;;  %v3377_v11 = vld [vmem:[#allocation2 + $0x174] sm:$0xe]  ;;  %v3001_v29 = vrot.slane %v2999_v56, 4 }
 0x4ee   : > { %11664 = vmatmul.msk.bf16.gmra.mxu0 %vm8820_vm5, %v9499_v9  ;;  %3821 = vrot.lane.b32.xlu2 %v3684_v0, %s12287_s11  ;;  %v10332_v32 = vadd.f32 %v16039_v23, %v10178_v55  ;;  %v2984_v9 = vsel %vm12823_vm14, %v2979_v51, %v2983_v19  ;;  %v2097_v37 = vld [vmem:[#allocation2 + $0x178] sm:$0xf]  ;;  %v2997_v21 = vrot.slane %v2995_v26, 5  ;;  %v2258_v26 = vld [vmem:[#allocation2 + $0x188] sm:$0x1] }
 0x4ef   : > { %v9324_v60 = vpop.f32.mrf.mxu2  ;;  %4206 = vrot.lane.b32.xlu1 %v4022_v58, %s12288_s19  ;;  %v3122_v7 = vpop.permute.xlu0 %3121  ;;  %11626 = vmatmul.msk.bf16.gmra.mxu3 %vm661_vm0, %v11859_v12  ;;  %v2992_v10 = vor.u32 %v2991_v47, %v2988_v16  ;;  %v2096_v12 = vld [vmem:[#allocation2 + $0x174] sm:$0xf]  ;;  %v10914_v58 = vrot.slane %v3377_v11, 9  ;;  %2161 = vst.msk [vmem:[#allocation3 + $0x2c4] sm:$0xf] %vm1055_vm1, %v2097_v37  ;;  %v11860_v11 = vld [vmem:[%s12476_s15 + $0x70] sm:$0xff] }
 0x4f0   : > { %3270 = vst.msk [vmem:[#allocation3 + $0x210] sm:$0xf] %vm3225_vm15, %v3122_v7  ;;  %v4185_v4 = vpop.permute.xlu2 %4184 }
 0x4f1   : > { %v4179_v57 = vpop.permute.xlu1 %4178  ;;  %v8988_v53 = vpop.f32.mrf.mxu1  ;;  %3946 = vst.msk [vmem:[#allocation3 + $0x210] sm:$0xf] %vm3901_vm2, %v3798_v49  ;;  %v9325_v49 = vadd.f32 %v9324_v60, %v9156_v24  ;;  %v2993_v0 = vrot.slane %v2992_v10, 4  ;;  %v10396_v60 = vmax.f32 %v10332_v32, 0.0 }
 0x4f2   : > { %4329 = vst.msk [vmem:[#allocation3 + $0x1f8] sm:$0xf] %vm4286_vm4, %v4179_v57  ;;  %v8989_v48 = vadd.f32 %v15918_v1, %v8988_v53  ;;  %v16186_v20 = vpop.f32.mrf.mxu3  ;;  %v3694_v1 = vsel %vm12704_vm11, %v3692_v28, %v3693_v14  ;;  %v16202_v53 = vld [vmem:[#allocation2 + $0x184] sm:$0xf] }
 0x4f3   : > { %v10179_v39 = vpop.f32.mrf.mxu0  ;;  %2160 = vst.msk [vmem:[#allocation3 + $0x2b8] sm:$0xf] %vm1055_vm1, %v2096_v12  ;;  %v9448_v51 = vmax.f32 %v9325_v49, 0.0  ;;  %v2998_v56 = vsel %vm12823_vm14, %v2993_v0, %v2997_v21  ;;  %v4024_v49 = vld [vmem:[#allocation2 + $0x180] sm:$0xf] }
 0x4f4   : > { %v10180_v40 = vadd.f32 %v10179_v39, %v16116_v52  ;;  %v9158_v13 = vadd.f32 %v14683_v50, %v8989_v48  ;;  %v11794_v57 = vld [vmem:[#allocation3 + $0x200] sm:$0xf0]  ;;  %v2259_v39 = vld [vmem:[#allocation2 + $0x18c] sm:$0xf] }
 0x4f5   : > { %3827 = vrot.lane.b32.xlu0 %v3694_v1, %s12287_s11  ;;  %v3010_v1 = vshrl.u32 %v2259_v39, 16  ;;  %v3013_v12 = vshll.u32 %v2259_v39, 16 }
 0x4f6   : > { %v10333_v43 = vadd.f32 %v16039_v23, %v10180_v40  ;;  %4208 = vrot.lane.b32.xlu2 %v4023_v31, %s12288_s19  ;;  %v3697_v40 = vrot.slane %v16202_v53, 5  ;;  %v3005_v31 = vshll.u32 %v2258_v26, 16  ;;  %v2099_v26 = vld [vmem:[#allocation2 + $0x184] sm:$0xf] }
 0x4f7   : > { %v9326_v52 = vpop.f32.mrf.mxu2  ;;  %3151 = vrot.lane.b32.xlu1 %v2984_v9, %s12286_s26  ;;  %v3800_v50 = vpop.permute.xlu0 %3799  ;;  %v3382_v9 = vld [vmem:[#allocation2 + $0x188] sm:$0x1]  ;;  %2163 = vst.msk [vmem:[#allocation3 + $0x2dc] sm:$0xf] %vm1055_vm1, %v2099_v26 }
 0x4f8   : > { %v10397_v16 = vmax.f32 %v10333_v43, 0.0  ;;  %v9327_v47 = vadd.f32 %v9326_v52, %v9158_v13  ;;  %v3802_v14 = vpop.permute.xlu2 %3801  ;;  %v3691_v43 = vsel %vm12704_vm11, %v10914_v58, %v3690_v25  ;;  %v3002_v13 = vor.u32 %v3001_v29, %v2997_v21 }
 0x4f9   : > { %v3124_v55 = vpop.permute.xlu1 %3123  ;;  %v8991_v7 = vpop.f32.mrf.mxu1  ;;  %v11235_v62 = vld [vmem:[#allocation3 + $0x1f8] sm:$0xf]  ;;  %v3699_v25 = vrot.slane %v3697_v40, 4  ;;  %v3700_v58 = vrot.slane %v3382_v9, 5 }
 0x4fa   : > { %v11901_v19 = vpack.c.bf16 %v10397_v16, %v10396_v60  ;;  %v9449_v28 = vmax.f32 %v9327_v47, 0.0  ;;  %3271 = vst.msk [vmem:[#allocation3 + $0x21c] sm:$0xf] %vm3225_vm15, %v3124_v55  ;;  %v11236_v48 = vor.u32 %v11794_v57, %v11235_v62  ;;  %v16206_v32 = vpop.f32.mrf.mxu3  ;;  %v2260_v16 = vld [vmem:[#allocation2 + $0x190] sm:$0xf]  ;;  %v3012_v47 = vrot.slane %v3010_v1, 4 }
 0x4fb   : > { %v10182_v10 = vpop.f32.mrf.mxu0  ;;  %3947 = vst.msk [vmem:[#allocation3 + $0x21c] sm:$0xf] %vm3901_vm2, %v3800_v50  ;;  %v3015_v50 = vrot.slane %v3013_v12, 5  ;;  %v3380_v57 = vld [vmem:[#allocation2 + $0x180] sm:$0xe] }
 0x4fc   : > { %12045 = vst [vmem:[%s16071_s30 + $0x18] sm:$0xff] %v11901_v19   ;;  %v9500_v24 = vpack.c.bf16 %v9449_v28, %v9448_v51  ;;  %9030 = vmatmul.bf16.gmra.mxu1 %v11236_v48  ;;  %v10183_v6 = vadd.f32 %v10182_v10, %v16141_v18  ;;  %v3003_v18 = vrot.slane %v3002_v13, 4  ;;  %v2098_v19 = vld [vmem:[#allocation2 + $0x180] sm:$0xf]  ;;  %v3019_v10 = vshll.u32 %v2260_v16, 16 }
 0x4fd   : > { %4332 = vst.msk [vmem:[#allocation3 + $0x21c] sm:$0xf] %vm4286_vm4, %v4185_v4  ;;  %3153 = vrot.lane.b32.xlu0 %v2998_v56, %s12286_s26  ;;  %v16225_v4 = vld [vmem:[%s16677_s7] ss:$0 sm:$0xff]  ;;  %v3023_v56 = vshrl.u32 %v2260_v16, 16 }
 0x4fe   : > { %11665 = vmatmul.msk.bf16.gmra.mxu0 %vm8820_vm5, %v9500_v24  ;;  %3825 = vrot.lane.b32.xlu2 %v3691_v43, %s12287_s11  ;;  %v8992_v52 = vadd.f32 %v16225_v4, %v8991_v7  ;;  %v3007_v7 = vrot.slane %v3005_v31, 5  ;;  %v10334_v28 = vadd.f32 %v16039_v23, %v10183_v6  ;;  %2162 = vst.msk [vmem:[#allocation3 + $0x2d0] sm:$0xf] %vm1055_vm1, %v2098_v19 }
 0x4ff   : > { %v9329_v37 = vpop.f32.mrf.mxu2  ;;  %4210 = vrot.lane.b32.xlu1 %v4024_v49, %s12288_s19  ;;  %v3126_v0 = vpop.permute.xlu0 %3125  ;;  %11627 = vmatmul.msk.bf16.gmra.mxu3 %vm661_vm0, %v11860_v11  ;;  %v3701_v24 = vsel %vm12704_vm11, %v3699_v25, %v3700_v58  ;;  %v3016_v11 = vor.u32 %v3015_v50, %v3012_v47  ;;  %v10915_v49 = vrot.slane %v3380_v57, 9 }
 0x500   : > { %3272 = vst.msk [vmem:[#allocation3 + $0x228] sm:$0xf] %vm3225_vm15, %v3126_v0  ;;  %v4189_v29 = vpop.permute.xlu2 %4188  ;;  %v9161_v48 = vadd.f32 %v14720_v30, %v8992_v52  ;;  %v3008_v30 = vsel %vm12823_vm14, %v3003_v18, %v3007_v7  ;;  %v10398_v43 = vmax.f32 %v10334_v28, 0.0  ;;  %v3021_v52 = vrot.slane %v3019_v10, 5  ;;  %v16253_v18 = vld [vmem:[#allocation2 + $0x190] sm:$0xf] }
 0x501   : > { %v4183_v21 = vpop.permute.xlu1 %4182  ;;  %v8993_v60 = vpop.f32.mrf.mxu1  ;;  %3948 = vst.msk [vmem:[#allocation3 + $0x228] sm:$0xf] %vm3901_vm2, %v3802_v14  ;;  %v3017_v58 = vrot.slane %v3016_v11, 4  ;;  %v11861_v28 = vld [vmem:[%s12476_s15 + $0x78] sm:$0xff]  ;;  %v3698_v26 = vsel %vm12704_vm11, %v10915_v49, %v3697_v40 }
 0x502   : > { %4331 = vst.msk [vmem:[#allocation3 + $0x210] sm:$0xf] %vm4286_vm4, %v4183_v21  ;;  %v8994_v55 = vadd.f32 %v16225_v4, %v8993_v60  ;;  %v16236_v51 = vpop.f32.mrf.mxu3  ;;  %v9330_v14 = vadd.f32 %v9329_v37, %v9161_v48  ;;  %v3025_v21 = vrot.slane %v3023_v56, 4  ;;  %v4026_v10 = vld [vmem:[#allocation2 + $0x18c] sm:$0xf] }
 0x503   : > { %v10184_v62 = vpop.f32.mrf.mxu0  ;;  %v3022_v48 = vsel %vm12823_vm14, %v3017_v58, %v3021_v52  ;;  %v3385_v56 = vld [vmem:[#allocation2 + $0x194] sm:$0x1] }
 0x504   : > { %v10185_v39 = vadd.f32 %v10184_v62, %v16161_v3  ;;  %v9163_v1 = vadd.f32 %v14750_v41, %v8994_v55  ;;  %v4025_v3 = vld [vmem:[#allocation2 + $0x184] sm:$0xf]  ;;  %v11797_v25 = vld [vmem:[#allocation3 + $0x218] sm:$0xf0]  ;;  %v9450_v60 = vmax.f32 %v9330_v14, 0.0 }
 0x505   : > { %3831 = vrot.lane.b32.xlu0 %v3701_v24, %s12287_s11  ;;  %v2261_v62 = vld [vmem:[#allocation2 + $0x194] sm:$0x1]  ;;  %v3026_v24 = vor.u32 %v3025_v21, %v3021_v52  ;;  %v2101_v52 = vld [vmem:[#allocation2 + $0x190] sm:$0xf] }
 0x506   : > { %v10335_v9 = vadd.f32 %v16039_v23, %v10185_v39  ;;  %4212 = vrot.lane.b32.xlu2 %v4025_v3, %s12288_s19  ;;  %v3704_v39 = vrot.slane %v16253_v18, 5  ;;  %v3029_v11 = vshll.u32 %v2261_v62, 16  ;;  %v3707_v3 = vrot.slane %v3385_v56, 5  ;;  %2165 = vst.msk [vmem:[#allocation3 + $0x2f4] sm:$0xf] %vm1055_vm1, %v2101_v52 }
 0x507   : > { %v9331_v12 = vpop.f32.mrf.mxu2  ;;  %3155 = vrot.lane.b32.xlu1 %v3008_v30, %s12286_s26  ;;  %v3804_v37 = vpop.permute.xlu0 %3803 }
 0x508   : > { %v10399_v13 = vmax.f32 %v10335_v9, 0.0  ;;  %v9332_v31 = vadd.f32 %v9331_v12, %v9163_v1  ;;  %v3806_v50 = vpop.permute.xlu2 %3805  ;;  %v3706_v40 = vrot.slane %v3704_v39, 4 }
 0x509   : > { %v3128_v6 = vpop.permute.xlu1 %3127  ;;  %v8996_v0 = vpop.f32.mrf.mxu1  ;;  %v11247_v41 = vld [vmem:[#allocation3 + $0x210] sm:$0xf] }
 0x50a   : > { %v11906_v16 = vpack.c.bf16 %v10399_v13, %v10398_v43  ;;  %v9451_v47 = vmax.f32 %v9332_v31, 0.0  ;;  %3273 = vst.msk [vmem:[#allocation3 + $0x234] sm:$0xf] %vm3225_vm15, %v3128_v6  ;;  %v11248_v55 = vor.u32 %v11797_v25, %v11247_v41  ;;  %v16256_v57 = vpop.f32.mrf.mxu3  ;;  %v3027_v43 = vrot.slane %v3026_v24, 4  ;;  %v2100_v31 = vld [vmem:[#allocation2 + $0x18c] sm:$0xf] }
 0x50b   : > { %v10187_v7 = vpop.f32.mrf.mxu0  ;;  %3949 = vst.msk [vmem:[#allocation3 + $0x234] sm:$0xf] %vm3901_vm2, %v3804_v37  ;;  %v3031_v13 = vrot.slane %v3029_v11, 5  ;;  %v3708_v58 = vsel %vm12704_vm11, %v3706_v40, %v3707_v3  ;;  %v11862_v3 = vld [vmem:[%s12476_s15 + $0x80] sm:$0xff] }
 0x50c   : > { %12046 = vst [vmem:[%s16071_s30 + $0x20] sm:$0xff] %v11906_v16   ;;  %v9501_v19 = vpack.c.bf16 %v9451_v47, %v9450_v60  ;;  %9035 = vmatmul.bf16.gmra.mxu1 %v11248_v55  ;;  %v10188_v9 = vadd.f32 %v10187_v7, %v16186_v20  ;;  %v16798_v16 = vld [vmem:[#allocation27_spill] sm:$0xff]  ;;  %v3383_v7 = vld [vmem:[#allocation2 + $0x18c] sm:$0xe] }
 0x50d   : > { %4334 = vst.msk [vmem:[#allocation3 + $0x234] sm:$0xf] %vm4286_vm4, %v4189_v29  ;;  %3157 = vrot.lane.b32.xlu0 %v3022_v48, %s12286_s26  ;;  %v8997_v29 = vadd.f32 %v16225_v4, %v8996_v0  ;;  %v16797_v0 = vld [vmem:[#allocation25_spill] sm:$0xff]  ;;  %v4027_v55 = vld [vmem:[#allocation2 + $0x190] sm:$0xf]  ;;  %v10916_v11 = vrot.slane %v3383_v7, 9 }
 0x50e   : > { %11666 = vmatmul.msk.bf16.gmra.mxu0 %vm8820_vm5, %v9501_v19  ;;  %3829 = vrot.lane.b32.xlu2 %v3698_v26, %s12287_s11  ;;  %v10336_v6 = vadd.f32 %v16039_v23, %v10188_v9  ;;  %2164 = vst.msk [vmem:[#allocation3 + $0x2e8] sm:$0xf] %vm1055_vm1, %v2100_v31 }
 0x50f   : > { %v9334_v14 = vpop.f32.mrf.mxu2  ;;  %4214 = vrot.lane.b32.xlu1 %v4026_v10, %s12288_s19  ;;  %v3130_v1 = vpop.permute.xlu0 %3129  ;;  %11628 = vmatmul.msk.bf16.gmra.mxu3 %vm661_vm0, %v11861_v28  ;;  %v9166_v41 = vadd.f32 %v16797_v0, %v8997_v29 }
 0x510   : > { %3274 = vst.msk [vmem:[#allocation3 + $0x240] sm:$0xf] %vm3225_vm15, %v3130_v1  ;;  %v4193_v12 = vpop.permute.xlu2 %4192  ;;  %v10400_v62 = vmax.f32 %v10336_v6, 0.0  ;;  %v16799_v6 = vld [vmem:[#allocation29_spill] sm:$0xff] }
 0x511   : > { %v4187_v53 = vpop.permute.xlu1 %4186  ;;  %v8998_v30 = vpop.f32.mrf.mxu1  ;;  %3950 = vst.msk [vmem:[#allocation3 + $0x240] sm:$0xf] %vm3901_vm2, %v3806_v50  ;;  %v9335_v21 = vadd.f32 %v9334_v14, %v9166_v41  ;;  %v3032_v50 = vsel %vm12823_vm14, %v3027_v43, %v3031_v13  ;;  %v4028_v43 = vld [vmem:[#allocation2 + $0x198] sm:$0xf]  ;;  %v3705_v13 = vsel %vm12704_vm11, %v10916_v11, %v3704_v39 }
 0x512   : > { %4333 = vst.msk [vmem:[#allocation3 + $0x228] sm:$0xf] %vm4286_vm4, %v4187_v53  ;;  %v8999_v49 = vadd.f32 %v16225_v4, %v8998_v30  ;;  %v16281_v37 = vpop.f32.mrf.mxu3 }
 0x513   : > { %v10189_v20 = vpop.f32.mrf.mxu0  ;;  %v9452_v56 = vmax.f32 %v9335_v21, 0.0  ;;  %v16800_v21 = vld [vmem:[#allocation19_spill] sm:$0xff] }
 0x514   : > { %v10190_v25 = vadd.f32 %v10189_v20, %v16206_v32  ;;  %v9168_v47 = vadd.f32 %v16798_v16, %v8999_v49  ;;  %v11800_v54 = vld [vmem:[#allocation3 + $0x230] sm:$0xf0]  ;;  %v16801_v16 = vld [vmem:[#allocation20_spill] sm:$0xff] }
 0x515   : > { %3835 = vrot.lane.b32.xlu0 %v3708_v58, %s12287_s11 }
 0x516   : > { %v10337_v60 = vadd.f32 %v16039_v23, %v10190_v25  ;;  %4216 = vrot.lane.b32.xlu2 %v4027_v55, %s12288_s19  ;;  %v4029_v55 = vld [vmem:[#allocation2 + $0x19c] sm:$0xf] }
 0x517   : > { %v9336_v32 = vpop.f32.mrf.mxu2  ;;  %3159 = vrot.lane.b32.xlu1 %v3032_v50, %s12286_s26  ;;  %v3808_v48 = vpop.permute.xlu0 %3807 }
 0x518   : > { %v10401_v19 = vmax.f32 %v10337_v60, 0.0  ;;  %v9337_v28 = vadd.f32 %v9336_v32, %v9168_v47  ;;  %v3810_v9 = vpop.permute.xlu2 %3809 }
 0x519   : > { %v3132_v10 = vpop.permute.xlu1 %3131  ;;  %v9001_v26 = vpop.f32.mrf.mxu1  ;;  %v11259_v24 = vld [vmem:[#allocation3 + $0x228] sm:$0xf] }
 0x51a   : > { %v11911_v14 = vpack.c.bf16 %v10401_v19, %v10400_v62  ;;  %v9453_v29 = vmax.f32 %v9337_v28, 0.0  ;;  %3275 = vst.msk [vmem:[#allocation3 + $0x24c] sm:$0xf] %vm3225_vm15, %v3132_v10  ;;  %v11260_v1 = vor.u32 %v11800_v54, %v11259_v24  ;;  %v16299_v30 = vpop.f32.mrf.mxu3  ;;  %v9002_v49 = vadd.f32 %v16225_v4, %v9001_v26 }
 0x51b   : > { %v10192_v53 = vpop.f32.mrf.mxu0  ;;  %3951 = vst.msk [vmem:[#allocation3 + $0x24c] sm:$0xf] %vm3901_vm2, %v3808_v48 }
 0x51c   : > { %12047 = vst [vmem:[%s16071_s30 + $0x28] sm:$0xff] %v11911_v14   ;;  %v9502_v40 = vpack.c.bf16 %v9453_v29, %v9452_v56  ;;  %9040 = vmatmul.bf16.gmra.mxu1 %v11260_v1  ;;  %v10193_v31 = vadd.f32 %v10192_v53, %v16236_v51  ;;  %v9171_v0 = vadd.f32 %v16799_v6, %v9002_v49  ;;  %v11863_v14 = vld [vmem:[%s12476_s15 + $0x88] sm:$0xff] }
 0x51d   : > { %4336 = vst.msk [vmem:[#allocation3 + $0x24c] sm:$0xf] %vm4286_vm4, %v4193_v12 }
 0x51e   : > { %11667 = vmatmul.msk.bf16.gmra.mxu0 %vm8820_vm5, %v9502_v40  ;;  %3833 = vrot.lane.b32.xlu2 %v3705_v13, %s12287_s11  ;;  %v10338_v51 = vadd.f32 %v16039_v23, %v10193_v31  ;;  %v9340_v60 = vadd.f32 %v16800_v21, %v9171_v0  ;;  %v16803_v0 = vld [vmem:[#allocation22_spill] sm:$0xff] }
 0x51f   : > { %4218 = vrot.lane.b32.xlu1 %v4028_v43, %s12288_s19  ;;  %v3134_v20 = vpop.permute.xlu0 %3133  ;;  %11629 = vmatmul.msk.bf16.gmra.mxu3 %vm661_vm0, %v11862_v3 }
 0x520   : > { %3276 = vst.msk [vmem:[#allocation3 + $0x258] sm:$0xf] %vm3225_vm15, %v3134_v20  ;;  %v4197_v18 = vpop.permute.xlu2 %4196  ;;  %v10402_v7 = vmax.f32 %v10338_v51, 0.0 }
 0x521   : > { %v4191_v12 = vpop.permute.xlu1 %4190  ;;  %v9003_v52 = vpop.f32.mrf.mxu1  ;;  %3952 = vst.msk [vmem:[#allocation3 + $0x258] sm:$0xf] %vm3901_vm2, %v3810_v9 }
 0x522   : > { %4335 = vst.msk [vmem:[#allocation3 + $0x240] sm:$0xf] %vm4286_vm4, %v4191_v12  ;;  %v9004_v46 = vadd.f32 %v16225_v4, %v9003_v52  ;;  %v16319_v41 = vpop.f32.mrf.mxu3  ;;  %v16802_v52 = vld [vmem:[#allocation21_spill] sm:$0xff] }
 0x523   : > { %v10194_v39 = vpop.f32.mrf.mxu0 }
 0x524   : > { %v9173_v25 = vadd.f32 %v14864_v27, %v9004_v46  ;;  %v10195_v58 = vadd.f32 %v10194_v39, %v16256_v57  ;;  %v11803_v10 = vld [vmem:[#allocation3 + $0x248] sm:$0xf0]  ;;  %v9454_v57 = vmax.f32 %v9340_v60, 0.0 }
 0x526   : > { %v9342_v47 = vadd.f32 %v16801_v16, %v9173_v25  ;;  %v10339_v50 = vadd.f32 %v16039_v23, %v10195_v58  ;;  %4220 = vrot.lane.b32.xlu2 %v4029_v55, %s12288_s19  ;;  %s12231_s19 = scalar_lea.hbm %s16679_s9, 1024 }
 0x527   : > { %v3812_v19 = vpop.permute.xlu0 %3811  ;;  %p12233_p1 = scmp.lt.s32.totalorder %s12231_s19, %s12227_s23 }
 0x528   : > { %v9455_v32 = vmax.f32 %v9342_v47, 0.0  ;;  %v10403_v62 = vmax.f32 %v10339_v50, 0.0  ;;  %v3814_v24 = vpop.permute.xlu2 %3813 }
 0x529   : > { %v3136_v28 = vpop.permute.xlu1 %3135  ;;  %v9006_v48 = vpop.f32.mrf.mxu1  ;;  %v11271_v27 = vld [vmem:[#allocation3 + $0x240] sm:$0xf]  ;;  %p12234_p3 = por %p12233_p1, %p12232_p9 }
 0x52a   : > { %v11916_v26 = vpack.c.bf16 %v10403_v62, %v10402_v7  ;;  %3277 = vst.msk [vmem:[#allocation3 + $0x264] sm:$0xf] %vm3225_vm15, %v3136_v28  ;;  %v11272_v54 = vor.u32 %v11803_v10, %v11271_v27  ;;  %v16330_v11 = vpop.f32.mrf.mxu3  ;;  %v9503_v56 = vpack.c.bf16 %v9455_v32, %v9454_v57  ;;  %v9007_v29 = vadd.f32 %v16225_v4, %v9006_v48 }
 0x52b   : > { %v10197_v23 = vpop.f32.mrf.mxu0  ;;  %3953 = vst.msk [vmem:[#allocation3 + $0x264] sm:$0xf] %vm3901_vm2, %v3812_v19  ;;  %v11864_v19 = vld [vmem:[%s12476_s15 + $0x90] sm:$0xff]  ;;  %p12235_p13 = pnand %p12234_p3, %p12230_p2 }
 0x52c   : > { %12048 = vst [vmem:[%s16071_s30 + $0x30] sm:$0xff] %v11916_v26   ;;  %9045 = vmatmul.bf16.gmra.mxu1 %v11272_v54  ;;  %v10198_v9 = vadd.f32 %v10197_v23, %v16281_v37  ;;  %v9176_v3 = vadd.f32 %v14889_v44, %v9007_v29  ;;  %v16349_v37 = vld [vmem:[%s16678_s8] ss:$0 sm:$0xff] }
 0x52d   : > { %4338 = vst.msk [vmem:[#allocation3 + $0x264] sm:$0xf] %vm4286_vm4, %v4197_v18 }
 0x52e   : > { %11668 = vmatmul.msk.bf16.gmra.mxu0 %vm8820_vm5, %v9503_v56  ;;  %v10340_v20 = vadd.f32 %v16349_v37, %v10198_v9  ;;  %v9345_v6 = vadd.f32 %v16802_v52, %v9176_v3 }
 0x52f   : > { %v3138_v1 = vpop.permute.xlu0 %3137  ;;  %11630 = vmatmul.msk.bf16.gmra.mxu3 %vm661_vm0, %v11863_v14  ;;  %v16804_v14 = vld [vmem:[#allocation30_spill] sm:$0xff] }
 0x530   : > { %3278 = vst.msk [vmem:[#allocation3 + $0x270] sm:$0xf] %vm3225_vm15, %v3138_v1  ;;  %v4201_v49 = vpop.permute.xlu2 %4200  ;;  %v10404_v39 = vmax.f32 %v10340_v20, 0.0  ;;  %v9456_v50 = vmax.f32 %v9345_v6, 0.0  ;;  %v16805_v1 = vld [vmem:[#allocation23_spill] sm:$0xff] }
 0x531   : > { %v4195_v53 = vpop.permute.xlu1 %4194  ;;  %v9008_v40 = vpop.f32.mrf.mxu1  ;;  %3954 = vst.msk [vmem:[#allocation3 + $0x270] sm:$0xf] %vm3901_vm2, %v3814_v24 }
 0x532   : > { %4337 = vst.msk [vmem:[#allocation3 + $0x258] sm:$0xf] %vm4286_vm4, %v4195_v53  ;;  %v9009_v43 = vadd.f32 %v16225_v4, %v9008_v40  ;;  %v16344_v31 = vpop.f32.mrf.mxu3  ;;  %v16806_v40 = vld [vmem:[#allocation24_spill] sm:$0xff] }
 0x533   : > { %v10199_v13 = vpop.f32.mrf.mxu0 }
 0x534   : > { %v9178_v12 = vadd.f32 %v14913_v33, %v9009_v43  ;;  %v10200_v44 = vadd.f32 %v10199_v13, %v16299_v30  ;;  %v11806_v47 = vld [vmem:[#allocation3 + $0x260] sm:$0xf0] }
 0x536   : > { %v9347_v18 = vadd.f32 %v16803_v0, %v9178_v12  ;;  %v10341_v46 = vadd.f32 %v16349_v37, %v10200_v44 }
 0x537   : > { %v3816_v58 = vpop.permute.xlu0 %3815 }
 0x538   : > { %v9457_v51 = vmax.f32 %v9347_v18, 0.0  ;;  %v10405_v25 = vmax.f32 %v10341_v46, 0.0  ;;  %v3818_v30 = vpop.permute.xlu2 %3817 }
 0x539   : > { %v3140_v21 = vpop.permute.xlu1 %3139  ;;  %v9011_v60 = vpop.f32.mrf.mxu1  ;;  %v11283_v16 = vld [vmem:[#allocation3 + $0x258] sm:$0xf] }
 0x53a   : > { %v11921_v33 = vpack.c.bf16 %v10405_v25, %v10404_v39  ;;  %3279 = vst.msk [vmem:[#allocation3 + $0x27c] sm:$0xf] %vm3225_vm15, %v3140_v21  ;;  %v11284_v55 = vor.u32 %v11806_v47, %v11283_v16  ;;  %v16359_v32 = vpop.f32.mrf.mxu3  ;;  %v9504_v62 = vpack.c.bf16 %v9457_v51, %v9456_v50  ;;  %v9012_v28 = vadd.f32 %v16225_v4, %v9011_v60 }
 0x53b   : > { %v10202_v7 = vpop.f32.mrf.mxu0  ;;  %3955 = vst.msk [vmem:[#allocation3 + $0x27c] sm:$0xf] %vm3901_vm2, %v3816_v58  ;;  %v11865_v58 = vld [vmem:[%s12476_s15 + $0x98] sm:$0xff] }
 0x53c   : > { %12049 = vst [vmem:[%s16071_s30 + $0x38] sm:$0xff] %v11921_v33   ;;  %9050 = vmatmul.bf16.gmra.mxu1 %v11284_v55  ;;  %v10203_v48 = vadd.f32 %v10202_v7, %v16319_v41  ;;  %v9181_v26 = vadd.f32 %v14935_v42, %v9012_v28  ;;  %v16807_v33 = vld [vmem:[#allocation31_spill] sm:$0xff]  ;;  %v16808_v28 = vld [vmem:[#allocation32_spill] sm:$0xff] }
 0x53d   : > { %4340 = vst.msk [vmem:[#allocation3 + $0x27c] sm:$0xf] %vm4286_vm4, %v4201_v49 }
 0x53e   : > { %11669 = vmatmul.msk.bf16.gmra.mxu0 %vm8820_vm5, %v9504_v62  ;;  %v10342_v41 = vadd.f32 %v16349_v37, %v10203_v48  ;;  %v9350_v53 = vadd.f32 %v16805_v1, %v9181_v26  ;;  %v16810_v26 = vld [vmem:[#allocation28_spill] sm:$0xff] }
 0x53f   : > { %v3142_v27 = vpop.permute.xlu0 %3141  ;;  %11631 = vmatmul.msk.bf16.gmra.mxu3 %vm661_vm0, %v11864_v19 }
 0x540   : > { %3280 = vst.msk [vmem:[#allocation3 + $0x288] sm:$0xf] %vm3225_vm15, %v3142_v27  ;;  %v4205_v24 = vpop.permute.xlu2 %4204  ;;  %v10406_v49 = vmax.f32 %v10342_v41, 0.0  ;;  %v9458_v0 = vmax.f32 %v9350_v53, 0.0 }
 0x541   : > { %v4199_v10 = vpop.permute.xlu1 %4198  ;;  %v9013_v57 = vpop.f32.mrf.mxu1  ;;  %3956 = vst.msk [vmem:[#allocation3 + $0x288] sm:$0xf] %vm3901_vm2, %v3818_v30 }
 0x542   : > { %4339 = vst.msk [vmem:[#allocation3 + $0x270] sm:$0xf] %vm4286_vm4, %v4199_v10  ;;  %v9014_v54 = vadd.f32 %v16225_v4, %v9013_v57  ;;  %v16373_v56 = vpop.f32.mrf.mxu3  ;;  %v16809_v10 = vld [vmem:[#allocation26_spill] sm:$0xff] }
 0x543   : > { %v10204_v23 = vpop.f32.mrf.mxu0 }
 0x544   : > { %v9183_v29 = vadd.f32 %v16804_v14, %v9014_v54  ;;  %v10205_v9 = vadd.f32 %v10204_v23, %v16330_v11  ;;  %v11809_v6 = vld [vmem:[#allocation3 + $0x278] sm:$0xf0] }
 0x546   : > { %v9352_v42 = vadd.f32 %v16806_v40, %v9183_v29  ;;  %v10343_v3 = vadd.f32 %v16349_v37, %v10205_v9 }
 0x547   : > { %v3820_v20 = vpop.permute.xlu0 %3819 }
 0x548   : > { %v9459_v43 = vmax.f32 %v9352_v42, 0.0  ;;  %v10407_v13 = vmax.f32 %v10343_v3, 0.0  ;;  %v3822_v11 = vpop.permute.xlu2 %3821 }
 0x549   : > { %v3144_v12 = vpop.permute.xlu1 %3143  ;;  %v9016_v44 = vpop.f32.mrf.mxu1  ;;  %v11295_v52 = vld [vmem:[#allocation3 + $0x270] sm:$0xf] }
 0x54a   : > { %v11926_v18 = vpack.c.bf16 %v10407_v13, %v10406_v49  ;;  %3281 = vst.msk [vmem:[#allocation3 + $0x294] sm:$0xf] %vm3225_vm15, %v3144_v12  ;;  %v11296_v46 = vor.u32 %v11809_v6, %v11295_v52  ;;  %v16383_v51 = vpop.f32.mrf.mxu3  ;;  %v9505_v25 = vpack.c.bf16 %v9459_v43, %v9458_v0  ;;  %v9017_v21 = vadd.f32 %v16225_v4, %v9016_v44  ;;  %v11866_v12 = vld [vmem:[%s12476_s15 + $0xa0] sm:$0xff] }
 0x54b   : > { %v10207_v39 = vpop.f32.mrf.mxu0  ;;  %3957 = vst.msk [vmem:[#allocation3 + $0x294] sm:$0xf] %vm3901_vm2, %v3820_v20 }
 0x54c   : > { %12050 = vst [vmem:[%s16071_s30 + $0x40] sm:$0xff] %v11926_v18   ;;  %9055 = vmatmul.bf16.gmra.mxu1 %v11296_v46  ;;  %v10208_v60 = vadd.f32 %v10207_v39, %v16344_v31  ;;  %v9186_v30 = vadd.f32 %v16807_v33, %v9017_v21  ;;  %v16813_v33 = vld [vmem:[#allocation44_spill] sm:$0xff] }
 0x54d   : > { %4342 = vst.msk [vmem:[#allocation3 + $0x294] sm:$0xf] %vm4286_vm4, %v4205_v24 }
 0x54e   : > { %11670 = vmatmul.msk.bf16.gmra.mxu0 %vm8820_vm5, %v9505_v25  ;;  %v10344_v31 = vadd.f32 %v16349_v37, %v10208_v60  ;;  %v9355_v57 = vadd.f32 %v16809_v10, %v9186_v30  ;;  %v16812_v60 = vld [vmem:[#allocation34_spill] sm:$0xff] }
 0x54f   : > { %v3146_v16 = vpop.permute.xlu0 %3145  ;;  %11632 = vmatmul.msk.bf16.gmra.mxu3 %vm661_vm0, %v11865_v58 }
 0x550   : > { %3282 = vst.msk [vmem:[#allocation3 + $0x2a0] sm:$0xf] %vm3225_vm15, %v3146_v16  ;;  %v4209_v55 = vpop.permute.xlu2 %4208  ;;  %v10408_v23 = vmax.f32 %v10344_v31, 0.0  ;;  %v9460_v42 = vmax.f32 %v9355_v57, 0.0 }
 0x551   : > { %v4203_v47 = vpop.permute.xlu1 %4202  ;;  %v9018_v50 = vpop.f32.mrf.mxu1  ;;  %3958 = vst.msk [vmem:[#allocation3 + $0x2a0] sm:$0xf] %vm3901_vm2, %v3822_v11  ;;  %v16811_v11 = vld [vmem:[#allocation33_spill] sm:$0xff] }
 0x552   : > { %4341 = vst.msk [vmem:[#allocation3 + $0x288] sm:$0xf] %vm4286_vm4, %v4203_v47  ;;  %v9019_v7 = vadd.f32 %v16225_v4, %v9018_v50  ;;  %v16397_v19 = vpop.f32.mrf.mxu3 }
 0x553   : > { %v10209_v62 = vpop.f32.mrf.mxu0 }
 0x554   : > { %v9188_v48 = vadd.f32 %v16808_v28, %v9019_v7  ;;  %v10210_v27 = vadd.f32 %v10209_v62, %v16359_v32  ;;  %v11812_v40 = vld [vmem:[#allocation3 + $0x290] sm:$0xf0] }
 0x556   : > { %v9357_v24 = vadd.f32 %v16810_v26, %v9188_v48  ;;  %v10345_v54 = vadd.f32 %v16349_v37, %v10210_v27 }
 0x557   : > { %v3824_v29 = vpop.permute.xlu0 %3823 }
 0x558   : > { %v9461_v41 = vmax.f32 %v9357_v24, 0.0  ;;  %v10409_v14 = vmax.f32 %v10345_v54, 0.0  ;;  %v3826_v32 = vpop.permute.xlu2 %3825 }
 0x559   : > { %v3148_v9 = vpop.permute.xlu1 %3147  ;;  %v9021_v1 = vpop.f32.mrf.mxu1  ;;  %v11307_v53 = vld [vmem:[#allocation3 + $0x288] sm:$0xf] }
 0x55a   : > { %v11931_v3 = vpack.c.bf16 %v10409_v14, %v10408_v23  ;;  %3283 = vst.msk [vmem:[#allocation3 + $0x2ac] sm:$0xf] %vm3225_vm15, %v3148_v9  ;;  %v11308_v49 = vor.u32 %v11812_v40, %v11307_v53  ;;  %v16407_v13 = vpop.f32.mrf.mxu3  ;;  %v9506_v20 = vpack.c.bf16 %v9461_v41, %v9460_v42  ;;  %v9022_v44 = vadd.f32 %v16225_v4, %v9021_v1  ;;  %v11867_v41 = vld [vmem:[%s12476_s15 + $0xa8] sm:$0xff]  ;;  %v16814_v42 = vld [vmem:[#allocation35_spill] sm:$0xff] }
 0x55b   : > { %v10212_v43 = vpop.f32.mrf.mxu0  ;;  %3959 = vst.msk [vmem:[#allocation3 + $0x2ac] sm:$0xf] %vm3901_vm2, %v3824_v29 }
 0x55c   : > { %12051 = vst [vmem:[%s16071_s30 + $0x48] sm:$0xff] %v11931_v3   ;;  %9060 = vmatmul.bf16.gmra.mxu1 %v11308_v49  ;;  %v10213_v52 = vadd.f32 %v10212_v43, %v16373_v56  ;;  %v9191_v46 = vadd.f32 %v16811_v11, %v9022_v44 }
 0x55d   : > { %4344 = vst.msk [vmem:[#allocation3 + $0x2ac] sm:$0xf] %vm4286_vm4, %v4209_v55 }
 0x55e   : > { %11671 = vmatmul.msk.bf16.gmra.mxu0 %vm8820_vm5, %v9506_v20  ;;  %v10346_v56 = vadd.f32 %v16349_v37, %v10213_v52  ;;  %v9360_v50 = vadd.f32 %v15266_v22, %v9191_v46  ;;  %v16815_v20 = vld [vmem:[#allocation36_spill] sm:$0xff]  ;;  %v16816_v52 = vld [vmem:[#allocation46_spill] sm:$0xff] }
 0x55f   : > { %v3150_v6 = vpop.permute.xlu0 %3149  ;;  %11633 = vmatmul.msk.bf16.gmra.mxu3 %vm661_vm0, %v11866_v12 }
 0x560   : > { %3284 = vst.msk [vmem:[#allocation3 + $0x2b8] sm:$0xf] %vm3225_vm15, %v3150_v6  ;;  %v4213_v21 = vpop.permute.xlu2 %4212  ;;  %v10410_v7 = vmax.f32 %v10346_v56, 0.0  ;;  %v9462_v26 = vmax.f32 %v9360_v50, 0.0 }
 0x561   : > { %v4207_v0 = vpop.permute.xlu1 %4206  ;;  %v9023_v18 = vpop.f32.mrf.mxu1  ;;  %3960 = vst.msk [vmem:[#allocation3 + $0x2b8] sm:$0xf] %vm3901_vm2, %v3826_v32 }
 0x562   : > { %4343 = vst.msk [vmem:[#allocation3 + $0x2a0] sm:$0xf] %vm4286_vm4, %v4207_v0  ;;  %v9024_v39 = vadd.f32 %v16225_v4, %v9023_v18  ;;  %v16421_v58 = vpop.f32.mrf.mxu3  ;;  %v16817_v0 = vld [vmem:[#allocation48_spill] sm:$0xff] }
 0x563   : > { %v10214_v25 = vpop.f32.mrf.mxu0 }
 0x564   : > { %v9193_v16 = vadd.f32 %v16812_v60, %v9024_v39  ;;  %v10215_v47 = vadd.f32 %v10214_v25, %v16383_v51  ;;  %v11815_v57 = vld [vmem:[#allocation3 + $0x2a8] sm:$0xf0] }
 0x566   : > { %v9362_v30 = vadd.f32 %v16813_v33, %v9193_v16  ;;  %v10347_v55 = vadd.f32 %v16349_v37, %v10215_v47 }
 0x567   : > { %v3828_v28 = vpop.permute.xlu0 %3827 }
 0x568   : > { %v9463_v62 = vmax.f32 %v9362_v30, 0.0  ;;  %v10411_v31 = vmax.f32 %v10347_v55, 0.0  ;;  %v3830_v14 = vpop.permute.xlu2 %3829 }
 0x569   : > { %v3152_v48 = vpop.permute.xlu1 %3151  ;;  %v9026_v27 = vpop.f32.mrf.mxu1  ;;  %v11319_v10 = vld [vmem:[#allocation3 + $0x2a0] sm:$0xf] }
 0x56a   : > { %v11936_v24 = vpack.c.bf16 %v10411_v31, %v10410_v7  ;;  %3285 = vst.msk [vmem:[#allocation3 + $0x2c4] sm:$0xf] %vm3225_vm15, %v3152_v48  ;;  %v11320_v51 = vor.u32 %v11815_v57, %v11319_v10  ;;  %v16431_v54 = vpop.f32.mrf.mxu3  ;;  %v9507_v23 = vpack.c.bf16 %v9463_v62, %v9462_v26  ;;  %v9027_v29 = vadd.f32 %v16225_v4, %v9026_v27  ;;  %v11868_v31 = vld [vmem:[%s12476_s15 + $0xb0] sm:$0xff] }
 0x56b   : > { %v10217_v22 = vpop.f32.mrf.mxu0  ;;  %3961 = vst.msk [vmem:[#allocation3 + $0x2c4] sm:$0xf] %vm3901_vm2, %v3828_v28 }
 0x56c   : > { %12052 = vst [vmem:[%s16071_s30 + $0x50] sm:$0xff] %v11936_v24   ;;  %9065 = vmatmul.bf16.gmra.mxu1 %v11320_v51  ;;  %v10218_v9 = vadd.f32 %v10217_v22, %v16397_v19  ;;  %v9196_v3 = vadd.f32 %v16814_v42, %v9027_v29  ;;  %v16818_v24 = vld [vmem:[#allocation37_spill] sm:$0xff] }
 0x56d   : > { %4346 = vst.msk [vmem:[#allocation3 + $0x2c4] sm:$0xf] %vm4286_vm4, %v4213_v21 }
 0x56e   : > { %11672 = vmatmul.msk.bf16.gmra.mxu0 %vm8820_vm5, %v9507_v23  ;;  %v10348_v19 = vadd.f32 %v16349_v37, %v10218_v9  ;;  %v9365_v6 = vadd.f32 %v16816_v52, %v9196_v3 }
 0x56f   : > { %v3154_v1 = vpop.permute.xlu0 %3153  ;;  %11634 = vmatmul.msk.bf16.gmra.mxu3 %vm661_vm0, %v11867_v41 }
 0x570   : > { %3286 = vst.msk [vmem:[#allocation3 + $0x2d0] sm:$0xf] %vm3225_vm15, %v3154_v1  ;;  %v10412_v46 = vmax.f32 %v10348_v19, 0.0  ;;  %v4217_v39 = vpop.permute.xlu2 %4216  ;;  %v9464_v33 = vmax.f32 %v9365_v6, 0.0  ;;  %v16820_v1 = vld [vmem:[#allocation50_spill] sm:$0xff] }
 0x571   : > { %v4211_v53 = vpop.permute.xlu1 %4210  ;;  %v9028_v40 = vpop.f32.mrf.mxu1  ;;  %3962 = vst.msk [vmem:[#allocation3 + $0x2d0] sm:$0xf] %vm3901_vm2, %v3830_v14  ;;  %v16819_v14 = vld [vmem:[#allocation38_spill] sm:$0xff] }
 0x572   : > { %4345 = vst.msk [vmem:[#allocation3 + $0x2b8] sm:$0xf] %vm4286_vm4, %v4211_v53  ;;  %v9029_v32 = vadd.f32 %v16225_v4, %v9028_v40  ;;  %v16445_v43 = vpop.f32.mrf.mxu3  ;;  %v16821_v40 = vld [vmem:[#allocation53_spill] sm:$0xff] }
 0x573   : > { %v10219_v49 = vpop.f32.mrf.mxu0 }
 0x574   : > { %v9198_v12 = vadd.f32 %v16815_v20, %v9029_v32  ;;  %v10220_v44 = vadd.f32 %v10219_v49, %v16407_v13  ;;  %v11818_v50 = vld [vmem:[#allocation3 + $0x2c0] sm:$0xf0] }
 0x576   : > { %v9367_v18 = vadd.f32 %v16817_v0, %v9198_v12  ;;  %v10349_v11 = vadd.f32 %v16349_v37, %v10220_v44 }
 0x577   : > { %v3832_v21 = vpop.permute.xlu0 %3831 }
 0x578   : > { %v9465_v25 = vmax.f32 %v9367_v18, 0.0  ;;  %v10413_v56 = vmax.f32 %v10349_v11, 0.0  ;;  %v3834_v26 = vpop.permute.xlu2 %3833 }
 0x579   : > { %v3156_v60 = vpop.permute.xlu1 %3155  ;;  %v9031_v16 = vpop.f32.mrf.mxu1  ;;  %v11331_v47 = vld [vmem:[#allocation3 + $0x2b8] sm:$0xf] }
 0x57a   : > { %v11941_v30 = vpack.c.bf16 %v10413_v56, %v10412_v46  ;;  %3287 = vst.msk [vmem:[#allocation3 + $0x2dc] sm:$0xf] %vm3225_vm15, %v3156_v60  ;;  %v11332_v13 = vor.u32 %v11818_v50, %v11331_v47  ;;  %v9952_v7 = vpop.f32.mrf.mxu3  ;;  %v9508_v62 = vpack.c.bf16 %v9465_v25, %v9464_v33  ;;  %v9032_v28 = vadd.f32 %v16225_v4, %v9031_v16  ;;  %v11869_v56 = vld [vmem:[%s12476_s15 + $0xb8] sm:$0xff]  ;;  %v16822_v50 = vld [vmem:[#allocation39_spill] sm:$0xff] }
 0x57b   : > { %v10222_v55 = vpop.f32.mrf.mxu0  ;;  %3963 = vst.msk [vmem:[#allocation3 + $0x2dc] sm:$0xf] %vm3901_vm2, %v3832_v21 }
 0x57c   : > { %12053 = vst [vmem:[%s16071_s30 + $0x58] sm:$0xff] %v11941_v30   ;;  %9070 = vmatmul.bf16.gmra.mxu1 %v11332_v13  ;;  %v10223_v48 = vadd.f32 %v10222_v55, %v16421_v58  ;;  %v9201_v51 = vadd.f32 %v16818_v24, %v9032_v28 }
 0x57d   : > { %4348 = vst.msk [vmem:[#allocation3 + $0x2dc] sm:$0xf] %vm4286_vm4, %v4217_v39 }
 0x57e   : > { %11673 = vmatmul.msk.bf16.gmra.mxu0 %vm8820_vm5, %v9508_v62  ;;  %v10350_v58 = vadd.f32 %v16349_v37, %v10223_v48  ;;  %v9370_v53 = vadd.f32 %v16820_v1, %v9201_v51 }
 0x57f   : > { %v3158_v27 = vpop.permute.xlu0 %3157  ;;  %11635 = vmatmul.msk.bf16.gmra.mxu3 %vm661_vm0, %v11868_v31  ;;  %v16823_v31 = vld [vmem:[#allocation40_spill] sm:$0xff] }
 0x580   : > { %3288 = vst.msk [vmem:[#allocation3 + $0x2e8] sm:$0xf] %vm3225_vm15, %v3158_v27  ;;  %v10414_v32 = vmax.f32 %v10350_v58, 0.0  ;;  %v9466_v0 = vmax.f32 %v9370_v53, 0.0  ;;  %v4221_v39 = vpop.permute.xlu2 %4220  ;;  %v16824_v27 = vld [vmem:[#allocation55_spill] sm:$0xff] }
 0x581   : > { %v4215_v10 = vpop.permute.xlu1 %4214  ;;  %v9033_v57 = vpop.f32.mrf.mxu1  ;;  %3964 = vst.msk [vmem:[#allocation3 + $0x2e8] sm:$0xf] %vm3901_vm2, %v3834_v26 }
 0x582   : > { %4347 = vst.msk [vmem:[#allocation3 + $0x2d0] sm:$0xf] %vm4286_vm4, %v4215_v10  ;;  %v9034_v22 = vadd.f32 %v16225_v4, %v9033_v57  ;;  %v9955_v41 = vpop.f32.mrf.mxu3  ;;  %v16825_v10 = vld [vmem:[#allocation57_spill] sm:$0xff] }
 0x583   : > { %v10224_v23 = vpop.f32.mrf.mxu0 }
 0x584   : > { %v9203_v29 = vadd.f32 %v16819_v14, %v9034_v22  ;;  %v10225_v9 = vadd.f32 %v10224_v23, %v16431_v54  ;;  %v11821_v6 = vld [vmem:[#allocation3 + $0x2d8] sm:$0xf0] }
 0x586   : > { %v9372_v42 = vadd.f32 %v16821_v40, %v9203_v29  ;;  %v10351_v3 = vadd.f32 %v16349_v37, %v10225_v9 }
 0x587   : > { %v3836_v20 = vpop.permute.xlu0 %3835 }
 0x588   : > { %v9467_v49 = vmax.f32 %v9372_v42, 0.0  ;;  %v10415_v19 = vmax.f32 %v10351_v3, 0.0  ;;  %v11870_v42 = vld [vmem:[%s12476_s15 + $0xc0] sm:$0xff] }
 0x589   : > { %v3160_v12 = vpop.permute.xlu1 %3159  ;;  %v9036_v44 = vpop.f32.mrf.mxu1  ;;  %v11343_v52 = vld [vmem:[#allocation3 + $0x2d0] sm:$0xf] }
 0x58a   : > { %v11946_v18 = vpack.c.bf16 %v10415_v19, %v10414_v32  ;;  %3289 = vst.msk [vmem:[#allocation3 + $0x2f4] sm:$0xf] %vm3225_vm15, %v3160_v12  ;;  %v11344_v54 = vor.u32 %v11821_v6, %v11343_v52  ;;  %v9957_v46 = vpop.f32.mrf.mxu3  ;;  %v9509_v25 = vpack.c.bf16 %v9467_v49, %v9466_v0  ;;  %v9037_v21 = vadd.f32 %v16225_v4, %v9036_v44  ;;  %v16826_v19 = vld [vmem:[#allocation41_spill] sm:$0xff]  ;;  %v16827_v0 = vld [vmem:[#allocation42_spill] sm:$0xff] }
 0x58b   : > { %v10227_v11 = vpop.f32.mrf.mxu0  ;;  %3965 = vst.msk [vmem:[#allocation3 + $0x2f4] sm:$0xf] %vm3901_vm2, %v3836_v20 }
 0x58c   : > { %12054 = vst [vmem:[%s16071_s30 + $0x60] sm:$0xff] %v11946_v18   ;;  %9075 = vmatmul.bf16.gmra.mxu1 %v11344_v54  ;;  %v10228_v60 = vadd.f32 %v10227_v11, %v16445_v43  ;;  %v9206_v33 = vadd.f32 %v16822_v50, %v9037_v21  ;;  %v16828_v11 = vld [vmem:[#allocation59_spill] sm:$0xff] }
 0x58d   : > { %4350 = vst.msk [vmem:[#allocation3 + $0x2f4] sm:$0xf] %vm4286_vm4, %v4221_v39 }
 0x58e   : > { %11674 = vmatmul.msk.bf16.gmra.mxu0 %vm8820_vm5, %v9509_v25  ;;  %v10352_v62 = vadd.f32 %v16349_v37, %v10228_v60  ;;  %v9375_v43 = vadd.f32 %v16824_v27, %v9206_v33  ;;  %v16829_v25 = vld [vmem:[#allocation61_spill] sm:$0xff]  ;;  %v16830_v27 = vld [vmem:[#allocation43_spill] sm:$0xff] }
 0x58f   : > { %11636 = vmatmul.msk.bf16.gmra.mxu3 %vm661_vm0, %v11869_v56 }
 0x590   : > { %v10416_v24 = vmax.f32 %v10352_v62, 0.0  ;;  %v9468_v29 = vmax.f32 %v9375_v43, 0.0 }
 0x591   : > { %v4219_v16 = vpop.permute.xlu1 %4218  ;;  %v9038_v47 = vpop.f32.mrf.mxu1 }
 0x592   : > { %4349 = vst.msk [vmem:[#allocation3 + $0x2e8] sm:$0xf] %vm4286_vm4, %v4219_v16  ;;  %v9039_v30 = vadd.f32 %v16225_v4, %v9038_v47  ;;  %v9960_v55 = vpop.f32.mrf.mxu3 }
 0x593   : > { %v10229_v13 = vpop.f32.mrf.mxu0 }
 0x594   : > { %v9208_v28 = vadd.f32 %v16823_v31, %v9039_v30  ;;  %v10230_v48 = vadd.f32 %v10229_v13, %v9952_v7  ;;  %v11824_v14 = vld [vmem:[#allocation3 + $0x2f0] sm:$0xf0]  ;;  %v11871_v31 = vld [vmem:[%s12476_s15 + $0xc8] sm:$0xff] }
 0x596   : > { %v9377_v57 = vadd.f32 %v16825_v10, %v9208_v28  ;;  %v10353_v26 = vadd.f32 %v16349_v37, %v10230_v48 }
 0x598   : > { %v9469_v51 = vmax.f32 %v9377_v57, 0.0  ;;  %v10417_v22 = vmax.f32 %v10353_v26, 0.0 }
 0x599   : > { %v9041_v23 = vpop.f32.mrf.mxu1  ;;  %v11355_v58 = vld [vmem:[#allocation3 + $0x2e8] sm:$0xf] }
 0x59a   : > { %v11951_v9 = vpack.c.bf16 %v10417_v22, %v10416_v24  ;;  %v11356_v1 = vor.u32 %v11824_v14, %v11355_v58  ;;  %v9962_v40 = vpop.f32.mrf.mxu3  ;;  %v9510_v7 = vpack.c.bf16 %v9469_v51, %v9468_v29  ;;  %v9042_v3 = vadd.f32 %v16225_v4, %v9041_v23  ;;  %v16831_v51 = vld [vmem:[#allocation45_spill] sm:$0xff] }
 0x59b   : > { %v10232_v53 = vpop.f32.mrf.mxu0 }
 0x59c   : > { %12055 = vst [vmem:[%s16071_s30 + $0x68] sm:$0xff] %v11951_v9   ;;  %9080 = vmatmul.bf16.gmra.mxu1 %v11356_v1  ;;  %v10233_v32 = vadd.f32 %v10232_v53, %v9955_v41  ;;  %v9211_v20 = vadd.f32 %v16826_v19, %v9042_v3 }
 0x59e   : > { %11675 = vmatmul.msk.bf16.gmra.mxu0 %vm8820_vm5, %v9510_v7  ;;  %v10354_v6 = vadd.f32 %v16349_v37, %v10233_v32  ;;  %v9380_v39 = vadd.f32 %v16828_v11, %v9211_v20  ;;  %v16832_v20 = vld [vmem:[#allocation47_spill] sm:$0xff] }
 0x59f   : > { %11637 = vmatmul.msk.bf16.gmra.mxu3 %vm661_vm0, %v11870_v42 }
 0x5a0   : > { %v10418_v21 = vmax.f32 %v10354_v6, 0.0  ;;  %v9470_v50 = vmax.f32 %v9380_v39, 0.0 }
 0x5a1   : > { %v9043_v49 = vpop.f32.mrf.mxu1 }
 0x5a2   : > { %v9044_v12 = vadd.f32 %v16225_v4, %v9043_v49  ;;  %v9965_v52 = vpop.f32.mrf.mxu3  ;;  %v11872_v49 = vld [vmem:[%s12476_s15 + $0xd0] sm:$0xff] }
 0x5a3   : > { %v10234_v44 = vpop.f32.mrf.mxu0 }
 0x5a4   : > { %v9213_v18 = vadd.f32 %v16827_v0, %v9044_v12  ;;  %v10235_v54 = vadd.f32 %v10234_v44, %v9957_v46 }
 0x5a6   : > { %v9382_v41 = vadd.f32 %v16829_v25, %v9213_v18  ;;  %v10355_v56 = vadd.f32 %v16349_v37, %v10235_v54  ;;  %v16833_v54 = vld [vmem:[#allocation49_spill] sm:$0xff]  ;;  %v16834_v25 = vld [vmem:[#allocation66_spill] sm:$0xff] }
 0x5a8   : > { %v9471_v60 = vmax.f32 %v9382_v41, 0.0  ;;  %v10419_v16 = vmax.f32 %v10355_v56, 0.0  ;;  %v16835_v56 = vld [vmem:[#allocation68_spill] sm:$0xff] }
 0x5a9   : > { %v9046_v47 = vpop.f32.mrf.mxu1 }
 0x5aa   : > { %v11956_v33 = vpack.c.bf16 %v10419_v16, %v10418_v21  ;;  %v9967_v13 = vpop.f32.mrf.mxu3  ;;  %v9511_v62 = vpack.c.bf16 %v9471_v60, %v9470_v50  ;;  %v9047_v28 = vadd.f32 %v16225_v4, %v9046_v47 }
 0x5ab   : > { %v10237_v30 = vpop.f32.mrf.mxu0 }
 0x5ac   : > { %12056 = vst [vmem:[%s16071_s30 + $0x70] sm:$0xff] %v11956_v33   ;;  %v10238_v46 = vadd.f32 %v10237_v30, %v9960_v55  ;;  %v9216_v43 = vadd.f32 %v16830_v27, %v9047_v28 }
 0x5ae   : > { %11676 = vmatmul.msk.bf16.gmra.mxu0 %vm8820_vm5, %v9511_v62  ;;  %v10356_v24 = vadd.f32 %v16349_v37, %v10238_v46  ;;  %v9385_v58 = vadd.f32 %v15545_v35, %v9216_v43  ;;  %v11873_v46 = vld [vmem:[%s12476_s15 + $0xd8] sm:$0xff]  ;;  %v16836_v43 = vld [vmem:[#allocation51_spill] sm:$0xff] }
 0x5af   : > { %11638 = vmatmul.msk.bf16.gmra.mxu3 %vm661_vm0, %v11871_v31 }
 0x5b0   : > { %v10420_v29 = vmax.f32 %v10356_v24, 0.0 }
 0x5b1   : > { %v9048_v48 = vpop.f32.mrf.mxu1 }
 0x5b2   : > { %v9049_v10 = vadd.f32 %v16225_v4, %v9048_v48  ;;  %v9970_v26 = vpop.f32.mrf.mxu3  ;;  %v9472_v4 = vmax.f32 %v9385_v58, 0.0 }
 0x5b3   : > { %v10239_v57 = vpop.f32.mrf.mxu0 }
 0x5b4   : > { %v9218_v22 = vadd.f32 %v16831_v51, %v9049_v10  ;;  %v10240_v23 = vadd.f32 %v10239_v57, %v9962_v40  ;;  %v16519_v40 = vld [vmem:[%s16677_s7] ss:$0 sm:$0xff] }
 0x5b6   : > { %v9387_v55 = vadd.f32 %v15574_v8, %v9218_v22  ;;  %v10357_v14 = vadd.f32 %v16349_v37, %v10240_v23  ;;  %v16837_v23 = vld [vmem:[#allocation52_spill] sm:$0xff] }
 0x5b8   : > { %v9473_v9 = vmax.f32 %v9387_v55, 0.0  ;;  %v10421_v1 = vmax.f32 %v10357_v14, 0.0  ;;  %v16838_v14 = vld [vmem:[#allocation70_spill] sm:$0xff] }
 0x5b9   : > { %v9051_v53 = vpop.f32.mrf.mxu1 }
 0x5ba   : > { %v11961_v7 = vpack.c.bf16 %v10421_v1, %v10420_v29  ;;  %v9972_v3 = vpop.f32.mrf.mxu3  ;;  %v9512_v32 = vpack.c.bf16 %v9473_v9, %v9472_v4  ;;  %v9052_v35 = vadd.f32 %v16519_v40, %v9051_v53 }
 0x5bb   : > { %v10242_v42 = vpop.f32.mrf.mxu0 }
 0x5bc   : > { %12057 = vst [vmem:[%s16071_s30 + $0x78] sm:$0xff] %v11961_v7   ;;  %v10243_v8 = vadd.f32 %v10242_v42, %v9965_v52  ;;  %v9221_v12 = vadd.f32 %v16832_v20, %v9052_v35 }
 0x5be   : > { %11677 = vmatmul.msk.bf16.gmra.mxu0 %vm8820_vm5, %v9512_v32  ;;  %v10358_v18 = vadd.f32 %v16349_v37, %v10243_v8  ;;  %v9390_v41 = vadd.f32 %v16834_v25, %v9221_v12  ;;  %v16839_v12 = vld [vmem:[#allocation54_spill] sm:$0xff] }
 0x5bf   : > { %11639 = vmatmul.msk.bf16.gmra.mxu3 %vm661_vm0, %v11872_v49 }
 0x5c0   : > { %v10422_v60 = vmax.f32 %v10358_v18, 0.0  ;;  %v9474_v33 = vmax.f32 %v9390_v41, 0.0 }
 0x5c1   : > { %v9053_v19 = vpop.f32.mrf.mxu1 }
 0x5c2   : > { %v9054_v44 = vadd.f32 %v16519_v40, %v9053_v19  ;;  %v9975_v0 = vpop.f32.mrf.mxu3  ;;  %v11874_v19 = vld [vmem:[%s12476_s15 + $0xe0] sm:$0xff] }
 0x5c3   : > { %v10244_v6 = vpop.f32.mrf.mxu0 }
 0x5c4   : > { %v9223_v11 = vadd.f32 %v16833_v54, %v9054_v44  ;;  %v10245_v39 = vadd.f32 %v10244_v6, %v9967_v13 }
 0x5c6   : > { %v9392_v52 = vadd.f32 %v16835_v56, %v9223_v11  ;;  %v10359_v21 = vadd.f32 %v16349_v37, %v10245_v39  ;;  %v16840_v39 = vld [vmem:[#allocation56_spill] sm:$0xff] }
 0x5c8   : > { %v9475_v16 = vmax.f32 %v9392_v52, 0.0  ;;  %v10423_v47 = vmax.f32 %v10359_v21, 0.0 }
 0x5c9   : > { %v9056_v50 = vpop.f32.mrf.mxu1 }
 0x5ca   : > { %v11966_v30 = vpack.c.bf16 %v10423_v47, %v10422_v60  ;;  %v9977_v31 = vpop.f32.mrf.mxu3  ;;  %v9513_v28 = vpack.c.bf16 %v9475_v16, %v9474_v33  ;;  %v9057_v48 = vadd.f32 %v16519_v40, %v9056_v50 }
 0x5cb   : > { %v10247_v62 = vpop.f32.mrf.mxu0 }
 0x5cc   : > { %12058 = vst [vmem:[%s16071_s30 + $0x80] sm:$0xff] %v11966_v30   ;;  %v10248_v13 = vadd.f32 %v10247_v62, %v9970_v26  ;;  %v9226_v10 = vadd.f32 %v16836_v43, %v9057_v48 }
 0x5ce   : > { %11678 = vmatmul.msk.bf16.gmra.mxu0 %vm8820_vm5, %v9513_v28  ;;  %v10360_v22 = vadd.f32 %v16349_v37, %v10248_v13  ;;  %v9395_v29 = vadd.f32 %v16838_v14, %v9226_v10 }
 0x5cf   : > { %11640 = vmatmul.msk.bf16.gmra.mxu3 %vm661_vm0, %v11873_v46  ;;  %v11875_v46 = vld [vmem:[%s12476_s15 + $0xe8] sm:$0xff] }
 0x5d0   : > { %v10424_v1 = vmax.f32 %v10360_v22, 0.0  ;;  %v9476_v42 = vmax.f32 %v9395_v29, 0.0 }
 0x5d1   : > { %v9058_v27 = vpop.f32.mrf.mxu1 }
 0x5d2   : > { %v9059_v57 = vadd.f32 %v16519_v40, %v9058_v27  ;;  %v9980_v51 = vpop.f32.mrf.mxu3 }
 0x5d3   : > { %v10249_v24 = vpop.f32.mrf.mxu0 }
 0x5d4   : > { %v9228_v58 = vadd.f32 %v16837_v23, %v9059_v57  ;;  %v10250_v55 = vadd.f32 %v10249_v24, %v9972_v3  ;;  %v16842_v24 = vld [vmem:[#allocation60_spill] sm:$0xff] }
 0x5d6   : > { %v9397_v26 = vadd.f32 %v15684_v38, %v9228_v58  ;;  %v10361_v9 = vadd.f32 %v16349_v37, %v10250_v55 }
 0x5d8   : > { %v9477_v53 = vmax.f32 %v9397_v26, 0.0  ;;  %v10425_v4 = vmax.f32 %v10361_v9, 0.0 }
 0x5d9   : > { %v9061_v7 = vpop.f32.mrf.mxu1 }
 0x5da   : > { %v11971_v32 = vpack.c.bf16 %v10425_v4, %v10424_v1  ;;  %v9982_v35 = vpop.f32.mrf.mxu3  ;;  %v9514_v8 = vpack.c.bf16 %v9477_v53, %v9476_v42  ;;  %v9062_v20 = vadd.f32 %v16519_v40, %v9061_v7 }
 0x5db   : > { %v10252_v49 = vpop.f32.mrf.mxu0 }
 0x5dc   : > { %12059 = vst [vmem:[%s16071_s30 + $0x88] sm:$0xff] %v11971_v32   ;;  %v10253_v3 = vadd.f32 %v10252_v49, %v9975_v0  ;;  %v9231_v44 = vadd.f32 %v16839_v12, %v9062_v20  ;;  %v11876_v32 = vld [vmem:[%s12476_s15 + $0xf0] sm:$0xff]  ;;  %v16844_v12 = vld [vmem:[#allocation63_spill] sm:$0xff] }
 0x5de   : > { %11679 = vmatmul.msk.bf16.gmra.mxu0 %vm8820_vm5, %v9514_v8  ;;  %v10362_v11 = vadd.f32 %v16349_v37, %v10253_v3  ;;  %v9400_v56 = vadd.f32 %v15714_v36, %v9231_v44 }
 0x5df   : > { %11641 = vmatmul.msk.bf16.gmra.mxu3 %vm661_vm0, %v11874_v19 }
 0x5e0   : > { %v10426_v21 = vmax.f32 %v10362_v11, 0.0  ;;  %v9478_v50 = vmax.f32 %v9400_v56, 0.0 }
 0x5e1   : > { %v9063_v38 = vpop.f32.mrf.mxu1 }
 0x5e2   : > { %v9064_v6 = vadd.f32 %v16519_v40, %v9063_v38  ;;  %v9985_v54 = vpop.f32.mrf.mxu3 }
 0x5e3   : > { %v10254_v18 = vpop.f32.mrf.mxu0 }
 0x5e4   : > { %v9233_v25 = vadd.f32 %v16840_v39, %v9064_v6  ;;  %v10255_v41 = vadd.f32 %v10254_v18, %v9977_v31  ;;  %v16841_v31 = vld [vmem:[#allocation58_spill] sm:$0xff] }
 0x5e6   : > { %v9402_v0 = vadd.f32 %v15737_v15, %v9233_v25  ;;  %v10363_v52 = vadd.f32 %v16349_v37, %v10255_v41 }
 0x5e8   : > { %v9479_v60 = vmax.f32 %v9402_v0, 0.0  ;;  %v10427_v16 = vmax.f32 %v10363_v52, 0.0 }
 0x5e9   : > { %v9066_v47 = vpop.f32.mrf.mxu1 }
 0x5ea   : > { %v11976_v33 = vpack.c.bf16 %v10427_v16, %v10426_v21  ;;  %v9987_v62 = vpop.f32.mrf.mxu3  ;;  %v9515_v28 = vpack.c.bf16 %v9479_v60, %v9478_v50  ;;  %v9067_v48 = vadd.f32 %v16519_v40, %v9066_v47  ;;  %v11877_v47 = vld [vmem:[%s12476_s15 + $0xf8] sm:$0xff] }
 0x5eb   : > { %v10257_v30 = vpop.f32.mrf.mxu0 }
 0x5ec   : > { %12060 = vst [vmem:[%s16071_s30 + $0x90] sm:$0xff] %v11976_v33   ;;  %v10258_v36 = vadd.f32 %v10257_v30, %v9980_v51  ;;  %v9236_v13 = vadd.f32 %v16841_v31, %v9067_v48  ;;  %v16845_v33 = vld [vmem:[#allocation64_spill] sm:$0xff] }
 0x5ee   : > { %11680 = vmatmul.msk.bf16.gmra.mxu0 %vm8820_vm5, %v9515_v28  ;;  %v10364_v57 = vadd.f32 %v16349_v37, %v10258_v36  ;;  %v9405_v58 = vadd.f32 %v15766_v63, %v9236_v13  ;;  %v16846_v36 = vld [vmem:[#allocation65_spill] sm:$0xff] }
 0x5ef   : > { %11642 = vmatmul.msk.bf16.gmra.mxu3 %vm661_vm0, %v11875_v46 }
 0x5f0   : > { %v10428_v14 = vmax.f32 %v10364_v57, 0.0  ;;  %v9480_v1 = vmax.f32 %v9405_v58, 0.0 }
 0x5f1   : > { %v9068_v15 = vpop.f32.mrf.mxu1 }
 0x5f2   : > { %v9069_v27 = vadd.f32 %v16519_v40, %v9068_v15  ;;  %v9990_v10 = vpop.f32.mrf.mxu3 }
 0x5f3   : > { %v10259_v43 = vpop.f32.mrf.mxu0 }
 0x5f4   : > { %v9238_v22 = vadd.f32 %v16842_v24, %v9069_v27  ;;  %v10260_v23 = vadd.f32 %v10259_v43, %v9982_v35  ;;  %v16843_v35 = vld [vmem:[#allocation62_spill] sm:$0xff] }
 0x5f6   : > { %v9407_v51 = vadd.f32 %v15791_v2, %v9238_v22  ;;  %v10365_v55 = vadd.f32 %v16349_v37, %v10260_v23 }
 0x5f8   : > { %v9481_v29 = vmax.f32 %v9407_v51, 0.0  ;;  %v10429_v26 = vmax.f32 %v10365_v55, 0.0 }
 0x5f9   : > { %v9071_v9 = vpop.f32.mrf.mxu1 }
 0x5fa   : > { %v11981_v53 = vpack.c.bf16 %v10429_v26, %v10428_v14  ;;  %v9992_v7 = vpop.f32.mrf.mxu3  ;;  %v9516_v42 = vpack.c.bf16 %v9481_v29, %v9480_v1  ;;  %v9072_v49 = vadd.f32 %v16519_v40, %v9071_v9  ;;  %v16847_v9 = vld [vmem:[#allocation67_spill] sm:$0xff] }
 0x5fb   : > { %v10262_v4 = vpop.f32.mrf.mxu0 }
 0x5fc   : > { %12061 = vst [vmem:[%s16071_s30 + $0x98] sm:$0xff] %v11981_v53   ;;  %v10263_v63 = vadd.f32 %v10262_v4, %v9985_v54  ;;  %v9241_v8 = vadd.f32 %v16843_v35, %v9072_v49 }
 0x5fe   : > { %11681 = vmatmul.msk.bf16.gmra.mxu0 %vm8820_vm5, %v9516_v42  ;;  %v10366_v38 = vadd.f32 %v16349_v37, %v10263_v63  ;;  %v9410_v18 = vadd.f32 %v15811_v59, %v9241_v8  ;;  %v16848_v42 = vld [vmem:[#allocation69_spill] sm:$0xff] }
 0x5ff   : > { %11643 = vmatmul.msk.bf16.gmra.mxu3 %vm661_vm0, %v11876_v32 }
 0x600   : > { %v10430_v39 = vmax.f32 %v10366_v38, 0.0  ;;  %v9482_v0 = vmax.f32 %v9410_v18, 0.0 }
 0x601   : > { %v9073_v2 = vpop.f32.mrf.mxu1 }
 0x602   : > { %v9074_v19 = vadd.f32 %v16519_v40, %v9073_v2  ;;  %v9995_v3 = vpop.f32.mrf.mxu3 }
 0x603   : > { %v10264_v20 = vpop.f32.mrf.mxu0 }
 0x604   : > { %v9243_v44 = vadd.f32 %v16844_v12, %v9074_v19  ;;  %v10265_v6 = vadd.f32 %v10264_v20, %v9987_v62 }
 0x606   : > { %v9412_v54 = vadd.f32 %v15838_v17, %v9243_v44  ;;  %v10367_v11 = vadd.f32 %v16349_v37, %v10265_v6 }
 0x608   : > { %v9483_v25 = vmax.f32 %v9412_v54, 0.0  ;;  %v10431_v41 = vmax.f32 %v10367_v11, 0.0 }
 0x609   : > { %v9076_v56 = vpop.f32.mrf.mxu1 }
 0x60a   : > { %v11986_v52 = vpack.c.bf16 %v10431_v41, %v10430_v39  ;;  %v9997_v60 = vpop.f32.mrf.mxu3  ;;  %v9517_v16 = vpack.c.bf16 %v9483_v25, %v9482_v0  ;;  %v9077_v50 = vadd.f32 %v16519_v40, %v9076_v56 }
 0x60b   : > { %v10267_v21 = vpop.f32.mrf.mxu0 }
 0x60c   : > { %12062 = vst [vmem:[%s16071_s30 + $0xa0] sm:$0xff] %v11986_v52   ;;  %v10268_v59 = vadd.f32 %v10267_v21, %v9990_v10  ;;  %v9246_v30 = vadd.f32 %v16845_v33, %v9077_v50 }
 0x60e   : > { %11682 = vmatmul.msk.bf16.gmra.mxu0 %vm8820_vm5, %v9517_v16  ;;  %v10368_v48 = vadd.f32 %v16349_v37, %v10268_v59  ;;  %v9415_v13 = vadd.f32 %v15868_v45, %v9246_v30 }
 0x60f   : > { %11644 = vmatmul.msk.bf16.gmra.mxu3 %vm661_vm0, %v11877_v47 }
 0x610   : > { %v10432_v10 = vmax.f32 %v10368_v48, 0.0  ;;  %v9484_v23 = vmax.f32 %v9415_v13, 0.0 }
 0x611   : > { %v9078_v17 = vpop.f32.mrf.mxu1 }
 0x612   : > { %v9079_v62 = vadd.f32 %v16519_v40, %v9078_v17  ;;  %v10000_v46 = vpop.f32.mrf.mxu3 }
 0x613   : > { %v10269_v28 = vpop.f32.mrf.mxu0 }
 0x614   : > { %v9248_v15 = vadd.f32 %v16846_v36, %v9079_v62  ;;  %v10270_v31 = vadd.f32 %v10269_v28, %v9992_v7 }
 0x616   : > { %v9417_v27 = vadd.f32 %v15892_v34, %v9248_v15  ;;  %v10369_v43 = vadd.f32 %v16349_v37, %v10270_v31 }
 0x618   : > { %v9485_v57 = vmax.f32 %v9417_v27, 0.0  ;;  %v10433_v24 = vmax.f32 %v10369_v43, 0.0 }
 0x619   : > { %v9081_v22 = vpop.f32.mrf.mxu1 }
 0x61a   : > { %v11991_v58 = vpack.c.bf16 %v10433_v24, %v10432_v10  ;;  %v10002_v55 = vpop.f32.mrf.mxu3  ;;  %v9518_v14 = vpack.c.bf16 %v9485_v57, %v9484_v23  ;;  %v9082_v29 = vadd.f32 %v16519_v40, %v9081_v22 }
 0x61b   : > { %v10272_v51 = vpop.f32.mrf.mxu0 }
 0x61c   : > { %12063 = vst [vmem:[%s16071_s30 + $0xa8] sm:$0xff] %v11991_v58   ;;  %v10273_v26 = vadd.f32 %v10272_v51, %v9995_v3  ;;  %v9251_v34 = vadd.f32 %v16847_v9, %v9082_v29 }
 0x61e   : > { %11683 = vmatmul.msk.bf16.gmra.mxu0 %vm8820_vm5, %v9518_v14  ;;  %v10370_v7 = vadd.f32 %v16349_v37, %v10273_v26  ;;  %v9420_v63 = vadd.f32 %v15922_v61, %v9251_v34 }
 0x620   : > { %v10434_v8 = vmax.f32 %v10370_v7, 0.0  ;;  %v9486_v3 = vmax.f32 %v9420_v63, 0.0 }
 0x621   : > { %v9083_v45 = vpop.f32.mrf.mxu1 }
 0x622   : > { %v9084_v1 = vadd.f32 %v16519_v40, %v9083_v45  ;;  %v10005_v4 = vpop.f32.mrf.mxu3 }
 0x623   : > { %v10274_v53 = vpop.f32.mrf.mxu0 }
 0x624   : > { %v9253_v32 = vadd.f32 %v16848_v42, %v9084_v1  ;;  %v10275_v49 = vadd.f32 %v10274_v53, %v9997_v60  ;;  %v16609_v60 = vld [vmem:[%s16678_s8] ss:$0 sm:$0xff] }
 0x626   : > { %v9422_v2 = vadd.f32 %v15939_v5, %v9253_v32  ;;  %v10371_v35 = vadd.f32 %v16349_v37, %v10275_v49 }
 0x628   : > { %v9487_v19 = vmax.f32 %v9422_v2, 0.0  ;;  %v10435_v20 = vmax.f32 %v10371_v35, 0.0 }
 0x62a   : > { %v11996_v38 = vpack.c.bf16 %v10435_v20, %v10434_v8  ;;  %v10007_v12 = vpop.f32.mrf.mxu3  ;;  %v9519_v44 = vpack.c.bf16 %v9487_v19, %v9486_v3 }
 0x62b   : > { %v10277_v40 = vpop.f32.mrf.mxu0 }
 0x62c   : > { %12064 = vst [vmem:[%s16071_s30 + $0xb0] sm:$0xff] %v11996_v38   ;;  %v10278_v6 = vadd.f32 %v10277_v40, %v10000_v46 }
 0x62e   : > { %11684 = vmatmul.msk.bf16.gmra.mxu0 %vm8820_vm5, %v9519_v44  ;;  %v10372_v61 = vadd.f32 %v16349_v37, %v10278_v6 }
 0x630   : > { %v10436_v39 = vmax.f32 %v10372_v61, 0.0 }
 0x632   : > { %v10010_v54 = vpop.f32.mrf.mxu3 }
 0x633   : > { %v10279_v18 = vpop.f32.mrf.mxu0 }
 0x634   : > { %v10280_v5 = vadd.f32 %v10279_v18, %v10002_v55 }
 0x636   : > { %v10373_v11 = vadd.f32 %v16349_v37, %v10280_v5 }
 0x638   : > { %v10437_v25 = vmax.f32 %v10373_v11, 0.0 }
 0x63a   : > { %v12001_v41 = vpack.c.bf16 %v10437_v25, %v10436_v39  ;;  %v10012_v0 = vpop.f32.mrf.mxu3 }
 0x63b   : > { %v10282_v56 = vpop.f32.mrf.mxu0 }
 0x63c   : > { %12065 = vst [vmem:[%s16071_s30 + $0xb8] sm:$0xff] %v12001_v41   ;;  %v10283_v52 = vadd.f32 %v10282_v56, %v10005_v4 }
 0x63e   : > { %v10374_v16 = vadd.f32 %v16609_v60, %v10283_v52 }
 0x640   : > { %v10438_v59 = vmax.f32 %v10374_v16, 0.0 }
 0x642   : > { %v10015_v50 = vpop.f32.mrf.mxu3 }
 0x643   : > { %v10284_v21 = vpop.f32.mrf.mxu0 }
 0x644   : > { %v10285_v47 = vadd.f32 %v10284_v21, %v10007_v12 }
 0x646   : > { %v10375_v37 = vadd.f32 %v16609_v60, %v10285_v47 }
 0x648   : > { %v10439_v17 = vmax.f32 %v10375_v37, 0.0 }
 0x64a   : > { %v12006_v33 = vpack.c.bf16 %v10439_v17, %v10438_v59  ;;  %v10017_v62 = vpop.f32.mrf.mxu3 }
 0x64b   : > { %v10287_v30 = vpop.f32.mrf.mxu0 }
 0x64c   : > { %12066 = vst [vmem:[%s16071_s30 + $0xc0] sm:$0xff] %v12006_v33   ;;  %v10288_v28 = vadd.f32 %v10287_v30, %v10010_v54 }
 0x64e   : > { %v10376_v48 = vadd.f32 %v16609_v60, %v10288_v28 }
 0x650   : > { %v10440_v31 = vmax.f32 %v10376_v48, 0.0 }
 0x652   : > { %v10020_v27 = vpop.f32.mrf.mxu3 }
 0x653   : > { %v10289_v46 = vpop.f32.mrf.mxu0 }
 0x654   : > { %v10290_v36 = vadd.f32 %v10289_v46, %v10012_v0 }
 0x656   : > { %v10377_v15 = vadd.f32 %v16609_v60, %v10290_v36 }
 0x658   : > { %v10441_v13 = vmax.f32 %v10377_v15, 0.0 }
 0x65a   : > { %v12011_v43 = vpack.c.bf16 %v10441_v13, %v10440_v31  ;;  %v10022_v22 = vpop.f32.mrf.mxu3 }
 0x65b   : > { %v10292_v10 = vpop.f32.mrf.mxu0 }
 0x65c   : > { %12067 = vst [vmem:[%s16071_s30 + $0xc8] sm:$0xff] %v12011_v43   ;;  %v10293_v57 = vadd.f32 %v10292_v10, %v10015_v50 }
 0x65e   : > { %v10378_v23 = vadd.f32 %v16609_v60, %v10293_v57 }
 0x660   : > { %v10442_v55 = vmax.f32 %v10378_v23, 0.0 }
 0x662   : > { %v10025_v45 = vpop.f32.mrf.mxu3 }
 0x663   : > { %v10294_v24 = vpop.f32.mrf.mxu0 }
 0x664   : > { %v10295_v58 = vadd.f32 %v10294_v24, %v10017_v62 }
 0x666   : > { %v10379_v51 = vadd.f32 %v16609_v60, %v10295_v58 }
 0x668   : > { %v10443_v14 = vmax.f32 %v10379_v51, 0.0 }
 0x66a   : > { %v12016_v29 = vpack.c.bf16 %v10443_v14, %v10442_v55  ;;  %v10027_v7 = vpop.f32.mrf.mxu3 }
 0x66b   : > { %v10297_v26 = vpop.f32.mrf.mxu0 }
 0x66c   : > { %12068 = vst [vmem:[%s16071_s30 + $0xd0] sm:$0xff] %v12016_v29   ;;  %v10298_v9 = vadd.f32 %v10297_v26, %v10020_v27 }
 0x66e   : > { %v10380_v1 = vadd.f32 %v16609_v60, %v10298_v9 }
 0x670   : > { %v10444_v42 = vmax.f32 %v10380_v1, 0.0 }
 0x672   : > { %v10030_v35 = vpop.f32.mrf.mxu3 }
 0x673   : > { %v10299_v34 = vpop.f32.mrf.mxu0 }
 0x674   : > { %v10300_v53 = vadd.f32 %v10299_v34, %v10022_v22 }
 0x676   : > { %v10381_v4 = vadd.f32 %v16609_v60, %v10300_v53 }
 0x678   : > { %v10445_v32 = vmax.f32 %v10381_v4, 0.0 }
 0x67a   : > { %v12021_v49 = vpack.c.bf16 %v10445_v32, %v10444_v42  ;;  %v10032_v44 = vpop.f32.mrf.mxu3 }
 0x67b   : > { %v10302_v63 = vpop.f32.mrf.mxu0 }
 0x67c   : > { %12069 = vst [vmem:[%s16071_s30 + $0xd8] sm:$0xff] %v12021_v49   ;;  %v10303_v2 = vadd.f32 %v10302_v63, %v10025_v45 }
 0x67e   : > { %v10382_v19 = vadd.f32 %v16609_v60, %v10303_v2 }
 0x680   : > { %v10446_v38 = vmax.f32 %v10382_v19, 0.0 }
 0x682   : > { %v10035_v11 = vpop.f32.mrf.mxu3 }
 0x683   : > { %v10304_v8 = vpop.f32.mrf.mxu0 }
 0x684   : > { %v10305_v20 = vadd.f32 %v10304_v8, %v10027_v7 }
 0x686   : > { %v10383_v3 = vadd.f32 %v16609_v60, %v10305_v20 }
 0x688   : > { %v10447_v40 = vmax.f32 %v10383_v3, 0.0 }
 0x68a   : > { %v12026_v12 = vpack.c.bf16 %v10447_v40, %v10446_v38  ;;  %v10037_v52 = vpop.f32.mrf.mxu3 }
 0x68b   : > { %v10307_v6 = vpop.f32.mrf.mxu0 }
 0x68c   : > { %12070 = vst [vmem:[%s16071_s30 + $0xe0] sm:$0xff] %v12026_v12   ;;  %v10308_v18 = vadd.f32 %v10307_v6, %v10030_v35 }
 0x68e   : > { %v10384_v61 = vadd.f32 %v16609_v60, %v10308_v18 }
 0x690   : > { %v10448_v25 = vmax.f32 %v10384_v61, 0.0 }
 0x692   : > { %v10040_v33 = vpop.f32.mrf.mxu3 }
 0x693   : > { %v10309_v54 = vpop.f32.mrf.mxu0 }
 0x694   : > { %v10310_v5 = vadd.f32 %v10309_v54, %v10032_v44 }
 0x696   : > { %v10385_v39 = vadd.f32 %v16609_v60, %v10310_v5 }
 0x698   : > { %v10449_v41 = vmax.f32 %v10385_v39, 0.0 }
 0x69a   : > { %v12031_v56 = vpack.c.bf16 %v10449_v41, %v10448_v25  ;;  %v10042_v46 = vpop.f32.mrf.mxu3 }
 0x69b   : > { %v10312_v0 = vpop.f32.mrf.mxu0 }
 0x69c   : > { %12071 = vst [vmem:[%s16071_s30 + $0xe8] sm:$0xff] %v12031_v56   ;;  %v10313_v21 = vadd.f32 %v10312_v0, %v10035_v11 }
 0x69e   : > { %v10386_v47 = vadd.f32 %v16609_v60, %v10313_v21 }
 0x6a0   : > { %v10450_v59 = vmax.f32 %v10386_v47, 0.0 }
 0x6a3   : > { %v10314_v16 = vpop.f32.mrf.mxu0 }
 0x6a4   : > { %v10315_v50 = vadd.f32 %v10314_v16, %v10037_v52 }
 0x6a6   : > { %v10387_v37 = vadd.f32 %v16609_v60, %v10315_v50 }
 0x6a8   : > { %v10451_v17 = vmax.f32 %v10387_v37, 0.0 }
 0x6aa   : > { %v12036_v30 = vpack.c.bf16 %v10451_v17, %v10450_v59 }
 0x6ab   : > { %v10317_v62 = vpop.f32.mrf.mxu0 }
 0x6ac   : > { %12072 = vst [vmem:[%s16071_s30 + $0xf0] sm:$0xff] %v12036_v30   ;;  %v10318_v28 = vadd.f32 %v10317_v62, %v10040_v33 }
 0x6ae   : > { %v10388_v36 = vadd.f32 %v16609_v60, %v10318_v28 }
 0x6b0   : > { %v10452_v13 = vmax.f32 %v10388_v36, 0.0 }
 0x6b3   : > { %v10319_v48 = vpop.f32.mrf.mxu0 }
 0x6b4   : > { %v10320_v15 = vadd.f32 %v10319_v48, %v10042_v46 }
 0x6b6   : > { %v10389_v31 = vadd.f32 %v16609_v60, %v10320_v15 }
 0x6b8   : > { %v10453_v27 = vmax.f32 %v10389_v31, 0.0 }
 0x6ba   : > { %v12041_v43 = vpack.c.bf16 %v10453_v27, %v10452_v13 }
 0x6bc   : > { %12073 = vst [vmem:[%s16071_s30 + $0xf8] sm:$0xff] %v12041_v43  }
 0x6bd   : > { %12238 = shalt.err (!%p12235_p13)
}
 0x6be   : > { %s12289_s0 = smov 4  }
 0x6bf   : > { %12084 = dma.vmem_to_hbm [thread:$0]  (%p12389_p10), %s10596_s29, 4096, %s10598_s16, %s10583_s13, %s12287_s11, %s12287_s11, %s12289_s0  }
 0x6c0 PF: > { %s16850_s30 = sld [smem:[#allocation13_spill]]  ;;  %p12098_p0 = scmp.ge.s32.totalorder %s12281_s12, 2 }
 0x6c2   : > { %p12094_p4 = pnand %p12098_p0, %p12393_p11 }
 0x6c4   : > { %p12095_p5 = pneg %p12094_p4 }
 0x6c6   : > { %s10612_s17 = sand.u32 1, %s16850_s30  }
 0x6c7   : > { %s10613_s25 = scalar_lea.sflag [#allocation6], %s10612_s17 }
 0x6c8   : > { %12264 = dma.done.wait (%p12095_p5), %s10613_s25, 4096  }
 0x6c9   : > { %12266 = vsyncadd (%p12095_p5), %s10613_s25, 4294963200  ;;  %s16852_s12 = sld [smem:[#allocation15_spill]]  ;;  %s16855_s30 = smov %s12273_s10 }
 0x6ca   : > { %s16853_s28 = sld [smem:[#allocation14_spill]] }
 0x6cb   : > { %s16854_s11 = sld [smem:[#allocation16_spill]] }
 0x6cf   : > { %p25_p7 = scmp.ge.s32.totalorder %s16852_s12, 6  }
 0x6d0   : > { %s16856_s10 = smov %s16853_s28 }
 0x6d1   :  { %27 = sbr.rel (!%p25_p7) target bundleno = 9 (0x9), region = 116 }
 0x6d6   :  { %10619 = vsyncpa [#allocation5], 1 }
 0x6d7   :  { %10621 = vsyncpa [#allocation5 + $0x1], 1 }
 0x6d8   :  { %10622 = vsyncpa [#allocation8], 1 }
 0x6d9   :  { %10624 = vsyncpa [#allocation8 + $0x1], 1 }
 0x6da   :  { %10625 = vsyncpa [#allocation6], 1 }
 0x6db   :  { %10627 = vsyncpa [#allocation6 + $0x1], 1 }

</bundles_post_ra>
